<compile_context>
chip_gen: v6e
topology: v6e:2x2x1
jax: 0.10.0
libtpu: 0.0.40
codegen_flags: <defaults>
</compile_context>

<pallas_src>
import jax
import jax.numpy as jnp
from jax.experimental import pallas as pl
from jax.experimental.pallas import tpu as pltpu


def _round_up(x, m):
    return (x + m - 1) // m * m


# ----------------------------------------------------------------------------
# Pallas kernel: Y(O, tm) = LeakyReLU(W(O, K) @ A(K, tm) + b(O, 1))
# Lane axis = output positions (M = N*Ho*Wo)  ->  dense vst stores.
# ----------------------------------------------------------------------------
def _conv_gemm_kernel(w_ref, a_ref, b_ref, o_ref):
    y = jnp.dot(w_ref[...], a_ref[...], preferred_element_type=jnp.float32)
    y = y + b_ref[...]                         # (O, 1) broadcast across lanes
    o_ref[...] = jnp.where(y > 0, y, 0.01 * y).astype(o_ref.dtype)


def conv_gemm_bias_lrelu(w_mat, patches, b_col, *, tm=4096):
    """w_mat: (O, K); patches: (K, M); b_col: (O, 1) -> (O, M) f32."""
    O, K = w_mat.shape
    K2, M = patches.shape
    assert K == K2, (K, K2)
    assert b_col.shape == (O, 1), b_col.shape

    tm_eff = max(128, min(tm, _round_up(M, 128)))   # whole problem if small
    grid = (pl.cdiv(M, tm_eff),)

    return pl.pallas_call(
        _conv_gemm_kernel,
        out_shape=jax.ShapeDtypeStruct((O, M), jnp.float32),
        grid_spec=pltpu.PrefetchScalarGridSpec(
            num_scalar_prefetch=0,
            grid=grid,
            in_specs=[
                pl.BlockSpec((O, K), lambda i: (0, 0)),        # full weight
                pl.BlockSpec((K, tm_eff), lambda i: (0, i)),   # patch lane-tile
                pl.BlockSpec((O, 1), lambda i: (0, 0)),        # bias column
            ],
            out_specs=pl.BlockSpec((O, tm_eff), lambda i: (0, i)),
        ),
        compiler_params=pltpu.CompilerParams(
            dimension_semantics=("parallel",),                 # v7x: both TCs
        ),
    )(w_mat, patches, b_col)


# ----------------------------------------------------------------------------
# Pallas kernel: fused 5-layer FC chain.  First layer contracts directly
# against conv4's (C4, N, H4*W4) activation (no flatten transpose needed):
#   h1 = sum_c  A[c] @ W1p[c]      with W1p pre-reshaped to (C4, H4*W4, 256).
# ----------------------------------------------------------------------------
def _fc_chain_kernel(a_ref, w1_ref, b1_ref, w2_ref, b2_ref, w3_ref, b3_ref,
                     w4_ref, b4_ref, w5_ref, b5_ref, o_ref):
    def lrelu(v):
        return jnp.where(v > 0, v, 0.01 * v)

    C = a_ref.shape[0]
    N = a_ref.shape[1]
    h = jnp.zeros((N, w1_ref.shape[2]), jnp.float32)
    for c in range(C):                       # static unroll: 16 small matmuls
        h = h + jnp.dot(a_ref[c], w1_ref[c], preferred_element_type=jnp.float32)
    h = lrelu(h + b1_ref[...])
    for w_ref, b_ref in ((w2_ref, b2_ref), (w3_ref, b3_ref),
                         (w4_ref, b4_ref), (w5_ref, b5_ref)):
        h = lrelu(jnp.dot(h, w_ref[...], preferred_element_type=jnp.float32)
                  + b_ref[...])
    o_ref[...] = h.astype(o_ref.dtype)


def fc_chain_lrelu(a4, w1p, b1, w2, b2, w3, b3, w4, b4, w5, b5):
    """a4: (C4, N, S4); w1p: (C4, S4, 256); others (K, N)/(1, N). -> (N, 2)."""
    N = a4.shape[1]
    n_out = w5.shape[1]

    def full(shape):
        nd = len(shape)
        return pl.BlockSpec(shape, lambda *_: (0,) * nd)

    args = (a4, w1p, b1, w2, b2, w3, b3, w4, b4, w5, b5)
    return pl.pallas_call(
        _fc_chain_kernel,
        out_shape=jax.ShapeDtypeStruct((N, n_out), jnp.float32),
        grid_spec=pltpu.PrefetchScalarGridSpec(
            num_scalar_prefetch=0,
            grid=(1,),
            in_specs=[full(a.shape) for a in args],
            out_specs=pl.BlockSpec((N, n_out), lambda i: (0, 0)),
        ),
        compiler_params=pltpu.CompilerParams(
            dimension_semantics=("arbitrary",),
        ),
    )(*args)


# ----------------------------------------------------------------------------
# Conv layer = channel-major im2col (XLA glue, NO transposes) + Pallas GEMM.
# Activations live in (C, N, H, W) layout the whole way through.
# TODO(synk): move the tap accumulation into the kernel to avoid materializing
# the (C*k*k, M) patch matrix in HBM.
# ----------------------------------------------------------------------------
def _im2col_t(x_cnhw, k, s):
    C, N, H, W = x_cnhw.shape
    Ho = (H - k) // s + 1
    Wo = (W - k) // s + 1
    taps = []
    for i in range(k):
        for j in range(k):
            taps.append(x_cnhw[:, :, i:i + s * Ho:s, j:j + s * Wo:s])  # (C,N,Ho,Wo)
    p = jnp.stack(taps, axis=1)                    # (C, k*k, N, Ho, Wo)
    return p.reshape(C * k * k, N * Ho * Wo), Ho, Wo   # bitcast reshape


def conv2d_lrelu_t(x_cnhw, w_mat, b_col, k, stride, *, tm=4096):
    """x: (C, N, H, W); w_mat: (O, C*k*k); b_col: (O, 1) -> (O, N, Ho, Wo)."""
    O = w_mat.shape[0]
    N = x_cnhw.shape[1]
    patches, Ho, Wo = _im2col_t(x_cnhw, k, stride)
    y = conv_gemm_bias_lrelu(w_mat, patches, b_col, tm=tm)   # (O, N*Ho*Wo)
    return y.reshape(O, N, Ho, Wo)


# ----------------------------------------------------------------------------
# Parameter preparation (ONCE, outside jit): weights already in GEMM layout,
# so the jitted forward contains no weight copies / transposes.
# ----------------------------------------------------------------------------
CONV_CFG = ((7, 2), (5, 2), (3, 2), (3, 2))   # (kernel, stride) per conv layer


def prepare_params(params):
    prep = {}
    for li in range(1, 5):
        w = params[f"w{li}"]                                   # (O, C, k, k)
        O = w.shape[0]
        prep[f"cw{li}"] = w.reshape(O, -1).astype(jnp.float32)  # (O, C*k*k)
        prep[f"cb{li}"] = params[f"b{li}"].reshape(O, 1).astype(jnp.float32)

    # linear1 weight: (256, 2304) with columns in (c, h, w) order ->
    # (C4, H4*W4, 256) so the FC kernel can contract against (C4, N, H4*W4).
    c4 = params["w4"].shape[0]
    feat = params["lw1"].shape[1]
    s4 = feat // c4
    prep["fw1"] = params["lw1"].T.reshape(c4, s4, -1).astype(jnp.float32)
    prep["fb1"] = params["lb1"].reshape(1, -1).astype(jnp.float32)
    for i in range(2, 6):
        prep[f"fw{i}"] = params[f"lw{i}"].T.astype(jnp.float32)
        prep[f"fb{i}"] = params[f"lb{i}"].reshape(1, -1).astype(jnp.float32)
    return prep


# ----------------------------------------------------------------------------
# Full ConvNet forward (Pallas-backed)
# ----------------------------------------------------------------------------
@jax.jit
def convnet_forward(x_nchw, prep):
    # channel-major activation layout (C, N, H, W); free for C=1.
    x = jnp.transpose(x_nchw, (1, 0, 2, 3))
    for li, (k, s) in enumerate(CONV_CFG, start=1):
        x = conv2d_lrelu_t(x, prep[f"cw{li}"], prep[f"cb{li}"], k, s, tm=4096)
    C4, N = x.shape[0], x.shape[1]
    a4 = x.reshape(C4, N, -1)                 # (16, N, 144) — pure reshape
    return fc_chain_lrelu(a4,
                          prep["fw1"], prep["fb1"],
                          prep["fw2"], prep["fb2"],
                          prep["fw3"], prep["fb3"],
                          prep["fw4"], prep["fb4"],
                          prep["fw5"], prep["fb5"])


# ----------------------------------------------------------------------------
# Pure-JAX reference (for correctness check)
# ----------------------------------------------------------------------------
def reference_forward(x, params):
    def lrelu(v):
        return jnp.where(v > 0, v, 0.01 * v)

    def conv(v, w, b, s):
        y = jax.lax.conv_general_dilated(
            v, w, (s, s), "VALID",
            dimension_numbers=("NCHW", "OIHW", "NCHW"),
            precision=jax.lax.Precision.HIGHEST)
        return lrelu(y + b[None, :, None, None])

    def lin(v, w, b):
        return lrelu(jnp.dot(v, w.T, precision=jax.lax.Precision.HIGHEST) + b)

    x = conv(x, params["w1"], params["b1"], 2)
    x = conv(x, params["w2"], params["b2"], 2)
    x = conv(x, params["w3"], params["b3"], 2)
    x = conv(x, params["w4"], params["b4"], 2)
    x = x.reshape(x.shape[0], -1)
    x = lin(x, params["lw1"], params["lb1"])
    x = lin(x, params["lw2"], params["lb2"])
    x = lin(x, params["lw3"], params["lb3"])
    x = lin(x, params["lw4"], params["lb4"])
    x = lin(x, params["lw5"], params["lb5"])
    return x


# ----------------------------------------------------------------------------
# Deterministic synthetic parameters (same shapes as the PyTorch __init__)
# ----------------------------------------------------------------------------
def make_params(key):
    def xavier(k, shape, fan_in, fan_out):
        scale = jnp.sqrt(2.0 / (fan_in + fan_out))
        return jax.random.normal(k, shape, jnp.float32) * scale

    keys = jax.random.split(key, 20)
    p = {}
    # convs: (out, in, kh, kw)
    p["w1"] = xavier(keys[0], (8, 1, 7, 7), 1 * 49, 8 * 49)
    p["b1"] = 0.01 * jax.random.normal(keys[1], (8,), jnp.float32)
    p["w2"] = xavier(keys[2], (16, 8, 5, 5), 8 * 25, 16 * 25)
    p["b2"] = 0.01 * jax.random.normal(keys[3], (16,), jnp.float32)
    p["w3"] = xavier(keys[4], (16, 16, 3, 3), 16 * 9, 16 * 9)
    p["b3"] = 0.01 * jax.random.normal(keys[5], (16,), jnp.float32)
    p["w4"] = xavier(keys[6], (16, 16, 3, 3), 16 * 9, 16 * 9)
    p["b4"] = 0.01 * jax.random.normal(keys[7], (16,), jnp.float32)
    # linears: (out, in) like torch.nn.Linear.weight
    dims = [(2304, 256), (256, 128), (128, 64), (64, 32), (32, 2)]
    for idx, (din, dout) in enumerate(dims, start=1):
        p[f"lw{idx}"] = xavier(keys[6 + 2 * idx], (dout, din), din, dout)
        p[f"lb{idx}"] = 0.01 * jax.random.normal(keys[7 + 2 * idx], (dout,),
                                                 jnp.float32)
    return p


if __name__ == "__main__":
    # Smallest input consistent with linear1's 2304 input features:
    # 215 -> conv1 -> 105 -> conv2 -> 51 -> conv3 -> 25 -> conv4 -> 12; 16*12*12 = 2304
    key = jax.random.PRNGKey(0)
    kx, kp = jax.random.split(key)
    x = jax.random.normal(kx, (2, 1, 215, 215), jnp.float32)
    params = make_params(kp)
    prep = prepare_params(params)

    out = convnet_forward(x, prep)
    out = jax.block_until_ready(out)
    assert out.shape == (2, 2), out.shape

    ref = reference_forward(x, params)
    ref = jax.block_until_ready(ref)
    max_err = float(jnp.max(jnp.abs(out - ref)))
    assert jnp.allclose(out, ref, rtol=2e-3, atol=2e-3), (max_err, out, ref)

    print("KERNEL_OK")
</pallas_src>

<mosaic_0001>
module attributes {stable_mosaic.version = 11 : i64} {
  func.func @_conv_gemm_kernel(%arg0: i32, %arg1: memref<8x49xf32, #tpu.memory_space<vmem>>, %arg2: memref<49x4096xf32, #tpu.memory_space<vmem>>, %arg3: memref<8x1xf32, #tpu.memory_space<vmem>>, %arg4: memref<8x4096xf32, #tpu.memory_space<vmem>>) attributes {dimension_semantics = [#tpu.dimension_semantics<parallel>], iteration_bounds = array<i64: 6>, scalar_prefetch = 0 : i64, scratch_operands = 0 : i64, tpu.core_type = #tpu.core_type<tc>, window_params = [{pipeline_mode = #tpu.pipeline_mode<synchronous>, transform_indices = @transform_0, window_bounds = array<i64: 8, 49>}, {transform_indices = @transform_1, window_bounds = array<i64: 49, 4096>}, {pipeline_mode = #tpu.pipeline_mode<synchronous>, transform_indices = @transform_2, window_bounds = array<i64: 8, 1>}, {transform_indices = @transform_3, window_bounds = array<i64: 8, 4096>}]} {
    %c0 = arith.constant 0 : index
    %c0_0 = arith.constant 0 : index
    %0 = vector.load %arg1[%c0, %c0_0] : memref<8x49xf32, #tpu.memory_space<vmem>>, vector<8x49xf32>
    %c0_1 = arith.constant 0 : index
    %c0_2 = arith.constant 0 : index
    %1 = vector.load %arg2[%c0_1, %c0_2] : memref<49x4096xf32, #tpu.memory_space<vmem>>, vector<49x4096xf32>
    %cst = arith.constant dense<0.000000e+00> : vector<8x4096xf32>
    %2 = tpu.matmul %0, %1, %cst {dimension_numbers = #tpu.dot_dimension_numbers<[1], [0], [0], [1], [0, 0, 1, 1], [], []>} : vector<8x49xf32>, vector<49x4096xf32>, vector<8x4096xf32> -> vector<8x4096xf32>
    %c0_3 = arith.constant 0 : index
    %c0_4 = arith.constant 0 : index
    %3 = vector.load %arg3[%c0_3, %c0_4] : memref<8x1xf32, #tpu.memory_space<vmem>>, vector<8x1xf32>
    %4 = vector.broadcast %3 : vector<8x1xf32> to vector<8x4096xf32>
    %5 = arith.addf %2, %4 : vector<8x4096xf32>
    %cst_5 = arith.constant 0.000000e+00 : f32
    %6 = vector.broadcast %cst_5 : f32 to vector<8x4096xf32>
    %7 = arith.cmpf ogt, %5, %6 : vector<8x4096xf32>
    %cst_6 = arith.constant 0.00999999977 : f32
    %8 = vector.broadcast %cst_6 : f32 to vector<8x4096xf32>
    %9 = arith.mulf %8, %5 : vector<8x4096xf32>
    %10 = arith.select %7, %5, %9 : vector<8x4096xi1>, vector<8x4096xf32>
    %c0_7 = arith.constant 0 : index
    %c0_8 = arith.constant 0 : index
    %11 = vector.load %arg4[%c0_7, %c0_8] : memref<8x4096xf32, #tpu.memory_space<vmem>>, vector<8x4096xf32>
    tpu.vector_store %arg4[%c0_7, %c0_8], %10 {strides = array<i32>} : memref<8x4096xf32, #tpu.memory_space<vmem>>, vector<8x4096xf32>,
    return
  }
  func.func @transform_0(%arg0: i32) -> (i32, i32) {
    %c0_i32 = arith.constant 0 : i32
    %c0_i32_0 = arith.constant 0 : i32
    %c0_i32_1 = arith.constant 0 : i32
    return %c0_i32, %c0_i32_0 : i32, i32
  }
  func.func @transform_1(%arg0: i32) -> (i32, i32) {
    %c0_i32 = arith.constant 0 : i32
    %c0_i32_0 = arith.constant 0 : i32
    return %c0_i32, %arg0 : i32, i32
  }
  func.func @transform_2(%arg0: i32) -> (i32, i32) {
    %c0_i32 = arith.constant 0 : i32
    %c0_i32_0 = arith.constant 0 : i32
    %c0_i32_1 = arith.constant 0 : i32
    return %c0_i32, %c0_i32_0 : i32, i32
  }
  func.func @transform_3(%arg0: i32) -> (i32, i32) {
    %c0_i32 = arith.constant 0 : i32
    %c0_i32_0 = arith.constant 0 : i32
    return %c0_i32, %arg0 : i32, i32
  }
}

module attributes {stable_mosaic.version = 11 : i64} {
  func.func @_conv_gemm_kernel(%arg0: i32, %arg1: memref<16x200xf32, #tpu.memory_space<vmem>>, %arg2: memref<200x4096xf32, #tpu.memory_space<vmem>>, %arg3: memref<16x1xf32, #tpu.memory_space<vmem>>, %arg4: memref<16x4096xf32, #tpu.memory_space<vmem>>) attributes {dimension_semantics = [#tpu.dimension_semantics<parallel>], iteration_bounds = array<i64: 2>, scalar_prefetch = 0 : i64, scratch_operands = 0 : i64, tpu.core_type = #tpu.core_type<tc>, window_params = [{pipeline_mode = #tpu.pipeline_mode<synchronous>, transform_indices = @transform_0, window_bounds = array<i64: 16, 200>}, {transform_indices = @transform_1, window_bounds = array<i64: 200, 4096>}, {pipeline_mode = #tpu.pipeline_mode<synchronous>, transform_indices = @transform_2, window_bounds = array<i64: 16, 1>}, {transform_indices = @transform_3, window_bounds = array<i64: 16, 4096>}]} {
    %c0 = arith.constant 0 : index
    %c0_0 = arith.constant 0 : index
    %0 = vector.load %arg1[%c0, %c0_0] : memref<16x200xf32, #tpu.memory_space<vmem>>, vector<16x200xf32>
    %c0_1 = arith.constant 0 : index
    %c0_2 = arith.constant 0 : index
    %1 = vector.load %arg2[%c0_1, %c0_2] : memref<200x4096xf32, #tpu.memory_space<vmem>>, vector<200x4096xf32>
    %cst = arith.constant dense<0.000000e+00> : vector<16x4096xf32>
    %2 = tpu.matmul %0, %1, %cst {dimension_numbers = #tpu.dot_dimension_numbers<[1], [0], [0], [1], [0, 0, 1, 1], [], []>} : vector<16x200xf32>, vector<200x4096xf32>, vector<16x4096xf32> -> vector<16x4096xf32>
    %c0_3 = arith.constant 0 : index
    %c0_4 = arith.constant 0 : index
    %3 = vector.load %arg3[%c0_3, %c0_4] : memref<16x1xf32, #tpu.memory_space<vmem>>, vector<16x1xf32>
    %4 = vector.broadcast %3 : vector<16x1xf32> to vector<16x4096xf32>
    %5 = arith.addf %2, %4 : vector<16x4096xf32>
    %cst_5 = arith.constant 0.000000e+00 : f32
    %6 = vector.broadcast %cst_5 : f32 to vector<16x4096xf32>
    %7 = arith.cmpf ogt, %5, %6 : vector<16x4096xf32>
    %cst_6 = arith.constant 0.00999999977 : f32
    %8 = vector.broadcast %cst_6 : f32 to vector<16x4096xf32>
    %9 = arith.mulf %8, %5 : vector<16x4096xf32>
    %10 = arith.select %7, %5, %9 : vector<16x4096xi1>, vector<16x4096xf32>
    %c0_7 = arith.constant 0 : index
    %c0_8 = arith.constant 0 : index
    %11 = vector.load %arg4[%c0_7, %c0_8] : memref<16x4096xf32, #tpu.memory_space<vmem>>, vector<16x4096xf32>
    tpu.vector_store %arg4[%c0_7, %c0_8], %10 {strides = array<i32>} : memref<16x4096xf32, #tpu.memory_space<vmem>>, vector<16x4096xf32>,
    return
  }
  func.func @transform_0(%arg0: i32) -> (i32, i32) {
    %c0_i32 = arith.constant 0 : i32
    %c0_i32_0 = arith.constant 0 : i32
    %c0_i32_1 = arith.constant 0 : i32
    return %c0_i32, %c0_i32_0 : i32, i32
  }
  func.func @transform_1(%arg0: i32) -> (i32, i32) {
    %c0_i32 = arith.constant 0 : i32
    %c0_i32_0 = arith.constant 0 : i32
    return %c0_i32, %arg0 : i32, i32
  }
  func.func @transform_2(%arg0: i32) -> (i32, i32) {
    %c0_i32 = arith.constant 0 : i32
    %c0_i32_0 = arith.constant 0 : i32
    %c0_i32_1 = arith.constant 0 : i32
    return %c0_i32, %c0_i32_0 : i32, i32
  }
  func.func @transform_3(%arg0: i32) -> (i32, i32) {
    %c0_i32 = arith.constant 0 : i32
    %c0_i32_0 = arith.constant 0 : i32
    return %c0_i32, %arg0 : i32, i32
  }
}

module attributes {stable_mosaic.version = 11 : i64} {
  func.func @_conv_gemm_kernel(%arg0: i32, %arg1: memref<16x144xf32, #tpu.memory_space<vmem>>, %arg2: memref<144x1280xf32, #tpu.memory_space<vmem>>, %arg3: memref<16x1xf32, #tpu.memory_space<vmem>>, %arg4: memref<16x1280xf32, #tpu.memory_space<vmem>>) attributes {dimension_semantics = [#tpu.dimension_semantics<parallel>], iteration_bounds = array<i64: 1>, scalar_prefetch = 0 : i64, scratch_operands = 0 : i64, tpu.core_type = #tpu.core_type<tc>, window_params = [{pipeline_mode = #tpu.pipeline_mode<synchronous>, transform_indices = @transform_0, window_bounds = array<i64: 16, 144>}, {transform_indices = @transform_1, window_bounds = array<i64: 144, 1280>}, {pipeline_mode = #tpu.pipeline_mode<synchronous>, transform_indices = @transform_2, window_bounds = array<i64: 16, 1>}, {transform_indices = @transform_3, window_bounds = array<i64: 16, 1280>}]} {
    %c0 = arith.constant 0 : index
    %c0_0 = arith.constant 0 : index
    %0 = vector.load %arg1[%c0, %c0_0] : memref<16x144xf32, #tpu.memory_space<vmem>>, vector<16x144xf32>
    %c0_1 = arith.constant 0 : index
    %c0_2 = arith.constant 0 : index
    %1 = vector.load %arg2[%c0_1, %c0_2] : memref<144x1280xf32, #tpu.memory_space<vmem>>, vector<144x1280xf32>
    %cst = arith.constant dense<0.000000e+00> : vector<16x1280xf32>
    %2 = tpu.matmul %0, %1, %cst {dimension_numbers = #tpu.dot_dimension_numbers<[1], [0], [0], [1], [0, 0, 1, 1], [], []>} : vector<16x144xf32>, vector<144x1280xf32>, vector<16x1280xf32> -> vector<16x1280xf32>
    %c0_3 = arith.constant 0 : index
    %c0_4 = arith.constant 0 : index
    %3 = vector.load %arg3[%c0_3, %c0_4] : memref<16x1xf32, #tpu.memory_space<vmem>>, vector<16x1xf32>
    %4 = vector.broadcast %3 : vector<16x1xf32> to vector<16x1280xf32>
    %5 = arith.addf %2, %4 : vector<16x1280xf32>
    %cst_5 = arith.constant 0.000000e+00 : f32
    %6 = vector.broadcast %cst_5 : f32 to vector<16x1280xf32>
    %7 = arith.cmpf ogt, %5, %6 : vector<16x1280xf32>
    %cst_6 = arith.constant 0.00999999977 : f32
    %8 = vector.broadcast %cst_6 : f32 to vector<16x1280xf32>
    %9 = arith.mulf %8, %5 : vector<16x1280xf32>
    %10 = arith.select %7, %5, %9 : vector<16x1280xi1>, vector<16x1280xf32>
    %c0_7 = arith.constant 0 : index
    %c0_8 = arith.constant 0 : index
    %11 = vector.load %arg4[%c0_7, %c0_8] : memref<16x1280xf32, #tpu.memory_space<vmem>>, vector<16x1280xf32>
    tpu.vector_store %arg4[%c0_7, %c0_8], %10 {strides = array<i32>} : memref<16x1280xf32, #tpu.memory_space<vmem>>, vector<16x1280xf32>,
    return
  }
  func.func @transform_0(%arg0: i32) -> (i32, i32) {
    %c0_i32 = arith.constant 0 : i32
    %c0_i32_0 = arith.constant 0 : i32
    %c0_i32_1 = arith.constant 0 : i32
    return %c0_i32, %c0_i32_0 : i32, i32
  }
  func.func @transform_1(%arg0: i32) -> (i32, i32) {
    %c0_i32 = arith.constant 0 : i32
    %c0_i32_0 = arith.constant 0 : i32
    return %c0_i32, %arg0 : i32, i32
  }
  func.func @transform_2(%arg0: i32) -> (i32, i32) {
    %c0_i32 = arith.constant 0 : i32
    %c0_i32_0 = arith.constant 0 : i32
    %c0_i32_1 = arith.constant 0 : i32
    return %c0_i32, %c0_i32_0 : i32, i32
  }
  func.func @transform_3(%arg0: i32) -> (i32, i32) {
    %c0_i32 = arith.constant 0 : i32
    %c0_i32_0 = arith.constant 0 : i32
    return %c0_i32, %arg0 : i32, i32
  }
}

module attributes {stable_mosaic.version = 11 : i64} {
  func.func @_conv_gemm_kernel(%arg0: i32, %arg1: memref<16x144xf32, #tpu.memory_space<vmem>>, %arg2: memref<144x384xf32, #tpu.memory_space<vmem>>, %arg3: memref<16x1xf32, #tpu.memory_space<vmem>>, %arg4: memref<16x384xf32, #tpu.memory_space<vmem>>) attributes {dimension_semantics = [#tpu.dimension_semantics<parallel>], iteration_bounds = array<i64: 1>, scalar_prefetch = 0 : i64, scratch_operands = 0 : i64, tpu.core_type = #tpu.core_type<tc>, window_params = [{pipeline_mode = #tpu.pipeline_mode<synchronous>, transform_indices = @transform_0, window_bounds = array<i64: 16, 144>}, {transform_indices = @transform_1, window_bounds = array<i64: 144, 384>}, {pipeline_mode = #tpu.pipeline_mode<synchronous>, transform_indices = @transform_2, window_bounds = array<i64: 16, 1>}, {transform_indices = @transform_3, window_bounds = array<i64: 16, 384>}]} {
    %c0 = arith.constant 0 : index
    %c0_0 = arith.constant 0 : index
    %0 = vector.load %arg1[%c0, %c0_0] : memref<16x144xf32, #tpu.memory_space<vmem>>, vector<16x144xf32>
    %c0_1 = arith.constant 0 : index
    %c0_2 = arith.constant 0 : index
    %1 = vector.load %arg2[%c0_1, %c0_2] : memref<144x384xf32, #tpu.memory_space<vmem>>, vector<144x384xf32>
    %cst = arith.constant dense<0.000000e+00> : vector<16x384xf32>
    %2 = tpu.matmul %0, %1, %cst {dimension_numbers = #tpu.dot_dimension_numbers<[1], [0], [0], [1], [0, 0, 1, 1], [], []>} : vector<16x144xf32>, vector<144x384xf32>, vector<16x384xf32> -> vector<16x384xf32>
    %c0_3 = arith.constant 0 : index
    %c0_4 = arith.constant 0 : index
    %3 = vector.load %arg3[%c0_3, %c0_4] : memref<16x1xf32, #tpu.memory_space<vmem>>, vector<16x1xf32>
    %4 = vector.broadcast %3 : vector<16x1xf32> to vector<16x384xf32>
    %5 = arith.addf %2, %4 : vector<16x384xf32>
    %cst_5 = arith.constant 0.000000e+00 : f32
    %6 = vector.broadcast %cst_5 : f32 to vector<16x384xf32>
    %7 = arith.cmpf ogt, %5, %6 : vector<16x384xf32>
    %cst_6 = arith.constant 0.00999999977 : f32
    %8 = vector.broadcast %cst_6 : f32 to vector<16x384xf32>
    %9 = arith.mulf %8, %5 : vector<16x384xf32>
    %10 = arith.select %7, %5, %9 : vector<16x384xi1>, vector<16x384xf32>
    %c0_7 = arith.constant 0 : index
    %c0_8 = arith.constant 0 : index
    %11 = vector.load %arg4[%c0_7, %c0_8] : memref<16x384xf32, #tpu.memory_space<vmem>>, vector<16x384xf32>
    tpu.vector_store %arg4[%c0_7, %c0_8], %10 {strides = array<i32>} : memref<16x384xf32, #tpu.memory_space<vmem>>, vector<16x384xf32>,
    return
  }
  func.func @transform_0(%arg0: i32) -> (i32, i32) {
    %c0_i32 = arith.constant 0 : i32
    %c0_i32_0 = arith.constant 0 : i32
    %c0_i32_1 = arith.constant 0 : i32
    return %c0_i32, %c0_i32_0 : i32, i32
  }
  func.func @transform_1(%arg0: i32) -> (i32, i32) {
    %c0_i32 = arith.constant 0 : i32
    %c0_i32_0 = arith.constant 0 : i32
    return %c0_i32, %arg0 : i32, i32
  }
  func.func @transform_2(%arg0: i32) -> (i32, i32) {
    %c0_i32 = arith.constant 0 : i32
    %c0_i32_0 = arith.constant 0 : i32
    %c0_i32_1 = arith.constant 0 : i32
    return %c0_i32, %c0_i32_0 : i32, i32
  }
  func.func @transform_3(%arg0: i32) -> (i32, i32) {
    %c0_i32 = arith.constant 0 : i32
    %c0_i32_0 = arith.constant 0 : i32
    return %c0_i32, %arg0 : i32, i32
  }
}

module attributes {stable_mosaic.version = 11 : i64} {
  func.func @_fc_chain_kernel(%arg0: i32, %arg1: memref<16x2x144xf32, #tpu.memory_space<vmem>>, %arg2: memref<16x144x256xf32, #tpu.memory_space<vmem>>, %arg3: memref<1x256xf32, #tpu.memory_space<vmem>>, %arg4: memref<256x128xf32, #tpu.memory_space<vmem>>, %arg5: memref<1x128xf32, #tpu.memory_space<vmem>>, %arg6: memref<128x64xf32, #tpu.memory_space<vmem>>, %arg7: memref<1x64xf32, #tpu.memory_space<vmem>>, %arg8: memref<64x32xf32, #tpu.memory_space<vmem>>, %arg9: memref<1x32xf32, #tpu.memory_space<vmem>>, %arg10: memref<32x2xf32, #tpu.memory_space<vmem>>, %arg11: memref<1x2xf32, #tpu.memory_space<vmem>>, %arg12: memref<2x2xf32, #tpu.memory_space<vmem>>) attributes {dimension_semantics = [#tpu.dimension_semantics<arbitrary>], iteration_bounds = array<i64: 1>, scalar_prefetch = 0 : i64, scratch_operands = 0 : i64, tpu.core_type = #tpu.core_type<tc>, window_params = [{pipeline_mode = #tpu.pipeline_mode<synchronous>, transform_indices = @transform_0, window_bounds = array<i64: 16, 2, 144>}, {pipeline_mode = #tpu.pipeline_mode<synchronous>, transform_indices = @transform_1, window_bounds = array<i64: 16, 144, 256>}, {pipeline_mode = #tpu.pipeline_mode<synchronous>, transform_indices = @transform_2, window_bounds = array<i64: 1, 256>}, {pipeline_mode = #tpu.pipeline_mode<synchronous>, transform_indices = @transform_3, window_bounds = array<i64: 256, 128>}, {pipeline_mode = #tpu.pipeline_mode<synchronous>, transform_indices = @transform_4, window_bounds = array<i64: 1, 128>}, {pipeline_mode = #tpu.pipeline_mode<synchronous>, transform_indices = @transform_5, window_bounds = array<i64: 128, 64>}, {pipeline_mode = #tpu.pipeline_mode<synchronous>, transform_indices = @transform_6, window_bounds = array<i64: 1, 64>}, {pipeline_mode = #tpu.pipeline_mode<synchronous>, transform_indices = @transform_7, window_bounds = array<i64: 64, 32>}, {pipeline_mode = #tpu.pipeline_mode<synchronous>, transform_indices = @transform_8, window_bounds = array<i64: 1, 32>}, {pipeline_mode = #tpu.pipeline_mode<synchronous>, transform_indices = @transform_9, window_bounds = array<i64: 32, 2>}, {pipeline_mode = #tpu.pipeline_mode<synchronous>, transform_indices = @transform_10, window_bounds = array<i64: 1, 2>}, {pipeline_mode = #tpu.pipeline_mode<synchronous>, transform_indices = @transform_11, window_bounds = array<i64: 2, 2>}]} {
    %cst = arith.constant 0.000000e+00 : f32
    %0 = vector.broadcast %cst : f32 to vector<2x256xf32>
    %c0 = arith.constant 0 : index
    %c0_0 = arith.constant 0 : index
    %c0_1 = arith.constant 0 : index
    %1 = vector.load %arg1[%c0, %c0_0, %c0_1] : memref<16x2x144xf32, #tpu.memory_space<vmem>>, vector<1x2x144xf32>
    %2 = vector.shape_cast %1 : vector<1x2x144xf32> to vector<2x144xf32>
    %c0_2 = arith.constant 0 : index
    %c0_3 = arith.constant 0 : index
    %c0_4 = arith.constant 0 : index
    %3 = vector.load %arg2[%c0_2, %c0_3, %c0_4] : memref<16x144x256xf32, #tpu.memory_space<vmem>>, vector<1x144x256xf32>
    %4 = vector.shape_cast %3 : vector<1x144x256xf32> to vector<144x256xf32>
    %cst_5 = arith.constant dense<0.000000e+00> : vector<2x256xf32>
    %5 = tpu.matmul %2, %4, %cst_5 {dimension_numbers = #tpu.dot_dimension_numbers<[1], [0], [0], [1], [0, 0, 1, 1], [], []>} : vector<2x144xf32>, vector<144x256xf32>, vector<2x256xf32> -> vector<2x256xf32>
    %6 = arith.addf %0, %5 : vector<2x256xf32>
    %c1 = arith.constant 1 : index
    %c0_6 = arith.constant 0 : index
    %c0_7 = arith.constant 0 : index
    %7 = vector.load %arg1[%c1, %c0_6, %c0_7] : memref<16x2x144xf32, #tpu.memory_space<vmem>>, vector<1x2x144xf32>
    %8 = vector.shape_cast %7 : vector<1x2x144xf32> to vector<2x144xf32>
    %c1_8 = arith.constant 1 : index
    %c0_9 = arith.constant 0 : index
    %c0_10 = arith.constant 0 : index
    %9 = vector.load %arg2[%c1_8, %c0_9, %c0_10] : memref<16x144x256xf32, #tpu.memory_space<vmem>>, vector<1x144x256xf32>
    %10 = vector.shape_cast %9 : vector<1x144x256xf32> to vector<144x256xf32>
    %cst_11 = arith.constant dense<0.000000e+00> : vector<2x256xf32>
    %11 = tpu.matmul %8, %10, %cst_11 {dimension_numbers = #tpu.dot_dimension_numbers<[1], [0], [0], [1], [0, 0, 1, 1], [], []>} : vector<2x144xf32>, vector<144x256xf32>, vector<2x256xf32> -> vector<2x256xf32>
    %12 = arith.addf %6, %11 : vector<2x256xf32>
    %c2 = arith.constant 2 : index
    %c0_12 = arith.constant 0 : index
    %c0_13 = arith.constant 0 : index
    %13 = vector.load %arg1[%c2, %c0_12, %c0_13] : memref<16x2x144xf32, #tpu.memory_space<vmem>>, vector<1x2x144xf32>
    %14 = vector.shape_cast %13 : vector<1x2x144xf32> to vector<2x144xf32>
    %c2_14 = arith.constant 2 : index
    %c0_15 = arith.constant 0 : index
    %c0_16 = arith.constant 0 : index
    %15 = vector.load %arg2[%c2_14, %c0_15, %c0_16] : memref<16x144x256xf32, #tpu.memory_space<vmem>>, vector<1x144x256xf32>
    %16 = vector.shape_cast %15 : vector<1x144x256xf32> to vector<144x256xf32>
    %cst_17 = arith.constant dense<0.000000e+00> : vector<2x256xf32>
    %17 = tpu.matmul %14, %16, %cst_17 {dimension_numbers = #tpu.dot_dimension_numbers<[1], [0], [0], [1], [0, 0, 1, 1], [], []>} : vector<2x144xf32>, vector<144x256xf32>, vector<2x256xf32> -> vector<2x256xf32>
    %18 = arith.addf %12, %17 : vector<2x256xf32>
    %c3 = arith.constant 3 : index
    %c0_18 = arith.constant 0 : index
    %c0_19 = arith.constant 0 : index
    %19 = vector.load %arg1[%c3, %c0_18, %c0_19] : memref<16x2x144xf32, #tpu.memory_space<vmem>>, vector<1x2x144xf32>
    %20 = vector.shape_cast %19 : vector<1x2x144xf32> to vector<2x144xf32>
    %c3_20 = arith.constant 3 : index
    %c0_21 = arith.constant 0 : index
    %c0_22 = arith.constant 0 : index
    %21 = vector.load %arg2[%c3_20, %c0_21, %c0_22] : memref<16x144x256xf32, #tpu.memory_space<vmem>>, vector<1x144x256xf32>
    %22 = vector.shape_cast %21 : vector<1x144x256xf32> to vector<144x256xf32>
    %cst_23 = arith.constant dense<0.000000e+00> : vector<2x256xf32>
    %23 = tpu.matmul %20, %22, %cst_23 {dimension_numbers = #tpu.dot_dimension_numbers<[1], [0], [0], [1], [0, 0, 1, 1], [], []>} : vector<2x144xf32>, vector<144x256xf32>, vector<2x256xf32> -> vector<2x256xf32>
    %24 = arith.addf %18, %23 : vector<2x256xf32>
    %c4 = arith.constant 4 : index
    %c0_24 = arith.constant 0 : index
    %c0_25 = arith.constant 0 : index
    %25 = vector.load %arg1[%c4, %c0_24, %c0_25] : memref<16x2x144xf32, #tpu.memory_space<vmem>>, vector<1x2x144xf32>
    %26 = vector.shape_cast %25 : vector<1x2x144xf32> to vector<2x144xf32>
    %c4_26 = arith.constant 4 : index
    %c0_27 = arith.constant 0 : index
    %c0_28 = arith.constant 0 : index
    %27 = vector.load %arg2[%c4_26, %c0_27, %c0_28] : memref<16x144x256xf32, #tpu.memory_space<vmem>>, vector<1x144x256xf32>
    %28 = vector.shape_cast %27 : vector<1x144x256xf32> to vector<144x256xf32>
    %cst_29 = arith.constant dense<0.000000e+00> : vector<2x256xf32>
    %29 = tpu.matmul %26, %28, %cst_29 {dimension_numbers = #tpu.dot_dimension_numbers<[1], [0], [0], [1], [0, 0, 1, 1], [], []>} : vector<2x144xf32>, vector<144x256xf32>, vector<2x256xf32> -> vector<2x256xf32>
    %30 = arith.addf %24, %29 : vector<2x256xf32>
    %c5 = arith.constant 5 : index
    %c0_30 = arith.constant 0 : index
    %c0_31 = arith.constant 0 : index
    %31 = vector.load %arg1[%c5, %c0_30, %c0_31] : memref<16x2x144xf32, #tpu.memory_space<vmem>>, vector<1x2x144xf32>
    %32 = vector.shape_cast %31 : vector<1x2x144xf32> to vector<2x144xf32>
    %c5_32 = arith.constant 5 : index
    %c0_33 = arith.constant 0 : index
    %c0_34 = arith.constant 0 : index
    %33 = vector.load %arg2[%c5_32, %c0_33, %c0_34] : memref<16x144x256xf32, #tpu.memory_space<vmem>>, vector<1x144x256xf32>
    %34 = vector.shape_cast %33 : vector<1x144x256xf32> to vector<144x256xf32>
    %cst_35 = arith.constant dense<0.000000e+00> : vector<2x256xf32>
    %35 = tpu.matmul %32, %34, %cst_35 {dimension_numbers = #tpu.dot_dimension_numbers<[1], [0], [0], [1], [0, 0, 1, 1], [], []>} : vector<2x144xf32>, vector<144x256xf32>, vector<2x256xf32> -> vector<2x256xf32>
    %36 = arith.addf %30, %35 : vector<2x256xf32>
    %c6 = arith.constant 6 : index
    %c0_36 = arith.constant 0 : index
    %c0_37 = arith.constant 0 : index
    %37 = vector.load %arg1[%c6, %c0_36, %c0_37] : memref<16x2x144xf32, #tpu.memory_space<vmem>>, vector<1x2x144xf32>
    %38 = vector.shape_cast %37 : vector<1x2x144xf32> to vector<2x144xf32>
    %c6_38 = arith.constant 6 : index
    %c0_39 = arith.constant 0 : index
    %c0_40 = arith.constant 0 : index
    %39 = vector.load %arg2[%c6_38, %c0_39, %c0_40] : memref<16x144x256xf32, #tpu.memory_space<vmem>>, vector<1x144x256xf32>
    %40 = vector.shape_cast %39 : vector<1x144x256xf32> to vector<144x256xf32>
    %cst_41 = arith.constant dense<0.000000e+00> : vector<2x256xf32>
    %41 = tpu.matmul %38, %40, %cst_41 {dimension_numbers = #tpu.dot_dimension_numbers<[1], [0], [0], [1], [0, 0, 1, 1], [], []>} : vector<2x144xf32>, vector<144x256xf32>, vector<2x256xf32> -> vector<2x256xf32>
    %42 = arith.addf %36, %41 : vector<2x256xf32>
    %c7 = arith.constant 7 : index
    %c0_42 = arith.constant 0 : index
    %c0_43 = arith.constant 0 : index
    %43 = vector.load %arg1[%c7, %c0_42, %c0_43] : memref<16x2x144xf32, #tpu.memory_space<vmem>>, vector<1x2x144xf32>
    %44 = vector.shape_cast %43 : vector<1x2x144xf32> to vector<2x144xf32>
    %c7_44 = arith.constant 7 : index
    %c0_45 = arith.constant 0 : index
    %c0_46 = arith.constant 0 : index
    %45 = vector.load %arg2[%c7_44, %c0_45, %c0_46] : memref<16x144x256xf32, #tpu.memory_space<vmem>>, vector<1x144x256xf32>
    %46 = vector.shape_cast %45 : vector<1x144x256xf32> to vector<144x256xf32>
    %cst_47 = arith.constant dense<0.000000e+00> : vector<2x256xf32>
    %47 = tpu.matmul %44, %46, %cst_47 {dimension_numbers = #tpu.dot_dimension_numbers<[1], [0], [0], [1], [0, 0, 1, 1], [], []>} : vector<2x144xf32>, vector<144x256xf32>, vector<2x256xf32> -> vector<2x256xf32>
    %48 = arith.addf %42, %47 : vector<2x256xf32>
    %c8 = arith.constant 8 : index
    %c0_48 = arith.constant 0 : index
    %c0_49 = arith.constant 0 : index
    %49 = vector.load %arg1[%c8, %c0_48, %c0_49] : memref<16x2x144xf32, #tpu.memory_space<vmem>>, vector<1x2x144xf32>
    %50 = vector.shape_cast %49 : vector<1x2x144xf32> to vector<2x144xf32>
    %c8_50 = arith.constant 8 : index
    %c0_51 = arith.constant 0 : index
    %c0_52 = arith.constant 0 : index
    %51 = vector.load %arg2[%c8_50, %c0_51, %c0_52] : memref<16x144x256xf32, #tpu.memory_space<vmem>>, vector<1x144x256xf32>
    %52 = vector.shape_cast %51 : vector<1x144x256xf32> to vector<144x256xf32>
    %cst_53 = arith.constant dense<0.000000e+00> : vector<2x256xf32>
    %53 = tpu.matmul %50, %52, %cst_53 {dimension_numbers = #tpu.dot_dimension_numbers<[1], [0], [0], [1], [0, 0, 1, 1], [], []>} : vector<2x144xf32>, vector<144x256xf32>, vector<2x256xf32> -> vector<2x256xf32>
    %54 = arith.addf %48, %53 : vector<2x256xf32>
    %c9 = arith.constant 9 : index
    %c0_54 = arith.constant 0 : index
    %c0_55 = arith.constant 0 : index
    %55 = vector.load %arg1[%c9, %c0_54, %c0_55] : memref<16x2x144xf32, #tpu.memory_space<vmem>>, vector<1x2x144xf32>
    %56 = vector.shape_cast %55 : vector<1x2x144xf32> to vector<2x144xf32>
    %c9_56 = arith.constant 9 : index
    %c0_57 = arith.constant 0 : index
    %c0_58 = arith.constant 0 : index
    %57 = vector.load %arg2[%c9_56, %c0_57, %c0_58] : memref<16x144x256xf32, #tpu.memory_space<vmem>>, vector<1x144x256xf32>
    %58 = vector.shape_cast %57 : vector<1x144x256xf32> to vector<144x256xf32>
    %cst_59 = arith.constant dense<0.000000e+00> : vector<2x256xf32>
    %59 = tpu.matmul %56, %58, %cst_59 {dimension_numbers = #tpu.dot_dimension_numbers<[1], [0], [0], [1], [0, 0, 1, 1], [], []>} : vector<2x144xf32>, vector<144x256xf32>, vector<2x256xf32> -> vector<2x256xf32>
    %60 = arith.addf %54, %59 : vector<2x256xf32>
    %c10 = arith.constant 10 : index
    %c0_60 = arith.constant 0 : index
    %c0_61 = arith.constant 0 : index
    %61 = vector.load %arg1[%c10, %c0_60, %c0_61] : memref<16x2x144xf32, #tpu.memory_space<vmem>>, vector<1x2x144xf32>
    %62 = vector.shape_cast %61 : vector<1x2x144xf32> to vector<2x144xf32>
    %c10_62 = arith.constant 10 : index
    %c0_63 = arith.constant 0 : index
    %c0_64 = arith.constant 0 : index
    %63 = vector.load %arg2[%c10_62, %c0_63, %c0_64] : memref<16x144x256xf32, #tpu.memory_space<vmem>>, vector<1x144x256xf32>
    %64 = vector.shape_cast %63 : vector<1x144x256xf32> to vector<144x256xf32>
    %cst_65 = arith.constant dense<0.000000e+00> : vector<2x256xf32>
    %65 = tpu.matmul %62, %64, %cst_65 {dimension_numbers = #tpu.dot_dimension_numbers<[1], [0], [0], [1], [0, 0, 1, 1], [], []>} : vector<2x144xf32>, vector<144x256xf32>, vector<2x256xf32> -> vector<2x256xf32>
    %66 = arith.addf %60, %65 : vector<2x256xf32>
    %c11 = arith.constant 11 : index
    %c0_66 = arith.constant 0 : index
    %c0_67 = arith.constant 0 : index
    %67 = vector.load %arg1[%c11, %c0_66, %c0_67] : memref<16x2x144xf32, #tpu.memory_space<vmem>>, vector<1x2x144xf32>
    %68 = vector.shape_cast %67 : vector<1x2x144xf32> to vector<2x144xf32>
    %c11_68 = arith.constant 11 : index
    %c0_69 = arith.constant 0 : index
    %c0_70 = arith.constant 0 : index
    %69 = vector.load %arg2[%c11_68, %c0_69, %c0_70] : memref<16x144x256xf32, #tpu.memory_space<vmem>>, vector<1x144x256xf32>
    %70 = vector.shape_cast %69 : vector<1x144x256xf32> to vector<144x256xf32>
    %cst_71 = arith.constant dense<0.000000e+00> : vector<2x256xf32>
    %71 = tpu.matmul %68, %70, %cst_71 {dimension_numbers = #tpu.dot_dimension_numbers<[1], [0], [0], [1], [0, 0, 1, 1], [], []>} : vector<2x144xf32>, vector<144x256xf32>, vector<2x256xf32> -> vector<2x256xf32>
    %72 = arith.addf %66, %71 : vector<2x256xf32>
    %c12 = arith.constant 12 : index
    %c0_72 = arith.constant 0 : index
    %c0_73 = arith.constant 0 : index
    %73 = vector.load %arg1[%c12, %c0_72, %c0_73] : memref<16x2x144xf32, #tpu.memory_space<vmem>>, vector<1x2x144xf32>
    %74 = vector.shape_cast %73 : vector<1x2x144xf32> to vector<2x144xf32>
    %c12_74 = arith.constant 12 : index
    %c0_75 = arith.constant 0 : index
    %c0_76 = arith.constant 0 : index
    %75 = vector.load %arg2[%c12_74, %c0_75, %c0_76] : memref<16x144x256xf32, #tpu.memory_space<vmem>>, vector<1x144x256xf32>
    %76 = vector.shape_cast %75 : vector<1x144x256xf32> to vector<144x256xf32>
    %cst_77 = arith.constant dense<0.000000e+00> : vector<2x256xf32>
    %77 = tpu.matmul %74, %76, %cst_77 {dimension_numbers = #tpu.dot_dimension_numbers<[1], [0], [0], [1], [0, 0, 1, 1], [], []>} : vector<2x144xf32>, vector<144x256xf32>, vector<2x256xf32> -> vector<2x256xf32>
    %78 = arith.addf %72, %77 : vector<2x256xf32>
    %c13 = arith.constant 13 : index
    %c0_78 = arith.constant 0 : index
    %c0_79 = arith.constant 0 : index
    %79 = vector.load %arg1[%c13, %c0_78, %c0_79] : memref<16x2x144xf32, #tpu.memory_space<vmem>>, vector<1x2x144xf32>
    %80 = vector.shape_cast %79 : vector<1x2x144xf32> to vector<2x144xf32>
    %c13_80 = arith.constant 13 : index
    %c0_81 = arith.constant 0 : index
    %c0_82 = arith.constant 0 : index
    %81 = vector.load %arg2[%c13_80, %c0_81, %c0_82] : memref<16x144x256xf32, #tpu.memory_space<vmem>>, vector<1x144x256xf32>
    %82 = vector.shape_cast %81 : vector<1x144x256xf32> to vector<144x256xf32>
    %cst_83 = arith.constant dense<0.000000e+00> : vector<2x256xf32>
    %83 = tpu.matmul %80, %82, %cst_83 {dimension_numbers = #tpu.dot_dimension_numbers<[1], [0], [0], [1], [0, 0, 1, 1], [], []>} : vector<2x144xf32>, vector<144x256xf32>, vector<2x256xf32> -> vector<2x256xf32>
    %84 = arith.addf %78, %83 : vector<2x256xf32>
    %c14 = arith.constant 14 : index
    %c0_84 = arith.constant 0 : index
    %c0_85 = arith.constant 0 : index
    %85 = vector.load %arg1[%c14, %c0_84, %c0_85] : memref<16x2x144xf32, #tpu.memory_space<vmem>>, vector<1x2x144xf32>
    %86 = vector.shape_cast %85 : vector<1x2x144xf32> to vector<2x144xf32>
    %c14_86 = arith.constant 14 : index
    %c0_87 = arith.constant 0 : index
    %c0_88 = arith.constant 0 : index
    %87 = vector.load %arg2[%c14_86, %c0_87, %c0_88] : memref<16x144x256xf32, #tpu.memory_space<vmem>>, vector<1x144x256xf32>
    %88 = vector.shape_cast %87 : vector<1x144x256xf32> to vector<144x256xf32>
    %cst_89 = arith.constant dense<0.000000e+00> : vector<2x256xf32>
    %89 = tpu.matmul %86, %88, %cst_89 {dimension_numbers = #tpu.dot_dimension_numbers<[1], [0], [0], [1], [0, 0, 1, 1], [], []>} : vector<2x144xf32>, vector<144x256xf32>, vector<2x256xf32> -> vector<2x256xf32>
    %90 = arith.addf %84, %89 : vector<2x256xf32>
    %c15 = arith.constant 15 : index
    %c0_90 = arith.constant 0 : index
    %c0_91 = arith.constant 0 : index
    %91 = vector.load %arg1[%c15, %c0_90, %c0_91] : memref<16x2x144xf32, #tpu.memory_space<vmem>>, vector<1x2x144xf32>
    %92 = vector.shape_cast %91 : vector<1x2x144xf32> to vector<2x144xf32>
    %c15_92 = arith.constant 15 : index
    %c0_93 = arith.constant 0 : index
    %c0_94 = arith.constant 0 : index
    %93 = vector.load %arg2[%c15_92, %c0_93, %c0_94] : memref<16x144x256xf32, #tpu.memory_space<vmem>>, vector<1x144x256xf32>
    %94 = vector.shape_cast %93 : vector<1x144x256xf32> to vector<144x256xf32>
    %cst_95 = arith.constant dense<0.000000e+00> : vector<2x256xf32>
    %95 = tpu.matmul %92, %94, %cst_95 {dimension_numbers = #tpu.dot_dimension_numbers<[1], [0], [0], [1], [0, 0, 1, 1], [], []>} : vector<2x144xf32>, vector<144x256xf32>, vector<2x256xf32> -> vector<2x256xf32>
    %96 = arith.addf %90, %95 : vector<2x256xf32>
    %c0_96 = arith.constant 0 : index
    %c0_97 = arith.constant 0 : index
    %97 = vector.load %arg3[%c0_96, %c0_97] : memref<1x256xf32, #tpu.memory_space<vmem>>, vector<1x256xf32>
    %98 = vector.broadcast %97 : vector<1x256xf32> to vector<2x256xf32>
    %99 = arith.addf %96, %98 : vector<2x256xf32>
    %cst_98 = arith.constant 0.000000e+00 : f32
    %100 = vector.broadcast %cst_98 : f32 to vector<2x256xf32>
    %101 = arith.cmpf ogt, %99, %100 : vector<2x256xf32>
    %cst_99 = arith.constant 0.00999999977 : f32
    %102 = vector.broadcast %cst_99 : f32 to vector<2x256xf32>
    %103 = arith.mulf %102, %99 : vector<2x256xf32>
    %104 = arith.select %101, %99, %103 : vector<2x256xi1>, vector<2x256xf32>
    %c0_100 = arith.constant 0 : index
    %c0_101 = arith.constant 0 : index
    %105 = vector.load %arg4[%c0_100, %c0_101] : memref<256x128xf32, #tpu.memory_space<vmem>>, vector<256x128xf32>
    %cst_102 = arith.constant dense<0.000000e+00> : vector<2x128xf32>
    %106 = tpu.matmul %104, %105, %cst_102 {dimension_numbers = #tpu.dot_dimension_numbers<[1], [0], [0], [1], [0, 0, 1, 1], [], []>} : vector<2x256xf32>, vector<256x128xf32>, vector<2x128xf32> -> vector<2x128xf32>
    %c0_103 = arith.constant 0 : index
    %c0_104 = arith.constant 0 : index
    %107 = vector.load %arg5[%c0_103, %c0_104] : memref<1x128xf32, #tpu.memory_space<vmem>>, vector<1x128xf32>
    %108 = vector.broadcast %107 : vector<1x128xf32> to vector<2x128xf32>
    %109 = arith.addf %106, %108 : vector<2x128xf32>
    %cst_105 = arith.constant 0.000000e+00 : f32
    %110 = vector.broadcast %cst_105 : f32 to vector<2x128xf32>
    %111 = arith.cmpf ogt, %109, %110 : vector<2x128xf32>
    %cst_106 = arith.constant 0.00999999977 : f32
    %112 = vector.broadcast %cst_106 : f32 to vector<2x128xf32>
    %113 = arith.mulf %112, %109 : vector<2x128xf32>
    %114 = arith.select %111, %109, %113 : vector<2x128xi1>, vector<2x128xf32>
    %c0_107 = arith.constant 0 : index
    %c0_108 = arith.constant 0 : index
    %115 = vector.load %arg6[%c0_107, %c0_108] : memref<128x64xf32, #tpu.memory_space<vmem>>, vector<128x64xf32>
    %cst_109 = arith.constant dense<0.000000e+00> : vector<2x64xf32>
    %116 = tpu.matmul %114, %115, %cst_109 {dimension_numbers = #tpu.dot_dimension_numbers<[1], [0], [0], [1], [0, 0, 1, 1], [], []>} : vector<2x128xf32>, vector<128x64xf32>, vector<2x64xf32> -> vector<2x64xf32>
    %c0_110 = arith.constant 0 : index
    %c0_111 = arith.constant 0 : index
    %117 = vector.load %arg7[%c0_110, %c0_111] : memref<1x64xf32, #tpu.memory_space<vmem>>, vector<1x64xf32>
    %118 = vector.broadcast %117 : vector<1x64xf32> to vector<2x64xf32>
    %119 = arith.addf %116, %118 : vector<2x64xf32>
    %cst_112 = arith.constant 0.000000e+00 : f32
    %120 = vector.broadcast %cst_112 : f32 to vector<2x64xf32>
    %121 = arith.cmpf ogt, %119, %120 : vector<2x64xf32>
    %cst_113 = arith.constant 0.00999999977 : f32
    %122 = vector.broadcast %cst_113 : f32 to vector<2x64xf32>
    %123 = arith.mulf %122, %119 : vector<2x64xf32>
    %124 = arith.select %121, %119, %123 : vector<2x64xi1>, vector<2x64xf32>
    %c0_114 = arith.constant 0 : index
    %c0_115 = arith.constant 0 : index
    %125 = vector.load %arg8[%c0_114, %c0_115] : memref<64x32xf32, #tpu.memory_space<vmem>>, vector<64x32xf32>
    %cst_116 = arith.constant dense<0.000000e+00> : vector<2x32xf32>
    %126 = tpu.matmul %124, %125, %cst_116 {dimension_numbers = #tpu.dot_dimension_numbers<[1], [0], [0], [1], [0, 0, 1, 1], [], []>} : vector<2x64xf32>, vector<64x32xf32>, vector<2x32xf32> -> vector<2x32xf32>
    %c0_117 = arith.constant 0 : index
    %c0_118 = arith.constant 0 : index
    %127 = vector.load %arg9[%c0_117, %c0_118] : memref<1x32xf32, #tpu.memory_space<vmem>>, vector<1x32xf32>
    %128 = vector.broadcast %127 : vector<1x32xf32> to vector<2x32xf32>
    %129 = arith.addf %126, %128 : vector<2x32xf32>
    %cst_119 = arith.constant 0.000000e+00 : f32
    %130 = vector.broadcast %cst_119 : f32 to vector<2x32xf32>
    %131 = arith.cmpf ogt, %129, %130 : vector<2x32xf32>
    %cst_120 = arith.constant 0.00999999977 : f32
    %132 = vector.broadcast %cst_120 : f32 to vector<2x32xf32>
    %133 = arith.mulf %132, %129 : vector<2x32xf32>
    %134 = arith.select %131, %129, %133 : vector<2x32xi1>, vector<2x32xf32>
    %c0_121 = arith.constant 0 : index
    %c0_122 = arith.constant 0 : index
    %135 = vector.load %arg10[%c0_121, %c0_122] : memref<32x2xf32, #tpu.memory_space<vmem>>, vector<32x2xf32>
    %cst_123 = arith.constant dense<0.000000e+00> : vector<2x2xf32>
    %136 = tpu.matmul %134, %135, %cst_123 {dimension_numbers = #tpu.dot_dimension_numbers<[1], [0], [0], [1], [0, 0, 1, 1], [], []>} : vector<2x32xf32>, vector<32x2xf32>, vector<2x2xf32> -> vector<2x2xf32>
    %c0_124 = arith.constant 0 : index
    %c0_125 = arith.constant 0 : index
    %137 = vector.load %arg11[%c0_124, %c0_125] : memref<1x2xf32, #tpu.memory_space<vmem>>, vector<1x2xf32>
    %138 = vector.broadcast %137 : vector<1x2xf32> to vector<2x2xf32>
    %139 = arith.addf %136, %138 : vector<2x2xf32>
    %cst_126 = arith.constant 0.000000e+00 : f32
    %140 = vector.broadcast %cst_126 : f32 to vector<2x2xf32>
    %141 = arith.cmpf ogt, %139, %140 : vector<2x2xf32>
    %cst_127 = arith.constant 0.00999999977 : f32
    %142 = vector.broadcast %cst_127 : f32 to vector<2x2xf32>
    %143 = arith.mulf %142, %139 : vector<2x2xf32>
    %144 = arith.select %141, %139, %143 : vector<2x2xi1>, vector<2x2xf32>
    %c0_128 = arith.constant 0 : index
    %c0_129 = arith.constant 0 : index
    %145 = vector.load %arg12[%c0_128, %c0_129] : memref<2x2xf32, #tpu.memory_space<vmem>>, vector<2x2xf32>
    tpu.vector_store %arg12[%c0_128, %c0_129], %144 {strides = array<i32>} : memref<2x2xf32, #tpu.memory_space<vmem>>, vector<2x2xf32>,
    return
  }
  func.func @transform_0(%arg0: i32) -> (i32, i32, i32) {
    %c0_i32 = arith.constant 0 : i32
    %c0_i32_0 = arith.constant 0 : i32
    %c0_i32_1 = arith.constant 0 : i32
    %c0_i32_2 = arith.constant 0 : i32
    return %c0_i32, %c0_i32_0, %c0_i32_1 : i32, i32, i32
  }
  func.func @transform_1(%arg0: i32) -> (i32, i32, i32) {
    %c0_i32 = arith.constant 0 : i32
    %c0_i32_0 = arith.constant 0 : i32
    %c0_i32_1 = arith.constant 0 : i32
    %c0_i32_2 = arith.constant 0 : i32
    return %c0_i32, %c0_i32_0, %c0_i32_1 : i32, i32, i32
  }
  func.func @transform_2(%arg0: i32) -> (i32, i32) {
    %c0_i32 = arith.constant 0 : i32
    %c0_i32_0 = arith.constant 0 : i32
    %c0_i32_1 = arith.constant 0 : i32
    return %c0_i32, %c0_i32_0 : i32, i32
  }
  func.func @transform_3(%arg0: i32) -> (i32, i32) {
    %c0_i32 = arith.constant 0 : i32
    %c0_i32_0 = arith.constant 0 : i32
    %c0_i32_1 = arith.constant 0 : i32
    return %c0_i32, %c0_i32_0 : i32, i32
  }
  func.func @transform_4(%arg0: i32) -> (i32, i32) {
    %c0_i32 = arith.constant 0 : i32
    %c0_i32_0 = arith.constant 0 : i32
    %c0_i32_1 = arith.constant 0 : i32
    return %c0_i32, %c0_i32_0 : i32, i32
  }
  func.func @transform_5(%arg0: i32) -> (i32, i32) {
    %c0_i32 = arith.constant 0 : i32
    %c0_i32_0 = arith.constant 0 : i32
    %c0_i32_1 = arith.constant 0 : i32
    return %c0_i32, %c0_i32_0 : i32, i32
  }
  func.func @transform_6(%arg0: i32) -> (i32, i32) {
    %c0_i32 = arith.constant 0 : i32
    %c0_i32_0 = arith.constant 0 : i32
    %c0_i32_1 = arith.constant 0 : i32
    return %c0_i32, %c0_i32_0 : i32, i32
  }
  func.func @transform_7(%arg0: i32) -> (i32, i32) {
    %c0_i32 = arith.constant 0 : i32
    %c0_i32_0 = arith.constant 0 : i32
    %c0_i32_1 = arith.constant 0 : i32
    return %c0_i32, %c0_i32_0 : i32, i32
  }
  func.func @transform_8(%arg0: i32) -> (i32, i32) {
    %c0_i32 = arith.constant 0 : i32
    %c0_i32_0 = arith.constant 0 : i32
    %c0_i32_1 = arith.constant 0 : i32
    return %c0_i32, %c0_i32_0 : i32, i32
  }
  func.func @transform_9(%arg0: i32) -> (i32, i32) {
    %c0_i32 = arith.constant 0 : i32
    %c0_i32_0 = arith.constant 0 : i32
    %c0_i32_1 = arith.constant 0 : i32
    return %c0_i32, %c0_i32_0 : i32, i32
  }
  func.func @transform_10(%arg0: i32) -> (i32, i32) {
    %c0_i32 = arith.constant 0 : i32
    %c0_i32_0 = arith.constant 0 : i32
    %c0_i32_1 = arith.constant 0 : i32
    return %c0_i32, %c0_i32_0 : i32, i32
  }
  func.func @transform_11(%arg0: i32) -> (i32, i32) {
    %c0_i32 = arith.constant 0 : i32
    %c0_i32_0 = arith.constant 0 : i32
    %c0_i32_1 = arith.constant 0 : i32
    return %c0_i32, %c0_i32_0 : i32, i32
  }
}

</mosaic_0001>

<bundles_post_ra>
// kernel: convnet_forward.5
= control target key start
LH: loop header
LB: loop body
LE: loop exit
PB: predicated region body
PF: predicated region fallthrough
CT: control target
= control target key end

     0   :  { %s3667_s12 = smov 0   ;;  %s3669_s13 = smov 0   ;;  %s5083_s0 = inlined_call_operand.vmem [shape: f32[8,49], index: 0, kind: input, shape index: {}]   ;;  %s5084_s1 = inlined_call_operand.vmem [shape: f32[49,22050], index: 1, kind: input, shape index: {}]   ;;  %s5085_s2 = inlined_call_operand.vmem [shape: f32[8,1], index: 2, kind: input, shape index: {}]   ;;  %s5086_s3 = inlined_call_operand.vmem [shape: f32[8,22050], index: 3, kind: output, shape index: {}]  }
   0x1   :  { %s3671_s14 = smov 0  }
   0x2 LB: > { %s3683_s15 = sadd.s32 4294967295, %s3511_s14   ;;  %s3686_s16 = sadd.s32 1, %s3511_s14   ;;  %s3511_s14 = sphi %s3671_s14, %s5116_s14   ;;  %s3507_s13 = sphi %s3669_s13, %s5115_s13   ;;  %s3503_s12 = sphi %s3667_s12, %s5114_s12  }
   0x3   : > { %s38_s17 = ssub.s32 %s3511_s14, %s3686_s16  ;;  %s41_s18 = sadd.s32 1, %s3507_s13 }
   0x4   : > { %p39_p0 = scmp.eq.s32.totalorder %s38_s17, 0  ;;  %p48_p1 = scmp.ne.s32.totalorder %s3507_s13, %s3503_s12 }
   0x5   : > { %p49_p2 = scmp.eq.s32.totalorder %s3511_s14, 0  ;;  %p99_p3 = scmp.eq.s32.totalorder %s3683_s15, 5 }
   0x6   : > { %s3696_s19 = scalar_select %p39_p0, %s3507_s13, %s41_s18  }
   0x7   : > { %p50_p4 = por %p49_p2, %p48_p1  ;;  %p3698_p5 = por %p99_p3, %p48_p1 }
   0x8   : > { %p2953_p6 = scmp.ge.s32.totalorder %s3511_s14, 6 }
   0xa   : > { %127 = sbr.rel (%p2953_p6) target bundleno = 234 (0xea), region = 24 }
   0xf   : > { %130 = sbr.rel (!%p50_p4) target bundleno = 234 (0xea), region = 28  ;;  %s132_s21 = sand.u32 (%p50_p4), 1, %s3507_s13  }
  0x10   : > { %s2954_s22 = sshll.u32 (%p50_p4), %s3511_s14, 5  ;;  %s3062_s23 = smul.u32 (%p50_p4), 1792, %s132_s21 }
  0x11   : > { %s136_s24 = ssub.s32 (%p50_p4), 173, %s2954_s22  ;;  %s3056_s25 = sshll.u32 (%p50_p4), %s3511_s14, 8 }
  0x12   : > { %p137_p7 = scmp.lt.s32.totalorder (%p50_p4), %s136_s24, 32  ;;  %s3709_s28 = scalar_lea.vmem (%p50_p4), %s5084_s1, %s3056_s25  }
  0x13   : > { %s3713_s4 = scalar_lea.vmem (%p50_p4), [#allocation2], %s3062_s23  }
  0x14   : > { %s5118_s24 = smov (!%p137_p7, %s136_s24), 32 }
  0x15   : > { %s139_s29 = smul.u32 896, %s5118_s24  ;;  %s3711_s30 = sshll.u32 %s5118_s24, 3 }
  0x17   : > { %p2958_p8 = scmp.eq.s32.totalorder %s139_s29, 0 }
  0x18   : > { %p147_p9 = scmp.lt.u32.totalorder (!%p2958_p8), %s3711_s30, 8 }
  0x19   : > { %146 = sbr.rel (%p2958_p8) target bundleno = 234 (0xea), region = 32 }
  0x1e   : > { %150 = sbr.rel (%p147_p9) target bundleno = 219 (0xdb), region = 36  ;;  %s3717_s5 = sand.u32 (!%p147_p9), 7, %s3711_s30  }
  0x1f   : > { %p179_p10 = scmp.eq.s32.totalorder (!%p147_p9), %s3717_s5, 0  ;;  %p2959_p11 = scmp.ne.s32.totalorder (!%p147_p9), %s3717_s5, 0 }
  0x23   : > { %182 = sbr.rel (%p2959_p11) target bundleno = 121 (0x79), region = 51  ;;  %s183_s6 = sshrl.u32 (!%p2959_p11), %s3711_s30, 3 }
  0x24   : > { %3352 = sdivrem.u32 (!%p2959_p11), %s183_s6, 12 }
  0x2d   : > { %s3724_s7 = spop.drf %3352 }
  0x2e   : > { %p2960_p12 = scmp.le.s32.totalorder %s3724_s7, 0 }
  0x2f   : > { %s5088_s8 = smov (!%p2960_p12), %s3713_s4  ;;  %s5089_s9 = smov (!%p2960_p12), %s3709_s28 }
  0x30   : > { %2823 = sbr.rel (%p2960_p12) target bundleno = 96 (0x60), region = 229  ;;  %s3733_s10 = smov (!%p2960_p12), 0  }
  0x31   : > { %s3735_s11 = smov (!%p2960_p12), 0  }
  0x35 LB: >> { %v197_v0 = vld [vmem:[%s3519_s9] sm:$0xff]  ;;  %v199_v1 = vld [vmem:[%s3519_s9 + $0x8] sm:$0xff]  ;;  %v201_v2 = vld [vmem:[%s3519_s9 + $0x10] sm:$0xff]  ;;  %s365_s17 = sadd.s32 1, %s3523_s10  ;;  %s191_s11 = sadd.s32 1, %s3527_s11   ;;  %s3527_s11 = sphi %s3735_s11, %s191_s11   ;;  %s3523_s10 = sphi %s3733_s10, %s5092_s10   ;;  %s3519_s9 = sphi %s5089_s9, %s5091_s9   ;;  %s3515_s8 = sphi %s5088_s8, %s5090_s8  }
  0x36   : >> { %198 = vst [vmem:[%s3515_s8] sm:$0xff] %v197_v0  ;;  %200 = vst [vmem:[%s3515_s8 + $0x8] sm:$0xff] %v199_v1  ;;  %v203_v3 = vld [vmem:[%s3519_s9 + $0x18] sm:$0xff]  ;;  %v205_v4 = vld [vmem:[%s3519_s9 + $0x20] sm:$0xff]  ;;  %p366_p13 = scmp.ge.s32.totalorder %s365_s17, %s3724_s7  ;;  %p190_p0 = scmp.ge.s32.totalorder %s191_s11, %s3724_s7 }
  0x37   : >> { %202 = vst [vmem:[%s3515_s8 + $0x10] sm:$0xff] %v201_v2  ;;  %v207_v5 = vld [vmem:[%s3519_s9 + $0x28] sm:$0xff]  ;;  %204 = vst [vmem:[%s3515_s8 + $0x18] sm:$0xff] %v203_v3  ;;  %v209_v6 = vld [vmem:[%s3519_s9 + $0x30] sm:$0xff] }
  0x38   : >> { %206 = vst [vmem:[%s3515_s8 + $0x20] sm:$0xff] %v205_v4  ;;  %208 = vst [vmem:[%s3515_s8 + $0x28] sm:$0xff] %v207_v5  ;;  %v211_v7 = vld [vmem:[%s3519_s9 + $0x38] sm:$0xff]  ;;  %v213_v8 = vld [vmem:[%s3519_s9 + $0x40] sm:$0xff]  ;;  %s5120_s17 = smov (%p366_p13, %s365_s17), 0 }
  0x39   : >> { %210 = vst [vmem:[%s3515_s8 + $0x30] sm:$0xff] %v209_v6  ;;  %212 = vst [vmem:[%s3515_s8 + $0x38] sm:$0xff] %v211_v7  ;;  %v215_v9 = vld [vmem:[%s3519_s9 + $0x48] sm:$0xff]  ;;  %v217_v10 = vld [vmem:[%s3519_s9 + $0x50] sm:$0xff]  ;;  %s368_s18 = smul.u32 96, %s5120_s17  ;;  %s5092_s10 = smov %s5120_s17 }
  0x3a   : >> { %214 = vst [vmem:[%s3515_s8 + $0x40] sm:$0xff] %v213_v8  ;;  %v219_v11 = vld [vmem:[%s3519_s9 + $0x58] sm:$0xff]  ;;  %216 = vst [vmem:[%s3515_s8 + $0x48] sm:$0xff] %v215_v9  ;;  %v221_v12 = vld [vmem:[%s3519_s9 + $0x568] sm:$0xff] }
  0x3b   : >> { %218 = vst [vmem:[%s3515_s8 + $0x50] sm:$0xff] %v217_v10  ;;  %220 = vst [vmem:[%s3515_s8 + $0x58] sm:$0xff] %v219_v11  ;;  %v223_v13 = vld [vmem:[%s3519_s9 + $0x570] sm:$0xff]  ;;  %v225_v14 = vld [vmem:[%s3519_s9 + $0x578] sm:$0xff]  ;;  %s3797_s21 = scalar_lea.vmem %s3709_s28, %s368_s18   ;;  %s3800_s22 = scalar_lea.vmem %s3713_s4, %s368_s18 [#allocation2]  }
  0x3c   : >> { %222 = vst [vmem:[%s3515_s8 + $0x100] sm:$0xff] %v221_v12  ;;  %224 = vst [vmem:[%s3515_s8 + $0x108] sm:$0xff] %v223_v13  ;;  %v227_v15 = vld [vmem:[%s3519_s9 + $0x580] sm:$0xff]  ;;  %v229_v16 = vld [vmem:[%s3519_s9 + $0x588] sm:$0xff] }
  0x3d   : >> { %226 = vst [vmem:[%s3515_s8 + $0x110] sm:$0xff] %v225_v14  ;;  %v231_v17 = vld [vmem:[%s3519_s9 + $0x590] sm:$0xff]  ;;  %228 = vst [vmem:[%s3515_s8 + $0x118] sm:$0xff] %v227_v15  ;;  %v233_v18 = vld [vmem:[%s3519_s9 + $0x598] sm:$0xff] }
  0x3e   : >> { %230 = vst [vmem:[%s3515_s8 + $0x120] sm:$0xff] %v229_v16  ;;  %232 = vst [vmem:[%s3515_s8 + $0x128] sm:$0xff] %v231_v17  ;;  %v235_v19 = vld [vmem:[%s3519_s9 + $0x5a0] sm:$0xff]  ;;  %v237_v20 = vld [vmem:[%s3519_s9 + $0x5a8] sm:$0xff] }
  0x3f   : >> { %234 = vst [vmem:[%s3515_s8 + $0x130] sm:$0xff] %v233_v18  ;;  %236 = vst [vmem:[%s3515_s8 + $0x138] sm:$0xff] %v235_v19  ;;  %v239_v21 = vld [vmem:[%s3519_s9 + $0x5b0] sm:$0xff]  ;;  %v241_v22 = vld [vmem:[%s3519_s9 + $0x5b8] sm:$0xff] }
  0x40   : >> { %238 = vst [vmem:[%s3515_s8 + $0x140] sm:$0xff] %v237_v20  ;;  %v243_v23 = vld [vmem:[%s3519_s9 + $0x5c0] sm:$0xff]  ;;  %240 = vst [vmem:[%s3515_s8 + $0x148] sm:$0xff] %v239_v21  ;;  %v245_v24 = vld [vmem:[%s3519_s9 + $0xad0] sm:$0xff] }
  0x41   : >> { %242 = vst [vmem:[%s3515_s8 + $0x150] sm:$0xff] %v241_v22  ;;  %244 = vst [vmem:[%s3515_s8 + $0x158] sm:$0xff] %v243_v23  ;;  %v247_v25 = vld [vmem:[%s3519_s9 + $0xad8] sm:$0xff]  ;;  %v249_v26 = vld [vmem:[%s3519_s9 + $0xae0] sm:$0xff] }
  0x42   : >> { %246 = vst [vmem:[%s3515_s8 + $0x200] sm:$0xff] %v245_v24  ;;  %248 = vst [vmem:[%s3515_s8 + $0x208] sm:$0xff] %v247_v25  ;;  %v251_v27 = vld [vmem:[%s3519_s9 + $0xae8] sm:$0xff]  ;;  %v253_v28 = vld [vmem:[%s3519_s9 + $0xaf0] sm:$0xff] }
  0x43   : >> { %250 = vst [vmem:[%s3515_s8 + $0x210] sm:$0xff] %v249_v26  ;;  %v255_v29 = vld [vmem:[%s3519_s9 + $0xaf8] sm:$0xff]  ;;  %252 = vst [vmem:[%s3515_s8 + $0x218] sm:$0xff] %v251_v27  ;;  %v257_v30 = vld [vmem:[%s3519_s9 + $0xb00] sm:$0xff] }
  0x44   : >> { %254 = vst [vmem:[%s3515_s8 + $0x220] sm:$0xff] %v253_v28  ;;  %256 = vst [vmem:[%s3515_s8 + $0x228] sm:$0xff] %v255_v29  ;;  %v259_v31 = vld [vmem:[%s3519_s9 + $0xb08] sm:$0xff]  ;;  %v261_v32 = vld [vmem:[%s3519_s9 + $0xb10] sm:$0xff] }
  0x45   : >> { %258 = vst [vmem:[%s3515_s8 + $0x230] sm:$0xff] %v257_v30  ;;  %260 = vst [vmem:[%s3515_s8 + $0x238] sm:$0xff] %v259_v31  ;;  %v263_v33 = vld [vmem:[%s3519_s9 + $0xb18] sm:$0xff]  ;;  %v265_v34 = vld [vmem:[%s3519_s9 + $0xb20] sm:$0xff] }
  0x46   : >> { %262 = vst [vmem:[%s3515_s8 + $0x240] sm:$0xff] %v261_v32  ;;  %v267_v35 = vld [vmem:[%s3519_s9 + $0xb28] sm:$0xff]  ;;  %264 = vst [vmem:[%s3515_s8 + $0x248] sm:$0xff] %v263_v33  ;;  %v269_v36 = vld [vmem:[%s3519_s9 + $0x1038] sm:$0xff] }
  0x47   : >> { %266 = vst [vmem:[%s3515_s8 + $0x250] sm:$0xff] %v265_v34  ;;  %268 = vst [vmem:[%s3515_s8 + $0x258] sm:$0xff] %v267_v35  ;;  %v271_v37 = vld [vmem:[%s3519_s9 + $0x1040] sm:$0xff]  ;;  %v273_v38 = vld [vmem:[%s3519_s9 + $0x1048] sm:$0xff] }
  0x48   : >> { %270 = vst [vmem:[%s3515_s8 + $0x300] sm:$0xff] %v269_v36  ;;  %272 = vst [vmem:[%s3515_s8 + $0x308] sm:$0xff] %v271_v37  ;;  %v275_v39 = vld [vmem:[%s3519_s9 + $0x1050] sm:$0xff]  ;;  %v277_v40 = vld [vmem:[%s3519_s9 + $0x1058] sm:$0xff] }
  0x49   : >> { %274 = vst [vmem:[%s3515_s8 + $0x310] sm:$0xff] %v273_v38  ;;  %v279_v41 = vld [vmem:[%s3519_s9 + $0x1060] sm:$0xff]  ;;  %276 = vst [vmem:[%s3515_s8 + $0x318] sm:$0xff] %v275_v39  ;;  %v281_v42 = vld [vmem:[%s3519_s9 + $0x1068] sm:$0xff] }
  0x4a   : >> { %278 = vst [vmem:[%s3515_s8 + $0x320] sm:$0xff] %v277_v40  ;;  %280 = vst [vmem:[%s3515_s8 + $0x328] sm:$0xff] %v279_v41  ;;  %v283_v43 = vld [vmem:[%s3519_s9 + $0x1070] sm:$0xff]  ;;  %v285_v44 = vld [vmem:[%s3519_s9 + $0x1078] sm:$0xff] }
  0x4b   : >> { %282 = vst [vmem:[%s3515_s8 + $0x330] sm:$0xff] %v281_v42  ;;  %284 = vst [vmem:[%s3515_s8 + $0x338] sm:$0xff] %v283_v43  ;;  %v287_v45 = vld [vmem:[%s3519_s9 + $0x1080] sm:$0xff]  ;;  %v289_v46 = vld [vmem:[%s3519_s9 + $0x1088] sm:$0xff] }
  0x4c   : >> { %286 = vst [vmem:[%s3515_s8 + $0x340] sm:$0xff] %v285_v44  ;;  %v291_v47 = vld [vmem:[%s3519_s9 + $0x1090] sm:$0xff]  ;;  %288 = vst [vmem:[%s3515_s8 + $0x348] sm:$0xff] %v287_v45  ;;  %v293_v48 = vld [vmem:[%s3519_s9 + $0x15a0] sm:$0xff] }
  0x4d   : >> { %290 = vst [vmem:[%s3515_s8 + $0x350] sm:$0xff] %v289_v46  ;;  %292 = vst [vmem:[%s3515_s8 + $0x358] sm:$0xff] %v291_v47  ;;  %v295_v49 = vld [vmem:[%s3519_s9 + $0x15a8] sm:$0xff]  ;;  %v297_v50 = vld [vmem:[%s3519_s9 + $0x15b0] sm:$0xff] }
  0x4e   : >> { %294 = vst [vmem:[%s3515_s8 + $0x400] sm:$0xff] %v293_v48  ;;  %296 = vst [vmem:[%s3515_s8 + $0x408] sm:$0xff] %v295_v49  ;;  %v299_v51 = vld [vmem:[%s3519_s9 + $0x15b8] sm:$0xff]  ;;  %v301_v52 = vld [vmem:[%s3519_s9 + $0x15c0] sm:$0xff] }
  0x4f   : >> { %298 = vst [vmem:[%s3515_s8 + $0x410] sm:$0xff] %v297_v50  ;;  %v303_v53 = vld [vmem:[%s3519_s9 + $0x15c8] sm:$0xff]  ;;  %300 = vst [vmem:[%s3515_s8 + $0x418] sm:$0xff] %v299_v51  ;;  %v305_v54 = vld [vmem:[%s3519_s9 + $0x15d0] sm:$0xff] }
  0x50   : >> { %302 = vst [vmem:[%s3515_s8 + $0x420] sm:$0xff] %v301_v52  ;;  %304 = vst [vmem:[%s3515_s8 + $0x428] sm:$0xff] %v303_v53  ;;  %v307_v55 = vld [vmem:[%s3519_s9 + $0x15d8] sm:$0xff]  ;;  %v309_v56 = vld [vmem:[%s3519_s9 + $0x15e0] sm:$0xff] }
  0x51   : >> { %306 = vst [vmem:[%s3515_s8 + $0x430] sm:$0xff] %v305_v54  ;;  %308 = vst [vmem:[%s3515_s8 + $0x438] sm:$0xff] %v307_v55  ;;  %v311_v57 = vld [vmem:[%s3519_s9 + $0x15e8] sm:$0xff]  ;;  %v313_v58 = vld [vmem:[%s3519_s9 + $0x15f0] sm:$0xff] }
  0x52   : >> { %310 = vst [vmem:[%s3515_s8 + $0x440] sm:$0xff] %v309_v56  ;;  %v315_v59 = vld [vmem:[%s3519_s9 + $0x15f8] sm:$0xff]  ;;  %312 = vst [vmem:[%s3515_s8 + $0x448] sm:$0xff] %v311_v57  ;;  %v317_v60 = vld [vmem:[%s3519_s9 + $0x1b08] sm:$0xff] }
  0x53   : >> { %314 = vst [vmem:[%s3515_s8 + $0x450] sm:$0xff] %v313_v58  ;;  %316 = vst [vmem:[%s3515_s8 + $0x458] sm:$0xff] %v315_v59  ;;  %v319_v61 = vld [vmem:[%s3519_s9 + $0x1b10] sm:$0xff]  ;;  %v321_v62 = vld [vmem:[%s3519_s9 + $0x1b18] sm:$0xff] }
  0x54   : >> { %318 = vst [vmem:[%s3515_s8 + $0x500] sm:$0xff] %v317_v60  ;;  %320 = vst [vmem:[%s3515_s8 + $0x508] sm:$0xff] %v319_v61  ;;  %v323_v63 = vld [vmem:[%s3519_s9 + $0x1b20] sm:$0xff]  ;;  %v325_v0 = vld [vmem:[%s3519_s9 + $0x1b28] sm:$0xff] }
  0x55   : >> { %322 = vst [vmem:[%s3515_s8 + $0x510] sm:$0xff] %v321_v62  ;;  %v327_v1 = vld [vmem:[%s3519_s9 + $0x1b30] sm:$0xff]  ;;  %324 = vst [vmem:[%s3515_s8 + $0x518] sm:$0xff] %v323_v63  ;;  %v329_v2 = vld [vmem:[%s3519_s9 + $0x1b38] sm:$0xff] }
  0x56   : >> { %326 = vst [vmem:[%s3515_s8 + $0x520] sm:$0xff] %v325_v0  ;;  %328 = vst [vmem:[%s3515_s8 + $0x528] sm:$0xff] %v327_v1  ;;  %v331_v3 = vld [vmem:[%s3519_s9 + $0x1b40] sm:$0xff]  ;;  %v333_v4 = vld [vmem:[%s3519_s9 + $0x1b48] sm:$0xff] }
  0x57   : >> { %330 = vst [vmem:[%s3515_s8 + $0x530] sm:$0xff] %v329_v2  ;;  %332 = vst [vmem:[%s3515_s8 + $0x538] sm:$0xff] %v331_v3  ;;  %v335_v5 = vld [vmem:[%s3519_s9 + $0x1b50] sm:$0xff]  ;;  %v337_v6 = vld [vmem:[%s3519_s9 + $0x1b58] sm:$0xff] }
  0x58   : >> { %334 = vst [vmem:[%s3515_s8 + $0x540] sm:$0xff] %v333_v4  ;;  %v339_v7 = vld [vmem:[%s3519_s9 + $0x1b60] sm:$0xff]  ;;  %336 = vst [vmem:[%s3515_s8 + $0x548] sm:$0xff] %v335_v5  ;;  %v341_v8 = vld [vmem:[%s3519_s9 + $0x2070] sm:$0xff] }
  0x59   : >> { %338 = vst [vmem:[%s3515_s8 + $0x550] sm:$0xff] %v337_v6  ;;  %340 = vst [vmem:[%s3515_s8 + $0x558] sm:$0xff] %v339_v7  ;;  %v343_v9 = vld [vmem:[%s3519_s9 + $0x2078] sm:$0xff]  ;;  %v345_v10 = vld [vmem:[%s3519_s9 + $0x2080] sm:$0xff] }
  0x5a   : >> { %342 = vst [vmem:[%s3515_s8 + $0x600] sm:$0xff] %v341_v8  ;;  %344 = vst [vmem:[%s3515_s8 + $0x608] sm:$0xff] %v343_v9  ;;  %v347_v11 = vld [vmem:[%s3519_s9 + $0x2088] sm:$0xff]  ;;  %v349_v12 = vld [vmem:[%s3519_s9 + $0x2090] sm:$0xff] }
  0x5b   : >> { %346 = vst [vmem:[%s3515_s8 + $0x610] sm:$0xff] %v345_v10  ;;  %v351_v13 = vld [vmem:[%s3519_s9 + $0x2098] sm:$0xff]  ;;  %348 = vst [vmem:[%s3515_s8 + $0x618] sm:$0xff] %v347_v11  ;;  %v353_v14 = vld [vmem:[%s3519_s9 + $0x20a0] sm:$0xff]  ;;  %193 = sbr.rel (!%p190_p0) target bundleno = 53 (0x35), region = 235 }
  0x5c   : >> { %350 = vst [vmem:[%s3515_s8 + $0x620] sm:$0xff] %v349_v12  ;;  %352 = vst [vmem:[%s3515_s8 + $0x628] sm:$0xff] %v351_v13  ;;  %v355_v15 = vld [vmem:[%s3519_s9 + $0x20a8] sm:$0xff]  ;;  %v357_v16 = vld [vmem:[%s3519_s9 + $0x20b0] sm:$0xff] }
  0x5d   : >> { %354 = vst [vmem:[%s3515_s8 + $0x630] sm:$0xff] %v353_v14  ;;  %356 = vst [vmem:[%s3515_s8 + $0x638] sm:$0xff] %v355_v15  ;;  %v359_v17 = vld [vmem:[%s3519_s9 + $0x20b8] sm:$0xff]  ;;  %v361_v18 = vld [vmem:[%s3519_s9 + $0x20c0] sm:$0xff] }
  0x5e   : >> { %358 = vst [vmem:[%s3515_s8 + $0x640] sm:$0xff] %v357_v16  ;;  %v363_v19 = vld [vmem:[%s3519_s9 + $0x20c8] sm:$0xff]  ;;  %360 = vst [vmem:[%s3515_s8 + $0x648] sm:$0xff] %v359_v17  ;;  %s5091_s9 = smov %s3797_s21 }
  0x5f   : >> { %362 = vst [vmem:[%s3515_s8 + $0x650] sm:$0xff] %v361_v18  ;;  %364 = vst [vmem:[%s3515_s8 + $0x658] sm:$0xff] %v363_v19  ;;  %s5090_s8 = smov %s3800_s22 }
  0x60 PF: > { %3354 = sdivrem.u32 %s183_s6, 12 }
  0x61   : > { %s2961_s23 = smul.u32 1536, %s3724_s7 }
  0x63   : > { %s376_s24 = sshra.s32 %s2961_s23, 4 }
  0x64   : > { %s3942_s25 = scalar_lea.vmem %s3709_s28, %s376_s24   ;;  %s3945_s26 = scalar_lea.vmem %s3713_s4, %s376_s24 [#allocation2]  }
  0x69   : > { %s3947_s27 = spop.drf %3354 }
  0x6a   : > { %p2963_p1 = scmp.le.s32.totalorder %s3947_s27, 0 }
  0x6b   : > { %s5093_s29 = smov (!%p2963_p1), %s3945_s26  ;;  %s5094_s8 = smov (!%p2963_p1), %s3942_s25 }
  0x6c   : > { %2837 = sbr.rel (%p2963_p1) target bundleno = 121 (0x79), region = 240  ;;  %s3956_s9 = smov (!%p2963_p1), 0  }
  0x6d   : > { %s3958_s6 = smov (!%p2963_p1), 0  }
  0x71 LB: >> { %v392_v20 = vld [vmem:[%s3535_s8] sm:$0xff]  ;;  %v394_v21 = vld [vmem:[%s3535_s8 + $0x568] sm:$0xff]  ;;  %v396_v22 = vld [vmem:[%s3535_s8 + $0xad0] sm:$0xff]  ;;  %s406_s7 = sadd.s32 1, %s3539_s9  ;;  %s386_s6 = sadd.s32 1, %s3543_s6   ;;  %s3543_s6 = sphi %s3958_s6, %s386_s6   ;;  %s3539_s9 = sphi %s3956_s9, %s5095_s9   ;;  %s3535_s8 = sphi %s5094_s8, %s411_s8   ;;  %s3531_s29 = sphi %s5093_s29, %s412_s29  }
  0x72   : >> { %393 = vst [vmem:[%s3531_s29] sm:$0xff] %v392_v20  ;;  %395 = vst [vmem:[%s3531_s29 + $0x100] sm:$0xff] %v394_v21  ;;  %v398_v23 = vld [vmem:[%s3535_s8 + $0x1038] sm:$0xff]  ;;  %v400_v24 = vld [vmem:[%s3535_s8 + $0x15a0] sm:$0xff]  ;;  %p407_p2 = scmp.ge.s32.totalorder %s406_s7, %s3947_s27  ;;  %p385_p3 = scmp.ge.s32.totalorder %s386_s6, %s3947_s27 }
  0x73   : >> { %397 = vst [vmem:[%s3531_s29 + $0x200] sm:$0xff] %v396_v22  ;;  %v402_v25 = vld [vmem:[%s3535_s8 + $0x1b08] sm:$0xff]  ;;  %399 = vst [vmem:[%s3531_s29 + $0x300] sm:$0xff] %v398_v23  ;;  %v404_v26 = vld [vmem:[%s3535_s8 + $0x2070] sm:$0xff] }
  0x74   : >> { %401 = vst [vmem:[%s3531_s29 + $0x400] sm:$0xff] %v400_v24  ;;  %403 = vst [vmem:[%s3531_s29 + $0x500] sm:$0xff] %v402_v25  ;;  %s5122_s7 = smov (%p407_p2, %s406_s7), 0  ;;  %388 = sbr.rel (!%p385_p3) target bundleno = 113 (0x71), region = 246 }
  0x75   : >> { %405 = vst [vmem:[%s3531_s29 + $0x600] sm:$0xff] %v404_v26  ;;  %s2964_s10 = sshll.u32 %s5122_s7, 3  ;;  %s5095_s9 = smov %s5122_s7 }
  0x76   : >> { %s411_s8 = scalar_lea.vmem %s3942_s25, %s2964_s10   ;;  %s412_s29 = scalar_lea.vmem %s3945_s26, %s2964_s10 [#allocation2]  }
  0x79 PF: > { %415 = sbr.rel (%p179_p10) target bundleno = 219 (0xdb), region = 69  ;;  %s417_s11 = ssub.s32 (!%p179_p10), %s3711_s30, %s3717_s5 }
  0x7a   : > { %s421_s17 = sshrl.u32 (!%p179_p10), %s3711_s30, 3  ;;  %s3982_s18 = scalar_lea.vmem (!%p179_p10), %s3709_s28, %s417_s11 }
  0x7b   : > { %s3985_s21 = scalar_lea.vmem (!%p179_p10), %s3713_s4, %s417_s11 [#allocation2]  ;;  %3356 = sdivrem.u32 (!%p179_p10), %s421_s17, 12 }
  0x84   : > { %s3989_s22 = spop.drf %3356 }
  0x85   : > { %p2966_p4 = scmp.le.s32.totalorder %s3989_s22, 0 }
  0x86   : > { %s5096_s23 = smov (!%p2966_p4), %s3713_s4  ;;  %s5097_s24 = smov (!%p2966_p4), %s3709_s28 }
  0x87   : > { %2851 = sbr.rel (%p2966_p4) target bundleno = 183 (0xb7), region = 251  ;;  %s3998_s25 = smov (!%p2966_p4), 0  }
  0x88   : > { %s4000_s26 = smov (!%p2966_p4), 0  }
  0x8c LB: >> { %v435_v27 = vld [vmem:[%s3551_s24] sm:$0xff]  ;;  %v437_v28 = vld [vmem:[%s3551_s24 + $0x8] sm:$0xff]  ;;  %v439_v29 = vld [vmem:[%s3551_s24 + $0x10] sm:$0xff]  ;;  %s603_s27 = sadd.s32 1, %s3555_s25  ;;  %s429_s26 = sadd.s32 1, %s3559_s26   ;;  %s3559_s26 = sphi %s4000_s26, %s429_s26   ;;  %s3555_s25 = sphi %s3998_s25, %s5100_s25   ;;  %s3551_s24 = sphi %s5097_s24, %s5099_s24   ;;  %s3547_s23 = sphi %s5096_s23, %s5098_s23  }
  0x8d   : >> { %436 = vst [vmem:[%s3547_s23] sm:$0xff] %v435_v27  ;;  %438 = vst [vmem:[%s3547_s23 + $0x8] sm:$0xff] %v437_v28  ;;  %v441_v30 = vld [vmem:[%s3551_s24 + $0x18] sm:$0xff]  ;;  %v443_v31 = vld [vmem:[%s3551_s24 + $0x20] sm:$0xff]  ;;  %p604_p6 = scmp.ge.s32.totalorder %s603_s27, %s3989_s22  ;;  %p428_p7 = scmp.ge.s32.totalorder %s429_s26, %s3989_s22 }
  0x8e   : >> { %440 = vst [vmem:[%s3547_s23 + $0x10] sm:$0xff] %v439_v29  ;;  %v445_v32 = vld [vmem:[%s3551_s24 + $0x28] sm:$0xff]  ;;  %442 = vst [vmem:[%s3547_s23 + $0x18] sm:$0xff] %v441_v30  ;;  %v447_v33 = vld [vmem:[%s3551_s24 + $0x30] sm:$0xff] }
  0x8f   : >> { %444 = vst [vmem:[%s3547_s23 + $0x20] sm:$0xff] %v443_v31  ;;  %446 = vst [vmem:[%s3547_s23 + $0x28] sm:$0xff] %v445_v32  ;;  %v449_v34 = vld [vmem:[%s3551_s24 + $0x38] sm:$0xff]  ;;  %v451_v35 = vld [vmem:[%s3551_s24 + $0x40] sm:$0xff]  ;;  %s5124_s27 = smov (%p604_p6, %s603_s27), 0 }
  0x90   : >> { %448 = vst [vmem:[%s3547_s23 + $0x30] sm:$0xff] %v447_v33  ;;  %450 = vst [vmem:[%s3547_s23 + $0x38] sm:$0xff] %v449_v34  ;;  %v453_v36 = vld [vmem:[%s3551_s24 + $0x48] sm:$0xff]  ;;  %v455_v37 = vld [vmem:[%s3551_s24 + $0x50] sm:$0xff]  ;;  %s606_s29 = smul.u32 96, %s5124_s27  ;;  %s5100_s25 = smov %s5124_s27 }
  0x91   : >> { %452 = vst [vmem:[%s3547_s23 + $0x40] sm:$0xff] %v451_v35  ;;  %v457_v38 = vld [vmem:[%s3551_s24 + $0x58] sm:$0xff]  ;;  %454 = vst [vmem:[%s3547_s23 + $0x48] sm:$0xff] %v453_v36  ;;  %v459_v39 = vld [vmem:[%s3551_s24 + $0x568] sm:$0xff] }
  0x92   : >> { %456 = vst [vmem:[%s3547_s23 + $0x50] sm:$0xff] %v455_v37  ;;  %458 = vst [vmem:[%s3547_s23 + $0x58] sm:$0xff] %v457_v38  ;;  %v461_v40 = vld [vmem:[%s3551_s24 + $0x570] sm:$0xff]  ;;  %v463_v41 = vld [vmem:[%s3551_s24 + $0x578] sm:$0xff]  ;;  %s4062_s8 = scalar_lea.vmem %s3709_s28, %s606_s29   ;;  %s4065_s9 = scalar_lea.vmem %s3713_s4, %s606_s29 [#allocation2]  }
  0x93   : >> { %460 = vst [vmem:[%s3547_s23 + $0x100] sm:$0xff] %v459_v39  ;;  %462 = vst [vmem:[%s3547_s23 + $0x108] sm:$0xff] %v461_v40  ;;  %v465_v42 = vld [vmem:[%s3551_s24 + $0x580] sm:$0xff]  ;;  %v467_v43 = vld [vmem:[%s3551_s24 + $0x588] sm:$0xff] }
  0x94   : >> { %464 = vst [vmem:[%s3547_s23 + $0x110] sm:$0xff] %v463_v41  ;;  %v469_v44 = vld [vmem:[%s3551_s24 + $0x590] sm:$0xff]  ;;  %466 = vst [vmem:[%s3547_s23 + $0x118] sm:$0xff] %v465_v42  ;;  %v471_v45 = vld [vmem:[%s3551_s24 + $0x598] sm:$0xff] }
  0x95   : >> { %468 = vst [vmem:[%s3547_s23 + $0x120] sm:$0xff] %v467_v43  ;;  %470 = vst [vmem:[%s3547_s23 + $0x128] sm:$0xff] %v469_v44  ;;  %v473_v46 = vld [vmem:[%s3551_s24 + $0x5a0] sm:$0xff]  ;;  %v475_v47 = vld [vmem:[%s3551_s24 + $0x5a8] sm:$0xff] }
  0x96   : >> { %472 = vst [vmem:[%s3547_s23 + $0x130] sm:$0xff] %v471_v45  ;;  %474 = vst [vmem:[%s3547_s23 + $0x138] sm:$0xff] %v473_v46  ;;  %v477_v48 = vld [vmem:[%s3551_s24 + $0x5b0] sm:$0xff]  ;;  %v479_v49 = vld [vmem:[%s3551_s24 + $0x5b8] sm:$0xff] }
  0x97   : >> { %476 = vst [vmem:[%s3547_s23 + $0x140] sm:$0xff] %v475_v47  ;;  %v481_v50 = vld [vmem:[%s3551_s24 + $0x5c0] sm:$0xff]  ;;  %478 = vst [vmem:[%s3547_s23 + $0x148] sm:$0xff] %v477_v48  ;;  %v483_v51 = vld [vmem:[%s3551_s24 + $0xad0] sm:$0xff] }
  0x98   : >> { %480 = vst [vmem:[%s3547_s23 + $0x150] sm:$0xff] %v479_v49  ;;  %482 = vst [vmem:[%s3547_s23 + $0x158] sm:$0xff] %v481_v50  ;;  %v485_v52 = vld [vmem:[%s3551_s24 + $0xad8] sm:$0xff]  ;;  %v487_v53 = vld [vmem:[%s3551_s24 + $0xae0] sm:$0xff] }
  0x99   : >> { %484 = vst [vmem:[%s3547_s23 + $0x200] sm:$0xff] %v483_v51  ;;  %486 = vst [vmem:[%s3547_s23 + $0x208] sm:$0xff] %v485_v52  ;;  %v489_v54 = vld [vmem:[%s3551_s24 + $0xae8] sm:$0xff]  ;;  %v491_v55 = vld [vmem:[%s3551_s24 + $0xaf0] sm:$0xff] }
  0x9a   : >> { %488 = vst [vmem:[%s3547_s23 + $0x210] sm:$0xff] %v487_v53  ;;  %v493_v56 = vld [vmem:[%s3551_s24 + $0xaf8] sm:$0xff]  ;;  %490 = vst [vmem:[%s3547_s23 + $0x218] sm:$0xff] %v489_v54  ;;  %v495_v57 = vld [vmem:[%s3551_s24 + $0xb00] sm:$0xff] }
  0x9b   : >> { %492 = vst [vmem:[%s3547_s23 + $0x220] sm:$0xff] %v491_v55  ;;  %494 = vst [vmem:[%s3547_s23 + $0x228] sm:$0xff] %v493_v56  ;;  %v497_v58 = vld [vmem:[%s3551_s24 + $0xb08] sm:$0xff]  ;;  %v499_v59 = vld [vmem:[%s3551_s24 + $0xb10] sm:$0xff] }
  0x9c   : >> { %496 = vst [vmem:[%s3547_s23 + $0x230] sm:$0xff] %v495_v57  ;;  %498 = vst [vmem:[%s3547_s23 + $0x238] sm:$0xff] %v497_v58  ;;  %v501_v60 = vld [vmem:[%s3551_s24 + $0xb18] sm:$0xff]  ;;  %v503_v61 = vld [vmem:[%s3551_s24 + $0xb20] sm:$0xff] }
  0x9d   : >> { %500 = vst [vmem:[%s3547_s23 + $0x240] sm:$0xff] %v499_v59  ;;  %v505_v62 = vld [vmem:[%s3551_s24 + $0xb28] sm:$0xff]  ;;  %502 = vst [vmem:[%s3547_s23 + $0x248] sm:$0xff] %v501_v60  ;;  %v507_v63 = vld [vmem:[%s3551_s24 + $0x1038] sm:$0xff] }
  0x9e   : >> { %504 = vst [vmem:[%s3547_s23 + $0x250] sm:$0xff] %v503_v61  ;;  %506 = vst [vmem:[%s3547_s23 + $0x258] sm:$0xff] %v505_v62  ;;  %v509_v0 = vld [vmem:[%s3551_s24 + $0x1040] sm:$0xff]  ;;  %v511_v1 = vld [vmem:[%s3551_s24 + $0x1048] sm:$0xff] }
  0x9f   : >> { %508 = vst [vmem:[%s3547_s23 + $0x300] sm:$0xff] %v507_v63  ;;  %510 = vst [vmem:[%s3547_s23 + $0x308] sm:$0xff] %v509_v0  ;;  %v513_v2 = vld [vmem:[%s3551_s24 + $0x1050] sm:$0xff]  ;;  %v515_v3 = vld [vmem:[%s3551_s24 + $0x1058] sm:$0xff] }
  0xa0   : >> { %512 = vst [vmem:[%s3547_s23 + $0x310] sm:$0xff] %v511_v1  ;;  %v517_v4 = vld [vmem:[%s3551_s24 + $0x1060] sm:$0xff]  ;;  %514 = vst [vmem:[%s3547_s23 + $0x318] sm:$0xff] %v513_v2  ;;  %v519_v5 = vld [vmem:[%s3551_s24 + $0x1068] sm:$0xff] }
  0xa1   : >> { %516 = vst [vmem:[%s3547_s23 + $0x320] sm:$0xff] %v515_v3  ;;  %518 = vst [vmem:[%s3547_s23 + $0x328] sm:$0xff] %v517_v4  ;;  %v521_v6 = vld [vmem:[%s3551_s24 + $0x1070] sm:$0xff]  ;;  %v523_v7 = vld [vmem:[%s3551_s24 + $0x1078] sm:$0xff] }
  0xa2   : >> { %520 = vst [vmem:[%s3547_s23 + $0x330] sm:$0xff] %v519_v5  ;;  %522 = vst [vmem:[%s3547_s23 + $0x338] sm:$0xff] %v521_v6  ;;  %v525_v8 = vld [vmem:[%s3551_s24 + $0x1080] sm:$0xff]  ;;  %v527_v9 = vld [vmem:[%s3551_s24 + $0x1088] sm:$0xff] }
  0xa3   : >> { %524 = vst [vmem:[%s3547_s23 + $0x340] sm:$0xff] %v523_v7  ;;  %v529_v10 = vld [vmem:[%s3551_s24 + $0x1090] sm:$0xff]  ;;  %526 = vst [vmem:[%s3547_s23 + $0x348] sm:$0xff] %v525_v8  ;;  %v531_v11 = vld [vmem:[%s3551_s24 + $0x15a0] sm:$0xff] }
  0xa4   : >> { %528 = vst [vmem:[%s3547_s23 + $0x350] sm:$0xff] %v527_v9  ;;  %530 = vst [vmem:[%s3547_s23 + $0x358] sm:$0xff] %v529_v10  ;;  %v533_v12 = vld [vmem:[%s3551_s24 + $0x15a8] sm:$0xff]  ;;  %v535_v13 = vld [vmem:[%s3551_s24 + $0x15b0] sm:$0xff] }
  0xa5   : >> { %532 = vst [vmem:[%s3547_s23 + $0x400] sm:$0xff] %v531_v11  ;;  %534 = vst [vmem:[%s3547_s23 + $0x408] sm:$0xff] %v533_v12  ;;  %v537_v14 = vld [vmem:[%s3551_s24 + $0x15b8] sm:$0xff]  ;;  %v539_v15 = vld [vmem:[%s3551_s24 + $0x15c0] sm:$0xff] }
  0xa6   : >> { %536 = vst [vmem:[%s3547_s23 + $0x410] sm:$0xff] %v535_v13  ;;  %v541_v16 = vld [vmem:[%s3551_s24 + $0x15c8] sm:$0xff]  ;;  %538 = vst [vmem:[%s3547_s23 + $0x418] sm:$0xff] %v537_v14  ;;  %v543_v17 = vld [vmem:[%s3551_s24 + $0x15d0] sm:$0xff] }
  0xa7   : >> { %540 = vst [vmem:[%s3547_s23 + $0x420] sm:$0xff] %v539_v15  ;;  %542 = vst [vmem:[%s3547_s23 + $0x428] sm:$0xff] %v541_v16  ;;  %v545_v18 = vld [vmem:[%s3551_s24 + $0x15d8] sm:$0xff]  ;;  %v547_v19 = vld [vmem:[%s3551_s24 + $0x15e0] sm:$0xff] }
  0xa8   : >> { %544 = vst [vmem:[%s3547_s23 + $0x430] sm:$0xff] %v543_v17  ;;  %546 = vst [vmem:[%s3547_s23 + $0x438] sm:$0xff] %v545_v18  ;;  %v549_v20 = vld [vmem:[%s3551_s24 + $0x15e8] sm:$0xff]  ;;  %v551_v21 = vld [vmem:[%s3551_s24 + $0x15f0] sm:$0xff] }
  0xa9   : >> { %548 = vst [vmem:[%s3547_s23 + $0x440] sm:$0xff] %v547_v19  ;;  %v553_v22 = vld [vmem:[%s3551_s24 + $0x15f8] sm:$0xff]  ;;  %550 = vst [vmem:[%s3547_s23 + $0x448] sm:$0xff] %v549_v20  ;;  %v555_v23 = vld [vmem:[%s3551_s24 + $0x1b08] sm:$0xff] }
  0xaa   : >> { %552 = vst [vmem:[%s3547_s23 + $0x450] sm:$0xff] %v551_v21  ;;  %554 = vst [vmem:[%s3547_s23 + $0x458] sm:$0xff] %v553_v22  ;;  %v557_v24 = vld [vmem:[%s3551_s24 + $0x1b10] sm:$0xff]  ;;  %v559_v25 = vld [vmem:[%s3551_s24 + $0x1b18] sm:$0xff] }
  0xab   : >> { %556 = vst [vmem:[%s3547_s23 + $0x500] sm:$0xff] %v555_v23  ;;  %558 = vst [vmem:[%s3547_s23 + $0x508] sm:$0xff] %v557_v24  ;;  %v561_v26 = vld [vmem:[%s3551_s24 + $0x1b20] sm:$0xff]  ;;  %v563_v27 = vld [vmem:[%s3551_s24 + $0x1b28] sm:$0xff] }
  0xac   : >> { %560 = vst [vmem:[%s3547_s23 + $0x510] sm:$0xff] %v559_v25  ;;  %v565_v28 = vld [vmem:[%s3551_s24 + $0x1b30] sm:$0xff]  ;;  %562 = vst [vmem:[%s3547_s23 + $0x518] sm:$0xff] %v561_v26  ;;  %v567_v29 = vld [vmem:[%s3551_s24 + $0x1b38] sm:$0xff] }
  0xad   : >> { %564 = vst [vmem:[%s3547_s23 + $0x520] sm:$0xff] %v563_v27  ;;  %566 = vst [vmem:[%s3547_s23 + $0x528] sm:$0xff] %v565_v28  ;;  %v569_v30 = vld [vmem:[%s3551_s24 + $0x1b40] sm:$0xff]  ;;  %v571_v31 = vld [vmem:[%s3551_s24 + $0x1b48] sm:$0xff] }
  0xae   : >> { %568 = vst [vmem:[%s3547_s23 + $0x530] sm:$0xff] %v567_v29  ;;  %570 = vst [vmem:[%s3547_s23 + $0x538] sm:$0xff] %v569_v30  ;;  %v573_v32 = vld [vmem:[%s3551_s24 + $0x1b50] sm:$0xff]  ;;  %v575_v33 = vld [vmem:[%s3551_s24 + $0x1b58] sm:$0xff] }
  0xaf   : >> { %572 = vst [vmem:[%s3547_s23 + $0x540] sm:$0xff] %v571_v31  ;;  %v577_v34 = vld [vmem:[%s3551_s24 + $0x1b60] sm:$0xff]  ;;  %574 = vst [vmem:[%s3547_s23 + $0x548] sm:$0xff] %v573_v32  ;;  %v579_v35 = vld [vmem:[%s3551_s24 + $0x2070] sm:$0xff] }
  0xb0   : >> { %576 = vst [vmem:[%s3547_s23 + $0x550] sm:$0xff] %v575_v33  ;;  %578 = vst [vmem:[%s3547_s23 + $0x558] sm:$0xff] %v577_v34  ;;  %v581_v36 = vld [vmem:[%s3551_s24 + $0x2078] sm:$0xff]  ;;  %v583_v37 = vld [vmem:[%s3551_s24 + $0x2080] sm:$0xff] }
  0xb1   : >> { %580 = vst [vmem:[%s3547_s23 + $0x600] sm:$0xff] %v579_v35  ;;  %582 = vst [vmem:[%s3547_s23 + $0x608] sm:$0xff] %v581_v36  ;;  %v585_v38 = vld [vmem:[%s3551_s24 + $0x2088] sm:$0xff]  ;;  %v587_v39 = vld [vmem:[%s3551_s24 + $0x2090] sm:$0xff] }
  0xb2   : >> { %584 = vst [vmem:[%s3547_s23 + $0x610] sm:$0xff] %v583_v37  ;;  %v589_v40 = vld [vmem:[%s3551_s24 + $0x2098] sm:$0xff]  ;;  %586 = vst [vmem:[%s3547_s23 + $0x618] sm:$0xff] %v585_v38  ;;  %v591_v41 = vld [vmem:[%s3551_s24 + $0x20a0] sm:$0xff]  ;;  %431 = sbr.rel (!%p428_p7) target bundleno = 140 (0x8c), region = 257 }
  0xb3   : >> { %588 = vst [vmem:[%s3547_s23 + $0x620] sm:$0xff] %v587_v39  ;;  %590 = vst [vmem:[%s3547_s23 + $0x628] sm:$0xff] %v589_v40  ;;  %v593_v42 = vld [vmem:[%s3551_s24 + $0x20a8] sm:$0xff]  ;;  %v595_v43 = vld [vmem:[%s3551_s24 + $0x20b0] sm:$0xff] }
  0xb4   : >> { %592 = vst [vmem:[%s3547_s23 + $0x630] sm:$0xff] %v591_v41  ;;  %594 = vst [vmem:[%s3547_s23 + $0x638] sm:$0xff] %v593_v42  ;;  %v597_v44 = vld [vmem:[%s3551_s24 + $0x20b8] sm:$0xff]  ;;  %v599_v45 = vld [vmem:[%s3551_s24 + $0x20c0] sm:$0xff] }
  0xb5   : >> { %596 = vst [vmem:[%s3547_s23 + $0x640] sm:$0xff] %v595_v43  ;;  %v601_v46 = vld [vmem:[%s3551_s24 + $0x20c8] sm:$0xff]  ;;  %598 = vst [vmem:[%s3547_s23 + $0x648] sm:$0xff] %v597_v44  ;;  %s5099_s24 = smov %s4062_s8 }
  0xb6   : >> { %600 = vst [vmem:[%s3547_s23 + $0x650] sm:$0xff] %v599_v45  ;;  %602 = vst [vmem:[%s3547_s23 + $0x658] sm:$0xff] %v601_v46  ;;  %s5098_s23 = smov %s4065_s9 }
  0xb7 PF: > { %3358 = sdivrem.u32 %s421_s17, 12 }
  0xb8   : > { %s2967_s6 = smul.u32 1536, %s3989_s22 }
  0xba   : > { %s614_s7 = sshra.s32 %s2967_s6, 4 }
  0xbb   : > { %s4207_s10 = scalar_lea.vmem %s3709_s28, %s614_s7   ;;  %s4210_s11 = scalar_lea.vmem %s3713_s4, %s614_s7 [#allocation2]  }
  0xc0   : > { %s4212_s29 = spop.drf %3358 }
  0xc1   : > { %p2969_p8 = scmp.le.s32.totalorder %s4212_s29, 0 }
  0xc2   : > { %s5101_s23 = smov (!%p2969_p8), %s4210_s11  ;;  %s5102_s24 = smov (!%p2969_p8), %s4207_s10 }
  0xc3   : > { %2865 = sbr.rel (%p2969_p8) target bundleno = 208 (0xd0), region = 262  ;;  %s4221_s25 = smov (!%p2969_p8), 0  }
  0xc4   : > { %s4223_s17 = smov (!%p2969_p8), 0  }
  0xc8 LB: >> { %v630_v47 = vld [vmem:[%s3567_s24] sm:$0xff]  ;;  %v632_v48 = vld [vmem:[%s3567_s24 + $0x568] sm:$0xff]  ;;  %v634_v49 = vld [vmem:[%s3567_s24 + $0xad0] sm:$0xff]  ;;  %s644_s22 = sadd.s32 1, %s3571_s25  ;;  %s624_s17 = sadd.s32 1, %s3575_s17   ;;  %s3575_s17 = sphi %s4223_s17, %s624_s17   ;;  %s3571_s25 = sphi %s4221_s25, %s5103_s25   ;;  %s3567_s24 = sphi %s5102_s24, %s649_s24   ;;  %s3563_s23 = sphi %s5101_s23, %s650_s23  }
  0xc9   : >> { %631 = vst [vmem:[%s3563_s23] sm:$0xff] %v630_v47  ;;  %633 = vst [vmem:[%s3563_s23 + $0x100] sm:$0xff] %v632_v48  ;;  %v636_v50 = vld [vmem:[%s3567_s24 + $0x1038] sm:$0xff]  ;;  %v638_v51 = vld [vmem:[%s3567_s24 + $0x15a0] sm:$0xff]  ;;  %p645_p9 = scmp.ge.s32.totalorder %s644_s22, %s4212_s29  ;;  %p623_p10 = scmp.ge.s32.totalorder %s624_s17, %s4212_s29 }
  0xca   : >> { %635 = vst [vmem:[%s3563_s23 + $0x200] sm:$0xff] %v634_v49  ;;  %v640_v52 = vld [vmem:[%s3567_s24 + $0x1b08] sm:$0xff]  ;;  %637 = vst [vmem:[%s3563_s23 + $0x300] sm:$0xff] %v636_v50  ;;  %v642_v53 = vld [vmem:[%s3567_s24 + $0x2070] sm:$0xff] }
  0xcb   : >> { %639 = vst [vmem:[%s3563_s23 + $0x400] sm:$0xff] %v638_v51  ;;  %641 = vst [vmem:[%s3563_s23 + $0x500] sm:$0xff] %v640_v52  ;;  %s5126_s22 = smov (%p645_p9, %s644_s22), 0  ;;  %626 = sbr.rel (!%p623_p10) target bundleno = 200 (0xc8), region = 268 }
  0xcc   : >> { %643 = vst [vmem:[%s3563_s23 + $0x600] sm:$0xff] %v642_v53  ;;  %s2970_s26 = sshll.u32 %s5126_s22, 3  ;;  %s5103_s25 = smov %s5126_s22 }
  0xcd   : >> { %s649_s24 = scalar_lea.vmem %s4207_s10, %s2970_s26   ;;  %s650_s23 = scalar_lea.vmem %s4210_s11, %s2970_s26 [#allocation2]  }
  0xd0 PF: > { %s3641_s27 = smov 1  }
  0xd1   : > { %s651_s8 = sshll.u32 %s3641_s27, %s3717_s5 }
  0xd2   : > { %s2972_s9 = sadd.s32 4294967295, %s651_s8 }
  0xd3   : > { %v661_v54 = vld [vmem:[%s3982_s18] sm:%s2972_s9]  ;;  %v663_v55 = vld [vmem:[%s3982_s18 + $0x568] sm:%s2972_s9] }
  0xd4   : > { %662 = vst [vmem:[%s3985_s21] sm:%s2972_s9] %v661_v54  ;;  %664 = vst [vmem:[%s3985_s21 + $0x100] sm:%s2972_s9] %v663_v55 }
  0xd5   : > { %v665_v56 = vld [vmem:[%s3982_s18 + $0xad0] sm:%s2972_s9]  ;;  %v667_v57 = vld [vmem:[%s3982_s18 + $0x1038] sm:%s2972_s9] }
  0xd6   : > { %666 = vst [vmem:[%s3985_s21 + $0x200] sm:%s2972_s9] %v665_v56  ;;  %668 = vst [vmem:[%s3985_s21 + $0x300] sm:%s2972_s9] %v667_v57 }
  0xd7   : > { %v669_v58 = vld [vmem:[%s3982_s18 + $0x15a0] sm:%s2972_s9]  ;;  %v671_v59 = vld [vmem:[%s3982_s18 + $0x1b08] sm:%s2972_s9] }
  0xd8   : > { %670 = vst [vmem:[%s3985_s21 + $0x400] sm:%s2972_s9] %v669_v58  ;;  %672 = vst [vmem:[%s3985_s21 + $0x500] sm:%s2972_s9] %v671_v59 }
  0xd9   : > { %v673_v60 = vld [vmem:[%s3982_s18 + $0x2070] sm:%s2972_s9] }
  0xda   : > { %674 = vst [vmem:[%s3985_s21 + $0x600] sm:%s2972_s9] %v673_v60 }
  0xdb PF: > { %p2973_p11 = scmp.ge.u32.totalorder %s3711_s30, 8 }
  0xdc   : > { %s3642_s5 = smov (!%p2973_p11), 1  }
  0xdd   : > { %153 = sbr.rel (%p2973_p11) target bundleno = 234 (0xea), region = 40  ;;  %s154_s18 = sshll.u32 (!%p2973_p11), %s3642_s5, %s3711_s30 }
  0xde   : > { %s2974_s21 = sadd.s32 (!%p2973_p11), 4294967295, %s154_s18 }
  0xe2   : > { %v164_v61 = vld [vmem:[%s3709_s28] sm:%s2974_s21]  ;;  %v166_v62 = vld [vmem:[%s3709_s28 + $0x568] sm:%s2974_s21] }
  0xe3   : > { %165 = vst [vmem:[%s3713_s4] sm:%s2974_s21] %v164_v61  ;;  %167 = vst [vmem:[%s3713_s4 + $0x100] sm:%s2974_s21] %v166_v62 }
  0xe4   : > { %v168_v63 = vld [vmem:[%s3709_s28 + $0xad0] sm:%s2974_s21]  ;;  %v170_v0 = vld [vmem:[%s3709_s28 + $0x1038] sm:%s2974_s21] }
  0xe5   : > { %169 = vst [vmem:[%s3713_s4 + $0x200] sm:%s2974_s21] %v168_v63  ;;  %171 = vst [vmem:[%s3713_s4 + $0x300] sm:%s2974_s21] %v170_v0 }
  0xe6   : > { %v172_v1 = vld [vmem:[%s3709_s28 + $0x15a0] sm:%s2974_s21]  ;;  %v174_v2 = vld [vmem:[%s3709_s28 + $0x1b08] sm:%s2974_s21] }
  0xe7   : > { %173 = vst [vmem:[%s3713_s4 + $0x400] sm:%s2974_s21] %v172_v1  ;;  %175 = vst [vmem:[%s3713_s4 + $0x500] sm:%s2974_s21] %v174_v2 }
  0xe8   : > { %v176_v3 = vld [vmem:[%s3709_s28 + $0x2070] sm:%s2974_s21] }
  0xe9   : > { %177 = vst [vmem:[%s3713_s4 + $0x600] sm:%s2974_s21] %v176_v3 }
  0xea PF: > { %p2975_p12 = scmp.ge.s32.totalorder %s3511_s14, 1  ;;  %p677_p13 = scmp.lt.s32.totalorder %s3511_s14, 7 }
  0xec   : > { %p678_p0 = pnand %p2975_p12, %p677_p13 }
  0xed   : > { %s684_s30 = sand.u32 (!%p678_p0), 1, %s3503_s12  }
  0xee   : > { %681 = sbr.rel (%p678_p0) target bundleno = 722 (0x2d2), region = 94  ;;  %s2976_s11 = sshll.u32 (!%p678_p0), %s684_s30, 8 }
  0xef   : > { %s3063_s6 = smul.u32 (!%p678_p0), 1792, %s684_s30  ;;  %s4599_s12 = scalar_lea.vmem (!%p678_p0), [#allocation3], %s2976_s11  }
  0xf1   : > { %s4282_s14 = scalar_lea.vmem (!%p678_p0), [#allocation2], %s3063_s6 }
  0xf3   : > { %v3643_v4 = vmov 0.0   ;;  %v941_v5 = vld [vmem:[%s5085_s2] sm:$0xff]  ;;  %vm951_vm0 = vcmask 1040384   ;;  %v3644_v6 = vmov 0   ;;  %v910_v7 = vld [vmem:[%s4282_s14 + $0x608] sm:$0x1] }
  0xf4   : > { %1112 = vmatprep.mubr.f32.mxu0 %v3643_v4  ;;  %1183 = vmatprep.mubr.f32.mxu1 %v3643_v4  ;;  %v912_v8 = vld [vmem:[%s4282_s14 + $0x618] sm:$0x1]  ;;  %v909_v9 = vld [vmem:[%s4282_s14 + $0x600] sm:$0x1]  ;;  %v911_v10 = vld [vmem:[%s4282_s14 + $0x610] sm:$0x1] }
  0xf5   : > { %3360 = vset.pattern.permute.xlu0 %v3644_v6  ;;  %2977 = vmatprep.subr.msk.mxu0 %vm951_vm0, %v910_v7  ;;  %v878_v11 = vld [vmem:[%s4282_s14 + $0x508] sm:$0xff]  ;;  %v880_v12 = vld [vmem:[%s4282_s14 + $0x518] sm:$0xff]  ;;  %v877_v13 = vld [vmem:[%s4282_s14 + $0x500] sm:$0xff]  ;;  %vm947_vm1 = vcmask 400384   ;;  %s3026_s29 = sshll.u32 (%p3698_p5), %s3683_s15, 5  ;;  %s3057_s23 = sshll.u32 (%p3698_p5), %s3683_s15, 8 }
  0xf6   : > { %944 = vperm.xlu0 %3360, %v941_v5   ;;  %2980 = vmatprep.subr.msk.mxu1 %vm951_vm0, %v912_v8  ;;  %v879_v14 = vld [vmem:[%s4282_s14 + $0x510] sm:$0xff]  ;;  %v846_v15 = vld [vmem:[%s4282_s14 + $0x408] sm:$0xff]  ;;  %v848_v16 = vld [vmem:[%s4282_s14 + $0x418] sm:$0xff]  ;;  %s2320_s24 = ssub.s32 (%p3698_p5), 173, %s3026_s29  ;;  %s4668_s22 = scalar_lea.vmem (%p3698_p5), %s5086_s3, %s3057_s23  }
  0xf7   : > { %2978 = vmatpush1.msk.msra.mxu0 %vm951_vm0, %v909_v9  ;;  %2981 = vmatpush1.msk.msra.mxu1 %vm951_vm0, %v911_v10  ;;  %v845_v17 = vld [vmem:[%s4282_s14 + $0x400] sm:$0xff]  ;;  %v847_v18 = vld [vmem:[%s4282_s14 + $0x410] sm:$0xff]  ;;  %v814_v19 = vld [vmem:[%s4282_s14 + $0x308] sm:$0xff]  ;;  %p2321_p1 = scmp.lt.s32.totalorder (%p3698_p5), %s2320_s24, 32 }
  0xf8   : > { %1068 = vmatprep.subr.mxu0 %v878_v11  ;;  %1139 = vmatprep.subr.mxu1 %v880_v12  ;;  %v816_v20 = vld [vmem:[%s4282_s14 + $0x318] sm:$0xff]  ;;  %v813_v21 = vld [vmem:[%s4282_s14 + $0x300] sm:$0xff]  ;;  %v815_v22 = vld [vmem:[%s4282_s14 + $0x310] sm:$0xff] }
  0xf9   : > { %1069 = vmatpush1.msra.mxu0 %v877_v13  ;;  %1140 = vmatpush1.msra.mxu1 %v879_v14  ;;  %v782_v23 = vld [vmem:[%s4282_s14 + $0x208] sm:$0xff]  ;;  %v784_v24 = vld [vmem:[%s4282_s14 + $0x218] sm:$0xff]  ;;  %v781_v25 = vld [vmem:[%s4282_s14 + $0x200] sm:$0xff] }
  0xfa   : > { %1070 = vmatprep.subr.mxu0 %v846_v15  ;;  %1141 = vmatprep.subr.mxu1 %v848_v16  ;;  %v783_v26 = vld [vmem:[%s4282_s14 + $0x210] sm:$0xff]  ;;  %v750_v27 = vld [vmem:[%s4282_s14 + $0x108] sm:$0xff]  ;;  %v752_v28 = vld [vmem:[%s4282_s14 + $0x118] sm:$0xff] }
  0xfb   : > { %1071 = vmatpush1.msra.mxu0 %v845_v17  ;;  %1142 = vmatpush1.msra.mxu1 %v847_v18  ;;  %v749_v29 = vld [vmem:[%s4282_s14 + $0x100] sm:$0xff]  ;;  %v751_v30 = vld [vmem:[%s4282_s14 + $0x110] sm:$0xff]  ;;  %v718_v31 = vld [vmem:[%s4282_s14 + $0x8] sm:$0xff] }
  0xfc   : > { %1072 = vmatprep.subr.mxu0 %v814_v19  ;;  %1143 = vmatprep.subr.mxu1 %v816_v20  ;;  %v720_v32 = vld [vmem:[%s4282_s14 + $0x18] sm:$0xff]  ;;  %v717_v33 = vld [vmem:[%s4282_s14] sm:$0xff]  ;;  %v719_v34 = vld [vmem:[%s4282_s14 + $0x10] sm:$0xff] }
  0xfd   : > { %1073 = vmatpush1.msra.mxu0 %v813_v21  ;;  %1144 = vmatpush1.msra.mxu1 %v815_v22  ;;  %v4319_v35 = vld [vmem:[%s5083_s0] sm:$0xff]  ;;  %v914_v36 = vld [vmem:[%s4282_s14 + $0x628] sm:$0x1]  ;;  %v916_v37 = vld [vmem:[%s4282_s14 + $0x638] sm:$0x1] }
  0xfe   : > { %1074 = vmatprep.subr.mxu0 %v782_v23  ;;  %1145 = vmatprep.subr.mxu1 %v784_v24  ;;  %v913_v38 = vld [vmem:[%s4282_s14 + $0x620] sm:$0x1]  ;;  %v915_v39 = vld [vmem:[%s4282_s14 + $0x630] sm:$0x1]  ;;  %v882_v40 = vld [vmem:[%s4282_s14 + $0x528] sm:$0xff] }
  0xff   : > { %1075 = vmatpush1.msra.mxu0 %v781_v25  ;;  %1146 = vmatpush1.msra.mxu1 %v783_v26  ;;  %v884_v41 = vld [vmem:[%s4282_s14 + $0x538] sm:$0xff]  ;;  %v881_v42 = vld [vmem:[%s4282_s14 + $0x520] sm:$0xff]  ;;  %v883_v43 = vld [vmem:[%s4282_s14 + $0x530] sm:$0xff] }
 0x100   : > { %1076 = vmatprep.subr.mxu0 %v750_v27  ;;  %1147 = vmatprep.subr.mxu1 %v752_v28  ;;  %v850_v44 = vld [vmem:[%s4282_s14 + $0x428] sm:$0xff]  ;;  %v852_v45 = vld [vmem:[%s4282_s14 + $0x438] sm:$0xff]  ;;  %v849_v46 = vld [vmem:[%s4282_s14 + $0x420] sm:$0xff] }
 0x101   : > { %1077 = vmatpush1.msra.mxu0 %v749_v29  ;;  %1148 = vmatpush1.msra.mxu1 %v751_v30  ;;  %v851_v47 = vld [vmem:[%s4282_s14 + $0x430] sm:$0xff]  ;;  %v818_v48 = vld [vmem:[%s4282_s14 + $0x328] sm:$0xff]  ;;  %v820_v49 = vld [vmem:[%s4282_s14 + $0x338] sm:$0xff] }
 0x102   : > { %1078 = vmatprep.subr.mxu0 %v718_v31  ;;  %1149 = vmatprep.subr.mxu1 %v720_v32  ;;  %v817_v50 = vld [vmem:[%s4282_s14 + $0x320] sm:$0xff]  ;;  %v819_v51 = vld [vmem:[%s4282_s14 + $0x330] sm:$0xff]  ;;  %v786_v52 = vld [vmem:[%s4282_s14 + $0x228] sm:$0xff] }
 0x103   : > { %1079 = vmatpush1.msra.mxu0 %v717_v33  ;;  %1150 = vmatpush1.msra.mxu1 %v719_v34  ;;  %v788_v53 = vld [vmem:[%s4282_s14 + $0x238] sm:$0xff]  ;;  %v785_v54 = vld [vmem:[%s4282_s14 + $0x220] sm:$0xff]  ;;  %v787_v55 = vld [vmem:[%s4282_s14 + $0x230] sm:$0xff] }
 0x104   : > { %2979 = vmatmul.mubr.msk.f32.vlgmr.msra.gmra.mxu0 %vm947_vm1, %v4319_v35  ;;  %2982 = vmatmul.mubr.msk.f32.vlgmr.msra.gmra.mxu1 %vm947_vm1, %v4319_v35  ;;  %v754_v56 = vld [vmem:[%s4282_s14 + $0x128] sm:$0xff]  ;;  %v756_v57 = vld [vmem:[%s4282_s14 + $0x138] sm:$0xff]  ;;  %v753_v58 = vld [vmem:[%s4282_s14 + $0x120] sm:$0xff] }
 0x105   : > { %2983 = vmatprep.subr.msk.mxu0 %vm951_vm0, %v914_v36  ;;  %2986 = vmatprep.subr.msk.mxu1 %vm951_vm0, %v916_v37  ;;  %v755_v59 = vld [vmem:[%s4282_s14 + $0x130] sm:$0xff]  ;;  %v722_v60 = vld [vmem:[%s4282_s14 + $0x28] sm:$0xff]  ;;  %v724_v61 = vld [vmem:[%s4282_s14 + $0x38] sm:$0xff] }
 0x106   : > { %2984 = vmatpush1.msk.msra.mxu0 %vm951_vm0, %v913_v38  ;;  %2987 = vmatpush1.msk.msra.mxu1 %vm951_vm0, %v915_v39  ;;  %v721_v62 = vld [vmem:[%s4282_s14 + $0x20] sm:$0xff]  ;;  %v723_v63 = vld [vmem:[%s4282_s14 + $0x30] sm:$0xff]  ;;  %v918_v0 = vld [vmem:[%s4282_s14 + $0x648] sm:$0x1] }
 0x107   : > { %1210 = vmatprep.subr.mxu0 %v882_v40  ;;  %1281 = vmatprep.subr.mxu1 %v884_v41  ;;  %v920_v1 = vld [vmem:[%s4282_s14 + $0x658] sm:$0x1]  ;;  %v917_v2 = vld [vmem:[%s4282_s14 + $0x640] sm:$0x1]  ;;  %v919_v3 = vld [vmem:[%s4282_s14 + $0x650] sm:$0x1] }
 0x108   : > { %1211 = vmatpush1.msra.mxu0 %v881_v42  ;;  %1282 = vmatpush1.msra.mxu1 %v883_v43  ;;  %v886_v5 = vld [vmem:[%s4282_s14 + $0x548] sm:$0xff]  ;;  %v888_v6 = vld [vmem:[%s4282_s14 + $0x558] sm:$0xff]  ;;  %v885_v7 = vld [vmem:[%s4282_s14 + $0x540] sm:$0xff] }
 0x109   : > { %1212 = vmatprep.subr.mxu0 %v850_v44  ;;  %1283 = vmatprep.subr.mxu1 %v852_v45  ;;  %v887_v8 = vld [vmem:[%s4282_s14 + $0x550] sm:$0xff]  ;;  %v854_v9 = vld [vmem:[%s4282_s14 + $0x448] sm:$0xff]  ;;  %v856_v10 = vld [vmem:[%s4282_s14 + $0x458] sm:$0xff] }
 0x10a   : > { %1213 = vmatpush1.msra.mxu0 %v849_v46  ;;  %1284 = vmatpush1.msra.mxu1 %v851_v47  ;;  %v853_v11 = vld [vmem:[%s4282_s14 + $0x440] sm:$0xff]  ;;  %v855_v12 = vld [vmem:[%s4282_s14 + $0x450] sm:$0xff]  ;;  %v822_v13 = vld [vmem:[%s4282_s14 + $0x348] sm:$0xff] }
 0x10b   : > { %1214 = vmatprep.subr.mxu0 %v818_v48  ;;  %1285 = vmatprep.subr.mxu1 %v820_v49  ;;  %v824_v14 = vld [vmem:[%s4282_s14 + $0x358] sm:$0xff]  ;;  %v821_v15 = vld [vmem:[%s4282_s14 + $0x340] sm:$0xff]  ;;  %v823_v16 = vld [vmem:[%s4282_s14 + $0x350] sm:$0xff] }
 0x10c   : > { %1215 = vmatpush1.msra.mxu0 %v817_v50  ;;  %1286 = vmatpush1.msra.mxu1 %v819_v51  ;;  %v790_v17 = vld [vmem:[%s4282_s14 + $0x248] sm:$0xff]  ;;  %v792_v18 = vld [vmem:[%s4282_s14 + $0x258] sm:$0xff]  ;;  %v789_v19 = vld [vmem:[%s4282_s14 + $0x240] sm:$0xff] }
 0x10d   : > { %1216 = vmatprep.subr.mxu0 %v786_v52  ;;  %1287 = vmatprep.subr.mxu1 %v788_v53  ;;  %v791_v20 = vld [vmem:[%s4282_s14 + $0x250] sm:$0xff]  ;;  %v758_v21 = vld [vmem:[%s4282_s14 + $0x148] sm:$0xff]  ;;  %v760_v22 = vld [vmem:[%s4282_s14 + $0x158] sm:$0xff] }
 0x10e   : > { %1217 = vmatpush1.msra.mxu0 %v785_v54  ;;  %1288 = vmatpush1.msra.mxu1 %v787_v55  ;;  %v757_v23 = vld [vmem:[%s4282_s14 + $0x140] sm:$0xff]  ;;  %v759_v24 = vld [vmem:[%s4282_s14 + $0x150] sm:$0xff]  ;;  %v726_v25 = vld [vmem:[%s4282_s14 + $0x48] sm:$0xff] }
 0x10f   : > { %1218 = vmatprep.subr.mxu0 %v754_v56  ;;  %1289 = vmatprep.subr.mxu1 %v756_v57  ;;  %v728_v26 = vld [vmem:[%s4282_s14 + $0x58] sm:$0xff]  ;;  %v725_v27 = vld [vmem:[%s4282_s14 + $0x40] sm:$0xff]  ;;  %v727_v28 = vld [vmem:[%s4282_s14 + $0x50] sm:$0xff] }
 0x110   : > { %1219 = vmatpush1.msra.mxu0 %v753_v58  ;;  %1290 = vmatpush1.msra.mxu1 %v755_v59  ;;  %v922_v29 = vld [vmem:[%s4282_s14 + $0x668] sm:$0x1]  ;;  %v924_v30 = vld [vmem:[%s4282_s14 + $0x678] sm:$0x1]  ;;  %v921_v31 = vld [vmem:[%s4282_s14 + $0x660] sm:$0x1] }
 0x111   : > { %1220 = vmatprep.subr.mxu0 %v722_v60  ;;  %1291 = vmatprep.subr.mxu1 %v724_v61  ;;  %v923_v32 = vld [vmem:[%s4282_s14 + $0x670] sm:$0x1]  ;;  %v890_v33 = vld [vmem:[%s4282_s14 + $0x568] sm:$0xff]  ;;  %v892_v34 = vld [vmem:[%s4282_s14 + $0x578] sm:$0xff] }
 0x112   : > { %1221 = vmatpush1.msra.mxu0 %v721_v62  ;;  %1254 = vmatprep.mubr.f32.mxu0 %v3643_v4  ;;  %v889_v36 = vld [vmem:[%s4282_s14 + $0x560] sm:$0xff]  ;;  %v891_v37 = vld [vmem:[%s4282_s14 + $0x570] sm:$0xff]  ;;  %v858_v38 = vld [vmem:[%s4282_s14 + $0x468] sm:$0xff] }
 0x113   : > { %1292 = vmatpush1.msra.mxu1 %v723_v63  ;;  %1325 = vmatprep.mubr.f32.mxu1 %v3643_v4  ;;  %v860_v39 = vld [vmem:[%s4282_s14 + $0x478] sm:$0xff]  ;;  %v857_v40 = vld [vmem:[%s4282_s14 + $0x460] sm:$0xff]  ;;  %v859_v41 = vld [vmem:[%s4282_s14 + $0x470] sm:$0xff] }
 0x114   : > { %2985 = vmatmul.mubr.msk.f32.vlgmr.msra.gmra.mxu0 %vm947_vm1, %v4319_v35  ;;  %2988 = vmatmul.mubr.msk.f32.vlgmr.msra.gmra.mxu1 %vm947_vm1, %v4319_v35  ;;  %v826_v42 = vld [vmem:[%s4282_s14 + $0x368] sm:$0xff]  ;;  %v828_v43 = vld [vmem:[%s4282_s14 + $0x378] sm:$0xff]  ;;  %v825_v44 = vld [vmem:[%s4282_s14 + $0x360] sm:$0xff] }
 0x115   : > { %2989 = vmatprep.subr.msk.mxu0 %vm951_vm0, %v918_v0  ;;  %2992 = vmatprep.subr.msk.mxu1 %vm951_vm0, %v920_v1  ;;  %v827_v45 = vld [vmem:[%s4282_s14 + $0x370] sm:$0xff]  ;;  %v794_v46 = vld [vmem:[%s4282_s14 + $0x268] sm:$0xff]  ;;  %v796_v47 = vld [vmem:[%s4282_s14 + $0x278] sm:$0xff] }
 0x116   : > { %2990 = vmatpush1.msk.msra.mxu0 %vm951_vm0, %v917_v2  ;;  %2993 = vmatpush1.msk.msra.mxu1 %vm951_vm0, %v919_v3  ;;  %v793_v48 = vld [vmem:[%s4282_s14 + $0x260] sm:$0xff]  ;;  %v795_v49 = vld [vmem:[%s4282_s14 + $0x270] sm:$0xff]  ;;  %v762_v50 = vld [vmem:[%s4282_s14 + $0x168] sm:$0xff] }
 0x117   : > { %1352 = vmatprep.subr.mxu0 %v886_v5  ;;  %1423 = vmatprep.subr.mxu1 %v888_v6  ;;  %v764_v51 = vld [vmem:[%s4282_s14 + $0x178] sm:$0xff]  ;;  %v761_v52 = vld [vmem:[%s4282_s14 + $0x160] sm:$0xff]  ;;  %v763_v53 = vld [vmem:[%s4282_s14 + $0x170] sm:$0xff] }
 0x118   : > { %1353 = vmatpush1.msra.mxu0 %v885_v7  ;;  %1424 = vmatpush1.msra.mxu1 %v887_v8  ;;  %v730_v54 = vld [vmem:[%s4282_s14 + $0x68] sm:$0xff]  ;;  %v732_v55 = vld [vmem:[%s4282_s14 + $0x78] sm:$0xff]  ;;  %v729_v56 = vld [vmem:[%s4282_s14 + $0x60] sm:$0xff] }
 0x119   : > { %1354 = vmatprep.subr.mxu0 %v854_v9  ;;  %1425 = vmatprep.subr.mxu1 %v856_v10  ;;  %v731_v57 = vld [vmem:[%s4282_s14 + $0x70] sm:$0xff]  ;;  %v926_v58 = vld [vmem:[%s4282_s14 + $0x688] sm:$0x1]  ;;  %v928_v59 = vld [vmem:[%s4282_s14 + $0x698] sm:$0x1] }
 0x11a   : > { %1355 = vmatpush1.msra.mxu0 %v853_v11  ;;  %1426 = vmatpush1.msra.mxu1 %v855_v12  ;;  %v925_v60 = vld [vmem:[%s4282_s14 + $0x680] sm:$0x1]  ;;  %v927_v61 = vld [vmem:[%s4282_s14 + $0x690] sm:$0x1]  ;;  %v894_v62 = vld [vmem:[%s4282_s14 + $0x588] sm:$0xff] }
 0x11b   : > { %1356 = vmatprep.subr.mxu0 %v822_v13  ;;  %1427 = vmatprep.subr.mxu1 %v824_v14  ;;  %v896_v63 = vld [vmem:[%s4282_s14 + $0x598] sm:$0xff]  ;;  %v893_v0 = vld [vmem:[%s4282_s14 + $0x580] sm:$0xff]  ;;  %v895_v1 = vld [vmem:[%s4282_s14 + $0x590] sm:$0xff] }
 0x11c   : > { %1357 = vmatpush1.msra.mxu0 %v821_v15  ;;  %1428 = vmatpush1.msra.mxu1 %v823_v16  ;;  %v862_v2 = vld [vmem:[%s4282_s14 + $0x488] sm:$0xff]  ;;  %v864_v3 = vld [vmem:[%s4282_s14 + $0x498] sm:$0xff]  ;;  %v861_v5 = vld [vmem:[%s4282_s14 + $0x480] sm:$0xff] }
 0x11d   : > { %1358 = vmatprep.subr.mxu0 %v790_v17  ;;  %1429 = vmatprep.subr.mxu1 %v792_v18  ;;  %v863_v6 = vld [vmem:[%s4282_s14 + $0x490] sm:$0xff]  ;;  %v830_v7 = vld [vmem:[%s4282_s14 + $0x388] sm:$0xff]  ;;  %v832_v8 = vld [vmem:[%s4282_s14 + $0x398] sm:$0xff] }
 0x11e   : > { %1359 = vmatpush1.msra.mxu0 %v789_v19  ;;  %1430 = vmatpush1.msra.mxu1 %v791_v20  ;;  %v829_v9 = vld [vmem:[%s4282_s14 + $0x380] sm:$0xff]  ;;  %v831_v10 = vld [vmem:[%s4282_s14 + $0x390] sm:$0xff]  ;;  %v798_v11 = vld [vmem:[%s4282_s14 + $0x288] sm:$0xff] }
 0x11f   : > { %1360 = vmatprep.subr.mxu0 %v758_v21  ;;  %1431 = vmatprep.subr.mxu1 %v760_v22  ;;  %v800_v12 = vld [vmem:[%s4282_s14 + $0x298] sm:$0xff]  ;;  %v797_v13 = vld [vmem:[%s4282_s14 + $0x280] sm:$0xff]  ;;  %v799_v14 = vld [vmem:[%s4282_s14 + $0x290] sm:$0xff] }
 0x120   : > { %1361 = vmatpush1.msra.mxu0 %v757_v23  ;;  %1432 = vmatpush1.msra.mxu1 %v759_v24  ;;  %v766_v15 = vld [vmem:[%s4282_s14 + $0x188] sm:$0xff]  ;;  %v768_v16 = vld [vmem:[%s4282_s14 + $0x198] sm:$0xff]  ;;  %v765_v17 = vld [vmem:[%s4282_s14 + $0x180] sm:$0xff] }
 0x121   : > { %1362 = vmatprep.subr.mxu0 %v726_v25  ;;  %1433 = vmatprep.subr.mxu1 %v728_v26  ;;  %v767_v18 = vld [vmem:[%s4282_s14 + $0x190] sm:$0xff]  ;;  %v734_v19 = vld [vmem:[%s4282_s14 + $0x88] sm:$0xff]  ;;  %v736_v20 = vld [vmem:[%s4282_s14 + $0x98] sm:$0xff] }
 0x122   : > { %1363 = vmatpush1.msra.mxu0 %v725_v27  ;;  %1396 = vmatprep.mubr.f32.mxu0 %v3643_v4  ;;  %v733_v21 = vld [vmem:[%s4282_s14 + $0x80] sm:$0xff]  ;;  %v735_v22 = vld [vmem:[%s4282_s14 + $0x90] sm:$0xff]  ;;  %v930_v23 = vld [vmem:[%s4282_s14 + $0x6a8] sm:$0x1] }
 0x123   : > { %1434 = vmatpush1.msra.mxu1 %v727_v28  ;;  %1467 = vmatprep.mubr.f32.mxu1 %v3643_v4  ;;  %v932_v24 = vld [vmem:[%s4282_s14 + $0x6b8] sm:$0x1]  ;;  %v929_v25 = vld [vmem:[%s4282_s14 + $0x6a0] sm:$0x1]  ;;  %v931_v26 = vld [vmem:[%s4282_s14 + $0x6b0] sm:$0x1] }
 0x124   : > { %2991 = vmatmul.mubr.msk.f32.vlgmr.msra.gmra.mxu0 %vm947_vm1, %v4319_v35  ;;  %2994 = vmatmul.mubr.msk.f32.vlgmr.msra.gmra.mxu1 %vm947_vm1, %v4319_v35  ;;  %v898_v27 = vld [vmem:[%s4282_s14 + $0x5a8] sm:$0xff]  ;;  %v900_v28 = vld [vmem:[%s4282_s14 + $0x5b8] sm:$0xff] }
 0x125   : > { %2995 = vmatprep.subr.msk.mxu0 %vm951_vm0, %v922_v29  ;;  %2998 = vmatprep.subr.msk.mxu1 %vm951_vm0, %v924_v30  ;;  %v897_v29 = vld [vmem:[%s4282_s14 + $0x5a0] sm:$0xff]  ;;  %v899_v30 = vld [vmem:[%s4282_s14 + $0x5b0] sm:$0xff] }
 0x126   : > { %2996 = vmatpush1.msk.msra.mxu0 %vm951_vm0, %v921_v31  ;;  %2999 = vmatpush1.msk.msra.mxu1 %vm951_vm0, %v923_v32  ;;  %v866_v31 = vld [vmem:[%s4282_s14 + $0x4a8] sm:$0xff]  ;;  %v868_v32 = vld [vmem:[%s4282_s14 + $0x4b8] sm:$0xff] }
 0x127   : > { %1494 = vmatprep.subr.mxu0 %v890_v33  ;;  %1565 = vmatprep.subr.mxu1 %v892_v34  ;;  %v865_v33 = vld [vmem:[%s4282_s14 + $0x4a0] sm:$0xff]  ;;  %v867_v34 = vld [vmem:[%s4282_s14 + $0x4b0] sm:$0xff] }
 0x128   : > { %1495 = vmatpush1.msra.mxu0 %v889_v36  ;;  %1566 = vmatpush1.msra.mxu1 %v891_v37  ;;  %v834_v36 = vld [vmem:[%s4282_s14 + $0x3a8] sm:$0xff]  ;;  %v836_v37 = vld [vmem:[%s4282_s14 + $0x3b8] sm:$0xff] }
 0x129   : > { %1496 = vmatprep.subr.mxu0 %v858_v38  ;;  %1567 = vmatprep.subr.mxu1 %v860_v39  ;;  %v833_v38 = vld [vmem:[%s4282_s14 + $0x3a0] sm:$0xff]  ;;  %v835_v39 = vld [vmem:[%s4282_s14 + $0x3b0] sm:$0xff] }
 0x12a   : > { %1497 = vmatpush1.msra.mxu0 %v857_v40  ;;  %1568 = vmatpush1.msra.mxu1 %v859_v41  ;;  %v802_v40 = vld [vmem:[%s4282_s14 + $0x2a8] sm:$0xff]  ;;  %v804_v41 = vld [vmem:[%s4282_s14 + $0x2b8] sm:$0xff] }
 0x12b   : > { %1498 = vmatprep.subr.mxu0 %v826_v42  ;;  %1569 = vmatprep.subr.mxu1 %v828_v43  ;;  %v801_v42 = vld [vmem:[%s4282_s14 + $0x2a0] sm:$0xff]  ;;  %v803_v43 = vld [vmem:[%s4282_s14 + $0x2b0] sm:$0xff] }
 0x12c   : > { %1499 = vmatpush1.msra.mxu0 %v825_v44  ;;  %1570 = vmatpush1.msra.mxu1 %v827_v45  ;;  %v770_v44 = vld [vmem:[%s4282_s14 + $0x1a8] sm:$0xff]  ;;  %v772_v45 = vld [vmem:[%s4282_s14 + $0x1b8] sm:$0xff] }
 0x12d   : > { %1500 = vmatprep.subr.mxu0 %v794_v46  ;;  %1571 = vmatprep.subr.mxu1 %v796_v47  ;;  %v769_v46 = vld [vmem:[%s4282_s14 + $0x1a0] sm:$0xff]  ;;  %v771_v47 = vld [vmem:[%s4282_s14 + $0x1b0] sm:$0xff] }
 0x12e   : > { %1501 = vmatpush1.msra.mxu0 %v793_v48  ;;  %1572 = vmatpush1.msra.mxu1 %v795_v49  ;;  %v738_v48 = vld [vmem:[%s4282_s14 + $0xa8] sm:$0xff]  ;;  %v740_v49 = vld [vmem:[%s4282_s14 + $0xb8] sm:$0xff] }
 0x12f   : > { %1502 = vmatprep.subr.mxu0 %v762_v50  ;;  %1573 = vmatprep.subr.mxu1 %v764_v51  ;;  %v737_v50 = vld [vmem:[%s4282_s14 + $0xa0] sm:$0xff]  ;;  %v739_v51 = vld [vmem:[%s4282_s14 + $0xb0] sm:$0xff] }
 0x130   : > { %1503 = vmatpush1.msra.mxu0 %v761_v52  ;;  %1574 = vmatpush1.msra.mxu1 %v763_v53  ;;  %v934_v52 = vld [vmem:[%s4282_s14 + $0x6c8] sm:$0x1]  ;;  %v936_v53 = vld [vmem:[%s4282_s14 + $0x6d8] sm:$0x1] }
 0x131   : > { %1504 = vmatprep.subr.mxu0 %v730_v54  ;;  %1575 = vmatprep.subr.mxu1 %v732_v55  ;;  %v933_v54 = vld [vmem:[%s4282_s14 + $0x6c0] sm:$0x1]  ;;  %v935_v55 = vld [vmem:[%s4282_s14 + $0x6d0] sm:$0x1] }
 0x132   : > { %1505 = vmatpush1.msra.mxu0 %v729_v56  ;;  %1538 = vmatprep.mubr.f32.mxu0 %v3643_v4  ;;  %v902_v56 = vld [vmem:[%s4282_s14 + $0x5c8] sm:$0xff] }
 0x133   : > { %1576 = vmatpush1.msra.mxu1 %v731_v57  ;;  %1609 = vmatprep.mubr.f32.mxu1 %v3643_v4  ;;  %v904_v57 = vld [vmem:[%s4282_s14 + $0x5d8] sm:$0xff] }
 0x134   : > { %2997 = vmatmul.mubr.msk.f32.vlgmr.msra.gmra.mxu0 %vm947_vm1, %v4319_v35  ;;  %3000 = vmatmul.mubr.msk.f32.vlgmr.msra.gmra.mxu1 %vm947_vm1, %v4319_v35 }
 0x135   : > { %3001 = vmatprep.subr.msk.mxu0 %vm951_vm0, %v926_v58  ;;  %3004 = vmatprep.subr.msk.mxu1 %vm951_vm0, %v928_v59  ;;  %v901_v58 = vld [vmem:[%s4282_s14 + $0x5c0] sm:$0xff]  ;;  %v903_v59 = vld [vmem:[%s4282_s14 + $0x5d0] sm:$0xff] }
 0x136   : > { %3002 = vmatpush1.msk.msra.mxu0 %vm951_vm0, %v925_v60  ;;  %3005 = vmatpush1.msk.msra.mxu1 %vm951_vm0, %v927_v61  ;;  %v870_v60 = vld [vmem:[%s4282_s14 + $0x4c8] sm:$0xff]  ;;  %v872_v61 = vld [vmem:[%s4282_s14 + $0x4d8] sm:$0xff] }
 0x137   : > { %1636 = vmatprep.subr.mxu0 %v894_v62  ;;  %1707 = vmatprep.subr.mxu1 %v896_v63  ;;  %v869_v62 = vld [vmem:[%s4282_s14 + $0x4c0] sm:$0xff]  ;;  %v871_v63 = vld [vmem:[%s4282_s14 + $0x4d0] sm:$0xff] }
 0x138   : > { %1637 = vmatpush1.msra.mxu0 %v893_v0  ;;  %1708 = vmatpush1.msra.mxu1 %v895_v1  ;;  %v838_v0 = vld [vmem:[%s4282_s14 + $0x3c8] sm:$0xff]  ;;  %v840_v1 = vld [vmem:[%s4282_s14 + $0x3d8] sm:$0xff] }
 0x139   : > { %1638 = vmatprep.subr.mxu0 %v862_v2  ;;  %1709 = vmatprep.subr.mxu1 %v864_v3  ;;  %v837_v2 = vld [vmem:[%s4282_s14 + $0x3c0] sm:$0xff]  ;;  %v839_v3 = vld [vmem:[%s4282_s14 + $0x3d0] sm:$0xff] }
 0x13a   : > { %1639 = vmatpush1.msra.mxu0 %v861_v5  ;;  %1710 = vmatpush1.msra.mxu1 %v863_v6  ;;  %v806_v5 = vld [vmem:[%s4282_s14 + $0x2c8] sm:$0xff]  ;;  %v808_v6 = vld [vmem:[%s4282_s14 + $0x2d8] sm:$0xff] }
 0x13b   : > { %1640 = vmatprep.subr.mxu0 %v830_v7  ;;  %1711 = vmatprep.subr.mxu1 %v832_v8  ;;  %v805_v7 = vld [vmem:[%s4282_s14 + $0x2c0] sm:$0xff]  ;;  %v807_v8 = vld [vmem:[%s4282_s14 + $0x2d0] sm:$0xff] }
 0x13c   : > { %1641 = vmatpush1.msra.mxu0 %v829_v9  ;;  %1712 = vmatpush1.msra.mxu1 %v831_v10  ;;  %v774_v9 = vld [vmem:[%s4282_s14 + $0x1c8] sm:$0xff]  ;;  %v776_v10 = vld [vmem:[%s4282_s14 + $0x1d8] sm:$0xff] }
 0x13d   : > { %1642 = vmatprep.subr.mxu0 %v798_v11  ;;  %1713 = vmatprep.subr.mxu1 %v800_v12  ;;  %v773_v11 = vld [vmem:[%s4282_s14 + $0x1c0] sm:$0xff]  ;;  %v775_v12 = vld [vmem:[%s4282_s14 + $0x1d0] sm:$0xff] }
 0x13e   : > { %1643 = vmatpush1.msra.mxu0 %v797_v13  ;;  %1714 = vmatpush1.msra.mxu1 %v799_v14  ;;  %v742_v13 = vld [vmem:[%s4282_s14 + $0xc8] sm:$0xff]  ;;  %v744_v14 = vld [vmem:[%s4282_s14 + $0xd8] sm:$0xff] }
 0x13f   : > { %1644 = vmatprep.subr.mxu0 %v766_v15  ;;  %1715 = vmatprep.subr.mxu1 %v768_v16  ;;  %v741_v15 = vld [vmem:[%s4282_s14 + $0xc0] sm:$0xff]  ;;  %v743_v16 = vld [vmem:[%s4282_s14 + $0xd0] sm:$0xff] }
 0x140   : > { %1645 = vmatpush1.msra.mxu0 %v765_v17  ;;  %1716 = vmatpush1.msra.mxu1 %v767_v18  ;;  %v938_v17 = vld [vmem:[%s4282_s14 + $0x6e8] sm:$0x1]  ;;  %v940_v18 = vld [vmem:[%s4282_s14 + $0x6f8] sm:$0x1] }
 0x141   : > { %1646 = vmatprep.subr.mxu0 %v734_v19  ;;  %1717 = vmatprep.subr.mxu1 %v736_v20  ;;  %v937_v19 = vld [vmem:[%s4282_s14 + $0x6e0] sm:$0x1]  ;;  %v939_v20 = vld [vmem:[%s4282_s14 + $0x6f0] sm:$0x1] }
 0x142   : > { %1647 = vmatpush1.msra.mxu0 %v733_v21  ;;  %1680 = vmatprep.mubr.f32.mxu0 %v3643_v4  ;;  %v906_v21 = vld [vmem:[%s4282_s14 + $0x5e8] sm:$0xff] }
 0x143   : > { %1718 = vmatpush1.msra.mxu1 %v735_v22  ;;  %1751 = vmatprep.mubr.f32.mxu1 %v3643_v4  ;;  %v908_v22 = vld [vmem:[%s4282_s14 + $0x5f8] sm:$0xff] }
 0x144   : > { %3003 = vmatmul.mubr.msk.f32.vlgmr.msra.gmra.mxu0 %vm947_vm1, %v4319_v35  ;;  %3006 = vmatmul.mubr.msk.f32.vlgmr.msra.gmra.mxu1 %vm947_vm1, %v4319_v35 }
 0x145   : > { %3007 = vmatprep.subr.msk.mxu0 %vm951_vm0, %v930_v23  ;;  %3010 = vmatprep.subr.msk.mxu1 %vm951_vm0, %v932_v24  ;;  %v905_v23 = vld [vmem:[%s4282_s14 + $0x5e0] sm:$0xff]  ;;  %v907_v24 = vld [vmem:[%s4282_s14 + $0x5f0] sm:$0xff] }
 0x146   : > { %3008 = vmatpush1.msk.msra.mxu0 %vm951_vm0, %v929_v25  ;;  %3011 = vmatpush1.msk.msra.mxu1 %vm951_vm0, %v931_v26  ;;  %v874_v25 = vld [vmem:[%s4282_s14 + $0x4e8] sm:$0xff]  ;;  %v876_v26 = vld [vmem:[%s4282_s14 + $0x4f8] sm:$0xff] }
 0x147   : > { %1778 = vmatprep.subr.mxu0 %v898_v27  ;;  %1849 = vmatprep.subr.mxu1 %v900_v28  ;;  %v873_v27 = vld [vmem:[%s4282_s14 + $0x4e0] sm:$0xff]  ;;  %v875_v28 = vld [vmem:[%s4282_s14 + $0x4f0] sm:$0xff] }
 0x148   : > { %1779 = vmatpush1.msra.mxu0 %v897_v29  ;;  %1850 = vmatpush1.msra.mxu1 %v899_v30  ;;  %v842_v29 = vld [vmem:[%s4282_s14 + $0x3e8] sm:$0xff]  ;;  %v844_v30 = vld [vmem:[%s4282_s14 + $0x3f8] sm:$0xff] }
 0x149   : > { %1780 = vmatprep.subr.mxu0 %v866_v31  ;;  %1851 = vmatprep.subr.mxu1 %v868_v32  ;;  %v841_v31 = vld [vmem:[%s4282_s14 + $0x3e0] sm:$0xff]  ;;  %v843_v32 = vld [vmem:[%s4282_s14 + $0x3f0] sm:$0xff] }
 0x14a   : > { %1781 = vmatpush1.msra.mxu0 %v865_v33  ;;  %1852 = vmatpush1.msra.mxu1 %v867_v34  ;;  %v810_v33 = vld [vmem:[%s4282_s14 + $0x2e8] sm:$0xff]  ;;  %v812_v34 = vld [vmem:[%s4282_s14 + $0x2f8] sm:$0xff] }
 0x14b   : > { %1782 = vmatprep.subr.mxu0 %v834_v36  ;;  %1853 = vmatprep.subr.mxu1 %v836_v37  ;;  %v809_v36 = vld [vmem:[%s4282_s14 + $0x2e0] sm:$0xff]  ;;  %v811_v37 = vld [vmem:[%s4282_s14 + $0x2f0] sm:$0xff] }
 0x14c   : > { %1783 = vmatpush1.msra.mxu0 %v833_v38  ;;  %1854 = vmatpush1.msra.mxu1 %v835_v39  ;;  %v778_v38 = vld [vmem:[%s4282_s14 + $0x1e8] sm:$0xff]  ;;  %v780_v39 = vld [vmem:[%s4282_s14 + $0x1f8] sm:$0xff] }
 0x14d   : > { %1784 = vmatprep.subr.mxu0 %v802_v40  ;;  %1855 = vmatprep.subr.mxu1 %v804_v41  ;;  %v777_v40 = vld [vmem:[%s4282_s14 + $0x1e0] sm:$0xff]  ;;  %v779_v41 = vld [vmem:[%s4282_s14 + $0x1f0] sm:$0xff] }
 0x14e   : > { %1785 = vmatpush1.msra.mxu0 %v801_v42  ;;  %1856 = vmatpush1.msra.mxu1 %v803_v43  ;;  %v746_v42 = vld [vmem:[%s4282_s14 + $0xe8] sm:$0xff]  ;;  %v748_v43 = vld [vmem:[%s4282_s14 + $0xf8] sm:$0xff] }
 0x14f   : > { %1786 = vmatprep.subr.mxu0 %v770_v44  ;;  %1857 = vmatprep.subr.mxu1 %v772_v45  ;;  %v745_v44 = vld [vmem:[%s4282_s14 + $0xe0] sm:$0xff]  ;;  %v747_v45 = vld [vmem:[%s4282_s14 + $0xf0] sm:$0xff] }
 0x150   : > { %1787 = vmatpush1.msra.mxu0 %v769_v46  ;;  %1858 = vmatpush1.msra.mxu1 %v771_v47 }
 0x151   : > { %1788 = vmatprep.subr.mxu0 %v738_v48  ;;  %1859 = vmatprep.subr.mxu1 %v740_v49 }
 0x152   : > { %1789 = vmatpush1.msra.mxu0 %v737_v50  ;;  %1822 = vmatprep.mubr.f32.mxu0 %v3643_v4 }
 0x153   : > { %1860 = vmatpush1.msra.mxu1 %v739_v51  ;;  %1893 = vmatprep.mubr.f32.mxu1 %v3643_v4 }
 0x154   : > { %3009 = vmatmul.mubr.msk.f32.vlgmr.msra.gmra.mxu0 %vm947_vm1, %v4319_v35  ;;  %3012 = vmatmul.mubr.msk.f32.vlgmr.msra.gmra.mxu1 %vm947_vm1, %v4319_v35 }
 0x155   : > { %3013 = vmatprep.subr.msk.mxu0 %vm951_vm0, %v934_v52  ;;  %3016 = vmatprep.subr.msk.mxu1 %vm951_vm0, %v936_v53 }
 0x156   : > { %3014 = vmatpush1.msk.msra.mxu0 %vm951_vm0, %v933_v54  ;;  %3017 = vmatpush1.msk.msra.mxu1 %vm951_vm0, %v935_v55 }
 0x157   : > { %1920 = vmatprep.subr.mxu0 %v902_v56  ;;  %1991 = vmatprep.subr.mxu1 %v904_v57 }
 0x158   : > { %1921 = vmatpush1.msra.mxu0 %v901_v58  ;;  %1992 = vmatpush1.msra.mxu1 %v903_v59 }
 0x159   : > { %1922 = vmatprep.subr.mxu0 %v870_v60  ;;  %1993 = vmatprep.subr.mxu1 %v872_v61 }
 0x15a   : > { %1923 = vmatpush1.msra.mxu0 %v869_v62  ;;  %1994 = vmatpush1.msra.mxu1 %v871_v63 }
 0x15b   : > { %1924 = vmatprep.subr.mxu0 %v838_v0  ;;  %1995 = vmatprep.subr.mxu1 %v840_v1 }
 0x15c   : > { %1925 = vmatpush1.msra.mxu0 %v837_v2  ;;  %1996 = vmatpush1.msra.mxu1 %v839_v3 }
 0x15d   : > { %1926 = vmatprep.subr.mxu0 %v806_v5  ;;  %1997 = vmatprep.subr.mxu1 %v808_v6 }
 0x15e   : > { %1927 = vmatpush1.msra.mxu0 %v805_v7  ;;  %1998 = vmatpush1.msra.mxu1 %v807_v8 }
 0x15f   : > { %1928 = vmatprep.subr.mxu0 %v774_v9  ;;  %1999 = vmatprep.subr.mxu1 %v776_v10 }
 0x160   : > { %1929 = vmatpush1.msra.mxu0 %v773_v11  ;;  %2000 = vmatpush1.msra.mxu1 %v775_v12 }
 0x161   : > { %1930 = vmatprep.subr.mxu0 %v742_v13  ;;  %2001 = vmatprep.subr.mxu1 %v744_v14 }
 0x162   : > { %1931 = vmatpush1.msra.mxu0 %v741_v15  ;;  %1964 = vmatprep.mubr.f32.mxu0 %v3643_v4 }
 0x163   : > { %2002 = vmatpush1.msra.mxu1 %v743_v16  ;;  %2035 = vmatprep.mubr.f32.mxu1 %v3643_v4 }
 0x164   : > { %3015 = vmatmul.mubr.msk.f32.vlgmr.msra.gmra.mxu0 %vm947_vm1, %v4319_v35  ;;  %3018 = vmatmul.mubr.msk.f32.vlgmr.msra.gmra.mxu1 %vm947_vm1, %v4319_v35 }
 0x165   : > { %3019 = vmatprep.subr.msk.mxu0 %vm951_vm0, %v938_v17  ;;  %3022 = vmatprep.subr.msk.mxu1 %vm951_vm0, %v940_v18 }
 0x166   : > { %3020 = vmatpush1.msk.msra.mxu0 %vm951_vm0, %v937_v19  ;;  %3023 = vmatpush1.msk.msra.mxu1 %vm951_vm0, %v939_v20 }
 0x167   : > { %2062 = vmatprep.subr.mxu0 %v906_v21  ;;  %2133 = vmatprep.subr.mxu1 %v908_v22 }
 0x168   : > { %2063 = vmatpush1.msra.mxu0 %v905_v23  ;;  %2134 = vmatpush1.msra.mxu1 %v907_v24 }
 0x169   : > { %2064 = vmatprep.subr.mxu0 %v874_v25  ;;  %2135 = vmatprep.subr.mxu1 %v876_v26 }
 0x16a   : > { %2065 = vmatpush1.msra.mxu0 %v873_v27  ;;  %2136 = vmatpush1.msra.mxu1 %v875_v28 }
 0x16b   : > { %2066 = vmatprep.subr.mxu0 %v842_v29  ;;  %2137 = vmatprep.subr.mxu1 %v844_v30 }
 0x16c   : > { %2067 = vmatpush1.msra.mxu0 %v841_v31  ;;  %2138 = vmatpush1.msra.mxu1 %v843_v32 }
 0x16d   : > { %2068 = vmatprep.subr.mxu0 %v810_v33  ;;  %2139 = vmatprep.subr.mxu1 %v812_v34 }
 0x16e   : > { %2069 = vmatpush1.msra.mxu0 %v809_v36  ;;  %2140 = vmatpush1.msra.mxu1 %v811_v37 }
 0x16f   : > { %2070 = vmatprep.subr.mxu0 %v778_v38  ;;  %2141 = vmatprep.subr.mxu1 %v780_v39 }
 0x170   : > { %2071 = vmatpush1.msra.mxu0 %v777_v40  ;;  %2142 = vmatpush1.msra.mxu1 %v779_v41 }
 0x171   : > { %2072 = vmatprep.subr.mxu0 %v746_v42  ;;  %2143 = vmatprep.subr.mxu1 %v748_v43  ;;  %v4591_v46 = vpop.permute.xlu0 %944 }
 0x172   : > { %2073 = vmatpush1.msra.mxu0 %v745_v44  ;;  %2106 = vmatprep.mubr.f32.mxu0 %v3643_v4 }
 0x173   : > { %2144 = vmatpush1.msra.mxu1 %v747_v45  ;;  %2177 = vmatprep.mubr.f32.mxu1 %v3643_v4 }
 0x174   : > { %3021 = vmatmul.mubr.msk.f32.vlgmr.msra.gmra.mxu0 %vm947_vm1, %v4319_v35  ;;  %3024 = vmatmul.mubr.msk.f32.vlgmr.msra.gmra.mxu1 %vm947_vm1, %v4319_v35 }
 0x1c4   : > { %v1114_v47 = vpop.f32.mrf.mxu0  ;;  %v1185_v48 = vpop.f32.mrf.mxu1 }
 0x1c5   : > { %v1115_v49 = vadd.f32 %v1114_v47, %v4591_v46  ;;  %v1186_v50 = vadd.f32 %v1185_v48, %v4591_v46 }
 0x1c6   : > { %v1116_v51 = vpop.f32.mrf.mxu0  ;;  %v1187_v52 = vpop.f32.mrf.mxu1 }
 0x1c7   : > { %vm2184_vm2 = vcmp.gt.f32.partialorder %v1115_v49, 0.0  ;;  %v2216_v4 = vmul.f32 0.01, %v1115_v49  ;;  %vm2186_vm3 = vcmp.gt.f32.partialorder %v1186_v50, 0.0  ;;  %v2218_v53 = vmul.f32 0.01, %v1186_v50 }
 0x1c8   : > { %v1117_v54 = vadd.f32 %v1116_v51, %v4591_v46  ;;  %v1188_v35 = vadd.f32 %v1187_v52, %v4591_v46 }
 0x1c9   : > { %v2248_v55 = vsel %vm2184_vm2, %v1115_v49, %v2216_v4  ;;  %v2250_v56 = vsel %vm2186_vm3, %v1186_v50, %v2218_v53 }
 0x1ca   : > { %2280 = vst [vmem:[%s4599_s12] sm:$0xff] %v2248_v55  ;;  %2282 = vst [vmem:[%s4599_s12 + $0x10] sm:$0xff] %v2250_v56  ;;  %vm2185_vm4 = vcmp.gt.f32.partialorder %v1117_v54, 0.0  ;;  %v2217_v57 = vmul.f32 0.01, %v1117_v54  ;;  %vm2187_vm5 = vcmp.gt.f32.partialorder %v1188_v35, 0.0 }
 0x1cb   : > { %v2219_v58 = vmul.f32 0.01, %v1188_v35 }
 0x1cc   : > { %v2249_v59 = vsel %vm2185_vm4, %v1117_v54, %v2217_v57 }
 0x1cd   : > { %v2251_v60 = vsel %vm2187_vm5, %v1188_v35, %v2219_v58  ;;  %2281 = vst [vmem:[%s4599_s12 + $0x8] sm:$0xff] %v2249_v59 }
 0x1ce   : > { %2283 = vst [vmem:[%s4599_s12 + $0x18] sm:$0xff] %v2251_v60 }
 0x1d4   : > { %v1256_v61 = vpop.f32.mrf.mxu0  ;;  %v1327_v62 = vpop.f32.mrf.mxu1 }
 0x1d5   : > { %v1257_v63 = vadd.f32 %v1256_v61, %v4591_v46  ;;  %v1328_v0 = vadd.f32 %v1327_v62, %v4591_v46 }
 0x1d6   : > { %v1258_v1 = vpop.f32.mrf.mxu0  ;;  %v1329_v2 = vpop.f32.mrf.mxu1 }
 0x1d7   : > { %vm2188_vm6 = vcmp.gt.f32.partialorder %v1257_v63, 0.0  ;;  %v2220_v3 = vmul.f32 0.01, %v1257_v63  ;;  %vm2190_vm7 = vcmp.gt.f32.partialorder %v1328_v0, 0.0  ;;  %v2222_v5 = vmul.f32 0.01, %v1328_v0 }
 0x1d8   : > { %v1259_v6 = vadd.f32 %v1258_v1, %v4591_v46  ;;  %v1330_v7 = vadd.f32 %v1329_v2, %v4591_v46 }
 0x1d9   : > { %v2252_v8 = vsel %vm2188_vm6, %v1257_v63, %v2220_v3  ;;  %v2254_v9 = vsel %vm2190_vm7, %v1328_v0, %v2222_v5 }
 0x1da   : > { %2284 = vst [vmem:[%s4599_s12 + $0x20] sm:$0xff] %v2252_v8  ;;  %2286 = vst [vmem:[%s4599_s12 + $0x30] sm:$0xff] %v2254_v9  ;;  %vm2189_vm8 = vcmp.gt.f32.partialorder %v1259_v6, 0.0  ;;  %v2221_v10 = vmul.f32 0.01, %v1259_v6  ;;  %vm2191_vm9 = vcmp.gt.f32.partialorder %v1330_v7, 0.0 }
 0x1db   : > { %v2223_v11 = vmul.f32 0.01, %v1330_v7 }
 0x1dc   : > { %v2253_v12 = vsel %vm2189_vm8, %v1259_v6, %v2221_v10 }
 0x1dd   : > { %v2255_v13 = vsel %vm2191_vm9, %v1330_v7, %v2223_v11  ;;  %2285 = vst [vmem:[%s4599_s12 + $0x28] sm:$0xff] %v2253_v12 }
 0x1de   : > { %2287 = vst [vmem:[%s4599_s12 + $0x38] sm:$0xff] %v2255_v13 }
 0x1e4   : > { %v1398_v14 = vpop.f32.mrf.mxu0  ;;  %v1469_v15 = vpop.f32.mrf.mxu1 }
 0x1e5   : > { %v1399_v16 = vadd.f32 %v1398_v14, %v4591_v46  ;;  %v1470_v17 = vadd.f32 %v1469_v15, %v4591_v46 }
 0x1e6   : > { %v1400_v18 = vpop.f32.mrf.mxu0  ;;  %v1471_v19 = vpop.f32.mrf.mxu1 }
 0x1e7   : > { %vm2192_vm10 = vcmp.gt.f32.partialorder %v1399_v16, 0.0  ;;  %v2224_v20 = vmul.f32 0.01, %v1399_v16  ;;  %vm2194_vm11 = vcmp.gt.f32.partialorder %v1470_v17, 0.0  ;;  %v2226_v21 = vmul.f32 0.01, %v1470_v17 }
 0x1e8   : > { %v1401_v22 = vadd.f32 %v1400_v18, %v4591_v46  ;;  %v1472_v23 = vadd.f32 %v1471_v19, %v4591_v46 }
 0x1e9   : > { %v2256_v24 = vsel %vm2192_vm10, %v1399_v16, %v2224_v20  ;;  %v2258_v25 = vsel %vm2194_vm11, %v1470_v17, %v2226_v21 }
 0x1ea   : > { %2288 = vst [vmem:[%s4599_s12 + $0x40] sm:$0xff] %v2256_v24  ;;  %2290 = vst [vmem:[%s4599_s12 + $0x50] sm:$0xff] %v2258_v25  ;;  %vm2193_vm12 = vcmp.gt.f32.partialorder %v1401_v22, 0.0  ;;  %v2225_v26 = vmul.f32 0.01, %v1401_v22  ;;  %vm2195_vm13 = vcmp.gt.f32.partialorder %v1472_v23, 0.0 }
 0x1eb   : > { %v2227_v27 = vmul.f32 0.01, %v1472_v23 }
 0x1ec   : > { %v2257_v28 = vsel %vm2193_vm12, %v1401_v22, %v2225_v26 }
 0x1ed   : > { %v2259_v29 = vsel %vm2195_vm13, %v1472_v23, %v2227_v27  ;;  %2289 = vst [vmem:[%s4599_s12 + $0x48] sm:$0xff] %v2257_v28 }
 0x1ee   : > { %2291 = vst [vmem:[%s4599_s12 + $0x58] sm:$0xff] %v2259_v29 }
 0x1f4   : > { %v1540_v30 = vpop.f32.mrf.mxu0  ;;  %v1611_v31 = vpop.f32.mrf.mxu1 }
 0x1f5   : > { %v1541_v32 = vadd.f32 %v1540_v30, %v4591_v46  ;;  %v1612_v33 = vadd.f32 %v1611_v31, %v4591_v46 }
 0x1f6   : > { %v1542_v34 = vpop.f32.mrf.mxu0  ;;  %v1613_v36 = vpop.f32.mrf.mxu1 }
 0x1f7   : > { %vm2196_vm14 = vcmp.gt.f32.partialorder %v1541_v32, 0.0  ;;  %v2228_v37 = vmul.f32 0.01, %v1541_v32  ;;  %vm2198_vm15 = vcmp.gt.f32.partialorder %v1612_v33, 0.0  ;;  %v2230_v38 = vmul.f32 0.01, %v1612_v33 }
 0x1f8   : > { %v1543_v39 = vadd.f32 %v1542_v34, %v4591_v46  ;;  %v1614_v40 = vadd.f32 %v1613_v36, %v4591_v46 }
 0x1f9   : > { %v2260_v41 = vsel %vm2196_vm14, %v1541_v32, %v2228_v37  ;;  %v2262_v42 = vsel %vm2198_vm15, %v1612_v33, %v2230_v38 }
 0x1fa   : > { %2292 = vst [vmem:[%s4599_s12 + $0x60] sm:$0xff] %v2260_v41  ;;  %2294 = vst [vmem:[%s4599_s12 + $0x70] sm:$0xff] %v2262_v42  ;;  %vm2197_vm0 = vcmp.gt.f32.partialorder %v1543_v39, 0.0  ;;  %v2229_v43 = vmul.f32 0.01, %v1543_v39  ;;  %vm2199_vm1 = vcmp.gt.f32.partialorder %v1614_v40, 0.0 }
 0x1fb   : > { %v2231_v44 = vmul.f32 0.01, %v1614_v40 }
 0x1fc   : > { %v2261_v45 = vsel %vm2197_vm0, %v1543_v39, %v2229_v43 }
 0x1fd   : > { %v2263_v47 = vsel %vm2199_vm1, %v1614_v40, %v2231_v44  ;;  %2293 = vst [vmem:[%s4599_s12 + $0x68] sm:$0xff] %v2261_v45 }
 0x1fe   : > { %2295 = vst [vmem:[%s4599_s12 + $0x78] sm:$0xff] %v2263_v47 }
 0x204   : > { %v1682_v48 = vpop.f32.mrf.mxu0  ;;  %v1753_v49 = vpop.f32.mrf.mxu1 }
 0x205   : > { %v1683_v50 = vadd.f32 %v1682_v48, %v4591_v46  ;;  %v1754_v51 = vadd.f32 %v1753_v49, %v4591_v46 }
 0x206   : > { %v1684_v52 = vpop.f32.mrf.mxu0  ;;  %v1755_v4 = vpop.f32.mrf.mxu1 }
 0x207   : > { %vm2200_vm2 = vcmp.gt.f32.partialorder %v1683_v50, 0.0  ;;  %v2232_v53 = vmul.f32 0.01, %v1683_v50  ;;  %vm2202_vm3 = vcmp.gt.f32.partialorder %v1754_v51, 0.0  ;;  %v2234_v54 = vmul.f32 0.01, %v1754_v51 }
 0x208   : > { %v1685_v35 = vadd.f32 %v1684_v52, %v4591_v46  ;;  %v1756_v55 = vadd.f32 %v1755_v4, %v4591_v46 }
 0x209   : > { %v2264_v56 = vsel %vm2200_vm2, %v1683_v50, %v2232_v53  ;;  %v2266_v57 = vsel %vm2202_vm3, %v1754_v51, %v2234_v54 }
 0x20a   : > { %2296 = vst [vmem:[%s4599_s12 + $0x80] sm:$0xff] %v2264_v56  ;;  %2298 = vst [vmem:[%s4599_s12 + $0x90] sm:$0xff] %v2266_v57  ;;  %vm2201_vm4 = vcmp.gt.f32.partialorder %v1685_v35, 0.0  ;;  %v2233_v58 = vmul.f32 0.01, %v1685_v35  ;;  %vm2203_vm5 = vcmp.gt.f32.partialorder %v1756_v55, 0.0 }
 0x20b   : > { %v2235_v59 = vmul.f32 0.01, %v1756_v55 }
 0x20c   : > { %v2265_v60 = vsel %vm2201_vm4, %v1685_v35, %v2233_v58 }
 0x20d   : > { %v2267_v61 = vsel %vm2203_vm5, %v1756_v55, %v2235_v59  ;;  %2297 = vst [vmem:[%s4599_s12 + $0x88] sm:$0xff] %v2265_v60 }
 0x20e   : > { %2299 = vst [vmem:[%s4599_s12 + $0x98] sm:$0xff] %v2267_v61 }
 0x214   : > { %v1824_v62 = vpop.f32.mrf.mxu0  ;;  %v1895_v63 = vpop.f32.mrf.mxu1 }
 0x215   : > { %v1825_v0 = vadd.f32 %v1824_v62, %v4591_v46  ;;  %v1896_v1 = vadd.f32 %v1895_v63, %v4591_v46 }
 0x216   : > { %v1826_v2 = vpop.f32.mrf.mxu0  ;;  %v1897_v3 = vpop.f32.mrf.mxu1 }
 0x217   : > { %vm2204_vm6 = vcmp.gt.f32.partialorder %v1825_v0, 0.0  ;;  %v2236_v5 = vmul.f32 0.01, %v1825_v0  ;;  %vm2206_vm7 = vcmp.gt.f32.partialorder %v1896_v1, 0.0  ;;  %v2238_v6 = vmul.f32 0.01, %v1896_v1 }
 0x218   : > { %v1827_v7 = vadd.f32 %v1826_v2, %v4591_v46  ;;  %v1898_v8 = vadd.f32 %v1897_v3, %v4591_v46 }
 0x219   : > { %v2268_v9 = vsel %vm2204_vm6, %v1825_v0, %v2236_v5  ;;  %v2270_v10 = vsel %vm2206_vm7, %v1896_v1, %v2238_v6 }
 0x21a   : > { %2300 = vst [vmem:[%s4599_s12 + $0xa0] sm:$0xff] %v2268_v9  ;;  %2302 = vst [vmem:[%s4599_s12 + $0xb0] sm:$0xff] %v2270_v10  ;;  %vm2205_vm8 = vcmp.gt.f32.partialorder %v1827_v7, 0.0  ;;  %v2237_v11 = vmul.f32 0.01, %v1827_v7  ;;  %vm2207_vm9 = vcmp.gt.f32.partialorder %v1898_v8, 0.0 }
 0x21b   : > { %v2239_v12 = vmul.f32 0.01, %v1898_v8 }
 0x21c   : > { %v2269_v13 = vsel %vm2205_vm8, %v1827_v7, %v2237_v11 }
 0x21d   : > { %v2271_v14 = vsel %vm2207_vm9, %v1898_v8, %v2239_v12  ;;  %2301 = vst [vmem:[%s4599_s12 + $0xa8] sm:$0xff] %v2269_v13 }
 0x21e   : > { %2303 = vst [vmem:[%s4599_s12 + $0xb8] sm:$0xff] %v2271_v14 }
 0x224   : > { %v1966_v15 = vpop.f32.mrf.mxu0  ;;  %v2037_v16 = vpop.f32.mrf.mxu1 }
 0x225   : > { %v1967_v17 = vadd.f32 %v1966_v15, %v4591_v46  ;;  %v2038_v18 = vadd.f32 %v2037_v16, %v4591_v46 }
 0x226   : > { %v1968_v19 = vpop.f32.mrf.mxu0  ;;  %v2039_v20 = vpop.f32.mrf.mxu1 }
 0x227   : > { %vm2208_vm10 = vcmp.gt.f32.partialorder %v1967_v17, 0.0  ;;  %v2240_v21 = vmul.f32 0.01, %v1967_v17  ;;  %vm2210_vm11 = vcmp.gt.f32.partialorder %v2038_v18, 0.0  ;;  %v2242_v22 = vmul.f32 0.01, %v2038_v18 }
 0x228   : > { %v1969_v23 = vadd.f32 %v1968_v19, %v4591_v46  ;;  %v2040_v24 = vadd.f32 %v2039_v20, %v4591_v46 }
 0x229   : > { %v2272_v25 = vsel %vm2208_vm10, %v1967_v17, %v2240_v21  ;;  %v2274_v26 = vsel %vm2210_vm11, %v2038_v18, %v2242_v22 }
 0x22a   : > { %2304 = vst [vmem:[%s4599_s12 + $0xc0] sm:$0xff] %v2272_v25  ;;  %2306 = vst [vmem:[%s4599_s12 + $0xd0] sm:$0xff] %v2274_v26  ;;  %vm2209_vm12 = vcmp.gt.f32.partialorder %v1969_v23, 0.0  ;;  %v2241_v27 = vmul.f32 0.01, %v1969_v23  ;;  %vm2211_vm13 = vcmp.gt.f32.partialorder %v2040_v24, 0.0 }
 0x22b   : > { %v2243_v28 = vmul.f32 0.01, %v2040_v24 }
 0x22c   : > { %v2273_v29 = vsel %vm2209_vm12, %v1969_v23, %v2241_v27 }
 0x22d   : > { %v2275_v30 = vsel %vm2211_vm13, %v2040_v24, %v2243_v28  ;;  %2305 = vst [vmem:[%s4599_s12 + $0xc8] sm:$0xff] %v2273_v29 }
 0x22e   : > { %2307 = vst [vmem:[%s4599_s12 + $0xd8] sm:$0xff] %v2275_v30 }
 0x234   : > { %v2108_v31 = vpop.f32.mrf.mxu0  ;;  %v2179_v32 = vpop.f32.mrf.mxu1 }
 0x235   : > { %v2109_v33 = vadd.f32 %v2108_v31, %v4591_v46  ;;  %v2180_v34 = vadd.f32 %v2179_v32, %v4591_v46 }
 0x236   : > { %v2110_v36 = vpop.f32.mrf.mxu0  ;;  %v2181_v37 = vpop.f32.mrf.mxu1 }
 0x237   : > { %vm2212_vm14 = vcmp.gt.f32.partialorder %v2109_v33, 0.0  ;;  %v2244_v38 = vmul.f32 0.01, %v2109_v33  ;;  %vm2214_vm15 = vcmp.gt.f32.partialorder %v2180_v34, 0.0  ;;  %v2246_v39 = vmul.f32 0.01, %v2180_v34 }
 0x238   : > { %v2111_v40 = vadd.f32 %v2110_v36, %v4591_v46  ;;  %v2182_v41 = vadd.f32 %v2181_v37, %v4591_v46 }
 0x239   : > { %v2276_v42 = vsel %vm2212_vm14, %v2109_v33, %v2244_v38  ;;  %v2278_v43 = vsel %vm2214_vm15, %v2180_v34, %v2246_v39 }
 0x23a   : > { %2308 = vst [vmem:[%s4599_s12 + $0xe0] sm:$0xff] %v2276_v42  ;;  %2310 = vst [vmem:[%s4599_s12 + $0xf0] sm:$0xff] %v2278_v43  ;;  %vm2213_vm0 = vcmp.gt.f32.partialorder %v2111_v40, 0.0  ;;  %v2245_v44 = vmul.f32 0.01, %v2111_v40  ;;  %vm2215_vm1 = vcmp.gt.f32.partialorder %v2182_v41, 0.0 }
 0x23b   : > { %v2247_v45 = vmul.f32 0.01, %v2182_v41  ;;  %2318 = sbr.rel (!%p3698_p5) target bundleno = 722 (0x2d2), region = 102 }
 0x23c   : > { %v2277_v47 = vsel %vm2213_vm0, %v2111_v40, %v2245_v44 }
 0x23d   : > { %v2279_v48 = vsel %vm2215_vm1, %v2182_v41, %v2247_v45  ;;  %2309 = vst [vmem:[%s4599_s12 + $0xe8] sm:$0xff] %v2277_v47 }
 0x23e   : > { %2311 = vst [vmem:[%s4599_s12 + $0xf8] sm:$0xff] %v2279_v48 }
 0x240   : > { %s5128_s24 = smov (!%p2321_p1, %s2320_s24), 32 }
 0x241   : > { %s3027_s26 = sshll.u32 %s5128_s24, 7  ;;  %s4670_s27 = sshll.u32 %s5128_s24, 3 }
 0x242   : > { %p3031_p2 = scmp.eq.s32.totalorder %s3027_s26, 0 }
 0x243   : > { %p2331_p3 = scmp.lt.u32.totalorder (!%p3031_p2), %s4670_s27, 8 }
 0x244   : > { %2330 = sbr.rel (%p3031_p2) target bundleno = 722 (0x2d2), region = 106 }
 0x249   : > { %2334 = sbr.rel (%p2331_p3) target bundleno = 713 (0x2c9), region = 110  ;;  %s4674_s20 = sand.u32 (!%p2331_p3), 7, %s4670_s27  }
 0x24a   : > { %p2351_p5 = scmp.eq.s32.totalorder (!%p2331_p3), %s4674_s20, 0  ;;  %p3032_p4 = scmp.ne.s32.totalorder (!%p2331_p3), %s4674_s20, 0 }
 0x24e   : > { %2354 = sbr.rel (%p3032_p4) target bundleno = 649 (0x289), region = 125  ;;  %s2355_s15 = sshrl.u32 (!%p3032_p4), %s4670_s27, 3 }
 0x24f   : > { %s4681_s8 = sshrl.u32 (!%p3032_p4), %s2355_s15, 6 }
 0x250   : > { %p3033_p6 = scmp.le.s32.totalorder (!%p3032_p4), %s4681_s8, 0 }
 0x253   : > { %2879 = sbr.rel (%p3033_p6) target bundleno = 633 (0x279), region = 273  ;;  %s5104_s9 = smov (!%p3033_p6), %s4668_s22 }
 0x254   : > { %s5105_s5 = smov (!%p3033_p6), %s4599_s12  ;;  %s4690_s18 = smov (!%p3033_p6), 0  }
 0x255   : > { %s4692_s21 = smov (!%p3033_p6), 0  }
 0x258 LB: >> { %v2368_v46 = vld [vmem:[%s3583_s5] sm:$0xff]  ;;  %v2370_v49 = vld [vmem:[%s3583_s5 + $0x8] sm:$0xff]  ;;  %v2372_v50 = vld [vmem:[%s3583_s5 + $0x10] sm:$0xff]  ;;  %s2496_s30 = sadd.s32 1, %s3587_s18  ;;  %s2362_s21 = sadd.s32 1, %s3591_s21   ;;  %s3591_s21 = sphi %s4692_s21, %s2362_s21   ;;  %s3587_s18 = sphi %s4690_s18, %s5108_s18   ;;  %s3583_s5 = sphi %s5105_s5, %s5107_s5   ;;  %s3579_s9 = sphi %s5104_s9, %s5106_s9  }
 0x259   : >> { %2369 = vst [vmem:[%s3579_s9] sm:$0xff] %v2368_v46  ;;  %2371 = vst [vmem:[%s3579_s9 + $0x8] sm:$0xff] %v2370_v49  ;;  %v2374_v51 = vld [vmem:[%s3583_s5 + $0x18] sm:$0xff]  ;;  %v2376_v52 = vld [vmem:[%s3583_s5 + $0x20] sm:$0xff]  ;;  %p2497_p7 = scmp.ge.s32.totalorder %s2496_s30, %s4681_s8  ;;  %p2361_p8 = scmp.ge.s32.totalorder %s2362_s21, %s4681_s8 }
 0x25a   : >> { %2373 = vst [vmem:[%s3579_s9 + $0x10] sm:$0xff] %v2372_v50  ;;  %v2378_v4 = vld [vmem:[%s3583_s5 + $0x28] sm:$0xff]  ;;  %2375 = vst [vmem:[%s3579_s9 + $0x18] sm:$0xff] %v2374_v51  ;;  %v2380_v53 = vld [vmem:[%s3583_s5 + $0x30] sm:$0xff] }
 0x25b   : >> { %2377 = vst [vmem:[%s3579_s9 + $0x20] sm:$0xff] %v2376_v52  ;;  %2379 = vst [vmem:[%s3579_s9 + $0x28] sm:$0xff] %v2378_v4  ;;  %v2382_v54 = vld [vmem:[%s3583_s5 + $0x38] sm:$0xff]  ;;  %v2384_v35 = vld [vmem:[%s3583_s5 + $0x40] sm:$0xff]  ;;  %s5130_s30 = smov (%p2497_p7, %s2496_s30), 0 }
 0x25c   : >> { %2381 = vst [vmem:[%s3579_s9 + $0x30] sm:$0xff] %v2380_v53  ;;  %2383 = vst [vmem:[%s3579_s9 + $0x38] sm:$0xff] %v2382_v54  ;;  %v2386_v55 = vld [vmem:[%s3583_s5 + $0x48] sm:$0xff]  ;;  %v2388_v56 = vld [vmem:[%s3583_s5 + $0x50] sm:$0xff]  ;;  %s3034_s6 = sshll.u32 %s5130_s30, 9  ;;  %s5108_s18 = smov %s5130_s30 }
 0x25d   : >> { %2385 = vst [vmem:[%s3579_s9 + $0x40] sm:$0xff] %v2384_v35  ;;  %v2390_v57 = vld [vmem:[%s3583_s5 + $0x58] sm:$0xff]  ;;  %2387 = vst [vmem:[%s3579_s9 + $0x48] sm:$0xff] %v2386_v55  ;;  %v2392_v58 = vld [vmem:[%s3583_s5 + $0x60] sm:$0xff]  ;;  %s4748_s28 = scalar_lea.vmem %s4599_s12, %s3034_s6 [#allocation3]   ;;  %s4751_s4 = scalar_lea.vmem %s4668_s22, %s3034_s6  }
 0x25e   : >> { %2389 = vst [vmem:[%s3579_s9 + $0x50] sm:$0xff] %v2388_v56  ;;  %2391 = vst [vmem:[%s3579_s9 + $0x58] sm:$0xff] %v2390_v57  ;;  %v2394_v59 = vld [vmem:[%s3583_s5 + $0x68] sm:$0xff]  ;;  %v2396_v60 = vld [vmem:[%s3583_s5 + $0x70] sm:$0xff] }
 0x25f   : >> { %2393 = vst [vmem:[%s3579_s9 + $0x60] sm:$0xff] %v2392_v58  ;;  %2395 = vst [vmem:[%s3579_s9 + $0x68] sm:$0xff] %v2394_v59  ;;  %v2398_v61 = vld [vmem:[%s3583_s5 + $0x78] sm:$0xff]  ;;  %v2400_v62 = vld [vmem:[%s3583_s5 + $0x80] sm:$0xff] }
 0x260   : >> { %2397 = vst [vmem:[%s3579_s9 + $0x70] sm:$0xff] %v2396_v60  ;;  %v2402_v63 = vld [vmem:[%s3583_s5 + $0x88] sm:$0xff]  ;;  %2399 = vst [vmem:[%s3579_s9 + $0x78] sm:$0xff] %v2398_v61  ;;  %v2404_v0 = vld [vmem:[%s3583_s5 + $0x90] sm:$0xff] }
 0x261   : >> { %2401 = vst [vmem:[%s3579_s9 + $0x80] sm:$0xff] %v2400_v62  ;;  %2403 = vst [vmem:[%s3579_s9 + $0x88] sm:$0xff] %v2402_v63  ;;  %v2406_v1 = vld [vmem:[%s3583_s5 + $0x98] sm:$0xff]  ;;  %v2408_v2 = vld [vmem:[%s3583_s5 + $0xa0] sm:$0xff] }
 0x262   : >> { %2405 = vst [vmem:[%s3579_s9 + $0x90] sm:$0xff] %v2404_v0  ;;  %2407 = vst [vmem:[%s3579_s9 + $0x98] sm:$0xff] %v2406_v1  ;;  %v2410_v3 = vld [vmem:[%s3583_s5 + $0xa8] sm:$0xff]  ;;  %v2412_v5 = vld [vmem:[%s3583_s5 + $0xb0] sm:$0xff] }
 0x263   : >> { %2409 = vst [vmem:[%s3579_s9 + $0xa0] sm:$0xff] %v2408_v2  ;;  %v2414_v6 = vld [vmem:[%s3583_s5 + $0xb8] sm:$0xff]  ;;  %2411 = vst [vmem:[%s3579_s9 + $0xa8] sm:$0xff] %v2410_v3  ;;  %v2416_v7 = vld [vmem:[%s3583_s5 + $0xc0] sm:$0xff] }
 0x264   : >> { %2413 = vst [vmem:[%s3579_s9 + $0xb0] sm:$0xff] %v2412_v5  ;;  %2415 = vst [vmem:[%s3579_s9 + $0xb8] sm:$0xff] %v2414_v6  ;;  %v2418_v8 = vld [vmem:[%s3583_s5 + $0xc8] sm:$0xff]  ;;  %v2420_v9 = vld [vmem:[%s3583_s5 + $0xd0] sm:$0xff] }
 0x265   : >> { %2417 = vst [vmem:[%s3579_s9 + $0xc0] sm:$0xff] %v2416_v7  ;;  %2419 = vst [vmem:[%s3579_s9 + $0xc8] sm:$0xff] %v2418_v8  ;;  %v2422_v10 = vld [vmem:[%s3583_s5 + $0xd8] sm:$0xff]  ;;  %v2424_v11 = vld [vmem:[%s3583_s5 + $0xe0] sm:$0xff] }
 0x266   : >> { %2421 = vst [vmem:[%s3579_s9 + $0xd0] sm:$0xff] %v2420_v9  ;;  %v2426_v12 = vld [vmem:[%s3583_s5 + $0xe8] sm:$0xff]  ;;  %2423 = vst [vmem:[%s3579_s9 + $0xd8] sm:$0xff] %v2422_v10  ;;  %v2428_v13 = vld [vmem:[%s3583_s5 + $0xf0] sm:$0xff] }
 0x267   : >> { %2425 = vst [vmem:[%s3579_s9 + $0xe0] sm:$0xff] %v2424_v11  ;;  %2427 = vst [vmem:[%s3579_s9 + $0xe8] sm:$0xff] %v2426_v12  ;;  %v2430_v14 = vld [vmem:[%s3583_s5 + $0xf8] sm:$0xff]  ;;  %v2432_v15 = vld [vmem:[%s3583_s5 + $0x100] sm:$0xff] }
 0x268   : >> { %2429 = vst [vmem:[%s3579_s9 + $0xf0] sm:$0xff] %v2428_v13  ;;  %2431 = vst [vmem:[%s3579_s9 + $0xf8] sm:$0xff] %v2430_v14  ;;  %v2434_v16 = vld [vmem:[%s3583_s5 + $0x108] sm:$0xff]  ;;  %v2436_v17 = vld [vmem:[%s3583_s5 + $0x110] sm:$0xff] }
 0x269   : >> { %2433 = vst [vmem:[%s3579_s9 + $0x100] sm:$0xff] %v2432_v15  ;;  %v2438_v18 = vld [vmem:[%s3583_s5 + $0x118] sm:$0xff]  ;;  %2435 = vst [vmem:[%s3579_s9 + $0x108] sm:$0xff] %v2434_v16  ;;  %v2440_v19 = vld [vmem:[%s3583_s5 + $0x120] sm:$0xff] }
 0x26a   : >> { %2437 = vst [vmem:[%s3579_s9 + $0x110] sm:$0xff] %v2436_v17  ;;  %2439 = vst [vmem:[%s3579_s9 + $0x118] sm:$0xff] %v2438_v18  ;;  %v2442_v20 = vld [vmem:[%s3583_s5 + $0x128] sm:$0xff]  ;;  %v2444_v21 = vld [vmem:[%s3583_s5 + $0x130] sm:$0xff] }
 0x26b   : >> { %2441 = vst [vmem:[%s3579_s9 + $0x120] sm:$0xff] %v2440_v19  ;;  %2443 = vst [vmem:[%s3579_s9 + $0x128] sm:$0xff] %v2442_v20  ;;  %v2446_v22 = vld [vmem:[%s3583_s5 + $0x138] sm:$0xff]  ;;  %v2448_v23 = vld [vmem:[%s3583_s5 + $0x140] sm:$0xff] }
 0x26c   : >> { %2445 = vst [vmem:[%s3579_s9 + $0x130] sm:$0xff] %v2444_v21  ;;  %v2450_v24 = vld [vmem:[%s3583_s5 + $0x148] sm:$0xff]  ;;  %2447 = vst [vmem:[%s3579_s9 + $0x138] sm:$0xff] %v2446_v22  ;;  %v2452_v25 = vld [vmem:[%s3583_s5 + $0x150] sm:$0xff] }
 0x26d   : >> { %2449 = vst [vmem:[%s3579_s9 + $0x140] sm:$0xff] %v2448_v23  ;;  %2451 = vst [vmem:[%s3579_s9 + $0x148] sm:$0xff] %v2450_v24  ;;  %v2454_v26 = vld [vmem:[%s3583_s5 + $0x158] sm:$0xff]  ;;  %v2456_v27 = vld [vmem:[%s3583_s5 + $0x160] sm:$0xff] }
 0x26e   : >> { %2453 = vst [vmem:[%s3579_s9 + $0x150] sm:$0xff] %v2452_v25  ;;  %2455 = vst [vmem:[%s3579_s9 + $0x158] sm:$0xff] %v2454_v26  ;;  %v2458_v28 = vld [vmem:[%s3583_s5 + $0x168] sm:$0xff]  ;;  %v2460_v29 = vld [vmem:[%s3583_s5 + $0x170] sm:$0xff] }
 0x26f   : >> { %2457 = vst [vmem:[%s3579_s9 + $0x160] sm:$0xff] %v2456_v27  ;;  %v2462_v30 = vld [vmem:[%s3583_s5 + $0x178] sm:$0xff]  ;;  %2459 = vst [vmem:[%s3579_s9 + $0x168] sm:$0xff] %v2458_v28  ;;  %v2464_v31 = vld [vmem:[%s3583_s5 + $0x180] sm:$0xff] }
 0x270   : >> { %2461 = vst [vmem:[%s3579_s9 + $0x170] sm:$0xff] %v2460_v29  ;;  %2463 = vst [vmem:[%s3579_s9 + $0x178] sm:$0xff] %v2462_v30  ;;  %v2466_v32 = vld [vmem:[%s3583_s5 + $0x188] sm:$0xff]  ;;  %v2468_v33 = vld [vmem:[%s3583_s5 + $0x190] sm:$0xff] }
 0x271   : >> { %2465 = vst [vmem:[%s3579_s9 + $0x180] sm:$0xff] %v2464_v31  ;;  %2467 = vst [vmem:[%s3579_s9 + $0x188] sm:$0xff] %v2466_v32  ;;  %v2470_v34 = vld [vmem:[%s3583_s5 + $0x198] sm:$0xff]  ;;  %v2472_v36 = vld [vmem:[%s3583_s5 + $0x1a0] sm:$0xff] }
 0x272   : >> { %2469 = vst [vmem:[%s3579_s9 + $0x190] sm:$0xff] %v2468_v33  ;;  %v2474_v37 = vld [vmem:[%s3583_s5 + $0x1a8] sm:$0xff]  ;;  %2471 = vst [vmem:[%s3579_s9 + $0x198] sm:$0xff] %v2470_v34  ;;  %v2476_v38 = vld [vmem:[%s3583_s5 + $0x1b0] sm:$0xff] }
 0x273   : >> { %2473 = vst [vmem:[%s3579_s9 + $0x1a0] sm:$0xff] %v2472_v36  ;;  %2475 = vst [vmem:[%s3579_s9 + $0x1a8] sm:$0xff] %v2474_v37  ;;  %v2478_v39 = vld [vmem:[%s3583_s5 + $0x1b8] sm:$0xff]  ;;  %v2480_v40 = vld [vmem:[%s3583_s5 + $0x1c0] sm:$0xff] }
 0x274   : >> { %2477 = vst [vmem:[%s3579_s9 + $0x1b0] sm:$0xff] %v2476_v38  ;;  %2479 = vst [vmem:[%s3579_s9 + $0x1b8] sm:$0xff] %v2478_v39  ;;  %v2482_v41 = vld [vmem:[%s3583_s5 + $0x1c8] sm:$0xff]  ;;  %v2484_v42 = vld [vmem:[%s3583_s5 + $0x1d0] sm:$0xff]  ;;  %2364 = sbr.rel (!%p2361_p8) target bundleno = 600 (0x258), region = 279 }
 0x275   : >> { %2481 = vst [vmem:[%s3579_s9 + $0x1c0] sm:$0xff] %v2480_v40  ;;  %v2486_v43 = vld [vmem:[%s3583_s5 + $0x1d8] sm:$0xff]  ;;  %2483 = vst [vmem:[%s3579_s9 + $0x1c8] sm:$0xff] %v2482_v41  ;;  %v2488_v44 = vld [vmem:[%s3583_s5 + $0x1e0] sm:$0xff] }
 0x276   : >> { %2485 = vst [vmem:[%s3579_s9 + $0x1d0] sm:$0xff] %v2484_v42  ;;  %2487 = vst [vmem:[%s3579_s9 + $0x1d8] sm:$0xff] %v2486_v43  ;;  %v2490_v45 = vld [vmem:[%s3583_s5 + $0x1e8] sm:$0xff]  ;;  %v2492_v47 = vld [vmem:[%s3583_s5 + $0x1f0] sm:$0xff] }
 0x277   : >> { %2489 = vst [vmem:[%s3579_s9 + $0x1e0] sm:$0xff] %v2488_v44  ;;  %2491 = vst [vmem:[%s3579_s9 + $0x1e8] sm:$0xff] %v2490_v45  ;;  %v2494_v48 = vld [vmem:[%s3583_s5 + $0x1f8] sm:$0xff]  ;;  %s5107_s5 = smov %s4748_s28 }
 0x278   : >> { %2493 = vst [vmem:[%s3579_s9 + $0x1f0] sm:$0xff] %v2492_v47  ;;  %2495 = vst [vmem:[%s3579_s9 + $0x1f8] sm:$0xff] %v2494_v48  ;;  %s5106_s9 = smov %s4751_s4 }
 0x279 PF: > { %s4857_s14 = sand.u32 63, %s2355_s15   ;;  %s3058_s7 = sshll.u32 %s4681_s8, 13 }
 0x27a   : > { %s2507_s10 = sshra.s32 %s3058_s7, 4  ;;  %p3039_p9 = scmp.le.s32.totalorder %s4857_s14, 0 }
 0x27b   : > { %s2508_s11 = scalar_lea.vmem %s4599_s12, %s2507_s10 [#allocation3]   ;;  %s2511_s29 = scalar_lea.vmem %s4668_s22, %s2507_s10  }
 0x27c   : > { %2893 = sbr.rel (%p3039_p9) target bundleno = 649 (0x289), region = 284  ;;  %s3593_s23 = smov (!%p3039_p9), %s2511_s29  }
 0x27d   : > { %s3597_s24 = smov (!%p3039_p9), %s2508_s11   ;;  %s3601_s25 = smov (!%p3039_p9), 0  }
 0x27e   : > { %s3605_s17 = smov (!%p3039_p9), 0  }
 0x281 LB: >> { %v2523_v46 = vld [vmem:[%s3599_s24] sm:$0xff]  ;;  %s2525_s26 = sadd.s32 1, %s3603_s25  ;;  %s2517_s17 = sadd.s32 1, %s3607_s17   ;;  %s3607_s17 = sphi %s3605_s17, %s2517_s17   ;;  %s3603_s25 = sphi %s3601_s25, %s3602_s25   ;;  %s3599_s24 = sphi %s3597_s24, %s2530_s24   ;;  %s3595_s23 = sphi %s3593_s23, %s2531_s23  }
 0x282   : >> { %2524 = vst [vmem:[%s3595_s23] sm:$0xff] %v2523_v46  ;;  %p2526_p10 = scmp.ge.s32.totalorder %s2525_s26, %s4857_s14  ;;  %p2516_p11 = scmp.ge.s32.totalorder %s2517_s17, %s4857_s14 }
 0x284   : >> { %s5132_s26 = smov (%p2526_p10, %s2525_s26), 0  ;;  %2519 = sbr.rel (!%p2516_p11) target bundleno = 641 (0x281), region = 290 }
 0x285   : >> { %s3040_s15 = sshll.u32 %s5132_s26, 3  ;;  %s3602_s25 = smov %s5132_s26  }
 0x286   : >> { %s2530_s24 = scalar_lea.vmem %s2508_s11, %s3040_s15 [#allocation3]   ;;  %s2531_s23 = scalar_lea.vmem %s2511_s29, %s3040_s15  }
 0x289 PF: > { %2534 = sbr.rel (%p2351_p5) target bundleno = 713 (0x2c9), region = 143  ;;  %s4869_s8 = ssub.s32 (!%p2351_p5), %s4670_s27, %s4674_s20 }
 0x28a   : > { %s2540_s9 = sshrl.u32 (!%p2351_p5), %s4670_s27, 3  ;;  %s2537_s5 = scalar_lea.vmem (!%p2351_p5), %s4599_s12, %s4869_s8 [#allocation3] }
 0x28b   : > { %s2539_s18 = scalar_lea.vmem (!%p2351_p5), %s4668_s22, %s4869_s8  ;;  %s4878_s21 = sshrl.u32 (!%p2351_p5), %s2540_s9, 6 }
 0x28c   : > { %p3042_p12 = scmp.le.s32.totalorder (!%p2351_p5), %s4878_s21, 0 }
 0x28e   : > { %2907 = sbr.rel (%p3042_p12) target bundleno = 692 (0x2b4), region = 295  ;;  %s5109_s30 = smov (!%p3042_p12), %s4668_s22 }
 0x28f   : > { %s5110_s6 = smov (!%p3042_p12), %s4599_s12  ;;  %s4887_s28 = smov (!%p3042_p12), 0  }
 0x290   : > { %s4889_s4 = smov (!%p3042_p12), 0  }
 0x293 LB: >> { %v2553_v49 = vld [vmem:[%s3615_s6] sm:$0xff]  ;;  %v2555_v50 = vld [vmem:[%s3615_s6 + $0x8] sm:$0xff]  ;;  %v2557_v51 = vld [vmem:[%s3615_s6 + $0x10] sm:$0xff]  ;;  %s2681_s14 = sadd.s32 1, %s3619_s28  ;;  %s2547_s4 = sadd.s32 1, %s3623_s4   ;;  %s3623_s4 = sphi %s4889_s4, %s2547_s4   ;;  %s3619_s28 = sphi %s4887_s28, %s5113_s28   ;;  %s3615_s6 = sphi %s5110_s6, %s5112_s6   ;;  %s3611_s30 = sphi %s5109_s30, %s5111_s30  }
 0x294   : >> { %2554 = vst [vmem:[%s3611_s30] sm:$0xff] %v2553_v49  ;;  %2556 = vst [vmem:[%s3611_s30 + $0x8] sm:$0xff] %v2555_v50  ;;  %v2559_v52 = vld [vmem:[%s3615_s6 + $0x18] sm:$0xff]  ;;  %v2561_v4 = vld [vmem:[%s3615_s6 + $0x20] sm:$0xff]  ;;  %p2682_p13 = scmp.ge.s32.totalorder %s2681_s14, %s4878_s21  ;;  %p2546_p0 = scmp.ge.s32.totalorder %s2547_s4, %s4878_s21 }
 0x295   : >> { %2558 = vst [vmem:[%s3611_s30 + $0x10] sm:$0xff] %v2557_v51  ;;  %v2563_v53 = vld [vmem:[%s3615_s6 + $0x28] sm:$0xff]  ;;  %2560 = vst [vmem:[%s3611_s30 + $0x18] sm:$0xff] %v2559_v52  ;;  %v2565_v54 = vld [vmem:[%s3615_s6 + $0x30] sm:$0xff] }
 0x296   : >> { %2562 = vst [vmem:[%s3611_s30 + $0x20] sm:$0xff] %v2561_v4  ;;  %2564 = vst [vmem:[%s3611_s30 + $0x28] sm:$0xff] %v2563_v53  ;;  %v2567_v35 = vld [vmem:[%s3615_s6 + $0x38] sm:$0xff]  ;;  %v2569_v55 = vld [vmem:[%s3615_s6 + $0x40] sm:$0xff]  ;;  %s5134_s14 = smov (%p2682_p13, %s2681_s14), 0 }
 0x297   : >> { %2566 = vst [vmem:[%s3611_s30 + $0x30] sm:$0xff] %v2565_v54  ;;  %2568 = vst [vmem:[%s3611_s30 + $0x38] sm:$0xff] %v2567_v35  ;;  %v2571_v56 = vld [vmem:[%s3615_s6 + $0x48] sm:$0xff]  ;;  %v2573_v57 = vld [vmem:[%s3615_s6 + $0x50] sm:$0xff]  ;;  %s3043_s7 = sshll.u32 %s5134_s14, 9  ;;  %s5113_s28 = smov %s5134_s14 }
 0x298   : >> { %2570 = vst [vmem:[%s3611_s30 + $0x40] sm:$0xff] %v2569_v55  ;;  %v2575_v58 = vld [vmem:[%s3615_s6 + $0x58] sm:$0xff]  ;;  %2572 = vst [vmem:[%s3611_s30 + $0x48] sm:$0xff] %v2571_v56  ;;  %v2577_v59 = vld [vmem:[%s3615_s6 + $0x60] sm:$0xff]  ;;  %s4945_s10 = scalar_lea.vmem %s4599_s12, %s3043_s7 [#allocation3]   ;;  %s4948_s11 = scalar_lea.vmem %s4668_s22, %s3043_s7  }
 0x299   : >> { %2574 = vst [vmem:[%s3611_s30 + $0x50] sm:$0xff] %v2573_v57  ;;  %2576 = vst [vmem:[%s3611_s30 + $0x58] sm:$0xff] %v2575_v58  ;;  %v2579_v60 = vld [vmem:[%s3615_s6 + $0x68] sm:$0xff]  ;;  %v2581_v61 = vld [vmem:[%s3615_s6 + $0x70] sm:$0xff] }
 0x29a   : >> { %2578 = vst [vmem:[%s3611_s30 + $0x60] sm:$0xff] %v2577_v59  ;;  %2580 = vst [vmem:[%s3611_s30 + $0x68] sm:$0xff] %v2579_v60  ;;  %v2583_v62 = vld [vmem:[%s3615_s6 + $0x78] sm:$0xff]  ;;  %v2585_v63 = vld [vmem:[%s3615_s6 + $0x80] sm:$0xff] }
 0x29b   : >> { %2582 = vst [vmem:[%s3611_s30 + $0x70] sm:$0xff] %v2581_v61  ;;  %v2587_v0 = vld [vmem:[%s3615_s6 + $0x88] sm:$0xff]  ;;  %2584 = vst [vmem:[%s3611_s30 + $0x78] sm:$0xff] %v2583_v62  ;;  %v2589_v1 = vld [vmem:[%s3615_s6 + $0x90] sm:$0xff] }
 0x29c   : >> { %2586 = vst [vmem:[%s3611_s30 + $0x80] sm:$0xff] %v2585_v63  ;;  %2588 = vst [vmem:[%s3611_s30 + $0x88] sm:$0xff] %v2587_v0  ;;  %v2591_v2 = vld [vmem:[%s3615_s6 + $0x98] sm:$0xff]  ;;  %v2593_v3 = vld [vmem:[%s3615_s6 + $0xa0] sm:$0xff] }
 0x29d   : >> { %2590 = vst [vmem:[%s3611_s30 + $0x90] sm:$0xff] %v2589_v1  ;;  %2592 = vst [vmem:[%s3611_s30 + $0x98] sm:$0xff] %v2591_v2  ;;  %v2595_v5 = vld [vmem:[%s3615_s6 + $0xa8] sm:$0xff]  ;;  %v2597_v6 = vld [vmem:[%s3615_s6 + $0xb0] sm:$0xff] }
 0x29e   : >> { %2594 = vst [vmem:[%s3611_s30 + $0xa0] sm:$0xff] %v2593_v3  ;;  %v2599_v7 = vld [vmem:[%s3615_s6 + $0xb8] sm:$0xff]  ;;  %2596 = vst [vmem:[%s3611_s30 + $0xa8] sm:$0xff] %v2595_v5  ;;  %v2601_v8 = vld [vmem:[%s3615_s6 + $0xc0] sm:$0xff] }
 0x29f   : >> { %2598 = vst [vmem:[%s3611_s30 + $0xb0] sm:$0xff] %v2597_v6  ;;  %2600 = vst [vmem:[%s3611_s30 + $0xb8] sm:$0xff] %v2599_v7  ;;  %v2603_v9 = vld [vmem:[%s3615_s6 + $0xc8] sm:$0xff]  ;;  %v2605_v10 = vld [vmem:[%s3615_s6 + $0xd0] sm:$0xff] }
 0x2a0   : >> { %2602 = vst [vmem:[%s3611_s30 + $0xc0] sm:$0xff] %v2601_v8  ;;  %2604 = vst [vmem:[%s3611_s30 + $0xc8] sm:$0xff] %v2603_v9  ;;  %v2607_v11 = vld [vmem:[%s3615_s6 + $0xd8] sm:$0xff]  ;;  %v2609_v12 = vld [vmem:[%s3615_s6 + $0xe0] sm:$0xff] }
 0x2a1   : >> { %2606 = vst [vmem:[%s3611_s30 + $0xd0] sm:$0xff] %v2605_v10  ;;  %v2611_v13 = vld [vmem:[%s3615_s6 + $0xe8] sm:$0xff]  ;;  %2608 = vst [vmem:[%s3611_s30 + $0xd8] sm:$0xff] %v2607_v11  ;;  %v2613_v14 = vld [vmem:[%s3615_s6 + $0xf0] sm:$0xff] }
 0x2a2   : >> { %2610 = vst [vmem:[%s3611_s30 + $0xe0] sm:$0xff] %v2609_v12  ;;  %2612 = vst [vmem:[%s3611_s30 + $0xe8] sm:$0xff] %v2611_v13  ;;  %v2615_v15 = vld [vmem:[%s3615_s6 + $0xf8] sm:$0xff]  ;;  %v2617_v16 = vld [vmem:[%s3615_s6 + $0x100] sm:$0xff] }
 0x2a3   : >> { %2614 = vst [vmem:[%s3611_s30 + $0xf0] sm:$0xff] %v2613_v14  ;;  %2616 = vst [vmem:[%s3611_s30 + $0xf8] sm:$0xff] %v2615_v15  ;;  %v2619_v17 = vld [vmem:[%s3615_s6 + $0x108] sm:$0xff]  ;;  %v2621_v18 = vld [vmem:[%s3615_s6 + $0x110] sm:$0xff] }
 0x2a4   : >> { %2618 = vst [vmem:[%s3611_s30 + $0x100] sm:$0xff] %v2617_v16  ;;  %v2623_v19 = vld [vmem:[%s3615_s6 + $0x118] sm:$0xff]  ;;  %2620 = vst [vmem:[%s3611_s30 + $0x108] sm:$0xff] %v2619_v17  ;;  %v2625_v20 = vld [vmem:[%s3615_s6 + $0x120] sm:$0xff] }
 0x2a5   : >> { %2622 = vst [vmem:[%s3611_s30 + $0x110] sm:$0xff] %v2621_v18  ;;  %2624 = vst [vmem:[%s3611_s30 + $0x118] sm:$0xff] %v2623_v19  ;;  %v2627_v21 = vld [vmem:[%s3615_s6 + $0x128] sm:$0xff]  ;;  %v2629_v22 = vld [vmem:[%s3615_s6 + $0x130] sm:$0xff] }
 0x2a6   : >> { %2626 = vst [vmem:[%s3611_s30 + $0x120] sm:$0xff] %v2625_v20  ;;  %2628 = vst [vmem:[%s3611_s30 + $0x128] sm:$0xff] %v2627_v21  ;;  %v2631_v23 = vld [vmem:[%s3615_s6 + $0x138] sm:$0xff]  ;;  %v2633_v24 = vld [vmem:[%s3615_s6 + $0x140] sm:$0xff] }
 0x2a7   : >> { %2630 = vst [vmem:[%s3611_s30 + $0x130] sm:$0xff] %v2629_v22  ;;  %v2635_v25 = vld [vmem:[%s3615_s6 + $0x148] sm:$0xff]  ;;  %2632 = vst [vmem:[%s3611_s30 + $0x138] sm:$0xff] %v2631_v23  ;;  %v2637_v26 = vld [vmem:[%s3615_s6 + $0x150] sm:$0xff] }
 0x2a8   : >> { %2634 = vst [vmem:[%s3611_s30 + $0x140] sm:$0xff] %v2633_v24  ;;  %2636 = vst [vmem:[%s3611_s30 + $0x148] sm:$0xff] %v2635_v25  ;;  %v2639_v27 = vld [vmem:[%s3615_s6 + $0x158] sm:$0xff]  ;;  %v2641_v28 = vld [vmem:[%s3615_s6 + $0x160] sm:$0xff] }
 0x2a9   : >> { %2638 = vst [vmem:[%s3611_s30 + $0x150] sm:$0xff] %v2637_v26  ;;  %2640 = vst [vmem:[%s3611_s30 + $0x158] sm:$0xff] %v2639_v27  ;;  %v2643_v29 = vld [vmem:[%s3615_s6 + $0x168] sm:$0xff]  ;;  %v2645_v30 = vld [vmem:[%s3615_s6 + $0x170] sm:$0xff] }
 0x2aa   : >> { %2642 = vst [vmem:[%s3611_s30 + $0x160] sm:$0xff] %v2641_v28  ;;  %v2647_v31 = vld [vmem:[%s3615_s6 + $0x178] sm:$0xff]  ;;  %2644 = vst [vmem:[%s3611_s30 + $0x168] sm:$0xff] %v2643_v29  ;;  %v2649_v32 = vld [vmem:[%s3615_s6 + $0x180] sm:$0xff] }
 0x2ab   : >> { %2646 = vst [vmem:[%s3611_s30 + $0x170] sm:$0xff] %v2645_v30  ;;  %2648 = vst [vmem:[%s3611_s30 + $0x178] sm:$0xff] %v2647_v31  ;;  %v2651_v33 = vld [vmem:[%s3615_s6 + $0x188] sm:$0xff]  ;;  %v2653_v34 = vld [vmem:[%s3615_s6 + $0x190] sm:$0xff] }
 0x2ac   : >> { %2650 = vst [vmem:[%s3611_s30 + $0x180] sm:$0xff] %v2649_v32  ;;  %2652 = vst [vmem:[%s3611_s30 + $0x188] sm:$0xff] %v2651_v33  ;;  %v2655_v36 = vld [vmem:[%s3615_s6 + $0x198] sm:$0xff]  ;;  %v2657_v37 = vld [vmem:[%s3615_s6 + $0x1a0] sm:$0xff] }
 0x2ad   : >> { %2654 = vst [vmem:[%s3611_s30 + $0x190] sm:$0xff] %v2653_v34  ;;  %v2659_v38 = vld [vmem:[%s3615_s6 + $0x1a8] sm:$0xff]  ;;  %2656 = vst [vmem:[%s3611_s30 + $0x198] sm:$0xff] %v2655_v36  ;;  %v2661_v39 = vld [vmem:[%s3615_s6 + $0x1b0] sm:$0xff] }
 0x2ae   : >> { %2658 = vst [vmem:[%s3611_s30 + $0x1a0] sm:$0xff] %v2657_v37  ;;  %2660 = vst [vmem:[%s3611_s30 + $0x1a8] sm:$0xff] %v2659_v38  ;;  %v2663_v40 = vld [vmem:[%s3615_s6 + $0x1b8] sm:$0xff]  ;;  %v2665_v41 = vld [vmem:[%s3615_s6 + $0x1c0] sm:$0xff] }
 0x2af   : >> { %2662 = vst [vmem:[%s3611_s30 + $0x1b0] sm:$0xff] %v2661_v39  ;;  %2664 = vst [vmem:[%s3611_s30 + $0x1b8] sm:$0xff] %v2663_v40  ;;  %v2667_v42 = vld [vmem:[%s3615_s6 + $0x1c8] sm:$0xff]  ;;  %v2669_v43 = vld [vmem:[%s3615_s6 + $0x1d0] sm:$0xff]  ;;  %2549 = sbr.rel (!%p2546_p0) target bundleno = 659 (0x293), region = 301 }
 0x2b0   : >> { %2666 = vst [vmem:[%s3611_s30 + $0x1c0] sm:$0xff] %v2665_v41  ;;  %v2671_v44 = vld [vmem:[%s3615_s6 + $0x1d8] sm:$0xff]  ;;  %2668 = vst [vmem:[%s3611_s30 + $0x1c8] sm:$0xff] %v2667_v42  ;;  %v2673_v45 = vld [vmem:[%s3615_s6 + $0x1e0] sm:$0xff] }
 0x2b1   : >> { %2670 = vst [vmem:[%s3611_s30 + $0x1d0] sm:$0xff] %v2669_v43  ;;  %2672 = vst [vmem:[%s3611_s30 + $0x1d8] sm:$0xff] %v2671_v44  ;;  %v2675_v47 = vld [vmem:[%s3615_s6 + $0x1e8] sm:$0xff]  ;;  %v2677_v48 = vld [vmem:[%s3615_s6 + $0x1f0] sm:$0xff] }
 0x2b2   : >> { %2674 = vst [vmem:[%s3611_s30 + $0x1e0] sm:$0xff] %v2673_v45  ;;  %2676 = vst [vmem:[%s3611_s30 + $0x1e8] sm:$0xff] %v2675_v47  ;;  %v2679_v46 = vld [vmem:[%s3615_s6 + $0x1f8] sm:$0xff]  ;;  %s5112_s6 = smov %s4945_s10 }
 0x2b3   : >> { %2678 = vst [vmem:[%s3611_s30 + $0x1f0] sm:$0xff] %v2677_v48  ;;  %2680 = vst [vmem:[%s3611_s30 + $0x1f8] sm:$0xff] %v2679_v46  ;;  %s5111_s30 = smov %s4948_s11 }
 0x2b4 PF: > { %s5054_s29 = sand.u32 63, %s2540_s9   ;;  %s3060_s23 = sshll.u32 %s4878_s21, 13 }
 0x2b5   : > { %s2692_s24 = sshra.s32 %s3060_s23, 4  ;;  %p3048_p1 = scmp.le.s32.totalorder %s5054_s29, 0 }
 0x2b6   : > { %s2693_s25 = scalar_lea.vmem %s4599_s12, %s2692_s24 [#allocation3]   ;;  %s2696_s17 = scalar_lea.vmem %s4668_s22, %s2692_s24  }
 0x2b7   : > { %2921 = sbr.rel (%p3048_p1) target bundleno = 708 (0x2c4), region = 306  ;;  %s3625_s26 = smov (!%p3048_p1), %s2696_s17  }
 0x2b8   : > { %s3629_s15 = smov (!%p3048_p1), %s2693_s25   ;;  %s3633_s14 = smov (!%p3048_p1), 0  }
 0x2b9   : > { %s3637_s4 = smov (!%p3048_p1), 0  }
 0x2bc LB: >> { %v2708_v49 = vld [vmem:[%s3631_s15] sm:$0xff]  ;;  %s2710_s9 = sadd.s32 1, %s3635_s14  ;;  %s2702_s4 = sadd.s32 1, %s3639_s4   ;;  %s3639_s4 = sphi %s3637_s4, %s2702_s4   ;;  %s3635_s14 = sphi %s3633_s14, %s3634_s14   ;;  %s3631_s15 = sphi %s3629_s15, %s2715_s15   ;;  %s3627_s26 = sphi %s3625_s26, %s2716_s26  }
 0x2bd   : >> { %2709 = vst [vmem:[%s3627_s26] sm:$0xff] %v2708_v49  ;;  %p2711_p2 = scmp.ge.s32.totalorder %s2710_s9, %s5054_s29  ;;  %p2701_p3 = scmp.ge.s32.totalorder %s2702_s4, %s5054_s29 }
 0x2bf   : >> { %s5136_s9 = smov (%p2711_p2, %s2710_s9), 0  ;;  %2704 = sbr.rel (!%p2701_p3) target bundleno = 700 (0x2bc), region = 312 }
 0x2c0   : >> { %s3049_s21 = sshll.u32 %s5136_s9, 3  ;;  %s3634_s14 = smov %s5136_s9  }
 0x2c1   : >> { %s2715_s15 = scalar_lea.vmem %s2693_s25, %s3049_s21 [#allocation3]   ;;  %s2716_s26 = scalar_lea.vmem %s2696_s17, %s3049_s21  }
 0x2c4 PF: > { %s3645_s30 = smov 1  }
 0x2c5   : > { %s2717_s6 = sshll.u32 %s3645_s30, %s4674_s20 }
 0x2c6   : > { %s3051_s28 = sadd.s32 4294967295, %s2717_s6 }
 0x2c7   : > { %v2727_v50 = vld [vmem:[%s2537_s5] sm:%s3051_s28] }
 0x2c8   : > { %2728 = vst [vmem:[%s2539_s18] sm:%s3051_s28] %v2727_v50 }
 0x2c9 PF: > { %p3052_p5 = scmp.ge.u32.totalorder %s4670_s27, 8 }
 0x2ca   : > { %s3646_s7 = smov (!%p3052_p5), 1  }
 0x2cb   : > { %2337 = sbr.rel (%p3052_p5) target bundleno = 722 (0x2d2), region = 114  ;;  %s2338_s10 = sshll.u32 (!%p3052_p5), %s3646_s7, %s4670_s27 }
 0x2cc   : > { %s3053_s11 = sadd.s32 (!%p3052_p5), 4294967295, %s2338_s10 }
 0x2d0   : > { %v2348_v51 = vld [vmem:[%s4599_s12] sm:%s3053_s11] }
 0x2d1   : > { %2349 = vst [vmem:[%s4668_s22] sm:%s3053_s11] %v2348_v51 }
 0x2d2 PF: > { %p10_p4 = scmp.ge.s32.totalorder %s3686_s16, 8   ;;  %s5114_s12 = smov %s3507_s13 }
 0x2d3   : > { %s5115_s13 = smov %s3696_s19  ;;  %s5116_s14 = smov %s3686_s16 }
 0x2d4   :  { %12 = sbr.rel (!%p10_p4) target bundleno = 2 (0x2), region = 323 }

// kernel: convnet_forward.6
= control target key start
LH: loop header
LB: loop body
LE: loop exit
PB: predicated region body
PF: predicated region fallthrough
CT: control target
= control target key end

     0   :  { %s4489_s12 = smov 0   ;;  %s4491_s13 = smov 0   ;;  %s6903_s0 = inlined_call_operand.vmem [shape: f32[16,200], index: 0, kind: input, shape index: {}]   ;;  %s6904_s1 = inlined_call_operand.vmem [shape: f32[200,5202], index: 1, kind: input, shape index: {}]   ;;  %s6905_s2 = inlined_call_operand.vmem [shape: f32[16,1], index: 2, kind: input, shape index: {}]   ;;  %s6906_s3 = inlined_call_operand.vmem [shape: f32[16,5202], index: 3, kind: output, shape index: {}]  }
   0x1   :  { %s4493_s14 = smov 0  }
   0x2 LB: > { %s4505_s15 = sadd.s32 4294967295, %s4334_s14   ;;  %s4508_s16 = sadd.s32 1, %s4334_s14   ;;  %s4334_s14 = sphi %s4493_s14, %s6940_s14   ;;  %s4330_s13 = sphi %s4491_s13, %s6939_s13   ;;  %s4326_s12 = sphi %s4489_s12, %s6938_s12  }
   0x3   : > { %s38_s17 = ssub.s32 %s4334_s14, %s4508_s16  ;;  %s41_s18 = sadd.s32 1, %s4330_s13 }
   0x4   : > { %p39_p0 = scmp.eq.s32.totalorder %s38_s17, 0  ;;  %p48_p1 = scmp.ne.s32.totalorder %s4330_s13, %s4326_s12 }
   0x5   : > { %p49_p2 = scmp.eq.s32.totalorder %s4334_s14, 0  ;;  %p99_p3 = scmp.eq.s32.totalorder %s4505_s15, 1 }
   0x6   : > { %s4518_s19 = scalar_select %p39_p0, %s4330_s13, %s41_s18  }
   0x7   : > { %p50_p4 = por %p49_p2, %p48_p1  ;;  %p4520_p5 = por %p99_p3, %p48_p1 }
   0x8   : > { %p3784_p6 = scmp.ge.s32.totalorder %s4334_s14, 2 }
   0xa   : > { %127 = sbr.rel (%p3784_p6) target bundleno = 274 (0x112), region = 24 }
   0xf   : > { %130 = sbr.rel (!%p50_p4) target bundleno = 274 (0x112), region = 28  ;;  %s132_s21 = sand.u32 (%p50_p4), 1, %s4330_s13  }
  0x10   : > { %s3785_s22 = sshll.u32 (%p50_p4), %s4334_s14, 5  ;;  %s3877_s23 = smul.u32 (%p50_p4), 6400, %s132_s21 }
  0x11   : > { %s136_s24 = ssub.s32 (%p50_p4), 41, %s3785_s22  ;;  %s3871_s25 = sshll.u32 (%p50_p4), %s4334_s14, 8 }
  0x12   : > { %p137_p7 = scmp.lt.s32.totalorder (%p50_p4), %s136_s24, 32  ;;  %s4531_s28 = scalar_lea.vmem (%p50_p4), %s6904_s1, %s3871_s25  }
  0x13   : > { %s4535_s4 = scalar_lea.vmem (%p50_p4), [#allocation2], %s3877_s23  }
  0x14   : > { %s6942_s24 = smov (!%p137_p7, %s136_s24), 32 }
  0x15   : > { %s139_s29 = smul.u32 3200, %s6942_s24  ;;  %s4533_s30 = sshll.u32 %s6942_s24, 3 }
  0x17   : > { %p3789_p8 = scmp.eq.s32.totalorder %s139_s29, 0 }
  0x18   : > { %p147_p9 = scmp.lt.u32.totalorder (!%p3789_p8), %s4533_s30, 8 }
  0x19   : > { %146 = sbr.rel (%p3789_p8) target bundleno = 274 (0x112), region = 32 }
  0x1e   : > { %150 = sbr.rel (%p147_p9) target bundleno = 241 (0xf1), region = 36  ;;  %s4539_s5 = sand.u32 (!%p147_p9), 7, %s4533_s30  }
  0x1f   : > { %p215_p10 = scmp.eq.s32.totalorder (!%p147_p9), %s4539_s5, 0  ;;  %p3790_p11 = scmp.ne.s32.totalorder (!%p147_p9), %s4539_s5, 0 }
  0x23   : > { %218 = sbr.rel (%p3790_p11) target bundleno = 123 (0x7b), region = 51  ;;  %s219_s6 = sshrl.u32 (!%p3790_p11), %s4533_s30, 3 }
  0x24   : > { %4166 = sdivrem.u32 (!%p3790_p11), %s219_s6, 3 }
  0x2d   : > { %s4546_s7 = spop.drf %4166 }
  0x2e   : > { %p3791_p12 = scmp.le.s32.totalorder %s4546_s7, 0 }
  0x2f   : > { %s6908_s8 = smov (!%p3791_p12), %s4535_s4  ;;  %s6909_s9 = smov (!%p3791_p12), %s4531_s28 }
  0x30   : > { %3654 = sbr.rel (%p3791_p12) target bundleno = 92 (0x5c), region = 229  ;;  %s4555_s10 = smov (!%p3791_p12), 0  }
  0x31   : > { %s4557_s11 = smov (!%p3791_p12), 0  }
  0x35 LB: >> { %v233_v0 = vld [vmem:[%s4342_s9] sm:$0xff]  ;;  %v235_v1 = vld [vmem:[%s4342_s9 + $0x8] sm:$0xff]  ;;  %v237_v2 = vld [vmem:[%s4342_s9 + $0x10] sm:$0xff]  ;;  %s383_s17 = sadd.s32 1, %s4346_s10  ;;  %s227_s11 = sadd.s32 1, %s4350_s11   ;;  %s4350_s11 = sphi %s4557_s11, %s227_s11   ;;  %s4346_s10 = sphi %s4555_s10, %s6912_s10   ;;  %s4342_s9 = sphi %s6909_s9, %s6911_s9   ;;  %s4338_s8 = sphi %s6908_s8, %s6910_s8  }
  0x36   : >> { %234 = vst [vmem:[%s4338_s8] sm:$0xff] %v233_v0  ;;  %236 = vst [vmem:[%s4338_s8 + $0x8] sm:$0xff] %v235_v1  ;;  %v239_v3 = vld [vmem:[%s4342_s9 + $0x148] sm:$0xff]  ;;  %v241_v4 = vld [vmem:[%s4342_s9 + $0x150] sm:$0xff]  ;;  %p384_p13 = scmp.ge.s32.totalorder %s383_s17, %s4546_s7  ;;  %p226_p0 = scmp.ge.s32.totalorder %s227_s11, %s4546_s7 }
  0x37   : >> { %238 = vst [vmem:[%s4338_s8 + $0x10] sm:$0xff] %v237_v2  ;;  %v243_v5 = vld [vmem:[%s4342_s9 + $0x158] sm:$0xff]  ;;  %240 = vst [vmem:[%s4338_s8 + $0x100] sm:$0xff] %v239_v3  ;;  %v245_v6 = vld [vmem:[%s4342_s9 + $0x290] sm:$0xff] }
  0x38   : >> { %242 = vst [vmem:[%s4338_s8 + $0x108] sm:$0xff] %v241_v4  ;;  %244 = vst [vmem:[%s4338_s8 + $0x110] sm:$0xff] %v243_v5  ;;  %v247_v7 = vld [vmem:[%s4342_s9 + $0x298] sm:$0xff]  ;;  %v249_v8 = vld [vmem:[%s4342_s9 + $0x2a0] sm:$0xff]  ;;  %s6944_s17 = smov (%p384_p13, %s383_s17), 0 }
  0x39   : >> { %246 = vst [vmem:[%s4338_s8 + $0x200] sm:$0xff] %v245_v6  ;;  %248 = vst [vmem:[%s4338_s8 + $0x208] sm:$0xff] %v247_v7  ;;  %v251_v9 = vld [vmem:[%s4342_s9 + $0x3d8] sm:$0xff]  ;;  %v253_v10 = vld [vmem:[%s4342_s9 + $0x3e0] sm:$0xff]  ;;  %s386_s18 = smul.u32 24, %s6944_s17  ;;  %s6912_s10 = smov %s6944_s17 }
  0x3a   : >> { %250 = vst [vmem:[%s4338_s8 + $0x210] sm:$0xff] %v249_v8  ;;  %v255_v11 = vld [vmem:[%s4342_s9 + $0x3e8] sm:$0xff]  ;;  %252 = vst [vmem:[%s4338_s8 + $0x300] sm:$0xff] %v251_v9  ;;  %v257_v12 = vld [vmem:[%s4342_s9 + $0x520] sm:$0xff] }
  0x3b   : >> { %254 = vst [vmem:[%s4338_s8 + $0x308] sm:$0xff] %v253_v10  ;;  %256 = vst [vmem:[%s4338_s8 + $0x310] sm:$0xff] %v255_v11  ;;  %v259_v13 = vld [vmem:[%s4342_s9 + $0x528] sm:$0xff]  ;;  %v261_v14 = vld [vmem:[%s4342_s9 + $0x530] sm:$0xff]  ;;  %s4619_s21 = scalar_lea.vmem %s4531_s28, %s386_s18   ;;  %s4622_s22 = scalar_lea.vmem %s4535_s4, %s386_s18 [#allocation2]  }
  0x3c   : >> { %258 = vst [vmem:[%s4338_s8 + $0x400] sm:$0xff] %v257_v12  ;;  %260 = vst [vmem:[%s4338_s8 + $0x408] sm:$0xff] %v259_v13  ;;  %v263_v15 = vld [vmem:[%s4342_s9 + $0x668] sm:$0xff]  ;;  %v265_v16 = vld [vmem:[%s4342_s9 + $0x670] sm:$0xff] }
  0x3d   : >> { %262 = vst [vmem:[%s4338_s8 + $0x410] sm:$0xff] %v261_v14  ;;  %v267_v17 = vld [vmem:[%s4342_s9 + $0x678] sm:$0xff]  ;;  %264 = vst [vmem:[%s4338_s8 + $0x500] sm:$0xff] %v263_v15  ;;  %v269_v18 = vld [vmem:[%s4342_s9 + $0x7b0] sm:$0xff] }
  0x3e   : >> { %266 = vst [vmem:[%s4338_s8 + $0x508] sm:$0xff] %v265_v16  ;;  %268 = vst [vmem:[%s4338_s8 + $0x510] sm:$0xff] %v267_v17  ;;  %v271_v19 = vld [vmem:[%s4342_s9 + $0x7b8] sm:$0xff]  ;;  %v273_v20 = vld [vmem:[%s4342_s9 + $0x7c0] sm:$0xff] }
  0x3f   : >> { %270 = vst [vmem:[%s4338_s8 + $0x600] sm:$0xff] %v269_v18  ;;  %272 = vst [vmem:[%s4338_s8 + $0x608] sm:$0xff] %v271_v19  ;;  %v275_v21 = vld [vmem:[%s4342_s9 + $0x8f8] sm:$0xff]  ;;  %v277_v22 = vld [vmem:[%s4342_s9 + $0x900] sm:$0xff] }
  0x40   : >> { %274 = vst [vmem:[%s4338_s8 + $0x610] sm:$0xff] %v273_v20  ;;  %v279_v23 = vld [vmem:[%s4342_s9 + $0x908] sm:$0xff]  ;;  %276 = vst [vmem:[%s4338_s8 + $0x700] sm:$0xff] %v275_v21  ;;  %v281_v24 = vld [vmem:[%s4342_s9 + $0xa40] sm:$0xff] }
  0x41   : >> { %278 = vst [vmem:[%s4338_s8 + $0x708] sm:$0xff] %v277_v22  ;;  %280 = vst [vmem:[%s4338_s8 + $0x710] sm:$0xff] %v279_v23  ;;  %v283_v25 = vld [vmem:[%s4342_s9 + $0xa48] sm:$0xff]  ;;  %v285_v26 = vld [vmem:[%s4342_s9 + $0xa50] sm:$0xff] }
  0x42   : >> { %282 = vst [vmem:[%s4338_s8 + $0x800] sm:$0xff] %v281_v24  ;;  %284 = vst [vmem:[%s4338_s8 + $0x808] sm:$0xff] %v283_v25  ;;  %v287_v27 = vld [vmem:[%s4342_s9 + $0xb88] sm:$0xff]  ;;  %v289_v28 = vld [vmem:[%s4342_s9 + $0xb90] sm:$0xff] }
  0x43   : >> { %286 = vst [vmem:[%s4338_s8 + $0x810] sm:$0xff] %v285_v26  ;;  %v291_v29 = vld [vmem:[%s4342_s9 + $0xb98] sm:$0xff]  ;;  %288 = vst [vmem:[%s4338_s8 + $0x900] sm:$0xff] %v287_v27  ;;  %v293_v30 = vld [vmem:[%s4342_s9 + $0xcd0] sm:$0xff] }
  0x44   : >> { %290 = vst [vmem:[%s4338_s8 + $0x908] sm:$0xff] %v289_v28  ;;  %292 = vst [vmem:[%s4338_s8 + $0x910] sm:$0xff] %v291_v29  ;;  %v295_v31 = vld [vmem:[%s4342_s9 + $0xcd8] sm:$0xff]  ;;  %v297_v32 = vld [vmem:[%s4342_s9 + $0xce0] sm:$0xff] }
  0x45   : >> { %294 = vst [vmem:[%s4338_s8 + $0xa00] sm:$0xff] %v293_v30  ;;  %296 = vst [vmem:[%s4338_s8 + $0xa08] sm:$0xff] %v295_v31  ;;  %v299_v33 = vld [vmem:[%s4342_s9 + $0xe18] sm:$0xff]  ;;  %v301_v34 = vld [vmem:[%s4342_s9 + $0xe20] sm:$0xff] }
  0x46   : >> { %298 = vst [vmem:[%s4338_s8 + $0xa10] sm:$0xff] %v297_v32  ;;  %v303_v35 = vld [vmem:[%s4342_s9 + $0xe28] sm:$0xff]  ;;  %300 = vst [vmem:[%s4338_s8 + $0xb00] sm:$0xff] %v299_v33  ;;  %v305_v36 = vld [vmem:[%s4342_s9 + $0xf60] sm:$0xff] }
  0x47   : >> { %302 = vst [vmem:[%s4338_s8 + $0xb08] sm:$0xff] %v301_v34  ;;  %304 = vst [vmem:[%s4338_s8 + $0xb10] sm:$0xff] %v303_v35  ;;  %v307_v37 = vld [vmem:[%s4342_s9 + $0xf68] sm:$0xff]  ;;  %v309_v38 = vld [vmem:[%s4342_s9 + $0xf70] sm:$0xff] }
  0x48   : >> { %306 = vst [vmem:[%s4338_s8 + $0xc00] sm:$0xff] %v305_v36  ;;  %308 = vst [vmem:[%s4338_s8 + $0xc08] sm:$0xff] %v307_v37  ;;  %v311_v39 = vld [vmem:[%s4342_s9 + $0x10a8] sm:$0xff]  ;;  %v313_v40 = vld [vmem:[%s4342_s9 + $0x10b0] sm:$0xff] }
  0x49   : >> { %310 = vst [vmem:[%s4338_s8 + $0xc10] sm:$0xff] %v309_v38  ;;  %v315_v41 = vld [vmem:[%s4342_s9 + $0x10b8] sm:$0xff]  ;;  %312 = vst [vmem:[%s4338_s8 + $0xd00] sm:$0xff] %v311_v39  ;;  %v317_v42 = vld [vmem:[%s4342_s9 + $0x11f0] sm:$0xff] }
  0x4a   : >> { %314 = vst [vmem:[%s4338_s8 + $0xd08] sm:$0xff] %v313_v40  ;;  %316 = vst [vmem:[%s4338_s8 + $0xd10] sm:$0xff] %v315_v41  ;;  %v319_v43 = vld [vmem:[%s4342_s9 + $0x11f8] sm:$0xff]  ;;  %v321_v44 = vld [vmem:[%s4342_s9 + $0x1200] sm:$0xff] }
  0x4b   : >> { %318 = vst [vmem:[%s4338_s8 + $0xe00] sm:$0xff] %v317_v42  ;;  %320 = vst [vmem:[%s4338_s8 + $0xe08] sm:$0xff] %v319_v43  ;;  %v323_v45 = vld [vmem:[%s4342_s9 + $0x1338] sm:$0xff]  ;;  %v325_v46 = vld [vmem:[%s4342_s9 + $0x1340] sm:$0xff] }
  0x4c   : >> { %322 = vst [vmem:[%s4338_s8 + $0xe10] sm:$0xff] %v321_v44  ;;  %v327_v47 = vld [vmem:[%s4342_s9 + $0x1348] sm:$0xff]  ;;  %324 = vst [vmem:[%s4338_s8 + $0xf00] sm:$0xff] %v323_v45  ;;  %v329_v48 = vld [vmem:[%s4342_s9 + $0x1480] sm:$0xff] }
  0x4d   : >> { %326 = vst [vmem:[%s4338_s8 + $0xf08] sm:$0xff] %v325_v46  ;;  %328 = vst [vmem:[%s4338_s8 + $0xf10] sm:$0xff] %v327_v47  ;;  %v331_v49 = vld [vmem:[%s4342_s9 + $0x1488] sm:$0xff]  ;;  %v333_v50 = vld [vmem:[%s4342_s9 + $0x1490] sm:$0xff] }
  0x4e   : >> { %330 = vst [vmem:[%s4338_s8 + $0x1000] sm:$0xff] %v329_v48  ;;  %332 = vst [vmem:[%s4338_s8 + $0x1008] sm:$0xff] %v331_v49  ;;  %v335_v51 = vld [vmem:[%s4342_s9 + $0x15c8] sm:$0xff]  ;;  %v337_v52 = vld [vmem:[%s4342_s9 + $0x15d0] sm:$0xff] }
  0x4f   : >> { %334 = vst [vmem:[%s4338_s8 + $0x1010] sm:$0xff] %v333_v50  ;;  %v339_v53 = vld [vmem:[%s4342_s9 + $0x15d8] sm:$0xff]  ;;  %336 = vst [vmem:[%s4338_s8 + $0x1100] sm:$0xff] %v335_v51  ;;  %v341_v54 = vld [vmem:[%s4342_s9 + $0x1710] sm:$0xff] }
  0x50   : >> { %338 = vst [vmem:[%s4338_s8 + $0x1108] sm:$0xff] %v337_v52  ;;  %340 = vst [vmem:[%s4338_s8 + $0x1110] sm:$0xff] %v339_v53  ;;  %v343_v55 = vld [vmem:[%s4342_s9 + $0x1718] sm:$0xff]  ;;  %v345_v56 = vld [vmem:[%s4342_s9 + $0x1720] sm:$0xff] }
  0x51   : >> { %342 = vst [vmem:[%s4338_s8 + $0x1200] sm:$0xff] %v341_v54  ;;  %344 = vst [vmem:[%s4338_s8 + $0x1208] sm:$0xff] %v343_v55  ;;  %v347_v57 = vld [vmem:[%s4342_s9 + $0x1858] sm:$0xff]  ;;  %v349_v58 = vld [vmem:[%s4342_s9 + $0x1860] sm:$0xff] }
  0x52   : >> { %346 = vst [vmem:[%s4338_s8 + $0x1210] sm:$0xff] %v345_v56  ;;  %v351_v59 = vld [vmem:[%s4342_s9 + $0x1868] sm:$0xff]  ;;  %348 = vst [vmem:[%s4338_s8 + $0x1300] sm:$0xff] %v347_v57  ;;  %v353_v60 = vld [vmem:[%s4342_s9 + $0x19a0] sm:$0xff] }
  0x53   : >> { %350 = vst [vmem:[%s4338_s8 + $0x1308] sm:$0xff] %v349_v58  ;;  %352 = vst [vmem:[%s4338_s8 + $0x1310] sm:$0xff] %v351_v59  ;;  %v355_v61 = vld [vmem:[%s4342_s9 + $0x19a8] sm:$0xff]  ;;  %v357_v62 = vld [vmem:[%s4342_s9 + $0x19b0] sm:$0xff] }
  0x54   : >> { %354 = vst [vmem:[%s4338_s8 + $0x1400] sm:$0xff] %v353_v60  ;;  %356 = vst [vmem:[%s4338_s8 + $0x1408] sm:$0xff] %v355_v61  ;;  %v359_v63 = vld [vmem:[%s4342_s9 + $0x1ae8] sm:$0xff]  ;;  %v361_v0 = vld [vmem:[%s4342_s9 + $0x1af0] sm:$0xff] }
  0x55   : >> { %358 = vst [vmem:[%s4338_s8 + $0x1410] sm:$0xff] %v357_v62  ;;  %v363_v1 = vld [vmem:[%s4342_s9 + $0x1af8] sm:$0xff]  ;;  %360 = vst [vmem:[%s4338_s8 + $0x1500] sm:$0xff] %v359_v63  ;;  %v365_v2 = vld [vmem:[%s4342_s9 + $0x1c30] sm:$0xff] }
  0x56   : >> { %362 = vst [vmem:[%s4338_s8 + $0x1508] sm:$0xff] %v361_v0  ;;  %364 = vst [vmem:[%s4338_s8 + $0x1510] sm:$0xff] %v363_v1  ;;  %v367_v3 = vld [vmem:[%s4342_s9 + $0x1c38] sm:$0xff]  ;;  %v369_v4 = vld [vmem:[%s4342_s9 + $0x1c40] sm:$0xff] }
  0x57   : >> { %366 = vst [vmem:[%s4338_s8 + $0x1600] sm:$0xff] %v365_v2  ;;  %368 = vst [vmem:[%s4338_s8 + $0x1608] sm:$0xff] %v367_v3  ;;  %v371_v5 = vld [vmem:[%s4342_s9 + $0x1d78] sm:$0xff]  ;;  %v373_v6 = vld [vmem:[%s4342_s9 + $0x1d80] sm:$0xff]  ;;  %229 = sbr.rel (!%p226_p0) target bundleno = 53 (0x35), region = 235 }
  0x58   : >> { %370 = vst [vmem:[%s4338_s8 + $0x1610] sm:$0xff] %v369_v4  ;;  %v375_v7 = vld [vmem:[%s4342_s9 + $0x1d88] sm:$0xff]  ;;  %372 = vst [vmem:[%s4338_s8 + $0x1700] sm:$0xff] %v371_v5  ;;  %v377_v8 = vld [vmem:[%s4342_s9 + $0x1ec0] sm:$0xff] }
  0x59   : >> { %374 = vst [vmem:[%s4338_s8 + $0x1708] sm:$0xff] %v373_v6  ;;  %376 = vst [vmem:[%s4338_s8 + $0x1710] sm:$0xff] %v375_v7  ;;  %v379_v9 = vld [vmem:[%s4342_s9 + $0x1ec8] sm:$0xff]  ;;  %v381_v10 = vld [vmem:[%s4342_s9 + $0x1ed0] sm:$0xff]  ;;  %s6911_s9 = smov %s4619_s21 }
  0x5a   : >> { %378 = vst [vmem:[%s4338_s8 + $0x1800] sm:$0xff] %v377_v8  ;;  %380 = vst [vmem:[%s4338_s8 + $0x1808] sm:$0xff] %v379_v9 }
  0x5b   : >> { %382 = vst [vmem:[%s4338_s8 + $0x1810] sm:$0xff] %v381_v10  ;;  %s6910_s8 = smov %s4622_s22 }
  0x5c PF: > { %4168 = sdivrem.u32 %s219_s6, 3 }
  0x5d   : > { %s3792_s23 = smul.u32 384, %s4546_s7 }
  0x5f   : > { %s394_s24 = sshra.s32 %s3792_s23, 4 }
  0x60   : > { %s4746_s25 = scalar_lea.vmem %s4531_s28, %s394_s24   ;;  %s4749_s26 = scalar_lea.vmem %s4535_s4, %s394_s24 [#allocation2]  }
  0x65   : > { %s4751_s27 = spop.drf %4168 }
  0x66   : > { %p3794_p1 = scmp.le.s32.totalorder %s4751_s27, 0 }
  0x67   : > { %s6913_s29 = smov (!%p3794_p1), %s4749_s26  ;;  %s6914_s8 = smov (!%p3794_p1), %s4746_s25 }
  0x68   : > { %3668 = sbr.rel (%p3794_p1) target bundleno = 123 (0x7b), region = 240  ;;  %s4760_s9 = smov (!%p3794_p1), 0  }
  0x69   : > { %s4762_s6 = smov (!%p3794_p1), 0  }
  0x6d LB: >> { %v410_v11 = vld [vmem:[%s4358_s8] sm:$0xff]  ;;  %v412_v12 = vld [vmem:[%s4358_s8 + $0x148] sm:$0xff]  ;;  %v414_v13 = vld [vmem:[%s4358_s8 + $0x290] sm:$0xff]  ;;  %s460_s7 = sadd.s32 1, %s4362_s9  ;;  %s404_s6 = sadd.s32 1, %s4366_s6   ;;  %s4366_s6 = sphi %s4762_s6, %s404_s6   ;;  %s4362_s9 = sphi %s4760_s9, %s6917_s9   ;;  %s4358_s8 = sphi %s6914_s8, %s6916_s8   ;;  %s4354_s29 = sphi %s6913_s29, %s6915_s29  }
  0x6e   : >> { %411 = vst [vmem:[%s4354_s29] sm:$0xff] %v410_v11  ;;  %413 = vst [vmem:[%s4354_s29 + $0x100] sm:$0xff] %v412_v12  ;;  %v416_v14 = vld [vmem:[%s4358_s8 + $0x3d8] sm:$0xff]  ;;  %v418_v15 = vld [vmem:[%s4358_s8 + $0x520] sm:$0xff]  ;;  %p461_p2 = scmp.ge.s32.totalorder %s460_s7, %s4751_s27  ;;  %p403_p3 = scmp.ge.s32.totalorder %s404_s6, %s4751_s27 }
  0x6f   : >> { %415 = vst [vmem:[%s4354_s29 + $0x200] sm:$0xff] %v414_v13  ;;  %v420_v16 = vld [vmem:[%s4358_s8 + $0x668] sm:$0xff]  ;;  %417 = vst [vmem:[%s4354_s29 + $0x300] sm:$0xff] %v416_v14  ;;  %v422_v17 = vld [vmem:[%s4358_s8 + $0x7b0] sm:$0xff] }
  0x70   : >> { %419 = vst [vmem:[%s4354_s29 + $0x400] sm:$0xff] %v418_v15  ;;  %421 = vst [vmem:[%s4354_s29 + $0x500] sm:$0xff] %v420_v16  ;;  %v424_v18 = vld [vmem:[%s4358_s8 + $0x8f8] sm:$0xff]  ;;  %v426_v19 = vld [vmem:[%s4358_s8 + $0xa40] sm:$0xff]  ;;  %s6946_s7 = smov (%p461_p2, %s460_s7), 0 }
  0x71   : >> { %423 = vst [vmem:[%s4354_s29 + $0x600] sm:$0xff] %v422_v17  ;;  %425 = vst [vmem:[%s4354_s29 + $0x700] sm:$0xff] %v424_v18  ;;  %v428_v20 = vld [vmem:[%s4358_s8 + $0xb88] sm:$0xff]  ;;  %v430_v21 = vld [vmem:[%s4358_s8 + $0xcd0] sm:$0xff]  ;;  %s3795_s10 = sshll.u32 %s6946_s7, 3  ;;  %s6917_s9 = smov %s6946_s7 }
  0x72   : >> { %427 = vst [vmem:[%s4354_s29 + $0x800] sm:$0xff] %v426_v19  ;;  %v432_v22 = vld [vmem:[%s4358_s8 + $0xe18] sm:$0xff]  ;;  %429 = vst [vmem:[%s4354_s29 + $0x900] sm:$0xff] %v428_v20  ;;  %v434_v23 = vld [vmem:[%s4358_s8 + $0xf60] sm:$0xff]  ;;  %s465_s11 = scalar_lea.vmem %s4746_s25, %s3795_s10   ;;  %s466_s17 = scalar_lea.vmem %s4749_s26, %s3795_s10 [#allocation2]  }
  0x73   : >> { %431 = vst [vmem:[%s4354_s29 + $0xa00] sm:$0xff] %v430_v21  ;;  %433 = vst [vmem:[%s4354_s29 + $0xb00] sm:$0xff] %v432_v22  ;;  %v436_v24 = vld [vmem:[%s4358_s8 + $0x10a8] sm:$0xff]  ;;  %v438_v25 = vld [vmem:[%s4358_s8 + $0x11f0] sm:$0xff] }
  0x74   : >> { %435 = vst [vmem:[%s4354_s29 + $0xc00] sm:$0xff] %v434_v23  ;;  %437 = vst [vmem:[%s4354_s29 + $0xd00] sm:$0xff] %v436_v24  ;;  %v440_v26 = vld [vmem:[%s4358_s8 + $0x1338] sm:$0xff]  ;;  %v442_v27 = vld [vmem:[%s4358_s8 + $0x1480] sm:$0xff] }
  0x75   : >> { %439 = vst [vmem:[%s4354_s29 + $0xe00] sm:$0xff] %v438_v25  ;;  %v444_v28 = vld [vmem:[%s4358_s8 + $0x15c8] sm:$0xff]  ;;  %441 = vst [vmem:[%s4354_s29 + $0xf00] sm:$0xff] %v440_v26  ;;  %v446_v29 = vld [vmem:[%s4358_s8 + $0x1710] sm:$0xff] }
  0x76   : >> { %443 = vst [vmem:[%s4354_s29 + $0x1000] sm:$0xff] %v442_v27  ;;  %445 = vst [vmem:[%s4354_s29 + $0x1100] sm:$0xff] %v444_v28  ;;  %v448_v30 = vld [vmem:[%s4358_s8 + $0x1858] sm:$0xff]  ;;  %v450_v31 = vld [vmem:[%s4358_s8 + $0x19a0] sm:$0xff]  ;;  %406 = sbr.rel (!%p403_p3) target bundleno = 109 (0x6d), region = 246 }
  0x77   : >> { %447 = vst [vmem:[%s4354_s29 + $0x1200] sm:$0xff] %v446_v29  ;;  %449 = vst [vmem:[%s4354_s29 + $0x1300] sm:$0xff] %v448_v30  ;;  %v452_v32 = vld [vmem:[%s4358_s8 + $0x1ae8] sm:$0xff]  ;;  %v454_v33 = vld [vmem:[%s4358_s8 + $0x1c30] sm:$0xff] }
  0x78   : >> { %451 = vst [vmem:[%s4354_s29 + $0x1400] sm:$0xff] %v450_v31  ;;  %v456_v34 = vld [vmem:[%s4358_s8 + $0x1d78] sm:$0xff]  ;;  %453 = vst [vmem:[%s4354_s29 + $0x1500] sm:$0xff] %v452_v32  ;;  %v458_v35 = vld [vmem:[%s4358_s8 + $0x1ec0] sm:$0xff]  ;;  %s6916_s8 = smov %s465_s11 }
  0x79   : >> { %455 = vst [vmem:[%s4354_s29 + $0x1600] sm:$0xff] %v454_v33  ;;  %457 = vst [vmem:[%s4354_s29 + $0x1700] sm:$0xff] %v456_v34 }
  0x7a   : >> { %459 = vst [vmem:[%s4354_s29 + $0x1800] sm:$0xff] %v458_v35  ;;  %s6915_s29 = smov %s466_s17 }
  0x7b PF: > { %469 = sbr.rel (%p215_p10) target bundleno = 241 (0xf1), region = 69  ;;  %s471_s18 = ssub.s32 (!%p215_p10), %s4533_s30, %s4539_s5 }
  0x7c   : > { %s475_s21 = sshrl.u32 (!%p215_p10), %s4533_s30, 3  ;;  %s4847_s22 = scalar_lea.vmem (!%p215_p10), %s4531_s28, %s471_s18 }
  0x7d   : > { %s4850_s23 = scalar_lea.vmem (!%p215_p10), %s4535_s4, %s471_s18 [#allocation2]  ;;  %4170 = sdivrem.u32 (!%p215_p10), %s475_s21, 3 }
  0x86   : > { %s4854_s24 = spop.drf %4170 }
  0x87   : > { %p3797_p4 = scmp.le.s32.totalorder %s4854_s24, 0 }
  0x88   : > { %s6918_s25 = smov (!%p3797_p4), %s4535_s4  ;;  %s6919_s26 = smov (!%p3797_p4), %s4531_s28 }
  0x89   : > { %3682 = sbr.rel (%p3797_p4) target bundleno = 181 (0xb5), region = 251  ;;  %s4863_s27 = smov (!%p3797_p4), 0  }
  0x8a   : > { %s4865_s29 = smov (!%p3797_p4), 0  }
  0x8e LB: >> { %v489_v36 = vld [vmem:[%s4374_s26] sm:$0xff]  ;;  %v491_v37 = vld [vmem:[%s4374_s26 + $0x8] sm:$0xff]  ;;  %v493_v38 = vld [vmem:[%s4374_s26 + $0x10] sm:$0xff]  ;;  %s639_s8 = sadd.s32 1, %s4378_s27  ;;  %s483_s29 = sadd.s32 1, %s4382_s29   ;;  %s4382_s29 = sphi %s4865_s29, %s483_s29   ;;  %s4378_s27 = sphi %s4863_s27, %s6922_s27   ;;  %s4374_s26 = sphi %s6919_s26, %s6921_s26   ;;  %s4370_s25 = sphi %s6918_s25, %s6920_s25  }
  0x8f   : >> { %490 = vst [vmem:[%s4370_s25] sm:$0xff] %v489_v36  ;;  %492 = vst [vmem:[%s4370_s25 + $0x8] sm:$0xff] %v491_v37  ;;  %v495_v39 = vld [vmem:[%s4374_s26 + $0x148] sm:$0xff]  ;;  %v497_v40 = vld [vmem:[%s4374_s26 + $0x150] sm:$0xff]  ;;  %p640_p6 = scmp.ge.s32.totalorder %s639_s8, %s4854_s24  ;;  %p482_p7 = scmp.ge.s32.totalorder %s483_s29, %s4854_s24 }
  0x90   : >> { %494 = vst [vmem:[%s4370_s25 + $0x10] sm:$0xff] %v493_v38  ;;  %v499_v41 = vld [vmem:[%s4374_s26 + $0x158] sm:$0xff]  ;;  %496 = vst [vmem:[%s4370_s25 + $0x100] sm:$0xff] %v495_v39  ;;  %v501_v42 = vld [vmem:[%s4374_s26 + $0x290] sm:$0xff] }
  0x91   : >> { %498 = vst [vmem:[%s4370_s25 + $0x108] sm:$0xff] %v497_v40  ;;  %500 = vst [vmem:[%s4370_s25 + $0x110] sm:$0xff] %v499_v41  ;;  %v503_v43 = vld [vmem:[%s4374_s26 + $0x298] sm:$0xff]  ;;  %v505_v44 = vld [vmem:[%s4374_s26 + $0x2a0] sm:$0xff]  ;;  %s6948_s8 = smov (%p640_p6, %s639_s8), 0 }
  0x92   : >> { %502 = vst [vmem:[%s4370_s25 + $0x200] sm:$0xff] %v501_v42  ;;  %504 = vst [vmem:[%s4370_s25 + $0x208] sm:$0xff] %v503_v43  ;;  %v507_v45 = vld [vmem:[%s4374_s26 + $0x3d8] sm:$0xff]  ;;  %v509_v46 = vld [vmem:[%s4374_s26 + $0x3e0] sm:$0xff]  ;;  %s642_s9 = smul.u32 24, %s6948_s8  ;;  %s6922_s27 = smov %s6948_s8 }
  0x93   : >> { %506 = vst [vmem:[%s4370_s25 + $0x210] sm:$0xff] %v505_v44  ;;  %v511_v47 = vld [vmem:[%s4374_s26 + $0x3e8] sm:$0xff]  ;;  %508 = vst [vmem:[%s4370_s25 + $0x300] sm:$0xff] %v507_v45  ;;  %v513_v48 = vld [vmem:[%s4374_s26 + $0x520] sm:$0xff] }
  0x94   : >> { %510 = vst [vmem:[%s4370_s25 + $0x308] sm:$0xff] %v509_v46  ;;  %512 = vst [vmem:[%s4370_s25 + $0x310] sm:$0xff] %v511_v47  ;;  %v515_v49 = vld [vmem:[%s4374_s26 + $0x528] sm:$0xff]  ;;  %v517_v50 = vld [vmem:[%s4374_s26 + $0x530] sm:$0xff]  ;;  %s4927_s6 = scalar_lea.vmem %s4531_s28, %s642_s9   ;;  %s4930_s7 = scalar_lea.vmem %s4535_s4, %s642_s9 [#allocation2]  }
  0x95   : >> { %514 = vst [vmem:[%s4370_s25 + $0x400] sm:$0xff] %v513_v48  ;;  %516 = vst [vmem:[%s4370_s25 + $0x408] sm:$0xff] %v515_v49  ;;  %v519_v51 = vld [vmem:[%s4374_s26 + $0x668] sm:$0xff]  ;;  %v521_v52 = vld [vmem:[%s4374_s26 + $0x670] sm:$0xff] }
  0x96   : >> { %518 = vst [vmem:[%s4370_s25 + $0x410] sm:$0xff] %v517_v50  ;;  %v523_v53 = vld [vmem:[%s4374_s26 + $0x678] sm:$0xff]  ;;  %520 = vst [vmem:[%s4370_s25 + $0x500] sm:$0xff] %v519_v51  ;;  %v525_v54 = vld [vmem:[%s4374_s26 + $0x7b0] sm:$0xff] }
  0x97   : >> { %522 = vst [vmem:[%s4370_s25 + $0x508] sm:$0xff] %v521_v52  ;;  %524 = vst [vmem:[%s4370_s25 + $0x510] sm:$0xff] %v523_v53  ;;  %v527_v55 = vld [vmem:[%s4374_s26 + $0x7b8] sm:$0xff]  ;;  %v529_v56 = vld [vmem:[%s4374_s26 + $0x7c0] sm:$0xff] }
  0x98   : >> { %526 = vst [vmem:[%s4370_s25 + $0x600] sm:$0xff] %v525_v54  ;;  %528 = vst [vmem:[%s4370_s25 + $0x608] sm:$0xff] %v527_v55  ;;  %v531_v57 = vld [vmem:[%s4374_s26 + $0x8f8] sm:$0xff]  ;;  %v533_v58 = vld [vmem:[%s4374_s26 + $0x900] sm:$0xff] }
  0x99   : >> { %530 = vst [vmem:[%s4370_s25 + $0x610] sm:$0xff] %v529_v56  ;;  %v535_v59 = vld [vmem:[%s4374_s26 + $0x908] sm:$0xff]  ;;  %532 = vst [vmem:[%s4370_s25 + $0x700] sm:$0xff] %v531_v57  ;;  %v537_v60 = vld [vmem:[%s4374_s26 + $0xa40] sm:$0xff] }
  0x9a   : >> { %534 = vst [vmem:[%s4370_s25 + $0x708] sm:$0xff] %v533_v58  ;;  %536 = vst [vmem:[%s4370_s25 + $0x710] sm:$0xff] %v535_v59  ;;  %v539_v61 = vld [vmem:[%s4374_s26 + $0xa48] sm:$0xff]  ;;  %v541_v62 = vld [vmem:[%s4374_s26 + $0xa50] sm:$0xff] }
  0x9b   : >> { %538 = vst [vmem:[%s4370_s25 + $0x800] sm:$0xff] %v537_v60  ;;  %540 = vst [vmem:[%s4370_s25 + $0x808] sm:$0xff] %v539_v61  ;;  %v543_v63 = vld [vmem:[%s4374_s26 + $0xb88] sm:$0xff]  ;;  %v545_v0 = vld [vmem:[%s4374_s26 + $0xb90] sm:$0xff] }
  0x9c   : >> { %542 = vst [vmem:[%s4370_s25 + $0x810] sm:$0xff] %v541_v62  ;;  %v547_v1 = vld [vmem:[%s4374_s26 + $0xb98] sm:$0xff]  ;;  %544 = vst [vmem:[%s4370_s25 + $0x900] sm:$0xff] %v543_v63  ;;  %v549_v2 = vld [vmem:[%s4374_s26 + $0xcd0] sm:$0xff] }
  0x9d   : >> { %546 = vst [vmem:[%s4370_s25 + $0x908] sm:$0xff] %v545_v0  ;;  %548 = vst [vmem:[%s4370_s25 + $0x910] sm:$0xff] %v547_v1  ;;  %v551_v3 = vld [vmem:[%s4374_s26 + $0xcd8] sm:$0xff]  ;;  %v553_v4 = vld [vmem:[%s4374_s26 + $0xce0] sm:$0xff] }
  0x9e   : >> { %550 = vst [vmem:[%s4370_s25 + $0xa00] sm:$0xff] %v549_v2  ;;  %552 = vst [vmem:[%s4370_s25 + $0xa08] sm:$0xff] %v551_v3  ;;  %v555_v5 = vld [vmem:[%s4374_s26 + $0xe18] sm:$0xff]  ;;  %v557_v6 = vld [vmem:[%s4374_s26 + $0xe20] sm:$0xff] }
  0x9f   : >> { %554 = vst [vmem:[%s4370_s25 + $0xa10] sm:$0xff] %v553_v4  ;;  %v559_v7 = vld [vmem:[%s4374_s26 + $0xe28] sm:$0xff]  ;;  %556 = vst [vmem:[%s4370_s25 + $0xb00] sm:$0xff] %v555_v5  ;;  %v561_v8 = vld [vmem:[%s4374_s26 + $0xf60] sm:$0xff] }
  0xa0   : >> { %558 = vst [vmem:[%s4370_s25 + $0xb08] sm:$0xff] %v557_v6  ;;  %560 = vst [vmem:[%s4370_s25 + $0xb10] sm:$0xff] %v559_v7  ;;  %v563_v9 = vld [vmem:[%s4374_s26 + $0xf68] sm:$0xff]  ;;  %v565_v10 = vld [vmem:[%s4374_s26 + $0xf70] sm:$0xff] }
  0xa1   : >> { %562 = vst [vmem:[%s4370_s25 + $0xc00] sm:$0xff] %v561_v8  ;;  %564 = vst [vmem:[%s4370_s25 + $0xc08] sm:$0xff] %v563_v9  ;;  %v567_v11 = vld [vmem:[%s4374_s26 + $0x10a8] sm:$0xff]  ;;  %v569_v12 = vld [vmem:[%s4374_s26 + $0x10b0] sm:$0xff] }
  0xa2   : >> { %566 = vst [vmem:[%s4370_s25 + $0xc10] sm:$0xff] %v565_v10  ;;  %v571_v13 = vld [vmem:[%s4374_s26 + $0x10b8] sm:$0xff]  ;;  %568 = vst [vmem:[%s4370_s25 + $0xd00] sm:$0xff] %v567_v11  ;;  %v573_v14 = vld [vmem:[%s4374_s26 + $0x11f0] sm:$0xff] }
  0xa3   : >> { %570 = vst [vmem:[%s4370_s25 + $0xd08] sm:$0xff] %v569_v12  ;;  %572 = vst [vmem:[%s4370_s25 + $0xd10] sm:$0xff] %v571_v13  ;;  %v575_v15 = vld [vmem:[%s4374_s26 + $0x11f8] sm:$0xff]  ;;  %v577_v16 = vld [vmem:[%s4374_s26 + $0x1200] sm:$0xff] }
  0xa4   : >> { %574 = vst [vmem:[%s4370_s25 + $0xe00] sm:$0xff] %v573_v14  ;;  %576 = vst [vmem:[%s4370_s25 + $0xe08] sm:$0xff] %v575_v15  ;;  %v579_v17 = vld [vmem:[%s4374_s26 + $0x1338] sm:$0xff]  ;;  %v581_v18 = vld [vmem:[%s4374_s26 + $0x1340] sm:$0xff] }
  0xa5   : >> { %578 = vst [vmem:[%s4370_s25 + $0xe10] sm:$0xff] %v577_v16  ;;  %v583_v19 = vld [vmem:[%s4374_s26 + $0x1348] sm:$0xff]  ;;  %580 = vst [vmem:[%s4370_s25 + $0xf00] sm:$0xff] %v579_v17  ;;  %v585_v20 = vld [vmem:[%s4374_s26 + $0x1480] sm:$0xff] }
  0xa6   : >> { %582 = vst [vmem:[%s4370_s25 + $0xf08] sm:$0xff] %v581_v18  ;;  %584 = vst [vmem:[%s4370_s25 + $0xf10] sm:$0xff] %v583_v19  ;;  %v587_v21 = vld [vmem:[%s4374_s26 + $0x1488] sm:$0xff]  ;;  %v589_v22 = vld [vmem:[%s4374_s26 + $0x1490] sm:$0xff] }
  0xa7   : >> { %586 = vst [vmem:[%s4370_s25 + $0x1000] sm:$0xff] %v585_v20  ;;  %588 = vst [vmem:[%s4370_s25 + $0x1008] sm:$0xff] %v587_v21  ;;  %v591_v23 = vld [vmem:[%s4374_s26 + $0x15c8] sm:$0xff]  ;;  %v593_v24 = vld [vmem:[%s4374_s26 + $0x15d0] sm:$0xff] }
  0xa8   : >> { %590 = vst [vmem:[%s4370_s25 + $0x1010] sm:$0xff] %v589_v22  ;;  %v595_v25 = vld [vmem:[%s4374_s26 + $0x15d8] sm:$0xff]  ;;  %592 = vst [vmem:[%s4370_s25 + $0x1100] sm:$0xff] %v591_v23  ;;  %v597_v26 = vld [vmem:[%s4374_s26 + $0x1710] sm:$0xff] }
  0xa9   : >> { %594 = vst [vmem:[%s4370_s25 + $0x1108] sm:$0xff] %v593_v24  ;;  %596 = vst [vmem:[%s4370_s25 + $0x1110] sm:$0xff] %v595_v25  ;;  %v599_v27 = vld [vmem:[%s4374_s26 + $0x1718] sm:$0xff]  ;;  %v601_v28 = vld [vmem:[%s4374_s26 + $0x1720] sm:$0xff] }
  0xaa   : >> { %598 = vst [vmem:[%s4370_s25 + $0x1200] sm:$0xff] %v597_v26  ;;  %600 = vst [vmem:[%s4370_s25 + $0x1208] sm:$0xff] %v599_v27  ;;  %v603_v29 = vld [vmem:[%s4374_s26 + $0x1858] sm:$0xff]  ;;  %v605_v30 = vld [vmem:[%s4374_s26 + $0x1860] sm:$0xff] }
  0xab   : >> { %602 = vst [vmem:[%s4370_s25 + $0x1210] sm:$0xff] %v601_v28  ;;  %v607_v31 = vld [vmem:[%s4374_s26 + $0x1868] sm:$0xff]  ;;  %604 = vst [vmem:[%s4370_s25 + $0x1300] sm:$0xff] %v603_v29  ;;  %v609_v32 = vld [vmem:[%s4374_s26 + $0x19a0] sm:$0xff] }
  0xac   : >> { %606 = vst [vmem:[%s4370_s25 + $0x1308] sm:$0xff] %v605_v30  ;;  %608 = vst [vmem:[%s4370_s25 + $0x1310] sm:$0xff] %v607_v31  ;;  %v611_v33 = vld [vmem:[%s4374_s26 + $0x19a8] sm:$0xff]  ;;  %v613_v34 = vld [vmem:[%s4374_s26 + $0x19b0] sm:$0xff] }
  0xad   : >> { %610 = vst [vmem:[%s4370_s25 + $0x1400] sm:$0xff] %v609_v32  ;;  %612 = vst [vmem:[%s4370_s25 + $0x1408] sm:$0xff] %v611_v33  ;;  %v615_v35 = vld [vmem:[%s4374_s26 + $0x1ae8] sm:$0xff]  ;;  %v617_v36 = vld [vmem:[%s4374_s26 + $0x1af0] sm:$0xff] }
  0xae   : >> { %614 = vst [vmem:[%s4370_s25 + $0x1410] sm:$0xff] %v613_v34  ;;  %v619_v37 = vld [vmem:[%s4374_s26 + $0x1af8] sm:$0xff]  ;;  %616 = vst [vmem:[%s4370_s25 + $0x1500] sm:$0xff] %v615_v35  ;;  %v621_v38 = vld [vmem:[%s4374_s26 + $0x1c30] sm:$0xff] }
  0xaf   : >> { %618 = vst [vmem:[%s4370_s25 + $0x1508] sm:$0xff] %v617_v36  ;;  %620 = vst [vmem:[%s4370_s25 + $0x1510] sm:$0xff] %v619_v37  ;;  %v623_v39 = vld [vmem:[%s4374_s26 + $0x1c38] sm:$0xff]  ;;  %v625_v40 = vld [vmem:[%s4374_s26 + $0x1c40] sm:$0xff] }
  0xb0   : >> { %622 = vst [vmem:[%s4370_s25 + $0x1600] sm:$0xff] %v621_v38  ;;  %624 = vst [vmem:[%s4370_s25 + $0x1608] sm:$0xff] %v623_v39  ;;  %v627_v41 = vld [vmem:[%s4374_s26 + $0x1d78] sm:$0xff]  ;;  %v629_v42 = vld [vmem:[%s4374_s26 + $0x1d80] sm:$0xff]  ;;  %485 = sbr.rel (!%p482_p7) target bundleno = 142 (0x8e), region = 257 }
  0xb1   : >> { %626 = vst [vmem:[%s4370_s25 + $0x1610] sm:$0xff] %v625_v40  ;;  %v631_v43 = vld [vmem:[%s4374_s26 + $0x1d88] sm:$0xff]  ;;  %628 = vst [vmem:[%s4370_s25 + $0x1700] sm:$0xff] %v627_v41  ;;  %v633_v44 = vld [vmem:[%s4374_s26 + $0x1ec0] sm:$0xff] }
  0xb2   : >> { %630 = vst [vmem:[%s4370_s25 + $0x1708] sm:$0xff] %v629_v42  ;;  %632 = vst [vmem:[%s4370_s25 + $0x1710] sm:$0xff] %v631_v43  ;;  %v635_v45 = vld [vmem:[%s4374_s26 + $0x1ec8] sm:$0xff]  ;;  %v637_v46 = vld [vmem:[%s4374_s26 + $0x1ed0] sm:$0xff]  ;;  %s6921_s26 = smov %s4927_s6 }
  0xb3   : >> { %634 = vst [vmem:[%s4370_s25 + $0x1800] sm:$0xff] %v633_v44  ;;  %636 = vst [vmem:[%s4370_s25 + $0x1808] sm:$0xff] %v635_v45 }
  0xb4   : >> { %638 = vst [vmem:[%s4370_s25 + $0x1810] sm:$0xff] %v637_v46  ;;  %s6920_s25 = smov %s4930_s7 }
  0xb5 PF: > { %4172 = sdivrem.u32 %s475_s21, 3 }
  0xb6   : > { %s3798_s10 = smul.u32 384, %s4854_s24 }
  0xb8   : > { %s650_s11 = sshra.s32 %s3798_s10, 4 }
  0xb9   : > { %s5054_s17 = scalar_lea.vmem %s4531_s28, %s650_s11   ;;  %s5057_s18 = scalar_lea.vmem %s4535_s4, %s650_s11 [#allocation2]  }
  0xbe   : > { %s5059_s9 = spop.drf %4172 }
  0xbf   : > { %p3800_p8 = scmp.le.s32.totalorder %s5059_s9, 0 }
  0xc0   : > { %s6923_s25 = smov (!%p3800_p8), %s5057_s18  ;;  %s6924_s26 = smov (!%p3800_p8), %s5054_s17 }
  0xc1   : > { %3696 = sbr.rel (%p3800_p8) target bundleno = 212 (0xd4), region = 262  ;;  %s5068_s27 = smov (!%p3800_p8), 0  }
  0xc2   : > { %s5070_s21 = smov (!%p3800_p8), 0  }
  0xc6 LB: >> { %v666_v47 = vld [vmem:[%s4390_s26] sm:$0xff]  ;;  %v668_v48 = vld [vmem:[%s4390_s26 + $0x148] sm:$0xff]  ;;  %v670_v49 = vld [vmem:[%s4390_s26 + $0x290] sm:$0xff]  ;;  %s716_s24 = sadd.s32 1, %s4394_s27  ;;  %s660_s21 = sadd.s32 1, %s4398_s21   ;;  %s4398_s21 = sphi %s5070_s21, %s660_s21   ;;  %s4394_s27 = sphi %s5068_s27, %s6927_s27   ;;  %s4390_s26 = sphi %s6924_s26, %s6926_s26   ;;  %s4386_s25 = sphi %s6923_s25, %s6925_s25  }
  0xc7   : >> { %667 = vst [vmem:[%s4386_s25] sm:$0xff] %v666_v47  ;;  %669 = vst [vmem:[%s4386_s25 + $0x100] sm:$0xff] %v668_v48  ;;  %v672_v50 = vld [vmem:[%s4390_s26 + $0x3d8] sm:$0xff]  ;;  %v674_v51 = vld [vmem:[%s4390_s26 + $0x520] sm:$0xff]  ;;  %p717_p9 = scmp.ge.s32.totalorder %s716_s24, %s5059_s9  ;;  %p659_p10 = scmp.ge.s32.totalorder %s660_s21, %s5059_s9 }
  0xc8   : >> { %671 = vst [vmem:[%s4386_s25 + $0x200] sm:$0xff] %v670_v49  ;;  %v676_v52 = vld [vmem:[%s4390_s26 + $0x668] sm:$0xff]  ;;  %673 = vst [vmem:[%s4386_s25 + $0x300] sm:$0xff] %v672_v50  ;;  %v678_v53 = vld [vmem:[%s4390_s26 + $0x7b0] sm:$0xff] }
  0xc9   : >> { %675 = vst [vmem:[%s4386_s25 + $0x400] sm:$0xff] %v674_v51  ;;  %677 = vst [vmem:[%s4386_s25 + $0x500] sm:$0xff] %v676_v52  ;;  %v680_v54 = vld [vmem:[%s4390_s26 + $0x8f8] sm:$0xff]  ;;  %v682_v55 = vld [vmem:[%s4390_s26 + $0xa40] sm:$0xff]  ;;  %s6950_s24 = smov (%p717_p9, %s716_s24), 0 }
  0xca   : >> { %679 = vst [vmem:[%s4386_s25 + $0x600] sm:$0xff] %v678_v53  ;;  %681 = vst [vmem:[%s4386_s25 + $0x700] sm:$0xff] %v680_v54  ;;  %v684_v56 = vld [vmem:[%s4390_s26 + $0xb88] sm:$0xff]  ;;  %v686_v57 = vld [vmem:[%s4390_s26 + $0xcd0] sm:$0xff]  ;;  %s3801_s29 = sshll.u32 %s6950_s24, 3  ;;  %s6927_s27 = smov %s6950_s24 }
  0xcb   : >> { %683 = vst [vmem:[%s4386_s25 + $0x800] sm:$0xff] %v682_v55  ;;  %v688_v58 = vld [vmem:[%s4390_s26 + $0xe18] sm:$0xff]  ;;  %685 = vst [vmem:[%s4386_s25 + $0x900] sm:$0xff] %v684_v56  ;;  %v690_v59 = vld [vmem:[%s4390_s26 + $0xf60] sm:$0xff]  ;;  %s721_s8 = scalar_lea.vmem %s5054_s17, %s3801_s29   ;;  %s722_s6 = scalar_lea.vmem %s5057_s18, %s3801_s29 [#allocation2]  }
  0xcc   : >> { %687 = vst [vmem:[%s4386_s25 + $0xa00] sm:$0xff] %v686_v57  ;;  %689 = vst [vmem:[%s4386_s25 + $0xb00] sm:$0xff] %v688_v58  ;;  %v692_v60 = vld [vmem:[%s4390_s26 + $0x10a8] sm:$0xff]  ;;  %v694_v61 = vld [vmem:[%s4390_s26 + $0x11f0] sm:$0xff] }
  0xcd   : >> { %691 = vst [vmem:[%s4386_s25 + $0xc00] sm:$0xff] %v690_v59  ;;  %693 = vst [vmem:[%s4386_s25 + $0xd00] sm:$0xff] %v692_v60  ;;  %v696_v62 = vld [vmem:[%s4390_s26 + $0x1338] sm:$0xff]  ;;  %v698_v63 = vld [vmem:[%s4390_s26 + $0x1480] sm:$0xff] }
  0xce   : >> { %695 = vst [vmem:[%s4386_s25 + $0xe00] sm:$0xff] %v694_v61  ;;  %v700_v0 = vld [vmem:[%s4390_s26 + $0x15c8] sm:$0xff]  ;;  %697 = vst [vmem:[%s4386_s25 + $0xf00] sm:$0xff] %v696_v62  ;;  %v702_v1 = vld [vmem:[%s4390_s26 + $0x1710] sm:$0xff] }
  0xcf   : >> { %699 = vst [vmem:[%s4386_s25 + $0x1000] sm:$0xff] %v698_v63  ;;  %701 = vst [vmem:[%s4386_s25 + $0x1100] sm:$0xff] %v700_v0  ;;  %v704_v2 = vld [vmem:[%s4390_s26 + $0x1858] sm:$0xff]  ;;  %v706_v3 = vld [vmem:[%s4390_s26 + $0x19a0] sm:$0xff]  ;;  %662 = sbr.rel (!%p659_p10) target bundleno = 198 (0xc6), region = 268 }
  0xd0   : >> { %703 = vst [vmem:[%s4386_s25 + $0x1200] sm:$0xff] %v702_v1  ;;  %705 = vst [vmem:[%s4386_s25 + $0x1300] sm:$0xff] %v704_v2  ;;  %v708_v4 = vld [vmem:[%s4390_s26 + $0x1ae8] sm:$0xff]  ;;  %v710_v5 = vld [vmem:[%s4390_s26 + $0x1c30] sm:$0xff] }
  0xd1   : >> { %707 = vst [vmem:[%s4386_s25 + $0x1400] sm:$0xff] %v706_v3  ;;  %v712_v6 = vld [vmem:[%s4390_s26 + $0x1d78] sm:$0xff]  ;;  %709 = vst [vmem:[%s4386_s25 + $0x1500] sm:$0xff] %v708_v4  ;;  %v714_v7 = vld [vmem:[%s4390_s26 + $0x1ec0] sm:$0xff]  ;;  %s6926_s26 = smov %s721_s8 }
  0xd2   : >> { %711 = vst [vmem:[%s4386_s25 + $0x1600] sm:$0xff] %v710_v5  ;;  %713 = vst [vmem:[%s4386_s25 + $0x1700] sm:$0xff] %v712_v6 }
  0xd3   : >> { %715 = vst [vmem:[%s4386_s25 + $0x1800] sm:$0xff] %v714_v7  ;;  %s6925_s25 = smov %s722_s6 }
  0xd4 PF: > { %s4464_s7 = smov 1  }
  0xd5   : > { %s723_s10 = sshll.u32 %s4464_s7, %s4539_s5 }
  0xd6   : > { %s5150_s11 = sadd.s32 4294967295, %s723_s10 }
  0xd7   : > { %v733_v8 = vld [vmem:[%s4847_s22] sm:%s5150_s11]  ;;  %v735_v9 = vld [vmem:[%s4847_s22 + $0x148] sm:%s5150_s11] }
  0xd8   : > { %734 = vst [vmem:[%s4850_s23] sm:%s5150_s11] %v733_v8  ;;  %736 = vst [vmem:[%s4850_s23 + $0x100] sm:%s5150_s11] %v735_v9 }
  0xd9   : > { %v737_v10 = vld [vmem:[%s4847_s22 + $0x290] sm:%s5150_s11]  ;;  %v739_v11 = vld [vmem:[%s4847_s22 + $0x3d8] sm:%s5150_s11] }
  0xda   : > { %738 = vst [vmem:[%s4850_s23 + $0x200] sm:%s5150_s11] %v737_v10  ;;  %740 = vst [vmem:[%s4850_s23 + $0x300] sm:%s5150_s11] %v739_v11 }
  0xdb   : > { %v741_v12 = vld [vmem:[%s4847_s22 + $0x520] sm:%s5150_s11]  ;;  %v743_v13 = vld [vmem:[%s4847_s22 + $0x668] sm:%s5150_s11] }
  0xdc   : > { %742 = vst [vmem:[%s4850_s23 + $0x400] sm:%s5150_s11] %v741_v12  ;;  %744 = vst [vmem:[%s4850_s23 + $0x500] sm:%s5150_s11] %v743_v13 }
  0xdd   : > { %v745_v14 = vld [vmem:[%s4847_s22 + $0x7b0] sm:%s5150_s11]  ;;  %v747_v15 = vld [vmem:[%s4847_s22 + $0x8f8] sm:%s5150_s11] }
  0xde   : > { %746 = vst [vmem:[%s4850_s23 + $0x600] sm:%s5150_s11] %v745_v14  ;;  %748 = vst [vmem:[%s4850_s23 + $0x700] sm:%s5150_s11] %v747_v15 }
  0xdf   : > { %v749_v16 = vld [vmem:[%s4847_s22 + $0xa40] sm:%s5150_s11]  ;;  %v751_v17 = vld [vmem:[%s4847_s22 + $0xb88] sm:%s5150_s11] }
  0xe0   : > { %750 = vst [vmem:[%s4850_s23 + $0x800] sm:%s5150_s11] %v749_v16  ;;  %752 = vst [vmem:[%s4850_s23 + $0x900] sm:%s5150_s11] %v751_v17 }
  0xe1   : > { %v753_v18 = vld [vmem:[%s4847_s22 + $0xcd0] sm:%s5150_s11]  ;;  %v755_v19 = vld [vmem:[%s4847_s22 + $0xe18] sm:%s5150_s11] }
  0xe2   : > { %754 = vst [vmem:[%s4850_s23 + $0xa00] sm:%s5150_s11] %v753_v18  ;;  %756 = vst [vmem:[%s4850_s23 + $0xb00] sm:%s5150_s11] %v755_v19 }
  0xe3   : > { %v757_v20 = vld [vmem:[%s4847_s22 + $0xf60] sm:%s5150_s11]  ;;  %v759_v21 = vld [vmem:[%s4847_s22 + $0x10a8] sm:%s5150_s11] }
  0xe4   : > { %758 = vst [vmem:[%s4850_s23 + $0xc00] sm:%s5150_s11] %v757_v20  ;;  %760 = vst [vmem:[%s4850_s23 + $0xd00] sm:%s5150_s11] %v759_v21 }
  0xe5   : > { %v761_v22 = vld [vmem:[%s4847_s22 + $0x11f0] sm:%s5150_s11]  ;;  %v763_v23 = vld [vmem:[%s4847_s22 + $0x1338] sm:%s5150_s11] }
  0xe6   : > { %762 = vst [vmem:[%s4850_s23 + $0xe00] sm:%s5150_s11] %v761_v22  ;;  %764 = vst [vmem:[%s4850_s23 + $0xf00] sm:%s5150_s11] %v763_v23 }
  0xe7   : > { %v765_v24 = vld [vmem:[%s4847_s22 + $0x1480] sm:%s5150_s11]  ;;  %v767_v25 = vld [vmem:[%s4847_s22 + $0x15c8] sm:%s5150_s11] }
  0xe8   : > { %766 = vst [vmem:[%s4850_s23 + $0x1000] sm:%s5150_s11] %v765_v24  ;;  %768 = vst [vmem:[%s4850_s23 + $0x1100] sm:%s5150_s11] %v767_v25 }
  0xe9   : > { %v769_v26 = vld [vmem:[%s4847_s22 + $0x1710] sm:%s5150_s11]  ;;  %v771_v27 = vld [vmem:[%s4847_s22 + $0x1858] sm:%s5150_s11] }
  0xea   : > { %770 = vst [vmem:[%s4850_s23 + $0x1200] sm:%s5150_s11] %v769_v26  ;;  %772 = vst [vmem:[%s4850_s23 + $0x1300] sm:%s5150_s11] %v771_v27 }
  0xeb   : > { %v773_v28 = vld [vmem:[%s4847_s22 + $0x19a0] sm:%s5150_s11]  ;;  %v775_v29 = vld [vmem:[%s4847_s22 + $0x1ae8] sm:%s5150_s11] }
  0xec   : > { %774 = vst [vmem:[%s4850_s23 + $0x1400] sm:%s5150_s11] %v773_v28  ;;  %776 = vst [vmem:[%s4850_s23 + $0x1500] sm:%s5150_s11] %v775_v29 }
  0xed   : > { %v777_v30 = vld [vmem:[%s4847_s22 + $0x1c30] sm:%s5150_s11]  ;;  %v779_v31 = vld [vmem:[%s4847_s22 + $0x1d78] sm:%s5150_s11] }
  0xee   : > { %778 = vst [vmem:[%s4850_s23 + $0x1600] sm:%s5150_s11] %v777_v30  ;;  %780 = vst [vmem:[%s4850_s23 + $0x1700] sm:%s5150_s11] %v779_v31 }
  0xef   : > { %v781_v32 = vld [vmem:[%s4847_s22 + $0x1ec0] sm:%s5150_s11] }
  0xf0   : > { %782 = vst [vmem:[%s4850_s23 + $0x1800] sm:%s5150_s11] %v781_v32 }
  0xf1 PF: > { %p3804_p11 = scmp.ge.u32.totalorder %s4533_s30, 8 }
  0xf2   : > { %s4465_s5 = smov (!%p3804_p11), 1  }
  0xf3   : > { %153 = sbr.rel (%p3804_p11) target bundleno = 274 (0x112), region = 40  ;;  %s154_s22 = sshll.u32 (!%p3804_p11), %s4465_s5, %s4533_s30 }
  0xf4   : > { %s5254_s23 = sadd.s32 (!%p3804_p11), 4294967295, %s154_s22 }
  0xf8   : > { %v164_v33 = vld [vmem:[%s4531_s28] sm:%s5254_s23]  ;;  %v166_v34 = vld [vmem:[%s4531_s28 + $0x148] sm:%s5254_s23] }
  0xf9   : > { %165 = vst [vmem:[%s4535_s4] sm:%s5254_s23] %v164_v33  ;;  %167 = vst [vmem:[%s4535_s4 + $0x100] sm:%s5254_s23] %v166_v34 }
  0xfa   : > { %v168_v35 = vld [vmem:[%s4531_s28 + $0x290] sm:%s5254_s23]  ;;  %v170_v36 = vld [vmem:[%s4531_s28 + $0x3d8] sm:%s5254_s23] }
  0xfb   : > { %169 = vst [vmem:[%s4535_s4 + $0x200] sm:%s5254_s23] %v168_v35  ;;  %171 = vst [vmem:[%s4535_s4 + $0x300] sm:%s5254_s23] %v170_v36 }
  0xfc   : > { %v172_v37 = vld [vmem:[%s4531_s28 + $0x520] sm:%s5254_s23]  ;;  %v174_v38 = vld [vmem:[%s4531_s28 + $0x668] sm:%s5254_s23] }
  0xfd   : > { %173 = vst [vmem:[%s4535_s4 + $0x400] sm:%s5254_s23] %v172_v37  ;;  %175 = vst [vmem:[%s4535_s4 + $0x500] sm:%s5254_s23] %v174_v38 }
  0xfe   : > { %v176_v39 = vld [vmem:[%s4531_s28 + $0x7b0] sm:%s5254_s23]  ;;  %v178_v40 = vld [vmem:[%s4531_s28 + $0x8f8] sm:%s5254_s23] }
  0xff   : > { %177 = vst [vmem:[%s4535_s4 + $0x600] sm:%s5254_s23] %v176_v39  ;;  %179 = vst [vmem:[%s4535_s4 + $0x700] sm:%s5254_s23] %v178_v40 }
 0x100   : > { %v180_v41 = vld [vmem:[%s4531_s28 + $0xa40] sm:%s5254_s23]  ;;  %v182_v42 = vld [vmem:[%s4531_s28 + $0xb88] sm:%s5254_s23] }
 0x101   : > { %181 = vst [vmem:[%s4535_s4 + $0x800] sm:%s5254_s23] %v180_v41  ;;  %183 = vst [vmem:[%s4535_s4 + $0x900] sm:%s5254_s23] %v182_v42 }
 0x102   : > { %v184_v43 = vld [vmem:[%s4531_s28 + $0xcd0] sm:%s5254_s23]  ;;  %v186_v44 = vld [vmem:[%s4531_s28 + $0xe18] sm:%s5254_s23] }
 0x103   : > { %185 = vst [vmem:[%s4535_s4 + $0xa00] sm:%s5254_s23] %v184_v43  ;;  %187 = vst [vmem:[%s4535_s4 + $0xb00] sm:%s5254_s23] %v186_v44 }
 0x104   : > { %v188_v45 = vld [vmem:[%s4531_s28 + $0xf60] sm:%s5254_s23]  ;;  %v190_v46 = vld [vmem:[%s4531_s28 + $0x10a8] sm:%s5254_s23] }
 0x105   : > { %189 = vst [vmem:[%s4535_s4 + $0xc00] sm:%s5254_s23] %v188_v45  ;;  %191 = vst [vmem:[%s4535_s4 + $0xd00] sm:%s5254_s23] %v190_v46 }
 0x106   : > { %v192_v47 = vld [vmem:[%s4531_s28 + $0x11f0] sm:%s5254_s23]  ;;  %v194_v48 = vld [vmem:[%s4531_s28 + $0x1338] sm:%s5254_s23] }
 0x107   : > { %193 = vst [vmem:[%s4535_s4 + $0xe00] sm:%s5254_s23] %v192_v47  ;;  %195 = vst [vmem:[%s4535_s4 + $0xf00] sm:%s5254_s23] %v194_v48 }
 0x108   : > { %v196_v49 = vld [vmem:[%s4531_s28 + $0x1480] sm:%s5254_s23]  ;;  %v198_v50 = vld [vmem:[%s4531_s28 + $0x15c8] sm:%s5254_s23] }
 0x109   : > { %197 = vst [vmem:[%s4535_s4 + $0x1000] sm:%s5254_s23] %v196_v49  ;;  %199 = vst [vmem:[%s4535_s4 + $0x1100] sm:%s5254_s23] %v198_v50 }
 0x10a   : > { %v200_v51 = vld [vmem:[%s4531_s28 + $0x1710] sm:%s5254_s23]  ;;  %v202_v52 = vld [vmem:[%s4531_s28 + $0x1858] sm:%s5254_s23] }
 0x10b   : > { %201 = vst [vmem:[%s4535_s4 + $0x1200] sm:%s5254_s23] %v200_v51  ;;  %203 = vst [vmem:[%s4535_s4 + $0x1300] sm:%s5254_s23] %v202_v52 }
 0x10c   : > { %v204_v53 = vld [vmem:[%s4531_s28 + $0x19a0] sm:%s5254_s23]  ;;  %v206_v54 = vld [vmem:[%s4531_s28 + $0x1ae8] sm:%s5254_s23] }
 0x10d   : > { %205 = vst [vmem:[%s4535_s4 + $0x1400] sm:%s5254_s23] %v204_v53  ;;  %207 = vst [vmem:[%s4535_s4 + $0x1500] sm:%s5254_s23] %v206_v54 }
 0x10e   : > { %v208_v55 = vld [vmem:[%s4531_s28 + $0x1c30] sm:%s5254_s23]  ;;  %v210_v56 = vld [vmem:[%s4531_s28 + $0x1d78] sm:%s5254_s23] }
 0x10f   : > { %209 = vst [vmem:[%s4535_s4 + $0x1600] sm:%s5254_s23] %v208_v55  ;;  %211 = vst [vmem:[%s4535_s4 + $0x1700] sm:%s5254_s23] %v210_v56 }
 0x110   : > { %v212_v57 = vld [vmem:[%s4531_s28 + $0x1ec0] sm:%s5254_s23] }
 0x111   : > { %213 = vst [vmem:[%s4535_s4 + $0x1800] sm:%s5254_s23] %v212_v57 }
 0x112 PF: > { %p3806_p12 = scmp.ge.s32.totalorder %s4334_s14, 1  ;;  %p785_p13 = scmp.lt.s32.totalorder %s4334_s14, 3 }
 0x114   : > { %p786_p0 = pnand %p3806_p12, %p785_p13 }
 0x115   : > { %s792_s30 = sand.u32 (!%p786_p0), 1, %s4326_s12  }
 0x116   : > { %789 = sbr.rel (%p786_p0) target bundleno = 1068 (0x42c), region = 94  ;;  %s5908_s22 = sshll.u32 (!%p786_p0), %s792_s30, 9 }
 0x117   : > { %s3878_s28 = smul.u32 (!%p786_p0), 6400, %s792_s30  ;;  %s5930_s12 = scalar_lea.vmem (!%p786_p0), [#allocation3], %s5908_s22  }
 0x119   : > { %s5373_s9 = scalar_lea.vmem (!%p786_p0), [#allocation2], %s3878_s28 }
 0x11b   : > { %v5362_v58 = vld [vmem:[%s6903_s0 + $0x8] sm:$0xff]  ;;  %vm1640_vm0 = vcmask 588800   ;;  %v1628_v59 = vld [vmem:[%s6905_s2] sm:$0xff]  ;;  %v4466_v60 = vmov 0   ;;  %v1311_v62 = vld [vmem:[%s5373_s9 + $0xf18] sm:$0xff]  ;;  %s3872_s6 = sshll.u32 (%p4520_p5), %s4505_s15, 8 }
 0x11c   : > { %3808 = vmatprep.mubr.msk.f32.mxu0 %vm1640_vm0, %v5362_v58  ;;  %3810 = vmatprep.mubr.msk.f32.mxu1 %vm1640_vm0, %v5362_v58  ;;  %v1309_v61 = vld [vmem:[%s5373_s9 + $0xf08] sm:$0xff]  ;;  %v1308_v63 = vld [vmem:[%s5373_s9 + $0xf00] sm:$0xff]  ;;  %v1310_v0 = vld [vmem:[%s5373_s9 + $0xf10] sm:$0xff]  ;;  %s6480_s5 = scalar_lea.vmem (%p4520_p5), %s6906_s3, %s3872_s6  }
 0x11d   : > { %4174 = vset.pattern.permute.xlu0 %v4466_v60  ;;  %1647 = vmatprep.subr.mxu0 %v1309_v61  ;;  %v1277_v1 = vld [vmem:[%s5373_s9 + $0xe08] sm:$0xff]  ;;  %v1279_v2 = vld [vmem:[%s5373_s9 + $0xe18] sm:$0xff]  ;;  %v1276_v3 = vld [vmem:[%s5373_s9 + $0xe00] sm:$0xff] }
 0x11e   : > { %1632 = vperm.xlu0 %4174, %v1628_v59   ;;  %1724 = vmatprep.subr.mxu1 %v1311_v62  ;;  %v1278_v4 = vld [vmem:[%s5373_s9 + $0xe10] sm:$0xff]  ;;  %v1245_v5 = vld [vmem:[%s5373_s9 + $0xd08] sm:$0xff]  ;;  %v1247_v6 = vld [vmem:[%s5373_s9 + $0xd18] sm:$0xff] }
 0x11f   : > { %1648 = vmatpush1.msra.mxu0 %v1308_v63  ;;  %1725 = vmatpush1.msra.mxu1 %v1310_v0  ;;  %v1244_v7 = vld [vmem:[%s5373_s9 + $0xd00] sm:$0xff]  ;;  %v1246_v8 = vld [vmem:[%s5373_s9 + $0xd10] sm:$0xff]  ;;  %v1213_v9 = vld [vmem:[%s5373_s9 + $0xc08] sm:$0xff] }
 0x120   : > { %1649 = vmatprep.subr.mxu0 %v1277_v1  ;;  %1726 = vmatprep.subr.mxu1 %v1279_v2  ;;  %v1215_v10 = vld [vmem:[%s5373_s9 + $0xc18] sm:$0xff]  ;;  %v1212_v11 = vld [vmem:[%s5373_s9 + $0xc00] sm:$0xff]  ;;  %v1214_v12 = vld [vmem:[%s5373_s9 + $0xc10] sm:$0xff] }
 0x121   : > { %1650 = vmatpush1.msra.mxu0 %v1276_v3  ;;  %1727 = vmatpush1.msra.mxu1 %v1278_v4  ;;  %v1181_v13 = vld [vmem:[%s5373_s9 + $0xb08] sm:$0xff]  ;;  %v1183_v14 = vld [vmem:[%s5373_s9 + $0xb18] sm:$0xff]  ;;  %v1180_v15 = vld [vmem:[%s5373_s9 + $0xb00] sm:$0xff] }
 0x122   : > { %1651 = vmatprep.subr.mxu0 %v1245_v5  ;;  %1728 = vmatprep.subr.mxu1 %v1247_v6  ;;  %v1182_v16 = vld [vmem:[%s5373_s9 + $0xb10] sm:$0xff]  ;;  %v1149_v17 = vld [vmem:[%s5373_s9 + $0xa08] sm:$0xff]  ;;  %v1151_v18 = vld [vmem:[%s5373_s9 + $0xa18] sm:$0xff] }
 0x123   : > { %1652 = vmatpush1.msra.mxu0 %v1244_v7  ;;  %1729 = vmatpush1.msra.mxu1 %v1246_v8  ;;  %v1148_v19 = vld [vmem:[%s5373_s9 + $0xa00] sm:$0xff]  ;;  %v1150_v20 = vld [vmem:[%s5373_s9 + $0xa10] sm:$0xff]  ;;  %v1117_v21 = vld [vmem:[%s5373_s9 + $0x908] sm:$0xff] }
 0x124   : > { %1653 = vmatprep.subr.mxu0 %v1213_v9  ;;  %1730 = vmatprep.subr.mxu1 %v1215_v10  ;;  %v1119_v22 = vld [vmem:[%s5373_s9 + $0x918] sm:$0xff]  ;;  %v1116_v23 = vld [vmem:[%s5373_s9 + $0x900] sm:$0xff]  ;;  %v1118_v24 = vld [vmem:[%s5373_s9 + $0x910] sm:$0xff] }
 0x125   : > { %1654 = vmatpush1.msra.mxu0 %v1212_v11  ;;  %1731 = vmatpush1.msra.mxu1 %v1214_v12  ;;  %v1085_v25 = vld [vmem:[%s5373_s9 + $0x808] sm:$0xff]  ;;  %v1087_v26 = vld [vmem:[%s5373_s9 + $0x818] sm:$0xff]  ;;  %v1084_v27 = vld [vmem:[%s5373_s9 + $0x800] sm:$0xff] }
 0x126   : > { %1655 = vmatprep.subr.mxu0 %v1181_v13  ;;  %1732 = vmatprep.subr.mxu1 %v1183_v14  ;;  %v1086_v28 = vld [vmem:[%s5373_s9 + $0x810] sm:$0xff]  ;;  %v1053_v29 = vld [vmem:[%s5373_s9 + $0x708] sm:$0xff]  ;;  %v1055_v30 = vld [vmem:[%s5373_s9 + $0x718] sm:$0xff] }
 0x127   : > { %1656 = vmatpush1.msra.mxu0 %v1180_v15  ;;  %1733 = vmatpush1.msra.mxu1 %v1182_v16  ;;  %v1052_v31 = vld [vmem:[%s5373_s9 + $0x700] sm:$0xff]  ;;  %v1054_v32 = vld [vmem:[%s5373_s9 + $0x710] sm:$0xff]  ;;  %v1021_v33 = vld [vmem:[%s5373_s9 + $0x608] sm:$0xff] }
 0x128   : > { %1657 = vmatprep.subr.mxu0 %v1149_v17  ;;  %1734 = vmatprep.subr.mxu1 %v1151_v18  ;;  %v1023_v34 = vld [vmem:[%s5373_s9 + $0x618] sm:$0xff]  ;;  %v1020_v35 = vld [vmem:[%s5373_s9 + $0x600] sm:$0xff]  ;;  %v1022_v36 = vld [vmem:[%s5373_s9 + $0x610] sm:$0xff] }
 0x129   : > { %1658 = vmatpush1.msra.mxu0 %v1148_v19  ;;  %1735 = vmatpush1.msra.mxu1 %v1150_v20  ;;  %v989_v37 = vld [vmem:[%s5373_s9 + $0x508] sm:$0xff]  ;;  %v991_v38 = vld [vmem:[%s5373_s9 + $0x518] sm:$0xff]  ;;  %v988_v39 = vld [vmem:[%s5373_s9 + $0x500] sm:$0xff] }
 0x12a   : > { %1659 = vmatprep.subr.mxu0 %v1117_v21  ;;  %1736 = vmatprep.subr.mxu1 %v1119_v22  ;;  %v990_v40 = vld [vmem:[%s5373_s9 + $0x510] sm:$0xff]  ;;  %v957_v41 = vld [vmem:[%s5373_s9 + $0x408] sm:$0xff]  ;;  %v959_v42 = vld [vmem:[%s5373_s9 + $0x418] sm:$0xff] }
 0x12b   : > { %1660 = vmatpush1.msra.mxu0 %v1116_v23  ;;  %1737 = vmatpush1.msra.mxu1 %v1118_v24  ;;  %v956_v43 = vld [vmem:[%s5373_s9 + $0x400] sm:$0xff]  ;;  %v958_v44 = vld [vmem:[%s5373_s9 + $0x410] sm:$0xff]  ;;  %v925_v45 = vld [vmem:[%s5373_s9 + $0x308] sm:$0xff] }
 0x12c   : > { %1661 = vmatprep.subr.mxu0 %v1085_v25  ;;  %1738 = vmatprep.subr.mxu1 %v1087_v26  ;;  %v927_v46 = vld [vmem:[%s5373_s9 + $0x318] sm:$0xff]  ;;  %v924_v47 = vld [vmem:[%s5373_s9 + $0x300] sm:$0xff]  ;;  %v926_v48 = vld [vmem:[%s5373_s9 + $0x310] sm:$0xff] }
 0x12d   : > { %1662 = vmatpush1.msra.mxu0 %v1084_v27  ;;  %1739 = vmatpush1.msra.mxu1 %v1086_v28  ;;  %v893_v49 = vld [vmem:[%s5373_s9 + $0x208] sm:$0xff]  ;;  %v895_v50 = vld [vmem:[%s5373_s9 + $0x218] sm:$0xff]  ;;  %v892_v51 = vld [vmem:[%s5373_s9 + $0x200] sm:$0xff] }
 0x12e   : > { %1663 = vmatprep.subr.mxu0 %v1053_v29  ;;  %1740 = vmatprep.subr.mxu1 %v1055_v30  ;;  %v894_v52 = vld [vmem:[%s5373_s9 + $0x210] sm:$0xff]  ;;  %v861_v53 = vld [vmem:[%s5373_s9 + $0x108] sm:$0xff]  ;;  %v863_v54 = vld [vmem:[%s5373_s9 + $0x118] sm:$0xff] }
 0x12f   : > { %1664 = vmatpush1.msra.mxu0 %v1052_v31  ;;  %1741 = vmatpush1.msra.mxu1 %v1054_v32  ;;  %v860_v55 = vld [vmem:[%s5373_s9 + $0x100] sm:$0xff]  ;;  %v862_v56 = vld [vmem:[%s5373_s9 + $0x110] sm:$0xff]  ;;  %v829_v57 = vld [vmem:[%s5373_s9 + $0x8] sm:$0xff] }
 0x130   : > { %1665 = vmatprep.subr.mxu0 %v1021_v33  ;;  %1742 = vmatprep.subr.mxu1 %v1023_v34  ;;  %v831_v59 = vld [vmem:[%s5373_s9 + $0x18] sm:$0xff]  ;;  %v828_v60 = vld [vmem:[%s5373_s9] sm:$0xff]  ;;  %v830_v61 = vld [vmem:[%s5373_s9 + $0x10] sm:$0xff] }
 0x131   : > { %1666 = vmatpush1.msra.mxu0 %v1020_v35  ;;  %1743 = vmatpush1.msra.mxu1 %v1022_v36  ;;  %v1597_v62 = vld [vmem:[%s5373_s9 + $0x1808] sm:$0xff]  ;;  %v1599_v63 = vld [vmem:[%s5373_s9 + $0x1818] sm:$0xff]  ;;  %v1596_v0 = vld [vmem:[%s5373_s9 + $0x1800] sm:$0xff] }
 0x132   : > { %1667 = vmatprep.subr.mxu0 %v989_v37  ;;  %1744 = vmatprep.subr.mxu1 %v991_v38  ;;  %v1598_v1 = vld [vmem:[%s5373_s9 + $0x1810] sm:$0xff]  ;;  %v1565_v2 = vld [vmem:[%s5373_s9 + $0x1708] sm:$0xff]  ;;  %v1567_v3 = vld [vmem:[%s5373_s9 + $0x1718] sm:$0xff] }
 0x133   : > { %1668 = vmatpush1.msra.mxu0 %v988_v39  ;;  %1745 = vmatpush1.msra.mxu1 %v990_v40  ;;  %v1564_v4 = vld [vmem:[%s5373_s9 + $0x1700] sm:$0xff]  ;;  %v1566_v5 = vld [vmem:[%s5373_s9 + $0x1710] sm:$0xff]  ;;  %v1533_v6 = vld [vmem:[%s5373_s9 + $0x1608] sm:$0xff] }
 0x134   : > { %1669 = vmatprep.subr.mxu0 %v957_v41  ;;  %1746 = vmatprep.subr.mxu1 %v959_v42  ;;  %v1535_v7 = vld [vmem:[%s5373_s9 + $0x1618] sm:$0xff]  ;;  %v1532_v8 = vld [vmem:[%s5373_s9 + $0x1600] sm:$0xff]  ;;  %v1534_v9 = vld [vmem:[%s5373_s9 + $0x1610] sm:$0xff] }
 0x135   : > { %1670 = vmatpush1.msra.mxu0 %v956_v43  ;;  %1747 = vmatpush1.msra.mxu1 %v958_v44  ;;  %v1501_v10 = vld [vmem:[%s5373_s9 + $0x1508] sm:$0xff]  ;;  %v1503_v11 = vld [vmem:[%s5373_s9 + $0x1518] sm:$0xff]  ;;  %v1500_v12 = vld [vmem:[%s5373_s9 + $0x1500] sm:$0xff] }
 0x136   : > { %1671 = vmatprep.subr.mxu0 %v925_v45  ;;  %1748 = vmatprep.subr.mxu1 %v927_v46  ;;  %v1502_v13 = vld [vmem:[%s5373_s9 + $0x1510] sm:$0xff]  ;;  %v1469_v14 = vld [vmem:[%s5373_s9 + $0x1408] sm:$0xff]  ;;  %v1471_v15 = vld [vmem:[%s5373_s9 + $0x1418] sm:$0xff] }
 0x137   : > { %1672 = vmatpush1.msra.mxu0 %v924_v47  ;;  %1749 = vmatpush1.msra.mxu1 %v926_v48  ;;  %v1468_v16 = vld [vmem:[%s5373_s9 + $0x1400] sm:$0xff]  ;;  %v1470_v17 = vld [vmem:[%s5373_s9 + $0x1410] sm:$0xff]  ;;  %v1437_v18 = vld [vmem:[%s5373_s9 + $0x1308] sm:$0xff] }
 0x138   : > { %1673 = vmatprep.subr.mxu0 %v893_v49  ;;  %1750 = vmatprep.subr.mxu1 %v895_v50  ;;  %v1439_v19 = vld [vmem:[%s5373_s9 + $0x1318] sm:$0xff]  ;;  %v1436_v20 = vld [vmem:[%s5373_s9 + $0x1300] sm:$0xff]  ;;  %v1438_v21 = vld [vmem:[%s5373_s9 + $0x1310] sm:$0xff] }
 0x139   : > { %1674 = vmatpush1.msra.mxu0 %v892_v51  ;;  %1751 = vmatpush1.msra.mxu1 %v894_v52  ;;  %v1405_v22 = vld [vmem:[%s5373_s9 + $0x1208] sm:$0xff]  ;;  %v1407_v23 = vld [vmem:[%s5373_s9 + $0x1218] sm:$0xff]  ;;  %v1404_v24 = vld [vmem:[%s5373_s9 + $0x1200] sm:$0xff] }
 0x13a   : > { %1675 = vmatprep.subr.mxu0 %v861_v53  ;;  %1752 = vmatprep.subr.mxu1 %v863_v54  ;;  %v1406_v25 = vld [vmem:[%s5373_s9 + $0x1210] sm:$0xff]  ;;  %v1373_v26 = vld [vmem:[%s5373_s9 + $0x1108] sm:$0xff]  ;;  %v1375_v27 = vld [vmem:[%s5373_s9 + $0x1118] sm:$0xff] }
 0x13b   : > { %1676 = vmatpush1.msra.mxu0 %v860_v55  ;;  %1753 = vmatpush1.msra.mxu1 %v862_v56  ;;  %v1372_v28 = vld [vmem:[%s5373_s9 + $0x1100] sm:$0xff]  ;;  %v1374_v29 = vld [vmem:[%s5373_s9 + $0x1110] sm:$0xff]  ;;  %v1341_v30 = vld [vmem:[%s5373_s9 + $0x1008] sm:$0xff] }
 0x13c   : > { %1677 = vmatprep.subr.mxu0 %v829_v57  ;;  %1754 = vmatprep.subr.mxu1 %v831_v59  ;;  %v1343_v31 = vld [vmem:[%s5373_s9 + $0x1018] sm:$0xff]  ;;  %v1340_v32 = vld [vmem:[%s5373_s9 + $0x1000] sm:$0xff]  ;;  %v1342_v33 = vld [vmem:[%s5373_s9 + $0x1010] sm:$0xff] }
 0x13d   : > { %1678 = vmatpush1.msra.mxu0 %v828_v60  ;;  %1755 = vmatpush1.msra.mxu1 %v830_v61  ;;  %v5478_v34 = vld [vmem:[%s6903_s0] sm:$0xff]  ;;  %v1313_v35 = vld [vmem:[%s5373_s9 + $0xf28] sm:$0xff]  ;;  %v1315_v36 = vld [vmem:[%s5373_s9 + $0xf38] sm:$0xff] }
 0x13e   : > { %1693 = vmatprep.subr.mxu0 %v1597_v62  ;;  %1770 = vmatprep.subr.mxu1 %v1599_v63  ;;  %v1312_v37 = vld [vmem:[%s5373_s9 + $0xf20] sm:$0xff]  ;;  %v1314_v38 = vld [vmem:[%s5373_s9 + $0xf30] sm:$0xff]  ;;  %v1281_v39 = vld [vmem:[%s5373_s9 + $0xe28] sm:$0xff] }
 0x13f   : > { %1694 = vmatpush2.msra.mxu0 %v1596_v0  ;;  %1771 = vmatpush2.msra.mxu1 %v1598_v1  ;;  %v1283_v40 = vld [vmem:[%s5373_s9 + $0xe38] sm:$0xff]  ;;  %v1280_v41 = vld [vmem:[%s5373_s9 + $0xe20] sm:$0xff]  ;;  %v1282_v42 = vld [vmem:[%s5373_s9 + $0xe30] sm:$0xff] }
 0x140   : > { %1695 = vmatprep.subr.mxu0 %v1565_v2  ;;  %1772 = vmatprep.subr.mxu1 %v1567_v3  ;;  %v1249_v43 = vld [vmem:[%s5373_s9 + $0xd28] sm:$0xff]  ;;  %v1251_v44 = vld [vmem:[%s5373_s9 + $0xd38] sm:$0xff]  ;;  %v1248_v45 = vld [vmem:[%s5373_s9 + $0xd20] sm:$0xff] }
 0x141   : > { %1696 = vmatpush2.msra.mxu0 %v1564_v4  ;;  %1773 = vmatpush2.msra.mxu1 %v1566_v5  ;;  %v1250_v46 = vld [vmem:[%s5373_s9 + $0xd30] sm:$0xff]  ;;  %v1217_v47 = vld [vmem:[%s5373_s9 + $0xc28] sm:$0xff]  ;;  %v1219_v48 = vld [vmem:[%s5373_s9 + $0xc38] sm:$0xff] }
 0x142   : > { %1697 = vmatprep.subr.mxu0 %v1533_v6  ;;  %1774 = vmatprep.subr.mxu1 %v1535_v7  ;;  %v1216_v49 = vld [vmem:[%s5373_s9 + $0xc20] sm:$0xff]  ;;  %v1218_v50 = vld [vmem:[%s5373_s9 + $0xc30] sm:$0xff]  ;;  %v1185_v51 = vld [vmem:[%s5373_s9 + $0xb28] sm:$0xff] }
 0x143   : > { %1698 = vmatpush2.msra.mxu0 %v1532_v8  ;;  %1775 = vmatpush2.msra.mxu1 %v1534_v9  ;;  %v1187_v52 = vld [vmem:[%s5373_s9 + $0xb38] sm:$0xff]  ;;  %v1184_v53 = vld [vmem:[%s5373_s9 + $0xb20] sm:$0xff]  ;;  %v1186_v54 = vld [vmem:[%s5373_s9 + $0xb30] sm:$0xff] }
 0x144   : > { %1699 = vmatprep.subr.mxu0 %v1501_v10  ;;  %1776 = vmatprep.subr.mxu1 %v1503_v11  ;;  %v1153_v55 = vld [vmem:[%s5373_s9 + $0xa28] sm:$0xff]  ;;  %v1155_v56 = vld [vmem:[%s5373_s9 + $0xa38] sm:$0xff]  ;;  %v1152_v57 = vld [vmem:[%s5373_s9 + $0xa20] sm:$0xff] }
 0x145   : > { %1700 = vmatpush2.msra.mxu0 %v1500_v12  ;;  %1777 = vmatpush2.msra.mxu1 %v1502_v13  ;;  %v1154_v59 = vld [vmem:[%s5373_s9 + $0xa30] sm:$0xff]  ;;  %v1121_v60 = vld [vmem:[%s5373_s9 + $0x928] sm:$0xff]  ;;  %v1123_v61 = vld [vmem:[%s5373_s9 + $0x938] sm:$0xff] }
 0x146   : > { %1701 = vmatprep.subr.mxu0 %v1469_v14  ;;  %1778 = vmatprep.subr.mxu1 %v1471_v15  ;;  %v1120_v62 = vld [vmem:[%s5373_s9 + $0x920] sm:$0xff]  ;;  %v1122_v63 = vld [vmem:[%s5373_s9 + $0x930] sm:$0xff]  ;;  %v1089_v0 = vld [vmem:[%s5373_s9 + $0x828] sm:$0xff] }
 0x147   : > { %1702 = vmatpush2.msra.mxu0 %v1468_v16  ;;  %1779 = vmatpush2.msra.mxu1 %v1470_v17  ;;  %v1091_v1 = vld [vmem:[%s5373_s9 + $0x838] sm:$0xff]  ;;  %v1088_v2 = vld [vmem:[%s5373_s9 + $0x820] sm:$0xff]  ;;  %v1090_v3 = vld [vmem:[%s5373_s9 + $0x830] sm:$0xff] }
 0x148   : > { %1703 = vmatprep.subr.mxu0 %v1437_v18  ;;  %1780 = vmatprep.subr.mxu1 %v1439_v19  ;;  %v1057_v4 = vld [vmem:[%s5373_s9 + $0x728] sm:$0xff]  ;;  %v1059_v5 = vld [vmem:[%s5373_s9 + $0x738] sm:$0xff]  ;;  %v1056_v6 = vld [vmem:[%s5373_s9 + $0x720] sm:$0xff] }
 0x149   : > { %1704 = vmatpush2.msra.mxu0 %v1436_v20  ;;  %1781 = vmatpush2.msra.mxu1 %v1438_v21  ;;  %v1058_v7 = vld [vmem:[%s5373_s9 + $0x730] sm:$0xff]  ;;  %v1025_v8 = vld [vmem:[%s5373_s9 + $0x628] sm:$0xff]  ;;  %v1027_v9 = vld [vmem:[%s5373_s9 + $0x638] sm:$0xff] }
 0x14a   : > { %1705 = vmatprep.subr.mxu0 %v1405_v22  ;;  %1782 = vmatprep.subr.mxu1 %v1407_v23  ;;  %v1024_v10 = vld [vmem:[%s5373_s9 + $0x620] sm:$0xff]  ;;  %v1026_v11 = vld [vmem:[%s5373_s9 + $0x630] sm:$0xff]  ;;  %v993_v12 = vld [vmem:[%s5373_s9 + $0x528] sm:$0xff] }
 0x14b   : > { %1706 = vmatpush2.msra.mxu0 %v1404_v24  ;;  %1783 = vmatpush2.msra.mxu1 %v1406_v25  ;;  %v995_v13 = vld [vmem:[%s5373_s9 + $0x538] sm:$0xff]  ;;  %v992_v14 = vld [vmem:[%s5373_s9 + $0x520] sm:$0xff]  ;;  %v994_v15 = vld [vmem:[%s5373_s9 + $0x530] sm:$0xff] }
 0x14c   : > { %1707 = vmatprep.subr.mxu0 %v1373_v26  ;;  %1784 = vmatprep.subr.mxu1 %v1375_v27  ;;  %v961_v16 = vld [vmem:[%s5373_s9 + $0x428] sm:$0xff]  ;;  %v963_v17 = vld [vmem:[%s5373_s9 + $0x438] sm:$0xff]  ;;  %v960_v18 = vld [vmem:[%s5373_s9 + $0x420] sm:$0xff] }
 0x14d   : > { %1708 = vmatpush2.msra.mxu0 %v1372_v28  ;;  %1785 = vmatpush2.msra.mxu1 %v1374_v29  ;;  %v962_v19 = vld [vmem:[%s5373_s9 + $0x430] sm:$0xff]  ;;  %v929_v20 = vld [vmem:[%s5373_s9 + $0x328] sm:$0xff]  ;;  %v931_v21 = vld [vmem:[%s5373_s9 + $0x338] sm:$0xff] }
 0x14e   : > { %1709 = vmatprep.subr.mxu0 %v1341_v30  ;;  %1786 = vmatprep.subr.mxu1 %v1343_v31  ;;  %v928_v22 = vld [vmem:[%s5373_s9 + $0x320] sm:$0xff]  ;;  %v930_v23 = vld [vmem:[%s5373_s9 + $0x330] sm:$0xff]  ;;  %v897_v24 = vld [vmem:[%s5373_s9 + $0x228] sm:$0xff] }
 0x14f   : > { %1710 = vmatpush2.msra.mxu0 %v1340_v32  ;;  %1787 = vmatpush2.msra.mxu1 %v1342_v33  ;;  %v899_v25 = vld [vmem:[%s5373_s9 + $0x238] sm:$0xff]  ;;  %v896_v26 = vld [vmem:[%s5373_s9 + $0x220] sm:$0xff]  ;;  %v898_v27 = vld [vmem:[%s5373_s9 + $0x230] sm:$0xff] }
 0x150   : > { %1712 = vmatmul.mubr.f32.vlgmr.msra.gmra.mxu0 %v5478_v34  ;;  %1789 = vmatmul.mubr.f32.vlgmr.msra.gmra.mxu1 %v5478_v34  ;;  %v865_v28 = vld [vmem:[%s5373_s9 + $0x128] sm:$0xff]  ;;  %v867_v29 = vld [vmem:[%s5373_s9 + $0x138] sm:$0xff]  ;;  %v864_v30 = vld [vmem:[%s5373_s9 + $0x120] sm:$0xff] }
 0x151   : > { %1801 = vmatprep.subr.mxu0 %v1313_v35  ;;  %1878 = vmatprep.subr.mxu1 %v1315_v36  ;;  %v866_v31 = vld [vmem:[%s5373_s9 + $0x130] sm:$0xff]  ;;  %v833_v32 = vld [vmem:[%s5373_s9 + $0x28] sm:$0xff]  ;;  %v835_v33 = vld [vmem:[%s5373_s9 + $0x38] sm:$0xff] }
 0x152   : > { %1802 = vmatpush1.msra.mxu0 %v1312_v37  ;;  %1879 = vmatpush1.msra.mxu1 %v1314_v38  ;;  %v832_v35 = vld [vmem:[%s5373_s9 + $0x20] sm:$0xff]  ;;  %v834_v36 = vld [vmem:[%s5373_s9 + $0x30] sm:$0xff]  ;;  %v1601_v37 = vld [vmem:[%s5373_s9 + $0x1828] sm:$0xff] }
 0x153   : > { %1803 = vmatprep.subr.mxu0 %v1281_v39  ;;  %1880 = vmatprep.subr.mxu1 %v1283_v40  ;;  %v1603_v38 = vld [vmem:[%s5373_s9 + $0x1838] sm:$0xff]  ;;  %v1600_v39 = vld [vmem:[%s5373_s9 + $0x1820] sm:$0xff]  ;;  %v1602_v40 = vld [vmem:[%s5373_s9 + $0x1830] sm:$0xff] }
 0x154   : > { %1804 = vmatpush1.msra.mxu0 %v1280_v41  ;;  %1881 = vmatpush1.msra.mxu1 %v1282_v42  ;;  %v1569_v41 = vld [vmem:[%s5373_s9 + $0x1728] sm:$0xff]  ;;  %v1571_v42 = vld [vmem:[%s5373_s9 + $0x1738] sm:$0xff] }
 0x155   : > { %1805 = vmatprep.subr.mxu0 %v1249_v43  ;;  %1882 = vmatprep.subr.mxu1 %v1251_v44  ;;  %v1568_v43 = vld [vmem:[%s5373_s9 + $0x1720] sm:$0xff]  ;;  %v1570_v44 = vld [vmem:[%s5373_s9 + $0x1730] sm:$0xff] }
 0x156   : > { %1806 = vmatpush1.msra.mxu0 %v1248_v45  ;;  %1883 = vmatpush1.msra.mxu1 %v1250_v46  ;;  %v1537_v45 = vld [vmem:[%s5373_s9 + $0x1628] sm:$0xff]  ;;  %v1539_v46 = vld [vmem:[%s5373_s9 + $0x1638] sm:$0xff] }
 0x157   : > { %1807 = vmatprep.subr.mxu0 %v1217_v47  ;;  %1884 = vmatprep.subr.mxu1 %v1219_v48  ;;  %v1536_v47 = vld [vmem:[%s5373_s9 + $0x1620] sm:$0xff]  ;;  %v1538_v48 = vld [vmem:[%s5373_s9 + $0x1630] sm:$0xff] }
 0x158   : > { %1808 = vmatpush1.msra.mxu0 %v1216_v49  ;;  %1885 = vmatpush1.msra.mxu1 %v1218_v50  ;;  %v1505_v49 = vld [vmem:[%s5373_s9 + $0x1528] sm:$0xff]  ;;  %v1507_v50 = vld [vmem:[%s5373_s9 + $0x1538] sm:$0xff] }
 0x159   : > { %1809 = vmatprep.subr.mxu0 %v1185_v51  ;;  %1886 = vmatprep.subr.mxu1 %v1187_v52  ;;  %v1504_v51 = vld [vmem:[%s5373_s9 + $0x1520] sm:$0xff]  ;;  %v1506_v52 = vld [vmem:[%s5373_s9 + $0x1530] sm:$0xff] }
 0x15a   : > { %1810 = vmatpush1.msra.mxu0 %v1184_v53  ;;  %1887 = vmatpush1.msra.mxu1 %v1186_v54  ;;  %v1473_v53 = vld [vmem:[%s5373_s9 + $0x1428] sm:$0xff]  ;;  %v1475_v54 = vld [vmem:[%s5373_s9 + $0x1438] sm:$0xff] }
 0x15b   : > { %1811 = vmatprep.subr.mxu0 %v1153_v55  ;;  %1888 = vmatprep.subr.mxu1 %v1155_v56  ;;  %v1472_v55 = vld [vmem:[%s5373_s9 + $0x1420] sm:$0xff]  ;;  %v1474_v56 = vld [vmem:[%s5373_s9 + $0x1430] sm:$0xff] }
 0x15c   : > { %1812 = vmatpush1.msra.mxu0 %v1152_v57  ;;  %1889 = vmatpush1.msra.mxu1 %v1154_v59  ;;  %v5569_v57 = vld [vmem:[%s6903_s0 + $0x18] sm:$0xff]  ;;  %v1441_v59 = vld [vmem:[%s5373_s9 + $0x1328] sm:$0xff] }
 0x15d   : > { %1813 = vmatprep.subr.mxu0 %v1121_v60  ;;  %1890 = vmatprep.subr.mxu1 %v1123_v61  ;;  %v1443_v60 = vld [vmem:[%s5373_s9 + $0x1338] sm:$0xff]  ;;  %v5576_v61 = vld [vmem:[%s6903_s0 + $0x10] sm:$0xff] }
 0x15e   : > { %1814 = vmatpush1.msra.mxu0 %v1120_v62  ;;  %1891 = vmatpush1.msra.mxu1 %v1122_v63  ;;  %v1440_v62 = vld [vmem:[%s5373_s9 + $0x1320] sm:$0xff]  ;;  %v1442_v63 = vld [vmem:[%s5373_s9 + $0x1330] sm:$0xff] }
 0x15f   : > { %1815 = vmatprep.subr.mxu0 %v1089_v0  ;;  %1892 = vmatprep.subr.mxu1 %v1091_v1  ;;  %v1409_v0 = vld [vmem:[%s5373_s9 + $0x1228] sm:$0xff]  ;;  %v1411_v1 = vld [vmem:[%s5373_s9 + $0x1238] sm:$0xff] }
 0x160   : > { %1816 = vmatpush1.msra.mxu0 %v1088_v2  ;;  %1893 = vmatpush1.msra.mxu1 %v1090_v3  ;;  %v1408_v2 = vld [vmem:[%s5373_s9 + $0x1220] sm:$0xff]  ;;  %v1410_v3 = vld [vmem:[%s5373_s9 + $0x1230] sm:$0xff] }
 0x161   : > { %1817 = vmatprep.subr.mxu0 %v1057_v4  ;;  %1894 = vmatprep.subr.mxu1 %v1059_v5  ;;  %v1377_v4 = vld [vmem:[%s5373_s9 + $0x1128] sm:$0xff]  ;;  %v1379_v5 = vld [vmem:[%s5373_s9 + $0x1138] sm:$0xff] }
 0x162   : > { %1818 = vmatpush1.msra.mxu0 %v1056_v6  ;;  %1895 = vmatpush1.msra.mxu1 %v1058_v7  ;;  %v1376_v6 = vld [vmem:[%s5373_s9 + $0x1120] sm:$0xff]  ;;  %v1378_v7 = vld [vmem:[%s5373_s9 + $0x1130] sm:$0xff] }
 0x163   : > { %1819 = vmatprep.subr.mxu0 %v1025_v8  ;;  %1896 = vmatprep.subr.mxu1 %v1027_v9  ;;  %v1345_v8 = vld [vmem:[%s5373_s9 + $0x1028] sm:$0xff]  ;;  %v1347_v9 = vld [vmem:[%s5373_s9 + $0x1038] sm:$0xff] }
 0x164   : > { %1820 = vmatpush1.msra.mxu0 %v1024_v10  ;;  %1897 = vmatpush1.msra.mxu1 %v1026_v11  ;;  %v1344_v10 = vld [vmem:[%s5373_s9 + $0x1020] sm:$0xff]  ;;  %v1346_v11 = vld [vmem:[%s5373_s9 + $0x1030] sm:$0xff] }
 0x165   : > { %1821 = vmatprep.subr.mxu0 %v993_v12  ;;  %1898 = vmatprep.subr.mxu1 %v995_v13  ;;  %v1317_v12 = vld [vmem:[%s5373_s9 + $0xf48] sm:$0xff]  ;;  %v1319_v13 = vld [vmem:[%s5373_s9 + $0xf58] sm:$0xff] }
 0x166   : > { %1822 = vmatpush1.msra.mxu0 %v992_v14  ;;  %1899 = vmatpush1.msra.mxu1 %v994_v15  ;;  %v1316_v14 = vld [vmem:[%s5373_s9 + $0xf40] sm:$0xff]  ;;  %v1318_v15 = vld [vmem:[%s5373_s9 + $0xf50] sm:$0xff] }
 0x167   : > { %1823 = vmatprep.subr.mxu0 %v961_v16  ;;  %1900 = vmatprep.subr.mxu1 %v963_v17  ;;  %v1285_v16 = vld [vmem:[%s5373_s9 + $0xe48] sm:$0xff]  ;;  %v1287_v17 = vld [vmem:[%s5373_s9 + $0xe58] sm:$0xff] }
 0x168   : > { %1824 = vmatpush1.msra.mxu0 %v960_v18  ;;  %1901 = vmatpush1.msra.mxu1 %v962_v19  ;;  %v1284_v18 = vld [vmem:[%s5373_s9 + $0xe40] sm:$0xff]  ;;  %v1286_v19 = vld [vmem:[%s5373_s9 + $0xe50] sm:$0xff] }
 0x169   : > { %1825 = vmatprep.subr.mxu0 %v929_v20  ;;  %1902 = vmatprep.subr.mxu1 %v931_v21  ;;  %v1255_v20 = vld [vmem:[%s5373_s9 + $0xd58] sm:$0xff]  ;;  %v1252_v21 = vld [vmem:[%s5373_s9 + $0xd40] sm:$0xff] }
 0x16a   : > { %1826 = vmatpush1.msra.mxu0 %v928_v22  ;;  %1903 = vmatpush1.msra.mxu1 %v930_v23  ;;  %v1254_v22 = vld [vmem:[%s5373_s9 + $0xd50] sm:$0xff]  ;;  %v1221_v23 = vld [vmem:[%s5373_s9 + $0xc48] sm:$0xff] }
 0x16b   : > { %1827 = vmatprep.subr.mxu0 %v897_v24  ;;  %1904 = vmatprep.subr.mxu1 %v899_v25  ;;  %v1223_v24 = vld [vmem:[%s5373_s9 + $0xc58] sm:$0xff]  ;;  %v1220_v25 = vld [vmem:[%s5373_s9 + $0xc40] sm:$0xff] }
 0x16c   : > { %1828 = vmatpush1.msra.mxu0 %v896_v26  ;;  %1905 = vmatpush1.msra.mxu1 %v898_v27  ;;  %v1222_v26 = vld [vmem:[%s5373_s9 + $0xc50] sm:$0xff]  ;;  %v1189_v27 = vld [vmem:[%s5373_s9 + $0xb48] sm:$0xff] }
 0x16d   : > { %1829 = vmatprep.subr.mxu0 %v865_v28  ;;  %1906 = vmatprep.subr.mxu1 %v867_v29  ;;  %v1191_v28 = vld [vmem:[%s5373_s9 + $0xb58] sm:$0xff]  ;;  %v1188_v29 = vld [vmem:[%s5373_s9 + $0xb40] sm:$0xff] }
 0x16e   : > { %1830 = vmatpush1.msra.mxu0 %v864_v30  ;;  %1907 = vmatpush1.msra.mxu1 %v866_v31  ;;  %v1190_v30 = vld [vmem:[%s5373_s9 + $0xb50] sm:$0xff]  ;;  %v1157_v31 = vld [vmem:[%s5373_s9 + $0xa48] sm:$0xff] }
 0x16f   : > { %1831 = vmatprep.subr.mxu0 %v833_v32  ;;  %1908 = vmatprep.subr.mxu1 %v835_v33  ;;  %v1159_v32 = vld [vmem:[%s5373_s9 + $0xa58] sm:$0xff]  ;;  %v1156_v33 = vld [vmem:[%s5373_s9 + $0xa40] sm:$0xff] }
 0x170   : > { %1832 = vmatpush1.msra.mxu0 %v832_v35  ;;  %1909 = vmatpush1.msra.mxu1 %v834_v36  ;;  %v1158_v35 = vld [vmem:[%s5373_s9 + $0xa50] sm:$0xff]  ;;  %v1125_v36 = vld [vmem:[%s5373_s9 + $0x948] sm:$0xff] }
 0x171   : > { %1847 = vmatprep.subr.mxu0 %v1601_v37  ;;  %1924 = vmatprep.subr.mxu1 %v1603_v38  ;;  %v1127_v37 = vld [vmem:[%s5373_s9 + $0x958] sm:$0xff]  ;;  %v1124_v38 = vld [vmem:[%s5373_s9 + $0x940] sm:$0xff] }
 0x172   : > { %1848 = vmatpush2.msra.mxu0 %v1600_v39  ;;  %1925 = vmatpush2.msra.mxu1 %v1602_v40  ;;  %v1126_v39 = vld [vmem:[%s5373_s9 + $0x950] sm:$0xff]  ;;  %v1093_v40 = vld [vmem:[%s5373_s9 + $0x848] sm:$0xff] }
 0x173   : > { %1849 = vmatprep.subr.mxu0 %v1569_v41  ;;  %1926 = vmatprep.subr.mxu1 %v1571_v42  ;;  %v1095_v41 = vld [vmem:[%s5373_s9 + $0x858] sm:$0xff]  ;;  %v1092_v42 = vld [vmem:[%s5373_s9 + $0x840] sm:$0xff] }
 0x174   : > { %1850 = vmatpush2.msra.mxu0 %v1568_v43  ;;  %1927 = vmatpush2.msra.mxu1 %v1570_v44  ;;  %v1094_v43 = vld [vmem:[%s5373_s9 + $0x850] sm:$0xff]  ;;  %v1061_v44 = vld [vmem:[%s5373_s9 + $0x748] sm:$0xff] }
 0x175   : > { %1851 = vmatprep.subr.mxu0 %v1537_v45  ;;  %1928 = vmatprep.subr.mxu1 %v1539_v46  ;;  %v1063_v45 = vld [vmem:[%s5373_s9 + $0x758] sm:$0xff]  ;;  %v1060_v46 = vld [vmem:[%s5373_s9 + $0x740] sm:$0xff] }
 0x176   : > { %1852 = vmatpush2.msra.mxu0 %v1536_v47  ;;  %1929 = vmatpush2.msra.mxu1 %v1538_v48  ;;  %v1062_v47 = vld [vmem:[%s5373_s9 + $0x750] sm:$0xff]  ;;  %v1029_v48 = vld [vmem:[%s5373_s9 + $0x648] sm:$0xff] }
 0x177   : > { %1853 = vmatprep.subr.mxu0 %v1505_v49  ;;  %1930 = vmatprep.subr.mxu1 %v1507_v50  ;;  %v1031_v49 = vld [vmem:[%s5373_s9 + $0x658] sm:$0xff]  ;;  %v1028_v50 = vld [vmem:[%s5373_s9 + $0x640] sm:$0xff] }
 0x178   : > { %1854 = vmatpush2.msra.mxu0 %v1504_v51  ;;  %1931 = vmatpush2.msra.mxu1 %v1506_v52  ;;  %v1030_v51 = vld [vmem:[%s5373_s9 + $0x650] sm:$0xff]  ;;  %v997_v52 = vld [vmem:[%s5373_s9 + $0x548] sm:$0xff] }
 0x179   : > { %1855 = vmatprep.subr.mxu0 %v1473_v53  ;;  %1932 = vmatprep.subr.mxu1 %v1475_v54  ;;  %v999_v53 = vld [vmem:[%s5373_s9 + $0x558] sm:$0xff]  ;;  %v996_v54 = vld [vmem:[%s5373_s9 + $0x540] sm:$0xff] }
 0x17a   : > { %1856 = vmatpush2.msra.mxu0 %v1472_v55  ;;  %1933 = vmatpush2.msra.mxu1 %v1474_v56  ;;  %v998_v55 = vld [vmem:[%s5373_s9 + $0x550] sm:$0xff]  ;;  %v965_v56 = vld [vmem:[%s5373_s9 + $0x448] sm:$0xff] }
 0x17b   : > { %3809 = vmatprep.mubr.msk.f32.mxu0 %vm1640_vm0, %v5569_v57  ;;  %3811 = vmatprep.mubr.msk.f32.mxu1 %vm1640_vm0, %v5569_v57 }
 0x17c   : > { %1857 = vmatprep.subr.mxu0 %v1441_v59  ;;  %1934 = vmatprep.subr.mxu1 %v1443_v60  ;;  %v967_v59 = vld [vmem:[%s5373_s9 + $0x458] sm:$0xff]  ;;  %v964_v60 = vld [vmem:[%s5373_s9 + $0x440] sm:$0xff] }
 0x17d   : > { %1718 = vmatmul.mubr.f32.gmra.mxu0 %v5576_v61  ;;  %1795 = vmatmul.mubr.f32.gmra.mxu1 %v5576_v61 }
 0x17e   : > { %1858 = vmatpush2.msra.mxu0 %v1440_v62  ;;  %1935 = vmatpush2.msra.mxu1 %v1442_v63  ;;  %v966_v62 = vld [vmem:[%s5373_s9 + $0x450] sm:$0xff]  ;;  %v933_v63 = vld [vmem:[%s5373_s9 + $0x348] sm:$0xff] }
 0x17f   : > { %1859 = vmatprep.subr.mxu0 %v1409_v0  ;;  %1936 = vmatprep.subr.mxu1 %v1411_v1  ;;  %v935_v0 = vld [vmem:[%s5373_s9 + $0x358] sm:$0xff]  ;;  %v932_v1 = vld [vmem:[%s5373_s9 + $0x340] sm:$0xff] }
 0x180   : > { %1860 = vmatpush2.msra.mxu0 %v1408_v2  ;;  %1937 = vmatpush2.msra.mxu1 %v1410_v3  ;;  %v934_v2 = vld [vmem:[%s5373_s9 + $0x350] sm:$0xff]  ;;  %v901_v3 = vld [vmem:[%s5373_s9 + $0x248] sm:$0xff] }
 0x181   : > { %1861 = vmatprep.subr.mxu0 %v1377_v4  ;;  %1938 = vmatprep.subr.mxu1 %v1379_v5  ;;  %v903_v4 = vld [vmem:[%s5373_s9 + $0x258] sm:$0xff]  ;;  %v900_v5 = vld [vmem:[%s5373_s9 + $0x240] sm:$0xff] }
 0x182   : > { %1862 = vmatpush2.msra.mxu0 %v1376_v6  ;;  %1939 = vmatpush2.msra.mxu1 %v1378_v7  ;;  %v902_v6 = vld [vmem:[%s5373_s9 + $0x250] sm:$0xff]  ;;  %v869_v7 = vld [vmem:[%s5373_s9 + $0x148] sm:$0xff] }
 0x183   : > { %1863 = vmatprep.subr.mxu0 %v1345_v8  ;;  %1940 = vmatprep.subr.mxu1 %v1347_v9  ;;  %v871_v8 = vld [vmem:[%s5373_s9 + $0x158] sm:$0xff]  ;;  %v868_v9 = vld [vmem:[%s5373_s9 + $0x140] sm:$0xff] }
 0x184   : > { %1864 = vmatpush2.msra.mxu0 %v1344_v10  ;;  %3812 = vmatprep.mubr.msk.f32.mxu0 %vm1640_vm0, %v5362_v58  ;;  %v870_v10 = vld [vmem:[%s5373_s9 + $0x150] sm:$0xff] }
 0x185   : > { %1941 = vmatpush2.msra.mxu1 %v1346_v11  ;;  %3814 = vmatprep.mubr.msk.f32.mxu1 %vm1640_vm0, %v5362_v58  ;;  %v1253_v58 = vld [vmem:[%s5373_s9 + $0xd48] sm:$0xff] }
 0x186   : > { %1866 = vmatmul.mubr.f32.vlgmr.msra.gmra.mxu0 %v5478_v34  ;;  %1943 = vmatmul.mubr.f32.vlgmr.msra.gmra.mxu1 %v5478_v34  ;;  %v837_v11 = vld [vmem:[%s5373_s9 + $0x48] sm:$0xff] }
 0x187   : > { %1955 = vmatprep.subr.mxu0 %v1317_v12  ;;  %2032 = vmatprep.subr.mxu1 %v1319_v13  ;;  %v839_v12 = vld [vmem:[%s5373_s9 + $0x58] sm:$0xff]  ;;  %v836_v13 = vld [vmem:[%s5373_s9 + $0x40] sm:$0xff] }
 0x188   : > { %1956 = vmatpush1.msra.mxu0 %v1316_v14  ;;  %2033 = vmatpush1.msra.mxu1 %v1318_v15  ;;  %v838_v14 = vld [vmem:[%s5373_s9 + $0x50] sm:$0xff]  ;;  %v1605_v15 = vld [vmem:[%s5373_s9 + $0x1848] sm:$0xff] }
 0x189   : > { %1957 = vmatprep.subr.mxu0 %v1285_v16  ;;  %2034 = vmatprep.subr.mxu1 %v1287_v17  ;;  %v1607_v16 = vld [vmem:[%s5373_s9 + $0x1858] sm:$0xff]  ;;  %v1604_v17 = vld [vmem:[%s5373_s9 + $0x1840] sm:$0xff] }
 0x18a   : > { %1958 = vmatpush1.msra.mxu0 %v1284_v18  ;;  %2035 = vmatpush1.msra.mxu1 %v1286_v19  ;;  %v1606_v18 = vld [vmem:[%s5373_s9 + $0x1850] sm:$0xff]  ;;  %v1573_v19 = vld [vmem:[%s5373_s9 + $0x1748] sm:$0xff] }
 0x18b   : > { %1959 = vmatprep.subr.mxu0 %v1253_v58  ;;  %2036 = vmatprep.subr.mxu1 %v1255_v20  ;;  %v1575_v58 = vld [vmem:[%s5373_s9 + $0x1758] sm:$0xff]  ;;  %v1572_v20 = vld [vmem:[%s5373_s9 + $0x1740] sm:$0xff] }
 0x18c   : > { %1960 = vmatpush1.msra.mxu0 %v1252_v21  ;;  %2037 = vmatpush1.msra.mxu1 %v1254_v22  ;;  %v1574_v21 = vld [vmem:[%s5373_s9 + $0x1750] sm:$0xff]  ;;  %v1541_v22 = vld [vmem:[%s5373_s9 + $0x1648] sm:$0xff] }
 0x18d   : > { %1961 = vmatprep.subr.mxu0 %v1221_v23  ;;  %2038 = vmatprep.subr.mxu1 %v1223_v24  ;;  %v1543_v23 = vld [vmem:[%s5373_s9 + $0x1658] sm:$0xff]  ;;  %v1540_v24 = vld [vmem:[%s5373_s9 + $0x1640] sm:$0xff] }
 0x18e   : > { %1962 = vmatpush1.msra.mxu0 %v1220_v25  ;;  %2039 = vmatpush1.msra.mxu1 %v1222_v26  ;;  %v1542_v25 = vld [vmem:[%s5373_s9 + $0x1650] sm:$0xff]  ;;  %v1509_v26 = vld [vmem:[%s5373_s9 + $0x1548] sm:$0xff] }
 0x18f   : > { %1963 = vmatprep.subr.mxu0 %v1189_v27  ;;  %2040 = vmatprep.subr.mxu1 %v1191_v28  ;;  %v1511_v27 = vld [vmem:[%s5373_s9 + $0x1558] sm:$0xff]  ;;  %v1508_v28 = vld [vmem:[%s5373_s9 + $0x1540] sm:$0xff] }
 0x190   : > { %1964 = vmatpush1.msra.mxu0 %v1188_v29  ;;  %2041 = vmatpush1.msra.mxu1 %v1190_v30  ;;  %v1510_v29 = vld [vmem:[%s5373_s9 + $0x1550] sm:$0xff]  ;;  %v1477_v30 = vld [vmem:[%s5373_s9 + $0x1448] sm:$0xff] }
 0x191   : > { %1965 = vmatprep.subr.mxu0 %v1157_v31  ;;  %2042 = vmatprep.subr.mxu1 %v1159_v32  ;;  %v1479_v31 = vld [vmem:[%s5373_s9 + $0x1458] sm:$0xff]  ;;  %v1476_v32 = vld [vmem:[%s5373_s9 + $0x1440] sm:$0xff] }
 0x192   : > { %1966 = vmatpush1.msra.mxu0 %v1156_v33  ;;  %2043 = vmatpush1.msra.mxu1 %v1158_v35  ;;  %v1478_v33 = vld [vmem:[%s5373_s9 + $0x1450] sm:$0xff]  ;;  %v1445_v35 = vld [vmem:[%s5373_s9 + $0x1348] sm:$0xff] }
 0x193   : > { %1967 = vmatprep.subr.mxu0 %v1125_v36  ;;  %2044 = vmatprep.subr.mxu1 %v1127_v37  ;;  %v1447_v36 = vld [vmem:[%s5373_s9 + $0x1358] sm:$0xff]  ;;  %v1444_v37 = vld [vmem:[%s5373_s9 + $0x1340] sm:$0xff] }
 0x194   : > { %1968 = vmatpush1.msra.mxu0 %v1124_v38  ;;  %2045 = vmatpush1.msra.mxu1 %v1126_v39  ;;  %v1446_v38 = vld [vmem:[%s5373_s9 + $0x1350] sm:$0xff]  ;;  %v1413_v39 = vld [vmem:[%s5373_s9 + $0x1248] sm:$0xff] }
 0x195   : > { %1969 = vmatprep.subr.mxu0 %v1093_v40  ;;  %2046 = vmatprep.subr.mxu1 %v1095_v41  ;;  %v1415_v40 = vld [vmem:[%s5373_s9 + $0x1258] sm:$0xff]  ;;  %v1412_v41 = vld [vmem:[%s5373_s9 + $0x1240] sm:$0xff] }
 0x196   : > { %1970 = vmatpush1.msra.mxu0 %v1092_v42  ;;  %2047 = vmatpush1.msra.mxu1 %v1094_v43  ;;  %v1414_v42 = vld [vmem:[%s5373_s9 + $0x1250] sm:$0xff]  ;;  %v1381_v43 = vld [vmem:[%s5373_s9 + $0x1148] sm:$0xff] }
 0x197   : > { %1971 = vmatprep.subr.mxu0 %v1061_v44  ;;  %2048 = vmatprep.subr.mxu1 %v1063_v45  ;;  %v1383_v44 = vld [vmem:[%s5373_s9 + $0x1158] sm:$0xff]  ;;  %v1380_v45 = vld [vmem:[%s5373_s9 + $0x1140] sm:$0xff] }
 0x198   : > { %1972 = vmatpush1.msra.mxu0 %v1060_v46  ;;  %2049 = vmatpush1.msra.mxu1 %v1062_v47  ;;  %v1382_v46 = vld [vmem:[%s5373_s9 + $0x1150] sm:$0xff]  ;;  %v1349_v47 = vld [vmem:[%s5373_s9 + $0x1048] sm:$0xff] }
 0x199   : > { %1973 = vmatprep.subr.mxu0 %v1029_v48  ;;  %2050 = vmatprep.subr.mxu1 %v1031_v49  ;;  %v1351_v48 = vld [vmem:[%s5373_s9 + $0x1058] sm:$0xff]  ;;  %v1348_v49 = vld [vmem:[%s5373_s9 + $0x1040] sm:$0xff] }
 0x19a   : > { %1974 = vmatpush1.msra.mxu0 %v1028_v50  ;;  %2051 = vmatpush1.msra.mxu1 %v1030_v51  ;;  %v1350_v50 = vld [vmem:[%s5373_s9 + $0x1050] sm:$0xff]  ;;  %v5713_v51 = vld [vmem:[%s6903_s0 + $0x8] sm:$0xff] }
 0x19b   : > { %1975 = vmatprep.subr.mxu0 %v997_v52  ;;  %2052 = vmatprep.subr.mxu1 %v999_v53  ;;  %v1321_v52 = vld [vmem:[%s5373_s9 + $0xf68] sm:$0xff]  ;;  %v1323_v53 = vld [vmem:[%s5373_s9 + $0xf78] sm:$0xff] }
 0x19c   : > { %1976 = vmatpush1.msra.mxu0 %v996_v54  ;;  %2053 = vmatpush1.msra.mxu1 %v998_v55  ;;  %v1320_v54 = vld [vmem:[%s5373_s9 + $0xf60] sm:$0xff]  ;;  %v1322_v55 = vld [vmem:[%s5373_s9 + $0xf70] sm:$0xff] }
 0x19d   : > { %1977 = vmatprep.subr.mxu0 %v965_v56  ;;  %2054 = vmatprep.subr.mxu1 %v967_v59  ;;  %v1289_v56 = vld [vmem:[%s5373_s9 + $0xe68] sm:$0xff]  ;;  %v1291_v59 = vld [vmem:[%s5373_s9 + $0xe78] sm:$0xff] }
 0x19e   : > { %1978 = vmatpush1.msra.mxu0 %v964_v60  ;;  %2055 = vmatpush1.msra.mxu1 %v966_v62  ;;  %v1288_v60 = vld [vmem:[%s5373_s9 + $0xe60] sm:$0xff]  ;;  %v1290_v62 = vld [vmem:[%s5373_s9 + $0xe70] sm:$0xff] }
 0x19f   : > { %1979 = vmatprep.subr.mxu0 %v933_v63  ;;  %2056 = vmatprep.subr.mxu1 %v935_v0  ;;  %v1257_v63 = vld [vmem:[%s5373_s9 + $0xd68] sm:$0xff]  ;;  %v1259_v0 = vld [vmem:[%s5373_s9 + $0xd78] sm:$0xff] }
 0x1a0   : > { %1980 = vmatpush1.msra.mxu0 %v932_v1  ;;  %2057 = vmatpush1.msra.mxu1 %v934_v2  ;;  %v1256_v1 = vld [vmem:[%s5373_s9 + $0xd60] sm:$0xff]  ;;  %v1225_v2 = vld [vmem:[%s5373_s9 + $0xc68] sm:$0xff] }
 0x1a1   : > { %1981 = vmatprep.subr.mxu0 %v901_v3  ;;  %2058 = vmatprep.subr.mxu1 %v903_v4  ;;  %v1227_v3 = vld [vmem:[%s5373_s9 + $0xc78] sm:$0xff]  ;;  %v1224_v4 = vld [vmem:[%s5373_s9 + $0xc60] sm:$0xff] }
 0x1a2   : > { %1982 = vmatpush1.msra.mxu0 %v900_v5  ;;  %2059 = vmatpush1.msra.mxu1 %v902_v6  ;;  %v1226_v5 = vld [vmem:[%s5373_s9 + $0xc70] sm:$0xff]  ;;  %v1193_v6 = vld [vmem:[%s5373_s9 + $0xb68] sm:$0xff] }
 0x1a3   : > { %1983 = vmatprep.subr.mxu0 %v869_v7  ;;  %2060 = vmatprep.subr.mxu1 %v871_v8  ;;  %v1195_v7 = vld [vmem:[%s5373_s9 + $0xb78] sm:$0xff]  ;;  %v1192_v8 = vld [vmem:[%s5373_s9 + $0xb60] sm:$0xff] }
 0x1a4   : > { %1984 = vmatpush1.msra.mxu0 %v868_v9  ;;  %2061 = vmatpush1.msra.mxu1 %v870_v10  ;;  %v1194_v9 = vld [vmem:[%s5373_s9 + $0xb70] sm:$0xff]  ;;  %v1161_v10 = vld [vmem:[%s5373_s9 + $0xa68] sm:$0xff] }
 0x1a5   : > { %1985 = vmatprep.subr.mxu0 %v837_v11  ;;  %2062 = vmatprep.subr.mxu1 %v839_v12  ;;  %v1163_v11 = vld [vmem:[%s5373_s9 + $0xa78] sm:$0xff]  ;;  %v1160_v12 = vld [vmem:[%s5373_s9 + $0xa60] sm:$0xff] }
 0x1a6   : > { %1986 = vmatpush1.msra.mxu0 %v836_v13  ;;  %2063 = vmatpush1.msra.mxu1 %v838_v14  ;;  %v1162_v13 = vld [vmem:[%s5373_s9 + $0xa70] sm:$0xff]  ;;  %v1129_v14 = vld [vmem:[%s5373_s9 + $0x968] sm:$0xff] }
 0x1a7   : > { %2001 = vmatprep.subr.mxu0 %v1605_v15  ;;  %2078 = vmatprep.subr.mxu1 %v1607_v16  ;;  %v1131_v15 = vld [vmem:[%s5373_s9 + $0x978] sm:$0xff]  ;;  %v1128_v16 = vld [vmem:[%s5373_s9 + $0x960] sm:$0xff] }
 0x1a8   : > { %2002 = vmatpush2.msra.mxu0 %v1604_v17  ;;  %2079 = vmatpush2.msra.mxu1 %v1606_v18  ;;  %v1130_v17 = vld [vmem:[%s5373_s9 + $0x970] sm:$0xff]  ;;  %v1629_v18 = vld [vmem:[%s6905_s2 + $0x8] sm:$0xff] }
 0x1a9   : > { %2003 = vmatprep.subr.mxu0 %v1573_v19  ;;  %2080 = vmatprep.subr.mxu1 %v1575_v58  ;;  %v1097_v19 = vld [vmem:[%s5373_s9 + $0x868] sm:$0xff]  ;;  %v1099_v58 = vld [vmem:[%s5373_s9 + $0x878] sm:$0xff] }
 0x1aa   : > { %2004 = vmatpush2.msra.mxu0 %v1572_v20  ;;  %2081 = vmatpush2.msra.mxu1 %v1574_v21  ;;  %v1096_v20 = vld [vmem:[%s5373_s9 + $0x860] sm:$0xff]  ;;  %v1098_v21 = vld [vmem:[%s5373_s9 + $0x870] sm:$0xff] }
 0x1ab   : > { %2005 = vmatprep.subr.mxu0 %v1541_v22  ;;  %2082 = vmatprep.subr.mxu1 %v1543_v23  ;;  %v1065_v22 = vld [vmem:[%s5373_s9 + $0x768] sm:$0xff]  ;;  %v1067_v23 = vld [vmem:[%s5373_s9 + $0x778] sm:$0xff] }
 0x1ac   : > { %2006 = vmatpush2.msra.mxu0 %v1540_v24  ;;  %2083 = vmatpush2.msra.mxu1 %v1542_v25  ;;  %v1064_v24 = vld [vmem:[%s5373_s9 + $0x760] sm:$0xff]  ;;  %v1066_v25 = vld [vmem:[%s5373_s9 + $0x770] sm:$0xff] }
 0x1ad   : > { %2007 = vmatprep.subr.mxu0 %v1509_v26  ;;  %2084 = vmatprep.subr.mxu1 %v1511_v27  ;;  %v1033_v26 = vld [vmem:[%s5373_s9 + $0x668] sm:$0xff]  ;;  %v1035_v27 = vld [vmem:[%s5373_s9 + $0x678] sm:$0xff] }
 0x1ae   : > { %2008 = vmatpush2.msra.mxu0 %v1508_v28  ;;  %2085 = vmatpush2.msra.mxu1 %v1510_v29  ;;  %v1032_v28 = vld [vmem:[%s5373_s9 + $0x660] sm:$0xff]  ;;  %v1034_v29 = vld [vmem:[%s5373_s9 + $0x670] sm:$0xff] }
 0x1af   : > { %2009 = vmatprep.subr.mxu0 %v1477_v30  ;;  %2086 = vmatprep.subr.mxu1 %v1479_v31  ;;  %v1001_v30 = vld [vmem:[%s5373_s9 + $0x568] sm:$0xff]  ;;  %v1003_v31 = vld [vmem:[%s5373_s9 + $0x578] sm:$0xff] }
 0x1b0   : > { %2010 = vmatpush2.msra.mxu0 %v1476_v32  ;;  %2087 = vmatpush2.msra.mxu1 %v1478_v33  ;;  %v1000_v32 = vld [vmem:[%s5373_s9 + $0x560] sm:$0xff]  ;;  %v1002_v33 = vld [vmem:[%s5373_s9 + $0x570] sm:$0xff] }
 0x1b1   : > { %3813 = vmatprep.mubr.msk.f32.mxu0 %vm1640_vm0, %v5569_v57  ;;  %3815 = vmatprep.mubr.msk.f32.mxu1 %vm1640_vm0, %v5569_v57 }
 0x1b2   : > { %2011 = vmatprep.subr.mxu0 %v1445_v35  ;;  %2088 = vmatprep.subr.mxu1 %v1447_v36  ;;  %v969_v35 = vld [vmem:[%s5373_s9 + $0x468] sm:$0xff]  ;;  %v971_v36 = vld [vmem:[%s5373_s9 + $0x478] sm:$0xff] }
 0x1b3   : > { %1872 = vmatmul.mubr.f32.gmra.mxu0 %v5576_v61  ;;  %1949 = vmatmul.mubr.f32.gmra.mxu1 %v5576_v61 }
 0x1b4   : > { %2012 = vmatpush2.msra.mxu0 %v1444_v37  ;;  %2089 = vmatpush2.msra.mxu1 %v1446_v38  ;;  %v968_v37 = vld [vmem:[%s5373_s9 + $0x460] sm:$0xff]  ;;  %v970_v38 = vld [vmem:[%s5373_s9 + $0x470] sm:$0xff] }
 0x1b5   : > { %2013 = vmatprep.subr.mxu0 %v1413_v39  ;;  %2090 = vmatprep.subr.mxu1 %v1415_v40  ;;  %v937_v39 = vld [vmem:[%s5373_s9 + $0x368] sm:$0xff]  ;;  %v939_v40 = vld [vmem:[%s5373_s9 + $0x378] sm:$0xff] }
 0x1b6   : > { %2014 = vmatpush2.msra.mxu0 %v1412_v41  ;;  %2091 = vmatpush2.msra.mxu1 %v1414_v42  ;;  %v936_v41 = vld [vmem:[%s5373_s9 + $0x360] sm:$0xff]  ;;  %v938_v42 = vld [vmem:[%s5373_s9 + $0x370] sm:$0xff] }
 0x1b7   : > { %2015 = vmatprep.subr.mxu0 %v1381_v43  ;;  %2092 = vmatprep.subr.mxu1 %v1383_v44  ;;  %v905_v43 = vld [vmem:[%s5373_s9 + $0x268] sm:$0xff]  ;;  %v907_v44 = vld [vmem:[%s5373_s9 + $0x278] sm:$0xff] }
 0x1b8   : > { %2016 = vmatpush2.msra.mxu0 %v1380_v45  ;;  %2093 = vmatpush2.msra.mxu1 %v1382_v46  ;;  %v904_v45 = vld [vmem:[%s5373_s9 + $0x260] sm:$0xff]  ;;  %v906_v46 = vld [vmem:[%s5373_s9 + $0x270] sm:$0xff] }
 0x1b9   : > { %2017 = vmatprep.subr.mxu0 %v1349_v47  ;;  %2094 = vmatprep.subr.mxu1 %v1351_v48  ;;  %v873_v47 = vld [vmem:[%s5373_s9 + $0x168] sm:$0xff]  ;;  %v875_v48 = vld [vmem:[%s5373_s9 + $0x178] sm:$0xff] }
 0x1ba   : > { %2018 = vmatpush2.msra.mxu0 %v1348_v49  ;;  %3816 = vmatprep.mubr.msk.f32.mxu0 %vm1640_vm0, %v5713_v51  ;;  %v872_v49 = vld [vmem:[%s5373_s9 + $0x160] sm:$0xff] }
 0x1bb   : > { %2095 = vmatpush2.msra.mxu1 %v1350_v50  ;;  %3818 = vmatprep.mubr.msk.f32.mxu1 %vm1640_vm0, %v5713_v51  ;;  %v874_v50 = vld [vmem:[%s5373_s9 + $0x170] sm:$0xff] }
 0x1bc   : > { %2020 = vmatmul.mubr.f32.vlgmr.msra.gmra.mxu0 %v5478_v34  ;;  %2097 = vmatmul.mubr.f32.vlgmr.msra.gmra.mxu1 %v5478_v34  ;;  %v1258_v34 = vld [vmem:[%s5373_s9 + $0xd70] sm:$0xff] }
 0x1bd   : > { %2109 = vmatprep.subr.mxu0 %v1321_v52  ;;  %2186 = vmatprep.subr.mxu1 %v1323_v53  ;;  %v841_v52 = vld [vmem:[%s5373_s9 + $0x68] sm:$0xff]  ;;  %v843_v53 = vld [vmem:[%s5373_s9 + $0x78] sm:$0xff] }
 0x1be   : > { %2110 = vmatpush1.msra.mxu0 %v1320_v54  ;;  %2187 = vmatpush1.msra.mxu1 %v1322_v55  ;;  %v840_v54 = vld [vmem:[%s5373_s9 + $0x60] sm:$0xff]  ;;  %v842_v55 = vld [vmem:[%s5373_s9 + $0x70] sm:$0xff] }
 0x1bf   : > { %2111 = vmatprep.subr.mxu0 %v1289_v56  ;;  %2188 = vmatprep.subr.mxu1 %v1291_v59  ;;  %v1609_v56 = vld [vmem:[%s5373_s9 + $0x1868] sm:$0xff]  ;;  %v1611_v59 = vld [vmem:[%s5373_s9 + $0x1878] sm:$0xff] }
 0x1c0   : > { %2112 = vmatpush1.msra.mxu0 %v1288_v60  ;;  %2189 = vmatpush1.msra.mxu1 %v1290_v62  ;;  %v1608_v60 = vld [vmem:[%s5373_s9 + $0x1860] sm:$0xff]  ;;  %v1610_v62 = vld [vmem:[%s5373_s9 + $0x1870] sm:$0xff] }
 0x1c1   : > { %2113 = vmatprep.subr.mxu0 %v1257_v63  ;;  %2190 = vmatprep.subr.mxu1 %v1259_v0  ;;  %v1577_v63 = vld [vmem:[%s5373_s9 + $0x1768] sm:$0xff]  ;;  %v1579_v0 = vld [vmem:[%s5373_s9 + $0x1778] sm:$0xff] }
 0x1c2   : > { %2114 = vmatpush1.msra.mxu0 %v1256_v1  ;;  %2191 = vmatpush1.msra.mxu1 %v1258_v34  ;;  %v1576_v1 = vld [vmem:[%s5373_s9 + $0x1760] sm:$0xff]  ;;  %v1578_v34 = vld [vmem:[%s5373_s9 + $0x1770] sm:$0xff] }
 0x1c3   : > { %2115 = vmatprep.subr.mxu0 %v1225_v2  ;;  %2192 = vmatprep.subr.mxu1 %v1227_v3  ;;  %v1545_v2 = vld [vmem:[%s5373_s9 + $0x1668] sm:$0xff]  ;;  %v1547_v3 = vld [vmem:[%s5373_s9 + $0x1678] sm:$0xff] }
 0x1c4   : > { %2116 = vmatpush1.msra.mxu0 %v1224_v4  ;;  %2193 = vmatpush1.msra.mxu1 %v1226_v5  ;;  %v1544_v4 = vld [vmem:[%s5373_s9 + $0x1660] sm:$0xff]  ;;  %v1546_v5 = vld [vmem:[%s5373_s9 + $0x1670] sm:$0xff] }
 0x1c5   : > { %2117 = vmatprep.subr.mxu0 %v1193_v6  ;;  %2194 = vmatprep.subr.mxu1 %v1195_v7  ;;  %v1513_v6 = vld [vmem:[%s5373_s9 + $0x1568] sm:$0xff]  ;;  %v1515_v7 = vld [vmem:[%s5373_s9 + $0x1578] sm:$0xff] }
 0x1c6   : > { %2118 = vmatpush1.msra.mxu0 %v1192_v8  ;;  %2195 = vmatpush1.msra.mxu1 %v1194_v9  ;;  %v1512_v8 = vld [vmem:[%s5373_s9 + $0x1560] sm:$0xff]  ;;  %v1514_v9 = vld [vmem:[%s5373_s9 + $0x1570] sm:$0xff] }
 0x1c7   : > { %2119 = vmatprep.subr.mxu0 %v1161_v10  ;;  %2196 = vmatprep.subr.mxu1 %v1163_v11  ;;  %v1481_v10 = vld [vmem:[%s5373_s9 + $0x1468] sm:$0xff]  ;;  %v1483_v11 = vld [vmem:[%s5373_s9 + $0x1478] sm:$0xff] }
 0x1c8   : > { %2120 = vmatpush1.msra.mxu0 %v1160_v12  ;;  %2197 = vmatpush1.msra.mxu1 %v1162_v13  ;;  %v1480_v12 = vld [vmem:[%s5373_s9 + $0x1460] sm:$0xff]  ;;  %v1482_v13 = vld [vmem:[%s5373_s9 + $0x1470] sm:$0xff] }
 0x1c9   : > { %2121 = vmatprep.subr.mxu0 %v1129_v14  ;;  %2198 = vmatprep.subr.mxu1 %v1131_v15  ;;  %v1449_v14 = vld [vmem:[%s5373_s9 + $0x1368] sm:$0xff]  ;;  %v1451_v15 = vld [vmem:[%s5373_s9 + $0x1378] sm:$0xff] }
 0x1ca   : > { %2122 = vmatpush1.msra.mxu0 %v1128_v16  ;;  %2199 = vmatpush1.msra.mxu1 %v1130_v17  ;;  %v1448_v16 = vld [vmem:[%s5373_s9 + $0x1360] sm:$0xff]  ;;  %v1450_v17 = vld [vmem:[%s5373_s9 + $0x1370] sm:$0xff] }
 0x1cb   : > { %1637 = vperm.xlu0 %4174, %v1629_v18   ;;  %2123 = vmatprep.subr.mxu0 %v1097_v19  ;;  %v1417_v18 = vld [vmem:[%s5373_s9 + $0x1268] sm:$0xff]  ;;  %v1419_v19 = vld [vmem:[%s5373_s9 + $0x1278] sm:$0xff] }
 0x1cc   : > { %2200 = vmatprep.subr.mxu1 %v1099_v58  ;;  %2124 = vmatpush1.msra.mxu0 %v1096_v20  ;;  %v1416_v58 = vld [vmem:[%s5373_s9 + $0x1260] sm:$0xff]  ;;  %v1418_v20 = vld [vmem:[%s5373_s9 + $0x1270] sm:$0xff] }
 0x1cd   : > { %2201 = vmatpush1.msra.mxu1 %v1098_v21  ;;  %2125 = vmatprep.subr.mxu0 %v1065_v22  ;;  %v1385_v21 = vld [vmem:[%s5373_s9 + $0x1168] sm:$0xff]  ;;  %v1384_v22 = vld [vmem:[%s5373_s9 + $0x1160] sm:$0xff] }
 0x1ce   : > { %2202 = vmatprep.subr.mxu1 %v1067_v23  ;;  %2126 = vmatpush1.msra.mxu0 %v1064_v24  ;;  %v1386_v23 = vld [vmem:[%s5373_s9 + $0x1170] sm:$0xff]  ;;  %v1353_v24 = vld [vmem:[%s5373_s9 + $0x1068] sm:$0xff] }
 0x1cf   : > { %2203 = vmatpush1.msra.mxu1 %v1066_v25  ;;  %2127 = vmatprep.subr.mxu0 %v1033_v26  ;;  %v1355_v25 = vld [vmem:[%s5373_s9 + $0x1078] sm:$0xff]  ;;  %v1352_v26 = vld [vmem:[%s5373_s9 + $0x1060] sm:$0xff] }
 0x1d0   : > { %2204 = vmatprep.subr.mxu1 %v1035_v27  ;;  %2128 = vmatpush1.msra.mxu0 %v1032_v28  ;;  %v1325_v27 = vld [vmem:[%s5373_s9 + $0xf88] sm:$0xff]  ;;  %v1327_v28 = vld [vmem:[%s5373_s9 + $0xf98] sm:$0xff] }
 0x1d1   : > { %2205 = vmatpush1.msra.mxu1 %v1034_v29  ;;  %2129 = vmatprep.subr.mxu0 %v1001_v30  ;;  %v1324_v29 = vld [vmem:[%s5373_s9 + $0xf80] sm:$0xff] }
 0x1d2   : > { %2206 = vmatprep.subr.mxu1 %v1003_v31  ;;  %2130 = vmatpush1.msra.mxu0 %v1000_v32  ;;  %v5840_v30 = vld [vmem:[%s6903_s0] sm:$0xff]  ;;  %v1326_v31 = vld [vmem:[%s5373_s9 + $0xf90] sm:$0xff]  ;;  %v1293_v32 = vld [vmem:[%s5373_s9 + $0xe88] sm:$0xff] }
 0x1d3   : > { %2207 = vmatpush1.msra.mxu1 %v1002_v33  ;;  %2131 = vmatprep.subr.mxu0 %v969_v35  ;;  %v1295_v33 = vld [vmem:[%s5373_s9 + $0xe98] sm:$0xff]  ;;  %v1292_v35 = vld [vmem:[%s5373_s9 + $0xe80] sm:$0xff] }
 0x1d4   : > { %2208 = vmatprep.subr.mxu1 %v971_v36  ;;  %2132 = vmatpush1.msra.mxu0 %v968_v37  ;;  %v1294_v36 = vld [vmem:[%s5373_s9 + $0xe90] sm:$0xff]  ;;  %v1261_v37 = vld [vmem:[%s5373_s9 + $0xd88] sm:$0xff] }
 0x1d5   : > { %2209 = vmatpush1.msra.mxu1 %v970_v38  ;;  %2133 = vmatprep.subr.mxu0 %v937_v39  ;;  %v1263_v38 = vld [vmem:[%s5373_s9 + $0xd98] sm:$0xff]  ;;  %v1260_v39 = vld [vmem:[%s5373_s9 + $0xd80] sm:$0xff] }
 0x1d6   : > { %2210 = vmatprep.subr.mxu1 %v939_v40  ;;  %2134 = vmatpush1.msra.mxu0 %v936_v41  ;;  %v1262_v40 = vld [vmem:[%s5373_s9 + $0xd90] sm:$0xff]  ;;  %v1229_v41 = vld [vmem:[%s5373_s9 + $0xc88] sm:$0xff] }
 0x1d7   : > { %2211 = vmatpush1.msra.mxu1 %v938_v42  ;;  %2135 = vmatprep.subr.mxu0 %v905_v43  ;;  %v1231_v42 = vld [vmem:[%s5373_s9 + $0xc98] sm:$0xff]  ;;  %v1228_v43 = vld [vmem:[%s5373_s9 + $0xc80] sm:$0xff] }
 0x1d8   : > { %2212 = vmatprep.subr.mxu1 %v907_v44  ;;  %2136 = vmatpush1.msra.mxu0 %v904_v45  ;;  %v1230_v44 = vld [vmem:[%s5373_s9 + $0xc90] sm:$0xff]  ;;  %v1197_v45 = vld [vmem:[%s5373_s9 + $0xb88] sm:$0xff] }
 0x1d9   : > { %2213 = vmatpush1.msra.mxu1 %v906_v46  ;;  %2137 = vmatprep.subr.mxu0 %v873_v47  ;;  %v1199_v46 = vld [vmem:[%s5373_s9 + $0xb98] sm:$0xff]  ;;  %v1196_v47 = vld [vmem:[%s5373_s9 + $0xb80] sm:$0xff] }
 0x1da   : > { %2214 = vmatprep.subr.mxu1 %v875_v48  ;;  %2138 = vmatpush1.msra.mxu0 %v872_v49  ;;  %v1198_v48 = vld [vmem:[%s5373_s9 + $0xb90] sm:$0xff]  ;;  %v1165_v49 = vld [vmem:[%s5373_s9 + $0xa88] sm:$0xff] }
 0x1db   : > { %2215 = vmatpush1.msra.mxu1 %v874_v50  ;;  %2139 = vmatprep.subr.mxu0 %v841_v52  ;;  %v1167_v50 = vld [vmem:[%s5373_s9 + $0xa98] sm:$0xff]  ;;  %v1164_v52 = vld [vmem:[%s5373_s9 + $0xa80] sm:$0xff] }
 0x1dc   : > { %2216 = vmatprep.subr.mxu1 %v843_v53  ;;  %2140 = vmatpush1.msra.mxu0 %v840_v54  ;;  %v1166_v53 = vld [vmem:[%s5373_s9 + $0xa90] sm:$0xff]  ;;  %v1133_v54 = vld [vmem:[%s5373_s9 + $0x988] sm:$0xff] }
 0x1dd   : > { %2217 = vmatpush1.msra.mxu1 %v842_v55  ;;  %2155 = vmatprep.subr.mxu0 %v1609_v56  ;;  %v1135_v55 = vld [vmem:[%s5373_s9 + $0x998] sm:$0xff]  ;;  %v1132_v56 = vld [vmem:[%s5373_s9 + $0x980] sm:$0xff] }
 0x1de   : > { %2232 = vmatprep.subr.mxu1 %v1611_v59  ;;  %2156 = vmatpush2.msra.mxu0 %v1608_v60  ;;  %v1134_v59 = vld [vmem:[%s5373_s9 + $0x990] sm:$0xff]  ;;  %v1101_v60 = vld [vmem:[%s5373_s9 + $0x888] sm:$0xff] }
 0x1df   : > { %2233 = vmatpush2.msra.mxu1 %v1610_v62  ;;  %2157 = vmatprep.subr.mxu0 %v1577_v63  ;;  %v1103_v62 = vld [vmem:[%s5373_s9 + $0x898] sm:$0xff]  ;;  %v1100_v63 = vld [vmem:[%s5373_s9 + $0x880] sm:$0xff] }
 0x1e0   : > { %2234 = vmatprep.subr.mxu1 %v1579_v0  ;;  %2158 = vmatpush2.msra.mxu0 %v1576_v1  ;;  %v1102_v0 = vld [vmem:[%s5373_s9 + $0x890] sm:$0xff]  ;;  %v1069_v1 = vld [vmem:[%s5373_s9 + $0x788] sm:$0xff] }
 0x1e1   : > { %2235 = vmatpush2.msra.mxu1 %v1578_v34  ;;  %2159 = vmatprep.subr.mxu0 %v1545_v2  ;;  %v1071_v34 = vld [vmem:[%s5373_s9 + $0x798] sm:$0xff]  ;;  %v1068_v2 = vld [vmem:[%s5373_s9 + $0x780] sm:$0xff] }
 0x1e2   : > { %2236 = vmatprep.subr.mxu1 %v1547_v3  ;;  %2160 = vmatpush2.msra.mxu0 %v1544_v4  ;;  %v1070_v3 = vld [vmem:[%s5373_s9 + $0x790] sm:$0xff]  ;;  %v1037_v4 = vld [vmem:[%s5373_s9 + $0x688] sm:$0xff] }
 0x1e3   : > { %2237 = vmatpush2.msra.mxu1 %v1546_v5  ;;  %2161 = vmatprep.subr.mxu0 %v1513_v6  ;;  %v1039_v5 = vld [vmem:[%s5373_s9 + $0x698] sm:$0xff]  ;;  %v1036_v6 = vld [vmem:[%s5373_s9 + $0x680] sm:$0xff] }
 0x1e4   : > { %2238 = vmatprep.subr.mxu1 %v1515_v7  ;;  %2162 = vmatpush2.msra.mxu0 %v1512_v8  ;;  %v1038_v7 = vld [vmem:[%s5373_s9 + $0x690] sm:$0xff]  ;;  %v1005_v8 = vld [vmem:[%s5373_s9 + $0x588] sm:$0xff] }
 0x1e5   : > { %2239 = vmatpush2.msra.mxu1 %v1514_v9  ;;  %2163 = vmatprep.subr.mxu0 %v1481_v10  ;;  %v1007_v9 = vld [vmem:[%s5373_s9 + $0x598] sm:$0xff]  ;;  %v1004_v10 = vld [vmem:[%s5373_s9 + $0x580] sm:$0xff] }
 0x1e6   : > { %2240 = vmatprep.subr.mxu1 %v1483_v11  ;;  %2164 = vmatpush2.msra.mxu0 %v1480_v12  ;;  %v1006_v11 = vld [vmem:[%s5373_s9 + $0x590] sm:$0xff]  ;;  %v973_v12 = vld [vmem:[%s5373_s9 + $0x488] sm:$0xff] }
 0x1e7   : > { %2241 = vmatpush2.msra.mxu1 %v1482_v13  ;;  %3817 = vmatprep.mubr.msk.f32.mxu0 %vm1640_vm0, %v5569_v57  ;;  %v975_v13 = vld [vmem:[%s5373_s9 + $0x498] sm:$0xff] }
 0x1e8   : > { %3819 = vmatprep.mubr.msk.f32.mxu1 %vm1640_vm0, %v5569_v57  ;;  %2165 = vmatprep.subr.mxu0 %v1449_v14  ;;  %v1387_v57 = vld [vmem:[%s5373_s9 + $0x1178] sm:$0xff]  ;;  %v972_v14 = vld [vmem:[%s5373_s9 + $0x480] sm:$0xff] }
 0x1e9   : > { %2242 = vmatprep.subr.mxu1 %v1451_v15  ;;  %2026 = vmatmul.mubr.f32.gmra.mxu0 %v5576_v61  ;;  %v974_v15 = vld [vmem:[%s5373_s9 + $0x490] sm:$0xff] }
 0x1ea   : > { %2103 = vmatmul.mubr.f32.gmra.mxu1 %v5576_v61  ;;  %2166 = vmatpush2.msra.mxu0 %v1448_v16  ;;  %v1354_v61 = vld [vmem:[%s5373_s9 + $0x1070] sm:$0xff]  ;;  %v941_v16 = vld [vmem:[%s5373_s9 + $0x388] sm:$0xff] }
 0x1eb   : > { %2243 = vmatpush2.msra.mxu1 %v1450_v17  ;;  %2167 = vmatprep.subr.mxu0 %v1417_v18  ;;  %v943_v17 = vld [vmem:[%s5373_s9 + $0x398] sm:$0xff]  ;;  %v940_v18 = vld [vmem:[%s5373_s9 + $0x380] sm:$0xff] }
 0x1ec   : > { %2244 = vmatprep.subr.mxu1 %v1419_v19  ;;  %2168 = vmatpush2.msra.mxu0 %v1416_v58  ;;  %v942_v19 = vld [vmem:[%s5373_s9 + $0x390] sm:$0xff]  ;;  %v909_v58 = vld [vmem:[%s5373_s9 + $0x288] sm:$0xff] }
 0x1ed   : > { %2245 = vmatpush2.msra.mxu1 %v1418_v20  ;;  %2169 = vmatprep.subr.mxu0 %v1385_v21  ;;  %v911_v20 = vld [vmem:[%s5373_s9 + $0x298] sm:$0xff]  ;;  %v908_v21 = vld [vmem:[%s5373_s9 + $0x280] sm:$0xff] }
 0x1ee   : > { %2246 = vmatprep.subr.mxu1 %v1387_v57  ;;  %2170 = vmatpush2.msra.mxu0 %v1384_v22  ;;  %v910_v57 = vld [vmem:[%s5373_s9 + $0x290] sm:$0xff]  ;;  %v877_v22 = vld [vmem:[%s5373_s9 + $0x188] sm:$0xff] }
 0x1ef   : > { %2247 = vmatpush2.msra.mxu1 %v1386_v23  ;;  %2171 = vmatprep.subr.mxu0 %v1353_v24  ;;  %v879_v23 = vld [vmem:[%s5373_s9 + $0x198] sm:$0xff]  ;;  %v876_v24 = vld [vmem:[%s5373_s9 + $0x180] sm:$0xff] }
 0x1f0   : > { %2248 = vmatprep.subr.mxu1 %v1355_v25  ;;  %2172 = vmatpush2.msra.mxu0 %v1352_v26  ;;  %v878_v25 = vld [vmem:[%s5373_s9 + $0x190] sm:$0xff]  ;;  %v845_v26 = vld [vmem:[%s5373_s9 + $0x88] sm:$0xff] }
 0x1f1   : > { %3820 = vmatprep.mubr.msk.f32.mxu0 %vm1640_vm0, %v5713_v51  ;;  %2249 = vmatpush2.msra.mxu1 %v1354_v61  ;;  %v5902_v61 = vpop.permute.xlu0 %1632 }
 0x1f2   : > { %3822 = vmatprep.mubr.msk.f32.mxu1 %vm1640_vm0, %v5713_v51  ;;  %2174 = vmatmul.mubr.f32.vlgmr.msra.gmra.mxu0 %v5840_v30 }
 0x1f3   : > { %2251 = vmatmul.mubr.f32.vlgmr.msra.gmra.mxu1 %v5840_v30  ;;  %2263 = vmatprep.subr.mxu0 %v1325_v27  ;;  %v847_v27 = vld [vmem:[%s5373_s9 + $0x98] sm:$0xff] }
 0x1f4   : > { %2340 = vmatprep.subr.mxu1 %v1327_v28  ;;  %2264 = vmatpush1.msra.mxu0 %v1324_v29  ;;  %v844_v28 = vld [vmem:[%s5373_s9 + $0x80] sm:$0xff]  ;;  %v846_v29 = vld [vmem:[%s5373_s9 + $0x90] sm:$0xff] }
 0x1f5   : > { %2341 = vmatpush1.msra.mxu1 %v1326_v31  ;;  %2265 = vmatprep.subr.mxu0 %v1293_v32  ;;  %v1613_v31 = vld [vmem:[%s5373_s9 + $0x1888] sm:$0xff] }
 0x1f6   : > { %2342 = vmatprep.subr.mxu1 %v1295_v33  ;;  %2266 = vmatpush1.msra.mxu0 %v1292_v35  ;;  %v1615_v35 = vld [vmem:[%s5373_s9 + $0x1898] sm:$0xff] }
 0x1f7   : > { %2343 = vmatpush1.msra.mxu1 %v1294_v36  ;;  %2267 = vmatprep.subr.mxu0 %v1261_v37  ;;  %v1612_v36 = vld [vmem:[%s5373_s9 + $0x1880] sm:$0xff]  ;;  %v1614_v37 = vld [vmem:[%s5373_s9 + $0x1890] sm:$0xff] }
 0x1f8   : > { %2344 = vmatprep.subr.mxu1 %v1263_v38  ;;  %2268 = vmatpush1.msra.mxu0 %v1260_v39 }
 0x1f9   : > { %2345 = vmatpush1.msra.mxu1 %v1262_v40  ;;  %2269 = vmatprep.subr.mxu0 %v1229_v41  ;;  %v1581_v40 = vld [vmem:[%s5373_s9 + $0x1788] sm:$0xff]  ;;  %v1583_v41 = vld [vmem:[%s5373_s9 + $0x1798] sm:$0xff] }
 0x1fa   : > { %2346 = vmatprep.subr.mxu1 %v1231_v42  ;;  %2270 = vmatpush1.msra.mxu0 %v1228_v43  ;;  %v1580_v42 = vld [vmem:[%s5373_s9 + $0x1780] sm:$0xff] }
 0x1fb   : > { %2347 = vmatpush1.msra.mxu1 %v1230_v44  ;;  %2271 = vmatprep.subr.mxu0 %v1197_v45 }
 0x1fc   : > { %2348 = vmatprep.subr.mxu1 %v1199_v46  ;;  %2272 = vmatpush1.msra.mxu0 %v1196_v47  ;;  %v1582_v47 = vld [vmem:[%s5373_s9 + $0x1790] sm:$0xff] }
 0x1fd   : > { %2349 = vmatpush1.msra.mxu1 %v1198_v48  ;;  %2273 = vmatprep.subr.mxu0 %v1165_v49  ;;  %v1549_v48 = vld [vmem:[%s5373_s9 + $0x1688] sm:$0xff]  ;;  %v1551_v49 = vld [vmem:[%s5373_s9 + $0x1698] sm:$0xff] }
 0x1fe   : > { %2350 = vmatprep.subr.mxu1 %v1167_v50  ;;  %2274 = vmatpush1.msra.mxu0 %v1164_v52 }
 0x1ff   : > { %2351 = vmatpush1.msra.mxu1 %v1166_v53  ;;  %2275 = vmatprep.subr.mxu0 %v1133_v54  ;;  %v1548_v53 = vld [vmem:[%s5373_s9 + $0x1680] sm:$0xff]  ;;  %v1550_v54 = vld [vmem:[%s5373_s9 + $0x1690] sm:$0xff] }
 0x200   : > { %2352 = vmatprep.subr.mxu1 %v1135_v55  ;;  %2276 = vmatpush1.msra.mxu0 %v1132_v56  ;;  %v1517_v55 = vld [vmem:[%s5373_s9 + $0x1588] sm:$0xff] }
 0x201   : > { %2353 = vmatpush1.msra.mxu1 %v1134_v59  ;;  %2277 = vmatprep.subr.mxu0 %v1101_v60 }
 0x202   : > { %2354 = vmatprep.subr.mxu1 %v1103_v62  ;;  %2278 = vmatpush1.msra.mxu0 %v1100_v63  ;;  %v1519_v63 = vld [vmem:[%s5373_s9 + $0x1598] sm:$0xff] }
 0x203   : > { %2355 = vmatpush1.msra.mxu1 %v1102_v0  ;;  %2279 = vmatprep.subr.mxu0 %v1069_v1  ;;  %v1516_v0 = vld [vmem:[%s5373_s9 + $0x1580] sm:$0xff]  ;;  %v1518_v1 = vld [vmem:[%s5373_s9 + $0x1590] sm:$0xff] }
 0x204   : > { %2356 = vmatprep.subr.mxu1 %v1071_v34  ;;  %2280 = vmatpush1.msra.mxu0 %v1068_v2  ;;  %v1485_v34 = vld [vmem:[%s5373_s9 + $0x1488] sm:$0xff] }
 0x205   : > { %2357 = vmatpush1.msra.mxu1 %v1070_v3  ;;  %2281 = vmatprep.subr.mxu0 %v1037_v4  ;;  %v1487_v4 = vld [vmem:[%s5373_s9 + $0x1498] sm:$0xff] }
 0x206   : > { %2358 = vmatprep.subr.mxu1 %v1039_v5  ;;  %2282 = vmatpush1.msra.mxu0 %v1036_v6  ;;  %v1484_v5 = vld [vmem:[%s5373_s9 + $0x1480] sm:$0xff]  ;;  %v1486_v6 = vld [vmem:[%s5373_s9 + $0x1490] sm:$0xff] }
 0x207   : > { %2359 = vmatpush1.msra.mxu1 %v1038_v7  ;;  %2283 = vmatprep.subr.mxu0 %v1005_v8  ;;  %v1453_v7 = vld [vmem:[%s5373_s9 + $0x1388] sm:$0xff]  ;;  %v1455_v8 = vld [vmem:[%s5373_s9 + $0x1398] sm:$0xff] }
 0x208   : > { %2360 = vmatprep.subr.mxu1 %v1007_v9  ;;  %2284 = vmatpush1.msra.mxu0 %v1004_v10  ;;  %v5948_v9 = vld [vmem:[%s6903_s0 + $0x18] sm:$0xff]  ;;  %v1452_v10 = vld [vmem:[%s5373_s9 + $0x1380] sm:$0xff] }
 0x209   : > { %2361 = vmatpush1.msra.mxu1 %v1006_v11  ;;  %2285 = vmatprep.subr.mxu0 %v973_v12  ;;  %v1454_v11 = vld [vmem:[%s5373_s9 + $0x1390] sm:$0xff]  ;;  %v1421_v12 = vld [vmem:[%s5373_s9 + $0x1288] sm:$0xff] }
 0x20a   : > { %2362 = vmatprep.subr.mxu1 %v975_v13  ;;  %2286 = vmatpush1.msra.mxu0 %v972_v14  ;;  %v5960_v13 = vld [vmem:[%s6903_s0 + $0x10] sm:$0xff]  ;;  %v1423_v14 = vld [vmem:[%s5373_s9 + $0x1298] sm:$0xff] }
 0x20b   : > { %2363 = vmatpush1.msra.mxu1 %v974_v15  ;;  %2287 = vmatprep.subr.mxu0 %v941_v16  ;;  %v1420_v15 = vld [vmem:[%s5373_s9 + $0x1280] sm:$0xff]  ;;  %v1422_v16 = vld [vmem:[%s5373_s9 + $0x1290] sm:$0xff] }
 0x20c   : > { %2364 = vmatprep.subr.mxu1 %v943_v17  ;;  %2288 = vmatpush1.msra.mxu0 %v940_v18  ;;  %v1389_v17 = vld [vmem:[%s5373_s9 + $0x1188] sm:$0xff]  ;;  %v1391_v18 = vld [vmem:[%s5373_s9 + $0x1198] sm:$0xff] }
 0x20d   : > { %2365 = vmatpush1.msra.mxu1 %v942_v19  ;;  %2289 = vmatprep.subr.mxu0 %v909_v58  ;;  %v1388_v19 = vld [vmem:[%s5373_s9 + $0x1180] sm:$0xff]  ;;  %v1390_v58 = vld [vmem:[%s5373_s9 + $0x1190] sm:$0xff] }
 0x20e   : > { %2366 = vmatprep.subr.mxu1 %v911_v20  ;;  %2290 = vmatpush1.msra.mxu0 %v908_v21  ;;  %v1357_v20 = vld [vmem:[%s5373_s9 + $0x1088] sm:$0xff]  ;;  %v1359_v21 = vld [vmem:[%s5373_s9 + $0x1098] sm:$0xff] }
 0x20f   : > { %2367 = vmatpush1.msra.mxu1 %v910_v57  ;;  %2291 = vmatprep.subr.mxu0 %v877_v22  ;;  %v1356_v57 = vld [vmem:[%s5373_s9 + $0x1080] sm:$0xff]  ;;  %v1358_v22 = vld [vmem:[%s5373_s9 + $0x1090] sm:$0xff] }
 0x210   : > { %2368 = vmatprep.subr.mxu1 %v879_v23  ;;  %2292 = vmatpush1.msra.mxu0 %v876_v24  ;;  %v1713_v32 = vpop.f32.mrf.mxu0  ;;  %v1790_v33 = vpop.f32.mrf.mxu1  ;;  %v1329_v23 = vld [vmem:[%s5373_s9 + $0xfa8] sm:$0xff]  ;;  %v1331_v24 = vld [vmem:[%s5373_s9 + $0xfb8] sm:$0xff] }
 0x211   : > { %2369 = vmatpush1.msra.mxu1 %v878_v25  ;;  %2293 = vmatprep.subr.mxu0 %v845_v26  ;;  %v1714_v38 = vadd.f32 %v1713_v32, %v5902_v61  ;;  %v1791_v39 = vadd.f32 %v1790_v33, %v5902_v61  ;;  %v1328_v25 = vld [vmem:[%s5373_s9 + $0xfa0] sm:$0xff]  ;;  %v1330_v26 = vld [vmem:[%s5373_s9 + $0xfb0] sm:$0xff]  ;;  %v1265_v32 = vld [vmem:[%s5373_s9 + $0xda8] sm:$0xff] }
 0x212   : > { %2370 = vmatprep.subr.mxu1 %v847_v27  ;;  %2294 = vmatpush1.msra.mxu0 %v844_v28  ;;  %v1715_v43 = vpop.f32.mrf.mxu0  ;;  %v1792_v44 = vpop.f32.mrf.mxu1  ;;  %v1297_v27 = vld [vmem:[%s5373_s9 + $0xea8] sm:$0xff]  ;;  %v1299_v28 = vld [vmem:[%s5373_s9 + $0xeb8] sm:$0xff]  ;;  %v1264_v33 = vld [vmem:[%s5373_s9 + $0xda0] sm:$0xff] }
 0x213   : > { %2371 = vmatpush1.msra.mxu1 %v846_v29  ;;  %2309 = vmatprep.subr.mxu0 %v1613_v31  ;;  %vm2879_vm1 = vcmp.gt.f32.partialorder %v1714_v38, 0.0  ;;  %v2943_v45 = vmul.f32 0.01, %v1714_v38  ;;  %vm2881_vm2 = vcmp.gt.f32.partialorder %v1791_v39, 0.0  ;;  %v2945_v46 = vmul.f32 0.01, %v1791_v39 }
 0x214   : > { %2386 = vmatprep.subr.mxu1 %v1615_v35  ;;  %2310 = vmatpush2.msra.mxu0 %v1612_v36  ;;  %v1716_v50 = vadd.f32 %v1715_v43, %v5902_v61  ;;  %v1793_v52 = vadd.f32 %v1792_v44, %v5902_v61  ;;  %v1296_v29 = vld [vmem:[%s5373_s9 + $0xea0] sm:$0xff]  ;;  %v1298_v31 = vld [vmem:[%s5373_s9 + $0xeb0] sm:$0xff]  ;;  %v1233_v36 = vld [vmem:[%s5373_s9 + $0xca8] sm:$0xff] }
 0x215   : > { %2387 = vmatpush2.msra.mxu1 %v1614_v37  ;;  %2311 = vmatprep.subr.mxu0 %v1581_v40  ;;  %v3007_v56 = vsel %vm2879_vm1, %v1714_v38, %v2943_v45  ;;  %v3009_v59 = vsel %vm2881_vm2, %v1791_v39, %v2945_v46  ;;  %v1266_v35 = vld [vmem:[%s5373_s9 + $0xdb0] sm:$0xff]  ;;  %v1235_v37 = vld [vmem:[%s5373_s9 + $0xcb8] sm:$0xff]  ;;  %v1232_v38 = vld [vmem:[%s5373_s9 + $0xca0] sm:$0xff] }
 0x216   : > { %2388 = vmatprep.subr.mxu1 %v1583_v41  ;;  %2312 = vmatpush2.msra.mxu0 %v1580_v42  ;;  %3071 = vst [vmem:[%s5930_s12] sm:$0xff] %v3007_v56  ;;  %3073 = vst [vmem:[%s5930_s12 + $0x10] sm:$0xff] %v3009_v59  ;;  %vm2880_vm3 = vcmp.gt.f32.partialorder %v1716_v50, 0.0  ;;  %v2944_v60 = vmul.f32 0.01, %v1716_v50  ;;  %vm2882_vm4 = vcmp.gt.f32.partialorder %v1793_v52, 0.0  ;;  %v1234_v39 = vld [vmem:[%s5373_s9 + $0xcb0] sm:$0xff] }
 0x217   : > { %v2946_v62 = vmul.f32 0.01, %v1793_v52  ;;  %2389 = vmatpush2.msra.mxu1 %v1582_v47  ;;  %2313 = vmatprep.subr.mxu0 %v1549_v48  ;;  %v1201_v40 = vld [vmem:[%s5373_s9 + $0xba8] sm:$0xff]  ;;  %v1203_v41 = vld [vmem:[%s5373_s9 + $0xbb8] sm:$0xff]  ;;  %v1200_v42 = vld [vmem:[%s5373_s9 + $0xba0] sm:$0xff] }
 0x218   : > { %2390 = vmatprep.subr.mxu1 %v1551_v49  ;;  %2314 = vmatpush2.msra.mxu0 %v1548_v53  ;;  %v3008_v2 = vsel %vm2880_vm3, %v1716_v50, %v2944_v60  ;;  %v1202_v43 = vld [vmem:[%s5373_s9 + $0xbb0] sm:$0xff]  ;;  %v1169_v44 = vld [vmem:[%s5373_s9 + $0xaa8] sm:$0xff]  ;;  %v1171_v45 = vld [vmem:[%s5373_s9 + $0xab8] sm:$0xff] }
 0x219   : > { %v3010_v3 = vsel %vm2882_vm4, %v1793_v52, %v2946_v62  ;;  %2391 = vmatpush2.msra.mxu1 %v1550_v54  ;;  %2315 = vmatprep.subr.mxu0 %v1517_v55  ;;  %3072 = vst [vmem:[%s5930_s12 + $0x8] sm:$0xff] %v3008_v2  ;;  %v1168_v46 = vld [vmem:[%s5373_s9 + $0xaa0] sm:$0xff]  ;;  %v1170_v47 = vld [vmem:[%s5373_s9 + $0xab0] sm:$0xff]  ;;  %v1137_v48 = vld [vmem:[%s5373_s9 + $0x9a8] sm:$0xff] }
 0x21a   : > { %3074 = vst [vmem:[%s5930_s12 + $0x18] sm:$0xff] %v3010_v3  ;;  %2392 = vmatprep.subr.mxu1 %v1519_v63  ;;  %2316 = vmatpush2.msra.mxu0 %v1516_v0  ;;  %v1139_v49 = vld [vmem:[%s5373_s9 + $0x9b8] sm:$0xff]  ;;  %v1136_v50 = vld [vmem:[%s5373_s9 + $0x9a0] sm:$0xff]  ;;  %v1138_v52 = vld [vmem:[%s5373_s9 + $0x9b0] sm:$0xff] }
 0x21b   : > { %2393 = vmatpush2.msra.mxu1 %v1518_v1  ;;  %2317 = vmatprep.subr.mxu0 %v1485_v34  ;;  %v1105_v53 = vld [vmem:[%s5373_s9 + $0x8a8] sm:$0xff]  ;;  %v1107_v54 = vld [vmem:[%s5373_s9 + $0x8b8] sm:$0xff]  ;;  %v1104_v55 = vld [vmem:[%s5373_s9 + $0x8a0] sm:$0xff] }
 0x21c   : > { %2394 = vmatprep.subr.mxu1 %v1487_v4  ;;  %2318 = vmatpush2.msra.mxu0 %v1484_v5  ;;  %v1106_v56 = vld [vmem:[%s5373_s9 + $0x8b0] sm:$0xff]  ;;  %v1073_v59 = vld [vmem:[%s5373_s9 + $0x7a8] sm:$0xff]  ;;  %v1075_v60 = vld [vmem:[%s5373_s9 + $0x7b8] sm:$0xff] }
 0x21d   : > { %2395 = vmatpush2.msra.mxu1 %v1486_v6  ;;  %3821 = vmatprep.mubr.msk.f32.mxu0 %vm1640_vm0, %v5948_v9  ;;  %v1072_v62 = vld [vmem:[%s5373_s9 + $0x7a0] sm:$0xff]  ;;  %v1074_v63 = vld [vmem:[%s5373_s9 + $0x7b0] sm:$0xff]  ;;  %v1041_v0 = vld [vmem:[%s5373_s9 + $0x6a8] sm:$0xff] }
 0x21e   : > { %3823 = vmatprep.mubr.msk.f32.mxu1 %vm1640_vm0, %v5948_v9  ;;  %2319 = vmatprep.subr.mxu0 %v1453_v7  ;;  %v1043_v1 = vld [vmem:[%s5373_s9 + $0x6b8] sm:$0xff]  ;;  %v1040_v34 = vld [vmem:[%s5373_s9 + $0x6a0] sm:$0xff]  ;;  %v1042_v2 = vld [vmem:[%s5373_s9 + $0x6b0] sm:$0xff] }
 0x21f   : > { %2396 = vmatprep.subr.mxu1 %v1455_v8  ;;  %2180 = vmatmul.mubr.f32.gmra.mxu0 %v5960_v13  ;;  %v1009_v3 = vld [vmem:[%s5373_s9 + $0x5a8] sm:$0xff]  ;;  %v1011_v4 = vld [vmem:[%s5373_s9 + $0x5b8] sm:$0xff]  ;;  %v1008_v5 = vld [vmem:[%s5373_s9 + $0x5a0] sm:$0xff] }
 0x220   : > { %2257 = vmatmul.mubr.f32.gmra.mxu1 %v5960_v13  ;;  %2320 = vmatpush2.msra.mxu0 %v1452_v10  ;;  %v1010_v6 = vld [vmem:[%s5373_s9 + $0x5b0] sm:$0xff]  ;;  %v977_v7 = vld [vmem:[%s5373_s9 + $0x4a8] sm:$0xff]  ;;  %v979_v8 = vld [vmem:[%s5373_s9 + $0x4b8] sm:$0xff] }
 0x221   : > { %2397 = vmatpush2.msra.mxu1 %v1454_v11  ;;  %2321 = vmatprep.subr.mxu0 %v1421_v12  ;;  %v976_v10 = vld [vmem:[%s5373_s9 + $0x4a0] sm:$0xff]  ;;  %v978_v11 = vld [vmem:[%s5373_s9 + $0x4b0] sm:$0xff]  ;;  %v945_v12 = vld [vmem:[%s5373_s9 + $0x3a8] sm:$0xff] }
 0x222   : > { %2398 = vmatprep.subr.mxu1 %v1423_v14  ;;  %2322 = vmatpush2.msra.mxu0 %v1420_v15  ;;  %v947_v14 = vld [vmem:[%s5373_s9 + $0x3b8] sm:$0xff]  ;;  %v944_v15 = vld [vmem:[%s5373_s9 + $0x3a0] sm:$0xff] }
 0x223   : > { %2399 = vmatpush2.msra.mxu1 %v1422_v16  ;;  %2323 = vmatprep.subr.mxu0 %v1389_v17  ;;  %v946_v16 = vld [vmem:[%s5373_s9 + $0x3b0] sm:$0xff]  ;;  %v913_v17 = vld [vmem:[%s5373_s9 + $0x2a8] sm:$0xff] }
 0x224   : > { %2400 = vmatprep.subr.mxu1 %v1391_v18  ;;  %2324 = vmatpush2.msra.mxu0 %v1388_v19  ;;  %v915_v19 = vld [vmem:[%s5373_s9 + $0x2b8] sm:$0xff] }
 0x225   : > { %2401 = vmatpush2.msra.mxu1 %v1390_v58  ;;  %2325 = vmatprep.subr.mxu0 %v1357_v20  ;;  %v912_v58 = vld [vmem:[%s5373_s9 + $0x2a0] sm:$0xff] }
 0x226   : > { %2402 = vmatprep.subr.mxu1 %v1359_v21  ;;  %2326 = vmatpush2.msra.mxu0 %v1356_v57  ;;  %v914_v21 = vld [vmem:[%s5373_s9 + $0x2b0] sm:$0xff]  ;;  %v881_v57 = vld [vmem:[%s5373_s9 + $0x1a8] sm:$0xff] }
 0x227   : > { %3824 = vmatprep.mubr.msk.f32.mxu0 %vm1640_vm0, %v5713_v51  ;;  %2403 = vmatpush2.msra.mxu1 %v1358_v22  ;;  %v883_v22 = vld [vmem:[%s5373_s9 + $0x1b8] sm:$0xff] }
 0x228   : > { %3826 = vmatprep.mubr.msk.f32.mxu1 %vm1640_vm0, %v5713_v51  ;;  %2328 = vmatmul.mubr.f32.vlgmr.msra.gmra.mxu0 %v5840_v30  ;;  %v1267_v51 = vld [vmem:[%s5373_s9 + $0xdb8] sm:$0xff] }
 0x229   : > { %2405 = vmatmul.mubr.f32.vlgmr.msra.gmra.mxu1 %v5840_v30  ;;  %2417 = vmatprep.subr.mxu0 %v1329_v23  ;;  %v880_v23 = vld [vmem:[%s5373_s9 + $0x1a0] sm:$0xff] }
 0x22a   : > { %2494 = vmatprep.subr.mxu1 %v1331_v24  ;;  %2418 = vmatpush1.msra.mxu0 %v1328_v25  ;;  %v882_v24 = vld [vmem:[%s5373_s9 + $0x1b0] sm:$0xff]  ;;  %v849_v25 = vld [vmem:[%s5373_s9 + $0xa8] sm:$0xff] }
 0x22b   : > { %2495 = vmatpush1.msra.mxu1 %v1330_v26  ;;  %2419 = vmatprep.subr.mxu0 %v1297_v27  ;;  %v851_v27 = vld [vmem:[%s5373_s9 + $0xb8] sm:$0xff] }
 0x22c   : > { %2496 = vmatprep.subr.mxu1 %v1299_v28  ;;  %2420 = vmatpush1.msra.mxu0 %v1296_v29  ;;  %v848_v28 = vld [vmem:[%s5373_s9 + $0xa0] sm:$0xff]  ;;  %v850_v29 = vld [vmem:[%s5373_s9 + $0xb0] sm:$0xff] }
 0x22d   : > { %2497 = vmatpush1.msra.mxu1 %v1298_v31  ;;  %2421 = vmatprep.subr.mxu0 %v1265_v32  ;;  %v1617_v32 = vld [vmem:[%s5373_s9 + $0x18a8] sm:$0xff] }
 0x22e   : > { %2498 = vmatprep.subr.mxu1 %v1267_v51  ;;  %2422 = vmatpush1.msra.mxu0 %v1264_v33  ;;  %v1619_v51 = vld [vmem:[%s5373_s9 + $0x18b8] sm:$0xff]  ;;  %v1616_v33 = vld [vmem:[%s5373_s9 + $0x18a0] sm:$0xff] }
 0x22f   : > { %2499 = vmatpush1.msra.mxu1 %v1266_v35  ;;  %2423 = vmatprep.subr.mxu0 %v1233_v36 }
 0x230   : > { %2500 = vmatprep.subr.mxu1 %v1235_v37  ;;  %2424 = vmatpush1.msra.mxu0 %v1232_v38  ;;  %v1618_v37 = vld [vmem:[%s5373_s9 + $0x18b0] sm:$0xff]  ;;  %v1585_v38 = vld [vmem:[%s5373_s9 + $0x17a8] sm:$0xff] }
 0x231   : > { %2501 = vmatpush1.msra.mxu1 %v1234_v39  ;;  %2425 = vmatprep.subr.mxu0 %v1201_v40  ;;  %v1587_v39 = vld [vmem:[%s5373_s9 + $0x17b8] sm:$0xff] }
 0x232   : > { %2502 = vmatprep.subr.mxu1 %v1203_v41  ;;  %2426 = vmatpush1.msra.mxu0 %v1200_v42 }
 0x233   : > { %2503 = vmatpush1.msra.mxu1 %v1202_v43  ;;  %2427 = vmatprep.subr.mxu0 %v1169_v44  ;;  %v1584_v44 = vld [vmem:[%s5373_s9 + $0x17a0] sm:$0xff] }
 0x234   : > { %2504 = vmatprep.subr.mxu1 %v1171_v45  ;;  %2428 = vmatpush1.msra.mxu0 %v1168_v46  ;;  %v1586_v45 = vld [vmem:[%s5373_s9 + $0x17b0] sm:$0xff]  ;;  %v1553_v46 = vld [vmem:[%s5373_s9 + $0x16a8] sm:$0xff] }
 0x235   : > { %2505 = vmatpush1.msra.mxu1 %v1170_v47  ;;  %2429 = vmatprep.subr.mxu0 %v1137_v48 }
 0x236   : > { %2506 = vmatprep.subr.mxu1 %v1139_v49  ;;  %2430 = vmatpush1.msra.mxu0 %v1136_v50 }
 0x237   : > { %2507 = vmatpush1.msra.mxu1 %v1138_v52  ;;  %2431 = vmatprep.subr.mxu0 %v1105_v53 }
 0x238   : > { %2508 = vmatprep.subr.mxu1 %v1107_v54  ;;  %2432 = vmatpush1.msra.mxu0 %v1104_v55 }
 0x239   : > { %2509 = vmatpush1.msra.mxu1 %v1106_v56  ;;  %2433 = vmatprep.subr.mxu0 %v1073_v59  ;;  %v1555_v59 = vld [vmem:[%s5373_s9 + $0x16b8] sm:$0xff] }
 0x23a   : > { %2510 = vmatprep.subr.mxu1 %v1075_v60  ;;  %2434 = vmatpush1.msra.mxu0 %v1072_v62 }
 0x23b   : > { %2511 = vmatpush1.msra.mxu1 %v1074_v63  ;;  %2435 = vmatprep.subr.mxu0 %v1041_v0  ;;  %v1552_v63 = vld [vmem:[%s5373_s9 + $0x16a0] sm:$0xff] }
 0x23c   : > { %2512 = vmatprep.subr.mxu1 %v1043_v1  ;;  %2436 = vmatpush1.msra.mxu0 %v1040_v34 }
 0x23d   : > { %2513 = vmatpush1.msra.mxu1 %v1042_v2  ;;  %2437 = vmatprep.subr.mxu0 %v1009_v3  ;;  %v1719_v18 = vpop.f32.mrf.mxu0  ;;  %v1796_v20 = vpop.f32.mrf.mxu1  ;;  %v1554_v2 = vld [vmem:[%s5373_s9 + $0x16b0] sm:$0xff]  ;;  %v1521_v3 = vld [vmem:[%s5373_s9 + $0x15a8] sm:$0xff] }
 0x23e   : > { %2514 = vmatprep.subr.mxu1 %v1011_v4  ;;  %2438 = vmatpush1.msra.mxu0 %v1008_v5  ;;  %v1523_v5 = vld [vmem:[%s5373_s9 + $0x15b8] sm:$0xff] }
 0x23f   : > { %2515 = vmatpush1.msra.mxu1 %v1010_v6  ;;  %2439 = vmatprep.subr.mxu0 %v977_v7  ;;  %v1721_v26 = vpop.f32.mrf.mxu0  ;;  %v1798_v31 = vpop.f32.mrf.mxu1  ;;  %v1520_v6 = vld [vmem:[%s5373_s9 + $0x15a0] sm:$0xff]  ;;  %v1522_v7 = vld [vmem:[%s5373_s9 + $0x15b0] sm:$0xff] }
 0x240   : > { %2516 = vmatprep.subr.mxu1 %v979_v8  ;;  %2440 = vmatpush1.msra.mxu0 %v976_v10 }
 0x241   : > { %2517 = vmatpush1.msra.mxu1 %v978_v11  ;;  %2441 = vmatprep.subr.mxu0 %v945_v12  ;;  %v1489_v12 = vld [vmem:[%s5373_s9 + $0x14a8] sm:$0xff] }
 0x242   : > { %2518 = vmatprep.subr.mxu1 %v947_v14  ;;  %2442 = vmatpush1.msra.mxu0 %v944_v15  ;;  %v1491_v14 = vld [vmem:[%s5373_s9 + $0x14b8] sm:$0xff]  ;;  %v1488_v15 = vld [vmem:[%s5373_s9 + $0x14a0] sm:$0xff] }
 0x243   : > { %2519 = vmatpush1.msra.mxu1 %v946_v16  ;;  %2443 = vmatprep.subr.mxu0 %v913_v17 }
 0x244   : > { %2520 = vmatprep.subr.mxu1 %v915_v19  ;;  %2444 = vmatpush1.msra.mxu0 %v912_v58  ;;  %v1490_v19 = vld [vmem:[%s5373_s9 + $0x14b0] sm:$0xff]  ;;  %v1457_v58 = vld [vmem:[%s5373_s9 + $0x13a8] sm:$0xff] }
 0x245   : > { %2521 = vmatpush1.msra.mxu1 %v914_v21  ;;  %2445 = vmatprep.subr.mxu0 %v881_v57  ;;  %v1459_v57 = vld [vmem:[%s5373_s9 + $0x13b8] sm:$0xff] }
 0x246   : > { %2522 = vmatprep.subr.mxu1 %v883_v22  ;;  %2446 = vmatpush1.msra.mxu0 %v880_v23  ;;  %v6048_v35 = vpop.permute.xlu0 %1637  ;;  %v1867_v36 = vpop.f32.mrf.mxu0  ;;  %v1456_v22 = vld [vmem:[%s5373_s9 + $0x13a0] sm:$0xff]  ;;  %v1458_v23 = vld [vmem:[%s5373_s9 + $0x13b0] sm:$0xff] }
 0x247   : > { %2523 = vmatpush1.msra.mxu1 %v882_v24  ;;  %2447 = vmatprep.subr.mxu0 %v849_v25  ;;  %v1720_v40 = vadd.f32 %v1719_v18, %v6048_v35  ;;  %v1797_v41 = vadd.f32 %v1796_v20, %v6048_v35  ;;  %v1722_v42 = vadd.f32 %v1721_v26, %v6048_v35  ;;  %v1944_v43 = vpop.f32.mrf.mxu1  ;;  %v1425_v24 = vld [vmem:[%s5373_s9 + $0x12a8] sm:$0xff]  ;;  %v1427_v25 = vld [vmem:[%s5373_s9 + $0x12b8] sm:$0xff]  ;;  %v1424_v26 = vld [vmem:[%s5373_s9 + $0x12a0] sm:$0xff] }
 0x248   : > { %2524 = vmatprep.subr.mxu1 %v851_v27  ;;  %2448 = vmatpush1.msra.mxu0 %v848_v28  ;;  %v1799_v47 = vadd.f32 %v1798_v31, %v6048_v35  ;;  %v1868_v48 = vadd.f32 %v1867_v36, %v5902_v61  ;;  %v1945_v49 = vadd.f32 %v1944_v43, %v5902_v61  ;;  %v1869_v55 = vpop.f32.mrf.mxu0  ;;  %v1426_v27 = vld [vmem:[%s5373_s9 + $0x12b0] sm:$0xff]  ;;  %v1393_v28 = vld [vmem:[%s5373_s9 + $0x11a8] sm:$0xff]  ;;  %v1300_v43 = vld [vmem:[%s5373_s9 + $0xec0] sm:$0xff] }
 0x249   : > { %2525 = vmatpush1.msra.mxu1 %v850_v29  ;;  %2463 = vmatprep.subr.mxu0 %v1617_v32  ;;  %vm2911_vm5 = vcmp.gt.f32.partialorder %v1720_v40, 0.0  ;;  %vm2913_vm6 = vcmp.gt.f32.partialorder %v1797_v41, 0.0  ;;  %v2975_v50 = vmul.f32 0.01, %v1720_v40  ;;  %v2977_v52 = vmul.f32 0.01, %v1797_v41  ;;  %v1946_v56 = vpop.f32.mrf.mxu1 }
 0x24a   : > { %2540 = vmatprep.subr.mxu1 %v1619_v51  ;;  %2464 = vmatpush2.msra.mxu0 %v1616_v33  ;;  %vm2912_vm7 = vcmp.gt.f32.partialorder %v1722_v42, 0.0  ;;  %v2976_v53 = vmul.f32 0.01, %v1722_v42  ;;  %vm2914_vm8 = vcmp.gt.f32.partialorder %v1799_v47, 0.0  ;;  %v2978_v54 = vmul.f32 0.01, %v1799_v47 }
 0x24b   : > { %2541 = vmatpush2.msra.mxu1 %v1618_v37  ;;  %2465 = vmatprep.subr.mxu0 %v1585_v38  ;;  %v3039_v60 = vsel %vm2911_vm5, %v1720_v40, %v2975_v50  ;;  %v3041_v62 = vsel %vm2913_vm6, %v1797_v41, %v2977_v52  ;;  %vm2883_vm9 = vcmp.gt.f32.partialorder %v1868_v48, 0.0  ;;  %v2947_v0 = vmul.f32 0.01, %v1868_v48  ;;  %v1392_v29 = vld [vmem:[%s5373_s9 + $0x11a0] sm:$0xff]  ;;  %v1394_v31 = vld [vmem:[%s5373_s9 + $0x11b0] sm:$0xff]  ;;  %v1361_v32 = vld [vmem:[%s5373_s9 + $0x10a8] sm:$0xff] }
 0x24c   : > { %2542 = vmatprep.subr.mxu1 %v1587_v39  ;;  %2466 = vmatpush2.msra.mxu0 %v1584_v44  ;;  %3103 = vst [vmem:[%s5930_s12 + $0x100] sm:$0xff] %v3039_v60  ;;  %3105 = vst [vmem:[%s5930_s12 + $0x110] sm:$0xff] %v3041_v62  ;;  %v3040_v1 = vsel %vm2912_vm7, %v1722_v42, %v2976_v53  ;;  %v3042_v34 = vsel %vm2914_vm8, %v1799_v47, %v2978_v54  ;;  %vm2885_vm10 = vcmp.gt.f32.partialorder %v1945_v49, 0.0  ;;  %v1363_v51 = vld [vmem:[%s5373_s9 + $0x10b8] sm:$0xff]  ;;  %v1360_v33 = vld [vmem:[%s5373_s9 + $0x10a0] sm:$0xff] }
 0x24d   : > { %v2949_v4 = vmul.f32 0.01, %v1945_v49  ;;  %2543 = vmatpush2.msra.mxu1 %v1586_v45  ;;  %2467 = vmatprep.subr.mxu0 %v1553_v46  ;;  %3104 = vst [vmem:[%s5930_s12 + $0x108] sm:$0xff] %v3040_v1  ;;  %3106 = vst [vmem:[%s5930_s12 + $0x118] sm:$0xff] %v3042_v34  ;;  %v3011_v8 = vsel %vm2883_vm9, %v1868_v48, %v2947_v0  ;;  %v1870_v10 = vadd.f32 %v1869_v55, %v5902_v61  ;;  %v1333_v36 = vld [vmem:[%s5373_s9 + $0xfc8] sm:$0xff]  ;;  %v1335_v38 = vld [vmem:[%s5373_s9 + $0xfd8] sm:$0xff] }
 0x24e   : > { %v1947_v11 = vadd.f32 %v1946_v56, %v5902_v61  ;;  %2544 = vmatprep.subr.mxu1 %v1555_v59  ;;  %2468 = vmatpush2.msra.mxu0 %v1552_v63  ;;  %3075 = vst [vmem:[%s5930_s12 + $0x20] sm:$0xff] %v3011_v8  ;;  %v6113_v37 = vld [vmem:[%s6903_s0 + $0x8] sm:$0xff]  ;;  %v1332_v39 = vld [vmem:[%s5373_s9 + $0xfc0] sm:$0xff]  ;;  %v1334_v40 = vld [vmem:[%s5373_s9 + $0xfd0] sm:$0xff] }
 0x24f   : > { %v3013_v16 = vsel %vm2885_vm10, %v1945_v49, %v2949_v4  ;;  %2545 = vmatpush2.msra.mxu1 %v1554_v2  ;;  %2469 = vmatprep.subr.mxu0 %v1521_v3  ;;  %vm2884_vm11 = vcmp.gt.f32.partialorder %v1870_v10, 0.0  ;;  %v2948_v17 = vmul.f32 0.01, %v1870_v10  ;;  %v1301_v41 = vld [vmem:[%s5373_s9 + $0xec8] sm:$0xff]  ;;  %v1303_v42 = vld [vmem:[%s5373_s9 + $0xed8] sm:$0xff]  ;;  %v1302_v44 = vld [vmem:[%s5373_s9 + $0xed0] sm:$0xff] }
 0x250   : > { %3077 = vst [vmem:[%s5930_s12 + $0x30] sm:$0xff] %v3013_v16  ;;  %vm2886_vm12 = vcmp.gt.f32.partialorder %v1947_v11, 0.0  ;;  %v2950_v18 = vmul.f32 0.01, %v1947_v11  ;;  %2546 = vmatprep.subr.mxu1 %v1523_v5  ;;  %2470 = vmatpush2.msra.mxu0 %v1520_v6  ;;  %v1269_v45 = vld [vmem:[%s5373_s9 + $0xdc8] sm:$0xff]  ;;  %v1271_v46 = vld [vmem:[%s5373_s9 + $0xdd8] sm:$0xff] }
 0x251   : > { %2547 = vmatpush2.msra.mxu1 %v1522_v7  ;;  %2471 = vmatprep.subr.mxu0 %v1489_v12  ;;  %v3012_v20 = vsel %vm2884_vm11, %v1870_v10, %v2948_v17  ;;  %v1268_v47 = vld [vmem:[%s5373_s9 + $0xdc0] sm:$0xff]  ;;  %v1237_v48 = vld [vmem:[%s5373_s9 + $0xcc8] sm:$0xff]  ;;  %v1239_v49 = vld [vmem:[%s5373_s9 + $0xcd8] sm:$0xff] }
 0x252   : > { %v3014_v21 = vsel %vm2886_vm12, %v1947_v11, %v2950_v18  ;;  %2548 = vmatprep.subr.mxu1 %v1491_v14  ;;  %2472 = vmatpush2.msra.mxu0 %v1488_v15  ;;  %3076 = vst [vmem:[%s5930_s12 + $0x28] sm:$0xff] %v3012_v20  ;;  %v1236_v50 = vld [vmem:[%s5373_s9 + $0xcc0] sm:$0xff]  ;;  %v1238_v52 = vld [vmem:[%s5373_s9 + $0xcd0] sm:$0xff]  ;;  %v1205_v53 = vld [vmem:[%s5373_s9 + $0xbc8] sm:$0xff] }
 0x253   : > { %3078 = vst [vmem:[%s5930_s12 + $0x38] sm:$0xff] %v3014_v21  ;;  %2549 = vmatpush2.msra.mxu1 %v1490_v19  ;;  %3825 = vmatprep.mubr.msk.f32.mxu0 %vm1640_vm0, %v5948_v9  ;;  %v1207_v54 = vld [vmem:[%s5373_s9 + $0xbd8] sm:$0xff]  ;;  %v1204_v55 = vld [vmem:[%s5373_s9 + $0xbc0] sm:$0xff]  ;;  %v1206_v56 = vld [vmem:[%s5373_s9 + $0xbd0] sm:$0xff] }
 0x254   : > { %3827 = vmatprep.mubr.msk.f32.mxu1 %vm1640_vm0, %v5948_v9  ;;  %2473 = vmatprep.subr.mxu0 %v1457_v58  ;;  %v1395_v9 = vld [vmem:[%s5373_s9 + $0x11b8] sm:$0xff]  ;;  %v1173_v59 = vld [vmem:[%s5373_s9 + $0xac8] sm:$0xff]  ;;  %v1172_v62 = vld [vmem:[%s5373_s9 + $0xac0] sm:$0xff] }
 0x255   : > { %2550 = vmatprep.subr.mxu1 %v1459_v57  ;;  %2334 = vmatmul.mubr.f32.gmra.mxu0 %v5960_v13  ;;  %v1175_v60 = vld [vmem:[%s5373_s9 + $0xad8] sm:$0xff]  ;;  %v1174_v63 = vld [vmem:[%s5373_s9 + $0xad0] sm:$0xff]  ;;  %v1141_v0 = vld [vmem:[%s5373_s9 + $0x9c8] sm:$0xff] }
 0x256   : > { %2411 = vmatmul.mubr.f32.gmra.mxu1 %v5960_v13  ;;  %2474 = vmatpush2.msra.mxu0 %v1456_v22  ;;  %v1362_v13 = vld [vmem:[%s5373_s9 + $0x10b0] sm:$0xff]  ;;  %v1143_v1 = vld [vmem:[%s5373_s9 + $0x9d8] sm:$0xff]  ;;  %v1140_v34 = vld [vmem:[%s5373_s9 + $0x9c0] sm:$0xff] }
 0x257   : > { %2551 = vmatpush2.msra.mxu1 %v1458_v23  ;;  %2475 = vmatprep.subr.mxu0 %v1425_v24  ;;  %v1142_v2 = vld [vmem:[%s5373_s9 + $0x9d0] sm:$0xff]  ;;  %v1109_v3 = vld [vmem:[%s5373_s9 + $0x8c8] sm:$0xff]  ;;  %v1111_v4 = vld [vmem:[%s5373_s9 + $0x8d8] sm:$0xff] }
 0x258   : > { %2552 = vmatprep.subr.mxu1 %v1427_v25  ;;  %2476 = vmatpush2.msra.mxu0 %v1424_v26  ;;  %v1108_v5 = vld [vmem:[%s5373_s9 + $0x8c0] sm:$0xff]  ;;  %v1110_v6 = vld [vmem:[%s5373_s9 + $0x8d0] sm:$0xff]  ;;  %v1077_v7 = vld [vmem:[%s5373_s9 + $0x7c8] sm:$0xff] }
 0x259   : > { %2553 = vmatpush2.msra.mxu1 %v1426_v27  ;;  %2477 = vmatprep.subr.mxu0 %v1393_v28  ;;  %v1079_v8 = vld [vmem:[%s5373_s9 + $0x7d8] sm:$0xff]  ;;  %v1076_v10 = vld [vmem:[%s5373_s9 + $0x7c0] sm:$0xff]  ;;  %v1078_v11 = vld [vmem:[%s5373_s9 + $0x7d0] sm:$0xff] }
 0x25a   : > { %2554 = vmatprep.subr.mxu1 %v1395_v9  ;;  %2478 = vmatpush2.msra.mxu0 %v1392_v29  ;;  %v1045_v12 = vld [vmem:[%s5373_s9 + $0x6c8] sm:$0xff]  ;;  %v1047_v14 = vld [vmem:[%s5373_s9 + $0x6d8] sm:$0xff]  ;;  %v1044_v15 = vld [vmem:[%s5373_s9 + $0x6c0] sm:$0xff] }
 0x25b   : > { %2555 = vmatpush2.msra.mxu1 %v1394_v31  ;;  %2479 = vmatprep.subr.mxu0 %v1361_v32  ;;  %v1046_v16 = vld [vmem:[%s5373_s9 + $0x6d0] sm:$0xff]  ;;  %v1013_v17 = vld [vmem:[%s5373_s9 + $0x5c8] sm:$0xff]  ;;  %v1015_v18 = vld [vmem:[%s5373_s9 + $0x5d8] sm:$0xff] }
 0x25c   : > { %2556 = vmatprep.subr.mxu1 %v1363_v51  ;;  %2480 = vmatpush2.msra.mxu0 %v1360_v33  ;;  %v1012_v19 = vld [vmem:[%s5373_s9 + $0x5c0] sm:$0xff]  ;;  %v1014_v58 = vld [vmem:[%s5373_s9 + $0x5d0] sm:$0xff]  ;;  %v981_v20 = vld [vmem:[%s5373_s9 + $0x4c8] sm:$0xff] }
 0x25d   : > { %3828 = vmatprep.mubr.msk.f32.mxu0 %vm1640_vm0, %v6113_v37  ;;  %2557 = vmatpush2.msra.mxu1 %v1362_v13  ;;  %v983_v21 = vld [vmem:[%s5373_s9 + $0x4d8] sm:$0xff]  ;;  %v980_v57 = vld [vmem:[%s5373_s9 + $0x4c0] sm:$0xff]  ;;  %v982_v24 = vld [vmem:[%s5373_s9 + $0x4d0] sm:$0xff] }
 0x25e   : > { %3830 = vmatprep.mubr.msk.f32.mxu1 %vm1640_vm0, %v6113_v37  ;;  %2482 = vmatmul.mubr.f32.vlgmr.msra.gmra.mxu0 %v5840_v30  ;;  %v949_v25 = vld [vmem:[%s5373_s9 + $0x3c8] sm:$0xff]  ;;  %v951_v26 = vld [vmem:[%s5373_s9 + $0x3d8] sm:$0xff]  ;;  %v948_v9 = vld [vmem:[%s5373_s9 + $0x3c0] sm:$0xff] }
 0x25f   : > { %2559 = vmatmul.mubr.f32.vlgmr.msra.gmra.mxu1 %v5840_v30  ;;  %2571 = vmatprep.subr.mxu0 %v1333_v36  ;;  %v1270_v30 = vld [vmem:[%s5373_s9 + $0xdd0] sm:$0xff]  ;;  %v917_v31 = vld [vmem:[%s5373_s9 + $0x2c8] sm:$0xff]  ;;  %v919_v36 = vld [vmem:[%s5373_s9 + $0x2d8] sm:$0xff] }
 0x260   : > { %2648 = vmatprep.subr.mxu1 %v1335_v38  ;;  %2572 = vmatpush1.msra.mxu0 %v1332_v39  ;;  %v950_v29 = vld [vmem:[%s5373_s9 + $0x3d0] sm:$0xff]  ;;  %v916_v38 = vld [vmem:[%s5373_s9 + $0x2c0] sm:$0xff] }
 0x261   : > { %2649 = vmatpush1.msra.mxu1 %v1334_v40  ;;  %2573 = vmatprep.subr.mxu0 %v1301_v41  ;;  %v918_v39 = vld [vmem:[%s5373_s9 + $0x2d0] sm:$0xff] }
 0x262   : > { %2650 = vmatprep.subr.mxu1 %v1303_v42  ;;  %2574 = vmatpush1.msra.mxu0 %v1300_v43  ;;  %v885_v42 = vld [vmem:[%s5373_s9 + $0x1c8] sm:$0xff]  ;;  %v887_v43 = vld [vmem:[%s5373_s9 + $0x1d8] sm:$0xff] }
 0x263   : > { %2651 = vmatpush1.msra.mxu1 %v1302_v44  ;;  %2575 = vmatprep.subr.mxu0 %v1269_v45  ;;  %v884_v44 = vld [vmem:[%s5373_s9 + $0x1c0] sm:$0xff] }
 0x264   : > { %2652 = vmatprep.subr.mxu1 %v1271_v46  ;;  %2576 = vmatpush1.msra.mxu0 %v1268_v47 }
 0x265   : > { %2653 = vmatpush1.msra.mxu1 %v1270_v30  ;;  %2577 = vmatprep.subr.mxu0 %v1237_v48  ;;  %v886_v48 = vld [vmem:[%s5373_s9 + $0x1d0] sm:$0xff] }
 0x266   : > { %2654 = vmatprep.subr.mxu1 %v1239_v49  ;;  %2578 = vmatpush1.msra.mxu0 %v1236_v50  ;;  %v853_v49 = vld [vmem:[%s5373_s9 + $0xc8] sm:$0xff]  ;;  %v855_v50 = vld [vmem:[%s5373_s9 + $0xd8] sm:$0xff] }
 0x267   : > { %2655 = vmatpush1.msra.mxu1 %v1238_v52  ;;  %2579 = vmatprep.subr.mxu0 %v1205_v53  ;;  %v852_v52 = vld [vmem:[%s5373_s9 + $0xc0] sm:$0xff] }
 0x268   : > { %2656 = vmatprep.subr.mxu1 %v1207_v54  ;;  %2580 = vmatpush1.msra.mxu0 %v1204_v55  ;;  %v854_v55 = vld [vmem:[%s5373_s9 + $0xd0] sm:$0xff] }
 0x269   : > { %2657 = vmatpush1.msra.mxu1 %v1206_v56  ;;  %2581 = vmatprep.subr.mxu0 %v1173_v59  ;;  %v1621_v56 = vld [vmem:[%s5373_s9 + $0x18c8] sm:$0xff] }
 0x26a   : > { %2658 = vmatprep.subr.mxu1 %v1175_v60  ;;  %2582 = vmatpush1.msra.mxu0 %v1172_v62  ;;  %v1623_v62 = vld [vmem:[%s5373_s9 + $0x18d8] sm:$0xff] }
 0x26b   : > { %2659 = vmatpush1.msra.mxu1 %v1174_v63  ;;  %2583 = vmatprep.subr.mxu0 %v1141_v0  ;;  %v1620_v63 = vld [vmem:[%s5373_s9 + $0x18c0] sm:$0xff]  ;;  %v1622_v0 = vld [vmem:[%s5373_s9 + $0x18d0] sm:$0xff] }
 0x26c   : > { %2660 = vmatprep.subr.mxu1 %v1143_v1  ;;  %2584 = vmatpush1.msra.mxu0 %v1140_v34 }
 0x26d   : > { %2661 = vmatpush1.msra.mxu1 %v1142_v2  ;;  %2585 = vmatprep.subr.mxu0 %v1109_v3  ;;  %v1589_v2 = vld [vmem:[%s5373_s9 + $0x17c8] sm:$0xff]  ;;  %v1591_v3 = vld [vmem:[%s5373_s9 + $0x17d8] sm:$0xff] }
 0x26e   : > { %2662 = vmatprep.subr.mxu1 %v1111_v4  ;;  %2586 = vmatpush1.msra.mxu0 %v1108_v5  ;;  %v1588_v4 = vld [vmem:[%s5373_s9 + $0x17c0] sm:$0xff] }
 0x26f   : > { %2663 = vmatpush1.msra.mxu1 %v1110_v6  ;;  %2587 = vmatprep.subr.mxu0 %v1077_v7 }
 0x270   : > { %2664 = vmatprep.subr.mxu1 %v1079_v8  ;;  %2588 = vmatpush1.msra.mxu0 %v1076_v10  ;;  %v1590_v10 = vld [vmem:[%s5373_s9 + $0x17d0] sm:$0xff] }
 0x271   : > { %2665 = vmatpush1.msra.mxu1 %v1078_v11  ;;  %2589 = vmatprep.subr.mxu0 %v1045_v12  ;;  %v1557_v11 = vld [vmem:[%s5373_s9 + $0x16c8] sm:$0xff]  ;;  %v1559_v12 = vld [vmem:[%s5373_s9 + $0x16d8] sm:$0xff] }
 0x272   : > { %2666 = vmatprep.subr.mxu1 %v1047_v14  ;;  %2590 = vmatpush1.msra.mxu0 %v1044_v15 }
 0x273   : > { %2667 = vmatpush1.msra.mxu1 %v1046_v16  ;;  %2591 = vmatprep.subr.mxu0 %v1013_v17  ;;  %v1873_v22 = vpop.f32.mrf.mxu0  ;;  %v1950_v23 = vpop.f32.mrf.mxu1  ;;  %v1556_v16 = vld [vmem:[%s5373_s9 + $0x16c0] sm:$0xff]  ;;  %v1558_v17 = vld [vmem:[%s5373_s9 + $0x16d0] sm:$0xff] }
 0x274   : > { %2668 = vmatprep.subr.mxu1 %v1015_v18  ;;  %2592 = vmatpush1.msra.mxu0 %v1012_v19  ;;  %v1874_v27 = vadd.f32 %v1873_v22, %v6048_v35  ;;  %v1951_v28 = vadd.f32 %v1950_v23, %v6048_v35  ;;  %v1525_v18 = vld [vmem:[%s5373_s9 + $0x15c8] sm:$0xff]  ;;  %v1524_v22 = vld [vmem:[%s5373_s9 + $0x15c0] sm:$0xff]  ;;  %v1526_v23 = vld [vmem:[%s5373_s9 + $0x15d0] sm:$0xff] }
 0x275   : > { %2669 = vmatpush1.msra.mxu1 %v1014_v58  ;;  %2593 = vmatprep.subr.mxu0 %v981_v20  ;;  %v1875_v32 = vpop.f32.mrf.mxu0  ;;  %v1952_v51 = vpop.f32.mrf.mxu1 }
 0x276   : > { %2670 = vmatprep.subr.mxu1 %v983_v21  ;;  %2594 = vmatpush1.msra.mxu0 %v980_v57  ;;  %vm2915_vm13 = vcmp.gt.f32.partialorder %v1874_v27, 0.0  ;;  %v2979_v33 = vmul.f32 0.01, %v1874_v27  ;;  %vm2917_vm14 = vcmp.gt.f32.partialorder %v1951_v28, 0.0  ;;  %v2981_v13 = vmul.f32 0.01, %v1951_v28 }
 0x277   : > { %2671 = vmatpush1.msra.mxu1 %v982_v24  ;;  %2595 = vmatprep.subr.mxu0 %v949_v25  ;;  %v1876_v40 = vadd.f32 %v1875_v32, %v6048_v35  ;;  %v1953_v41 = vadd.f32 %v1952_v51, %v6048_v35  ;;  %v1527_v57 = vld [vmem:[%s5373_s9 + $0x15d8] sm:$0xff]  ;;  %v1493_v24 = vld [vmem:[%s5373_s9 + $0x14c8] sm:$0xff]  ;;  %v1460_v51 = vld [vmem:[%s5373_s9 + $0x13c0] sm:$0xff] }
 0x278   : > { %2672 = vmatprep.subr.mxu1 %v951_v26  ;;  %2596 = vmatpush1.msra.mxu0 %v948_v9  ;;  %v3043_v45 = vsel %vm2915_vm13, %v1874_v27, %v2979_v33  ;;  %v3045_v46 = vsel %vm2917_vm14, %v1951_v28, %v2981_v13  ;;  %v1495_v27 = vld [vmem:[%s5373_s9 + $0x14d8] sm:$0xff]  ;;  %v1492_v28 = vld [vmem:[%s5373_s9 + $0x14c0] sm:$0xff]  ;;  %v1494_v9 = vld [vmem:[%s5373_s9 + $0x14d0] sm:$0xff] }
 0x279   : > { %2673 = vmatpush1.msra.mxu1 %v950_v29  ;;  %2597 = vmatprep.subr.mxu0 %v917_v31  ;;  %3107 = vst [vmem:[%s5930_s12 + $0x120] sm:$0xff] %v3043_v45  ;;  %3109 = vst [vmem:[%s5930_s12 + $0x130] sm:$0xff] %v3045_v46  ;;  %vm2916_vm15 = vcmp.gt.f32.partialorder %v1876_v40, 0.0  ;;  %v2980_v47 = vmul.f32 0.01, %v1876_v40  ;;  %vm2918_vm1 = vcmp.gt.f32.partialorder %v1953_v41, 0.0 }
 0x27a   : > { %v2982_v30 = vmul.f32 0.01, %v1953_v41  ;;  %2674 = vmatprep.subr.mxu1 %v919_v36  ;;  %2598 = vmatpush1.msra.mxu0 %v916_v38  ;;  %v1461_v29 = vld [vmem:[%s5373_s9 + $0x13c8] sm:$0xff]  ;;  %v1463_v31 = vld [vmem:[%s5373_s9 + $0x13d8] sm:$0xff]  ;;  %v1462_v33 = vld [vmem:[%s5373_s9 + $0x13d0] sm:$0xff] }
 0x27b   : > { %2675 = vmatpush1.msra.mxu1 %v918_v39  ;;  %2599 = vmatprep.subr.mxu0 %v885_v42  ;;  %v3044_v53 = vsel %vm2916_vm15, %v1876_v40, %v2980_v47  ;;  %v6227_v32 = vld [vmem:[%s6903_s0 + $0x18] sm:$0xff]  ;;  %v1429_v13 = vld [vmem:[%s5373_s9 + $0x12c8] sm:$0xff]  ;;  %v6239_v36 = vld [vmem:[%s6903_s0 + $0x10] sm:$0xff] }
 0x27c   : > { %v3046_v54 = vsel %vm2918_vm1, %v1953_v41, %v2982_v30  ;;  %2676 = vmatprep.subr.mxu1 %v887_v43  ;;  %2600 = vmatpush1.msra.mxu0 %v884_v44  ;;  %3108 = vst [vmem:[%s5930_s12 + $0x128] sm:$0xff] %v3044_v53  ;;  %v2021_v59 = vpop.f32.mrf.mxu0  ;;  %v2098_v60 = vpop.f32.mrf.mxu1  ;;  %v1431_v38 = vld [vmem:[%s5373_s9 + $0x12d8] sm:$0xff]  ;;  %v1428_v39 = vld [vmem:[%s5373_s9 + $0x12c0] sm:$0xff]  ;;  %v1430_v40 = vld [vmem:[%s5373_s9 + $0x12d0] sm:$0xff] }
 0x27d   : > { %3110 = vst [vmem:[%s5930_s12 + $0x138] sm:$0xff] %v3046_v54  ;;  %2677 = vmatpush1.msra.mxu1 %v886_v48  ;;  %2601 = vmatprep.subr.mxu0 %v853_v49  ;;  %v2022_v1 = vadd.f32 %v2021_v59, %v5902_v61  ;;  %v2099_v34 = vadd.f32 %v2098_v60, %v5902_v61  ;;  %v1397_v41 = vld [vmem:[%s5373_s9 + $0x11c8] sm:$0xff]  ;;  %v1399_v42 = vld [vmem:[%s5373_s9 + $0x11d8] sm:$0xff]  ;;  %v1396_v43 = vld [vmem:[%s5373_s9 + $0x11c0] sm:$0xff] }
 0x27e   : > { %2678 = vmatprep.subr.mxu1 %v855_v50  ;;  %2602 = vmatpush1.msra.mxu0 %v852_v52  ;;  %v2023_v5 = vpop.f32.mrf.mxu0  ;;  %v2100_v6 = vpop.f32.mrf.mxu1  ;;  %v1398_v44 = vld [vmem:[%s5373_s9 + $0x11d0] sm:$0xff]  ;;  %v1365_v45 = vld [vmem:[%s5373_s9 + $0x10c8] sm:$0xff]  ;;  %v1367_v46 = vld [vmem:[%s5373_s9 + $0x10d8] sm:$0xff] }
 0x27f   : > { %2679 = vmatpush1.msra.mxu1 %v854_v55  ;;  %2617 = vmatprep.subr.mxu0 %v1621_v56  ;;  %vm2887_vm2 = vcmp.gt.f32.partialorder %v2022_v1, 0.0  ;;  %v2951_v7 = vmul.f32 0.01, %v2022_v1  ;;  %vm2889_vm3 = vcmp.gt.f32.partialorder %v2099_v34, 0.0  ;;  %v2953_v8 = vmul.f32 0.01, %v2099_v34 }
 0x280   : > { %2694 = vmatprep.subr.mxu1 %v1623_v62  ;;  %2618 = vmatpush2.msra.mxu0 %v1620_v63  ;;  %v2024_v14 = vadd.f32 %v2023_v5, %v5902_v61  ;;  %v2101_v15 = vadd.f32 %v2100_v6, %v5902_v61  ;;  %v1364_v47 = vld [vmem:[%s5373_s9 + $0x10c0] sm:$0xff]  ;;  %v1366_v30 = vld [vmem:[%s5373_s9 + $0x10d0] sm:$0xff]  ;;  %v1337_v48 = vld [vmem:[%s5373_s9 + $0xfe8] sm:$0xff] }
 0x281   : > { %2695 = vmatpush2.msra.mxu1 %v1622_v0  ;;  %2619 = vmatprep.subr.mxu0 %v1589_v2  ;;  %v3015_v19 = vsel %vm2887_vm2, %v2022_v1, %v2951_v7  ;;  %v3017_v58 = vsel %vm2889_vm3, %v2099_v34, %v2953_v8  ;;  %v1339_v49 = vld [vmem:[%s5373_s9 + $0xff8] sm:$0xff]  ;;  %v1336_v50 = vld [vmem:[%s5373_s9 + $0xfe0] sm:$0xff]  ;;  %v1338_v53 = vld [vmem:[%s5373_s9 + $0xff0] sm:$0xff] }
 0x282   : > { %2696 = vmatprep.subr.mxu1 %v1591_v3  ;;  %2620 = vmatpush2.msra.mxu0 %v1588_v4  ;;  %3079 = vst [vmem:[%s5930_s12 + $0x40] sm:$0xff] %v3015_v19  ;;  %3081 = vst [vmem:[%s5930_s12 + $0x50] sm:$0xff] %v3017_v58  ;;  %vm2888_vm4 = vcmp.gt.f32.partialorder %v2024_v14, 0.0  ;;  %v2952_v20 = vmul.f32 0.01, %v2024_v14  ;;  %vm2890_vm5 = vcmp.gt.f32.partialorder %v2101_v15, 0.0 }
 0x283   : > { %v2954_v21 = vmul.f32 0.01, %v2101_v15  ;;  %2697 = vmatpush2.msra.mxu1 %v1590_v10  ;;  %2621 = vmatprep.subr.mxu0 %v1557_v11  ;;  %v6264_v52 = vld [vmem:[%s6903_s0] sm:$0xff]  ;;  %v1305_v54 = vld [vmem:[%s5373_s9 + $0xee8] sm:$0xff]  ;;  %v1307_v55 = vld [vmem:[%s5373_s9 + $0xef8] sm:$0xff] }
 0x284   : > { %2698 = vmatprep.subr.mxu1 %v1559_v12  ;;  %2622 = vmatpush2.msra.mxu0 %v1556_v16  ;;  %v3016_v25 = vsel %vm2888_vm4, %v2024_v14, %v2952_v20  ;;  %v1304_v56 = vld [vmem:[%s5373_s9 + $0xee0] sm:$0xff]  ;;  %v1306_v59 = vld [vmem:[%s5373_s9 + $0xef0] sm:$0xff]  ;;  %v1273_v60 = vld [vmem:[%s5373_s9 + $0xde8] sm:$0xff] }
 0x285   : > { %v3018_v26 = vsel %vm2890_vm5, %v2101_v15, %v2954_v21  ;;  %2699 = vmatpush2.msra.mxu1 %v1558_v17  ;;  %2623 = vmatprep.subr.mxu0 %v1525_v18  ;;  %3080 = vst [vmem:[%s5930_s12 + $0x48] sm:$0xff] %v3016_v25  ;;  %v1275_v62 = vld [vmem:[%s5373_s9 + $0xdf8] sm:$0xff]  ;;  %v1272_v63 = vld [vmem:[%s5373_s9 + $0xde0] sm:$0xff]  ;;  %v1274_v0 = vld [vmem:[%s5373_s9 + $0xdf0] sm:$0xff] }
 0x286   : > { %3082 = vst [vmem:[%s5930_s12 + $0x58] sm:$0xff] %v3018_v26  ;;  %2700 = vmatprep.subr.mxu1 %v1527_v57  ;;  %2624 = vmatpush2.msra.mxu0 %v1524_v22  ;;  %v1241_v1 = vld [vmem:[%s5373_s9 + $0xce8] sm:$0xff]  ;;  %v1243_v34 = vld [vmem:[%s5373_s9 + $0xcf8] sm:$0xff]  ;;  %v1240_v2 = vld [vmem:[%s5373_s9 + $0xce0] sm:$0xff] }
 0x287   : > { %2701 = vmatpush2.msra.mxu1 %v1526_v23  ;;  %2625 = vmatprep.subr.mxu0 %v1493_v24  ;;  %v1242_v3 = vld [vmem:[%s5373_s9 + $0xcf0] sm:$0xff]  ;;  %v1209_v4 = vld [vmem:[%s5373_s9 + $0xbe8] sm:$0xff]  ;;  %v1211_v5 = vld [vmem:[%s5373_s9 + $0xbf8] sm:$0xff] }
 0x288   : > { %2702 = vmatprep.subr.mxu1 %v1495_v27  ;;  %2626 = vmatpush2.msra.mxu0 %v1492_v28  ;;  %v1208_v6 = vld [vmem:[%s5373_s9 + $0xbe0] sm:$0xff]  ;;  %v1210_v7 = vld [vmem:[%s5373_s9 + $0xbf0] sm:$0xff]  ;;  %v1177_v8 = vld [vmem:[%s5373_s9 + $0xae8] sm:$0xff] }
 0x289   : > { %2703 = vmatpush2.msra.mxu1 %v1494_v9  ;;  %3829 = vmatprep.mubr.msk.f32.mxu0 %vm1640_vm0, %v6227_v32  ;;  %v1179_v10 = vld [vmem:[%s5373_s9 + $0xaf8] sm:$0xff]  ;;  %v1176_v11 = vld [vmem:[%s5373_s9 + $0xae0] sm:$0xff]  ;;  %v1178_v12 = vld [vmem:[%s5373_s9 + $0xaf0] sm:$0xff] }
 0x28a   : > { %3831 = vmatprep.mubr.msk.f32.mxu1 %vm1640_vm0, %v6227_v32  ;;  %2627 = vmatprep.subr.mxu0 %v1461_v29  ;;  %v1145_v14 = vld [vmem:[%s5373_s9 + $0x9e8] sm:$0xff]  ;;  %v1147_v15 = vld [vmem:[%s5373_s9 + $0x9f8] sm:$0xff]  ;;  %v1144_v16 = vld [vmem:[%s5373_s9 + $0x9e0] sm:$0xff] }
 0x28b   : > { %2704 = vmatprep.subr.mxu1 %v1463_v31  ;;  %2488 = vmatmul.mubr.f32.gmra.mxu0 %v6239_v36  ;;  %v1146_v17 = vld [vmem:[%s5373_s9 + $0x9f0] sm:$0xff]  ;;  %v1113_v18 = vld [vmem:[%s5373_s9 + $0x8e8] sm:$0xff]  ;;  %v1115_v19 = vld [vmem:[%s5373_s9 + $0x8f8] sm:$0xff] }
 0x28c   : > { %2565 = vmatmul.mubr.f32.gmra.mxu1 %v6239_v36  ;;  %2628 = vmatpush2.msra.mxu0 %v1460_v51  ;;  %v1112_v58 = vld [vmem:[%s5373_s9 + $0x8e0] sm:$0xff]  ;;  %v1114_v20 = vld [vmem:[%s5373_s9 + $0x8f0] sm:$0xff]  ;;  %v1081_v21 = vld [vmem:[%s5373_s9 + $0x7e8] sm:$0xff] }
 0x28d   : > { %2705 = vmatpush2.msra.mxu1 %v1462_v33  ;;  %2629 = vmatprep.subr.mxu0 %v1429_v13  ;;  %v1083_v57 = vld [vmem:[%s5373_s9 + $0x7f8] sm:$0xff]  ;;  %v1080_v22 = vld [vmem:[%s5373_s9 + $0x7e0] sm:$0xff]  ;;  %v1082_v23 = vld [vmem:[%s5373_s9 + $0x7f0] sm:$0xff] }
 0x28e   : > { %2706 = vmatprep.subr.mxu1 %v1431_v38  ;;  %2630 = vmatpush2.msra.mxu0 %v1428_v39  ;;  %v1049_v24 = vld [vmem:[%s5373_s9 + $0x6e8] sm:$0xff]  ;;  %v1051_v25 = vld [vmem:[%s5373_s9 + $0x6f8] sm:$0xff]  ;;  %v1048_v26 = vld [vmem:[%s5373_s9 + $0x6e0] sm:$0xff] }
 0x28f   : > { %2707 = vmatpush2.msra.mxu1 %v1430_v40  ;;  %2631 = vmatprep.subr.mxu0 %v1397_v41  ;;  %v1050_v27 = vld [vmem:[%s5373_s9 + $0x6f0] sm:$0xff]  ;;  %v1017_v28 = vld [vmem:[%s5373_s9 + $0x5e8] sm:$0xff]  ;;  %v1019_v9 = vld [vmem:[%s5373_s9 + $0x5f8] sm:$0xff] }
 0x290   : > { %2708 = vmatprep.subr.mxu1 %v1399_v42  ;;  %2632 = vmatpush2.msra.mxu0 %v1396_v43  ;;  %v1016_v29 = vld [vmem:[%s5373_s9 + $0x5e0] sm:$0xff]  ;;  %v1018_v31 = vld [vmem:[%s5373_s9 + $0x5f0] sm:$0xff]  ;;  %v985_v51 = vld [vmem:[%s5373_s9 + $0x4e8] sm:$0xff] }
 0x291   : > { %2709 = vmatpush2.msra.mxu1 %v1398_v44  ;;  %2633 = vmatprep.subr.mxu0 %v1365_v45  ;;  %v987_v33 = vld [vmem:[%s5373_s9 + $0x4f8] sm:$0xff]  ;;  %v984_v13 = vld [vmem:[%s5373_s9 + $0x4e0] sm:$0xff]  ;;  %v986_v39 = vld [vmem:[%s5373_s9 + $0x4f0] sm:$0xff] }
 0x292   : > { %2710 = vmatprep.subr.mxu1 %v1367_v46  ;;  %2634 = vmatpush2.msra.mxu0 %v1364_v47  ;;  %v953_v40 = vld [vmem:[%s5373_s9 + $0x3e8] sm:$0xff]  ;;  %v955_v43 = vld [vmem:[%s5373_s9 + $0x3f8] sm:$0xff]  ;;  %v952_v44 = vld [vmem:[%s5373_s9 + $0x3e0] sm:$0xff] }
 0x293   : > { %3832 = vmatprep.mubr.msk.f32.mxu0 %vm1640_vm0, %v6113_v37  ;;  %2711 = vmatpush2.msra.mxu1 %v1366_v30  ;;  %v954_v47 = vld [vmem:[%s5373_s9 + $0x3f0] sm:$0xff]  ;;  %v921_v30 = vld [vmem:[%s5373_s9 + $0x2e8] sm:$0xff] }
 0x294   : > { %3834 = vmatprep.mubr.msk.f32.mxu1 %vm1640_vm0, %v6113_v37  ;;  %2636 = vmatmul.mubr.f32.vlgmr.msra.gmra.mxu0 %v6264_v52 }
 0x295   : > { %2713 = vmatmul.mubr.f32.vlgmr.msra.gmra.mxu1 %v6264_v52  ;;  %2725 = vmatprep.subr.mxu0 %v1337_v48 }
 0x296   : > { %2802 = vmatprep.subr.mxu1 %v1339_v49  ;;  %2726 = vmatpush1.msra.mxu0 %v1336_v50 }
 0x297   : > { %2803 = vmatpush1.msra.mxu1 %v1338_v53  ;;  %2727 = vmatprep.subr.mxu0 %v1305_v54  ;;  %v923_v53 = vld [vmem:[%s5373_s9 + $0x2f8] sm:$0xff]  ;;  %v920_v54 = vld [vmem:[%s5373_s9 + $0x2e0] sm:$0xff] }
 0x298   : > { %2804 = vmatprep.subr.mxu1 %v1307_v55  ;;  %2728 = vmatpush1.msra.mxu0 %v1304_v56 }
 0x299   : > { %2805 = vmatpush1.msra.mxu1 %v1306_v59  ;;  %2729 = vmatprep.subr.mxu0 %v1273_v60  ;;  %v922_v59 = vld [vmem:[%s5373_s9 + $0x2f0] sm:$0xff]  ;;  %v889_v60 = vld [vmem:[%s5373_s9 + $0x1e8] sm:$0xff] }
 0x29a   : > { %2806 = vmatprep.subr.mxu1 %v1275_v62  ;;  %2730 = vmatpush1.msra.mxu0 %v1272_v63 }
 0x29b   : > { %2807 = vmatpush1.msra.mxu1 %v1274_v0  ;;  %2731 = vmatprep.subr.mxu0 %v1241_v1  ;;  %v891_v0 = vld [vmem:[%s5373_s9 + $0x1f8] sm:$0xff]  ;;  %v888_v1 = vld [vmem:[%s5373_s9 + $0x1e0] sm:$0xff] }
 0x29c   : > { %2808 = vmatprep.subr.mxu1 %v1243_v34  ;;  %2732 = vmatpush1.msra.mxu0 %v1240_v2 }
 0x29d   : > { %2809 = vmatpush1.msra.mxu1 %v1242_v3  ;;  %2733 = vmatprep.subr.mxu0 %v1209_v4  ;;  %v890_v3 = vld [vmem:[%s5373_s9 + $0x1f0] sm:$0xff]  ;;  %v857_v4 = vld [vmem:[%s5373_s9 + $0xe8] sm:$0xff] }
 0x29e   : > { %2810 = vmatprep.subr.mxu1 %v1211_v5  ;;  %2734 = vmatpush1.msra.mxu0 %v1208_v6  ;;  %v859_v6 = vld [vmem:[%s5373_s9 + $0xf8] sm:$0xff] }
 0x29f   : > { %2811 = vmatpush1.msra.mxu1 %v1210_v7  ;;  %2735 = vmatprep.subr.mxu0 %v1177_v8  ;;  %v856_v7 = vld [vmem:[%s5373_s9 + $0xe0] sm:$0xff] }
 0x2a0   : > { %2812 = vmatprep.subr.mxu1 %v1179_v10  ;;  %2736 = vmatpush1.msra.mxu0 %v1176_v11  ;;  %v858_v10 = vld [vmem:[%s5373_s9 + $0xf0] sm:$0xff]  ;;  %v1625_v11 = vld [vmem:[%s5373_s9 + $0x18e8] sm:$0xff] }
 0x2a1   : > { %2813 = vmatpush1.msra.mxu1 %v1178_v12  ;;  %2737 = vmatprep.subr.mxu0 %v1145_v14  ;;  %v1627_v14 = vld [vmem:[%s5373_s9 + $0x18f8] sm:$0xff] }
 0x2a2   : > { %2814 = vmatprep.subr.mxu1 %v1147_v15  ;;  %2738 = vmatpush1.msra.mxu0 %v1144_v16  ;;  %v1624_v15 = vld [vmem:[%s5373_s9 + $0x18e0] sm:$0xff] }
 0x2a3   : > { %2815 = vmatpush1.msra.mxu1 %v1146_v17  ;;  %2739 = vmatprep.subr.mxu0 %v1113_v18  ;;  %v1626_v18 = vld [vmem:[%s5373_s9 + $0x18f0] sm:$0xff] }
 0x2a4   : > { %2816 = vmatprep.subr.mxu1 %v1115_v19  ;;  %2740 = vmatpush1.msra.mxu0 %v1112_v58  ;;  %v1593_v19 = vld [vmem:[%s5373_s9 + $0x17e8] sm:$0xff] }
 0x2a5   : > { %2817 = vmatpush1.msra.mxu1 %v1114_v20  ;;  %2741 = vmatprep.subr.mxu0 %v1081_v21  ;;  %v1595_v21 = vld [vmem:[%s5373_s9 + $0x17f8] sm:$0xff] }
 0x2a6   : > { %2818 = vmatprep.subr.mxu1 %v1083_v57  ;;  %2742 = vmatpush1.msra.mxu0 %v1080_v22  ;;  %v1592_v57 = vld [vmem:[%s5373_s9 + $0x17e0] sm:$0xff] }
 0x2a7   : > { %2819 = vmatpush1.msra.mxu1 %v1082_v23  ;;  %2743 = vmatprep.subr.mxu0 %v1049_v24 }
 0x2a8   : > { %2820 = vmatprep.subr.mxu1 %v1051_v25  ;;  %2744 = vmatpush1.msra.mxu0 %v1048_v26  ;;  %v1594_v25 = vld [vmem:[%s5373_s9 + $0x17f0] sm:$0xff]  ;;  %v1561_v26 = vld [vmem:[%s5373_s9 + $0x16e8] sm:$0xff] }
 0x2a9   : > { %2821 = vmatpush1.msra.mxu1 %v1050_v27  ;;  %2745 = vmatprep.subr.mxu0 %v1017_v28  ;;  %v2027_v38 = vpop.f32.mrf.mxu0 }
 0x2aa   : > { %2822 = vmatprep.subr.mxu1 %v1019_v9  ;;  %2746 = vmatpush1.msra.mxu0 %v1016_v29  ;;  %v2028_v41 = vadd.f32 %v2027_v38, %v6048_v35  ;;  %v2104_v42 = vpop.f32.mrf.mxu1  ;;  %v1563_v9 = vld [vmem:[%s5373_s9 + $0x16f8] sm:$0xff]  ;;  %v1560_v29 = vld [vmem:[%s5373_s9 + $0x16e0] sm:$0xff] }
 0x2ab   : > { %2823 = vmatpush1.msra.mxu1 %v1018_v31  ;;  %2747 = vmatprep.subr.mxu0 %v985_v51  ;;  %v2105_v45 = vadd.f32 %v2104_v42, %v6048_v35  ;;  %v2029_v46 = vpop.f32.mrf.mxu0 }
 0x2ac   : > { %2824 = vmatprep.subr.mxu1 %v987_v33  ;;  %2748 = vmatpush1.msra.mxu0 %v984_v13  ;;  %vm2919_vm6 = vcmp.gt.f32.partialorder %v2028_v41, 0.0  ;;  %v2983_v48 = vmul.f32 0.01, %v2028_v41  ;;  %v2030_v49 = vadd.f32 %v2029_v46, %v6048_v35  ;;  %v2106_v50 = vpop.f32.mrf.mxu1  ;;  %v1562_v33 = vld [vmem:[%s5373_s9 + $0x16f0] sm:$0xff]  ;;  %v1529_v13 = vld [vmem:[%s5373_s9 + $0x15e8] sm:$0xff]  ;;  %v1499_v46 = vld [vmem:[%s5373_s9 + $0x14f8] sm:$0xff] }
 0x2ad   : > { %2825 = vmatpush1.msra.mxu1 %v986_v39  ;;  %2749 = vmatprep.subr.mxu0 %v953_v40  ;;  %vm2921_vm7 = vcmp.gt.f32.partialorder %v2105_v45, 0.0  ;;  %v2985_v55 = vmul.f32 0.01, %v2105_v45  ;;  %v2107_v56 = vadd.f32 %v2106_v50, %v6048_v35  ;;  %v1531_v40 = vld [vmem:[%s5373_s9 + $0x15f8] sm:$0xff]  ;;  %v1464_v50 = vld [vmem:[%s5373_s9 + $0x13e0] sm:$0xff] }
 0x2ae   : > { %2826 = vmatprep.subr.mxu1 %v955_v43  ;;  %2750 = vmatpush1.msra.mxu0 %v952_v44  ;;  %v3047_v62 = vsel %vm2919_vm6, %v2028_v41, %v2983_v48  ;;  %vm2920_vm8 = vcmp.gt.f32.partialorder %v2030_v49, 0.0  ;;  %v2984_v63 = vmul.f32 0.01, %v2030_v49  ;;  %v1528_v41 = vld [vmem:[%s5373_s9 + $0x15e0] sm:$0xff]  ;;  %v1530_v43 = vld [vmem:[%s5373_s9 + $0x15f0] sm:$0xff]  ;;  %v1497_v44 = vld [vmem:[%s5373_s9 + $0x14e8] sm:$0xff] }
 0x2af   : > { %2827 = vmatpush1.msra.mxu1 %v954_v47  ;;  %2751 = vmatprep.subr.mxu0 %v921_v30  ;;  %3111 = vst [vmem:[%s5930_s12 + $0x140] sm:$0xff] %v3047_v62  ;;  %v3049_v34 = vsel %vm2921_vm7, %v2105_v45, %v2985_v55  ;;  %vm2922_vm9 = vcmp.gt.f32.partialorder %v2107_v56, 0.0  ;;  %v2986_v2 = vmul.f32 0.01, %v2107_v56  ;;  %v1496_v47 = vld [vmem:[%s5373_s9 + $0x14e0] sm:$0xff]  ;;  %v1498_v30 = vld [vmem:[%s5373_s9 + $0x14f0] sm:$0xff] }
 0x2b0   : > { %2828 = vmatprep.subr.mxu1 %v923_v53  ;;  %2752 = vmatpush1.msra.mxu0 %v920_v54  ;;  %3113 = vst [vmem:[%s5930_s12 + $0x150] sm:$0xff] %v3049_v34  ;;  %v3048_v5 = vsel %vm2920_vm8, %v2030_v49, %v2984_v63  ;;  %v1465_v48 = vld [vmem:[%s5373_s9 + $0x13e8] sm:$0xff]  ;;  %v1467_v49 = vld [vmem:[%s5373_s9 + $0x13f8] sm:$0xff]  ;;  %v1466_v53 = vld [vmem:[%s5373_s9 + $0x13f0] sm:$0xff] }
 0x2b1   : > { %2829 = vmatpush1.msra.mxu1 %v922_v59  ;;  %2753 = vmatprep.subr.mxu0 %v889_v60  ;;  %3112 = vst [vmem:[%s5930_s12 + $0x148] sm:$0xff] %v3048_v5  ;;  %v3050_v8 = vsel %vm2922_vm9, %v2107_v56, %v2986_v2  ;;  %v1433_v54 = vld [vmem:[%s5373_s9 + $0x12e8] sm:$0xff]  ;;  %v1435_v55 = vld [vmem:[%s5373_s9 + $0x12f8] sm:$0xff]  ;;  %v1432_v56 = vld [vmem:[%s5373_s9 + $0x12e0] sm:$0xff] }
 0x2b2   : > { %2830 = vmatprep.subr.mxu1 %v891_v0  ;;  %2754 = vmatpush1.msra.mxu0 %v888_v1  ;;  %3114 = vst [vmem:[%s5930_s12 + $0x158] sm:$0xff] %v3050_v8  ;;  %v2175_v12 = vpop.f32.mrf.mxu0  ;;  %v1434_v59 = vld [vmem:[%s5373_s9 + $0x12f0] sm:$0xff]  ;;  %v1401_v60 = vld [vmem:[%s5373_s9 + $0x11e8] sm:$0xff]  ;;  %v1403_v62 = vld [vmem:[%s5373_s9 + $0x11f8] sm:$0xff] }
 0x2b3   : > { %2831 = vmatpush1.msra.mxu1 %v890_v3  ;;  %2755 = vmatprep.subr.mxu0 %v857_v4  ;;  %v2176_v16 = vadd.f32 %v2175_v12, %v5902_v61  ;;  %v2252_v17 = vpop.f32.mrf.mxu1  ;;  %v1400_v63 = vld [vmem:[%s5373_s9 + $0x11e0] sm:$0xff]  ;;  %v1402_v0 = vld [vmem:[%s5373_s9 + $0x11f0] sm:$0xff]  ;;  %v1369_v1 = vld [vmem:[%s5373_s9 + $0x10e8] sm:$0xff] }
 0x2b4   : > { %2832 = vmatprep.subr.mxu1 %v859_v6  ;;  %2756 = vmatpush1.msra.mxu0 %v856_v7  ;;  %v2253_v58 = vadd.f32 %v2252_v17, %v5902_v61  ;;  %v2177_v20 = vpop.f32.mrf.mxu0  ;;  %v1371_v34 = vld [vmem:[%s5373_s9 + $0x10f8] sm:$0xff]  ;;  %v1368_v2 = vld [vmem:[%s5373_s9 + $0x10e0] sm:$0xff]  ;;  %v1370_v3 = vld [vmem:[%s5373_s9 + $0x10f0] sm:$0xff]  ;;  %s3841_s9 = sshll.u32 (%p4520_p5), %s4505_s15, 5 }
 0x2b5   : > { %2833 = vmatpush1.msra.mxu1 %v858_v10  ;;  %2771 = vmatprep.subr.mxu0 %v1625_v11  ;;  %vm2891_vm10 = vcmp.gt.f32.partialorder %v2176_v16, 0.0  ;;  %v2955_v22 = vmul.f32 0.01, %v2176_v16  ;;  %v2178_v23 = vadd.f32 %v2177_v20, %v5902_v61  ;;  %v2254_v24 = vpop.f32.mrf.mxu1  ;;  %v4183_v4 = vld [vmem:[%s6903_s0 + $0x8] sm:$0xff]  ;;  %s3143_s7 = ssub.s32 (%p4520_p5), 41, %s3841_s9 }
 0x2b6   : > { %2848 = vmatprep.subr.mxu1 %v1627_v14  ;;  %2772 = vmatpush2.msra.mxu0 %v1624_v15  ;;  %vm2893_vm11 = vcmp.gt.f32.partialorder %v2253_v58, 0.0  ;;  %v2957_v27 = vmul.f32 0.01, %v2253_v58  ;;  %v2255_v28 = vadd.f32 %v2254_v24, %v5902_v61  ;;  %p3144_p1 = scmp.lt.s32.totalorder (%p4520_p5), %s3143_s7, 32 }
 0x2b7   : > { %2849 = vmatpush2.msra.mxu1 %v1626_v18  ;;  %2773 = vmatprep.subr.mxu0 %v1593_v19  ;;  %v3019_v31 = vsel %vm2891_vm10, %v2176_v16, %v2955_v22  ;;  %vm2892_vm12 = vcmp.gt.f32.partialorder %v2178_v23, 0.0  ;;  %v2956_v51 = vmul.f32 0.01, %v2178_v23 }
 0x2b8   : > { %2850 = vmatprep.subr.mxu1 %v1595_v21  ;;  %2774 = vmatpush2.msra.mxu0 %v1592_v57  ;;  %3083 = vst [vmem:[%s5930_s12 + $0x60] sm:$0xff] %v3019_v31  ;;  %v3021_v38 = vsel %vm2893_vm11, %v2253_v58, %v2957_v27  ;;  %vm2894_vm13 = vcmp.gt.f32.partialorder %v2255_v28, 0.0  ;;  %v2958_v39 = vmul.f32 0.01, %v2255_v28 }
 0x2b9   : > { %2851 = vmatpush2.msra.mxu1 %v1594_v25  ;;  %2775 = vmatprep.subr.mxu0 %v1561_v26  ;;  %3085 = vst [vmem:[%s5930_s12 + $0x70] sm:$0xff] %v3021_v38  ;;  %v3020_v42 = vsel %vm2892_vm12, %v2178_v23, %v2956_v51 }
 0x2ba   : > { %2852 = vmatprep.subr.mxu1 %v1563_v9  ;;  %2776 = vmatpush2.msra.mxu0 %v1560_v29  ;;  %3084 = vst [vmem:[%s5930_s12 + $0x68] sm:$0xff] %v3020_v42  ;;  %v3022_v45 = vsel %vm2894_vm13, %v2255_v28, %v2958_v39 }
 0x2bb   : > { %2853 = vmatpush2.msra.mxu1 %v1562_v33  ;;  %2777 = vmatprep.subr.mxu0 %v1529_v13  ;;  %3086 = vst [vmem:[%s5930_s12 + $0x78] sm:$0xff] %v3022_v45 }
 0x2bc   : > { %2854 = vmatprep.subr.mxu1 %v1531_v40  ;;  %2778 = vmatpush2.msra.mxu0 %v1528_v41 }
 0x2bd   : > { %2855 = vmatpush2.msra.mxu1 %v1530_v43  ;;  %2779 = vmatprep.subr.mxu0 %v1497_v44 }
 0x2be   : > { %2856 = vmatprep.subr.mxu1 %v1499_v46  ;;  %3833 = vmatprep.mubr.msk.f32.mxu0 %vm1640_vm0, %v6227_v32 }
 0x2bf   : > { %3835 = vmatprep.mubr.msk.f32.mxu1 %vm1640_vm0, %v6227_v32  ;;  %2780 = vmatpush2.msra.mxu0 %v1496_v47 }
 0x2c0   : > { %2857 = vmatpush2.msra.mxu1 %v1498_v30  ;;  %2642 = vmatmul.mubr.f32.gmra.mxu0 %v6239_v36 }
 0x2c1   : > { %2719 = vmatmul.mubr.f32.gmra.mxu1 %v6239_v36  ;;  %2781 = vmatprep.subr.mxu0 %v1465_v48 }
 0x2c2   : > { %2858 = vmatprep.subr.mxu1 %v1467_v49  ;;  %2782 = vmatpush2.msra.mxu0 %v1464_v50 }
 0x2c3   : > { %2859 = vmatpush2.msra.mxu1 %v1466_v53  ;;  %2783 = vmatprep.subr.mxu0 %v1433_v54 }
 0x2c4   : > { %2860 = vmatprep.subr.mxu1 %v1435_v55  ;;  %2784 = vmatpush2.msra.mxu0 %v1432_v56 }
 0x2c5   : > { %2861 = vmatpush2.msra.mxu1 %v1434_v59  ;;  %2785 = vmatprep.subr.mxu0 %v1401_v60 }
 0x2c6   : > { %2862 = vmatprep.subr.mxu1 %v1403_v62  ;;  %2786 = vmatpush2.msra.mxu0 %v1400_v63 }
 0x2c7   : > { %2863 = vmatpush2.msra.mxu1 %v1402_v0  ;;  %2787 = vmatprep.subr.mxu0 %v1369_v1 }
 0x2c8   : > { %2864 = vmatprep.subr.mxu1 %v1371_v34  ;;  %2788 = vmatpush2.msra.mxu0 %v1368_v2 }
 0x2c9   : > { %3836 = vmatprep.mubr.msk.f32.mxu0 %vm1640_vm0, %v6113_v37  ;;  %2865 = vmatpush2.msra.mxu1 %v1370_v3 }
 0x2ca   : > { %3838 = vmatprep.mubr.msk.f32.mxu1 %vm1640_vm0, %v4183_v4  ;;  %2790 = vmatmul.mubr.f32.vlgmr.msra.gmra.mxu0 %v6264_v52 }
 0x2cb   : > { %2867 = vmatmul.mubr.f32.vlgmr.msra.gmra.mxu1 %v6264_v52  ;;  %3837 = vmatprep.mubr.msk.f32.mxu0 %vm1640_vm0, %v6227_v32 }
 0x2cc   : > { %3839 = vmatprep.mubr.msk.f32.mxu1 %vm1640_vm0, %v6227_v32 }
 0x2ce   : > { %2796 = vmatmul.mubr.f32.gmra.mxu0 %v6239_v36 }
 0x2cf   : > { %2873 = vmatmul.mubr.f32.gmra.mxu1 %v6239_v36 }
 0x2df   : > { %v2181_v37 = vpop.f32.mrf.mxu0 }
 0x2e0   : > { %v2182_v5 = vadd.f32 %v2181_v37, %v6048_v35  ;;  %v2258_v6 = vpop.f32.mrf.mxu1 }
 0x2e1   : > { %v2259_v7 = vadd.f32 %v2258_v6, %v6048_v35  ;;  %v2183_v8 = vpop.f32.mrf.mxu0 }
 0x2e2   : > { %vm2923_vm14 = vcmp.gt.f32.partialorder %v2182_v5, 0.0  ;;  %v2987_v52 = vmul.f32 0.01, %v2182_v5  ;;  %v2184_v10 = vadd.f32 %v2183_v8, %v6048_v35  ;;  %v2260_v32 = vpop.f32.mrf.mxu1 }
 0x2e3   : > { %vm2925_vm0 = vcmp.gt.f32.partialorder %v2259_v7, 0.0  ;;  %v2989_v11 = vmul.f32 0.01, %v2259_v7  ;;  %v2261_v36 = vadd.f32 %v2260_v32, %v6048_v35 }
 0x2e4   : > { %v3051_v12 = vsel %vm2923_vm14, %v2182_v5, %v2987_v52  ;;  %vm2924_vm15 = vcmp.gt.f32.partialorder %v2184_v10, 0.0  ;;  %v2988_v14 = vmul.f32 0.01, %v2184_v10 }
 0x2e5   : > { %3115 = vst [vmem:[%s5930_s12 + $0x160] sm:$0xff] %v3051_v12  ;;  %v3053_v15 = vsel %vm2925_vm0, %v2259_v7, %v2989_v11  ;;  %vm2926_vm1 = vcmp.gt.f32.partialorder %v2261_v36, 0.0  ;;  %v2990_v16 = vmul.f32 0.01, %v2261_v36 }
 0x2e6   : > { %3117 = vst [vmem:[%s5930_s12 + $0x170] sm:$0xff] %v3053_v15  ;;  %v3052_v17 = vsel %vm2924_vm15, %v2184_v10, %v2988_v14 }
 0x2e7   : > { %3116 = vst [vmem:[%s5930_s12 + $0x168] sm:$0xff] %v3052_v17  ;;  %v3054_v18 = vsel %vm2926_vm1, %v2261_v36, %v2990_v16 }
 0x2e8   : > { %3118 = vst [vmem:[%s5930_s12 + $0x178] sm:$0xff] %v3054_v18  ;;  %v2329_v19 = vpop.f32.mrf.mxu0 }
 0x2e9   : > { %v2330_v58 = vadd.f32 %v2329_v19, %v5902_v61  ;;  %v2406_v20 = vpop.f32.mrf.mxu1 }
 0x2ea   : > { %v2407_v21 = vadd.f32 %v2406_v20, %v5902_v61  ;;  %v2331_v57 = vpop.f32.mrf.mxu0 }
 0x2eb   : > { %vm2895_vm2 = vcmp.gt.f32.partialorder %v2330_v58, 0.0  ;;  %v2959_v22 = vmul.f32 0.01, %v2330_v58  ;;  %v2332_v23 = vadd.f32 %v2331_v57, %v5902_v61  ;;  %v2408_v24 = vpop.f32.mrf.mxu1 }
 0x2ec   : > { %vm2897_vm3 = vcmp.gt.f32.partialorder %v2407_v21, 0.0  ;;  %v2961_v25 = vmul.f32 0.01, %v2407_v21  ;;  %v2409_v26 = vadd.f32 %v2408_v24, %v5902_v61 }
 0x2ed   : > { %v3023_v27 = vsel %vm2895_vm2, %v2330_v58, %v2959_v22  ;;  %vm2896_vm4 = vcmp.gt.f32.partialorder %v2332_v23, 0.0  ;;  %v2960_v28 = vmul.f32 0.01, %v2332_v23 }
 0x2ee   : > { %3087 = vst [vmem:[%s5930_s12 + $0x80] sm:$0xff] %v3023_v27  ;;  %v3025_v9 = vsel %vm2897_vm3, %v2407_v21, %v2961_v25  ;;  %vm2898_vm5 = vcmp.gt.f32.partialorder %v2409_v26, 0.0  ;;  %v2962_v29 = vmul.f32 0.01, %v2409_v26 }
 0x2ef   : > { %3089 = vst [vmem:[%s5930_s12 + $0x90] sm:$0xff] %v3025_v9  ;;  %v3024_v31 = vsel %vm2896_vm4, %v2332_v23, %v2960_v28 }
 0x2f0   : > { %3088 = vst [vmem:[%s5930_s12 + $0x88] sm:$0xff] %v3024_v31  ;;  %v3026_v51 = vsel %vm2898_vm5, %v2409_v26, %v2962_v29 }
 0x2f1   : > { %3090 = vst [vmem:[%s5930_s12 + $0x98] sm:$0xff] %v3026_v51 }
 0x315   : > { %v2335_v33 = vpop.f32.mrf.mxu0 }
 0x316   : > { %v2336_v13 = vadd.f32 %v2335_v33, %v6048_v35  ;;  %v2412_v38 = vpop.f32.mrf.mxu1 }
 0x317   : > { %v2413_v39 = vadd.f32 %v2412_v38, %v6048_v35  ;;  %v2337_v40 = vpop.f32.mrf.mxu0 }
 0x318   : > { %vm2927_vm6 = vcmp.gt.f32.partialorder %v2336_v13, 0.0  ;;  %v2991_v41 = vmul.f32 0.01, %v2336_v13  ;;  %v2338_v42 = vadd.f32 %v2337_v40, %v6048_v35  ;;  %v2414_v43 = vpop.f32.mrf.mxu1 }
 0x319   : > { %vm2929_vm7 = vcmp.gt.f32.partialorder %v2413_v39, 0.0  ;;  %v2993_v44 = vmul.f32 0.01, %v2413_v39  ;;  %v2415_v45 = vadd.f32 %v2414_v43, %v6048_v35 }
 0x31a   : > { %v3055_v46 = vsel %vm2927_vm6, %v2336_v13, %v2991_v41  ;;  %vm2928_vm8 = vcmp.gt.f32.partialorder %v2338_v42, 0.0  ;;  %v2992_v47 = vmul.f32 0.01, %v2338_v42 }
 0x31b   : > { %3119 = vst [vmem:[%s5930_s12 + $0x180] sm:$0xff] %v3055_v46  ;;  %v3057_v30 = vsel %vm2929_vm7, %v2413_v39, %v2993_v44  ;;  %vm2930_vm9 = vcmp.gt.f32.partialorder %v2415_v45, 0.0  ;;  %v2994_v48 = vmul.f32 0.01, %v2415_v45 }
 0x31c   : > { %3121 = vst [vmem:[%s5930_s12 + $0x190] sm:$0xff] %v3057_v30  ;;  %v3056_v49 = vsel %vm2928_vm8, %v2338_v42, %v2992_v47 }
 0x31d   : > { %3120 = vst [vmem:[%s5930_s12 + $0x188] sm:$0xff] %v3056_v49  ;;  %v3058_v50 = vsel %vm2930_vm9, %v2415_v45, %v2994_v48 }
 0x31e   : > { %3122 = vst [vmem:[%s5930_s12 + $0x198] sm:$0xff] %v3058_v50  ;;  %v2483_v53 = vpop.f32.mrf.mxu0 }
 0x31f   : > { %v2484_v54 = vadd.f32 %v2483_v53, %v5902_v61  ;;  %v2560_v55 = vpop.f32.mrf.mxu1 }
 0x320   : > { %v2561_v56 = vadd.f32 %v2560_v55, %v5902_v61  ;;  %v2485_v59 = vpop.f32.mrf.mxu0 }
 0x321   : > { %vm2899_vm10 = vcmp.gt.f32.partialorder %v2484_v54, 0.0  ;;  %v2963_v60 = vmul.f32 0.01, %v2484_v54  ;;  %v2486_v62 = vadd.f32 %v2485_v59, %v5902_v61  ;;  %v2562_v63 = vpop.f32.mrf.mxu1 }
 0x322   : > { %vm2901_vm11 = vcmp.gt.f32.partialorder %v2561_v56, 0.0  ;;  %v2965_v0 = vmul.f32 0.01, %v2561_v56  ;;  %v2563_v1 = vadd.f32 %v2562_v63, %v5902_v61 }
 0x323   : > { %v3027_v34 = vsel %vm2899_vm10, %v2484_v54, %v2963_v60  ;;  %vm2900_vm12 = vcmp.gt.f32.partialorder %v2486_v62, 0.0  ;;  %v2964_v2 = vmul.f32 0.01, %v2486_v62 }
 0x324   : > { %3091 = vst [vmem:[%s5930_s12 + $0xa0] sm:$0xff] %v3027_v34  ;;  %v3029_v3 = vsel %vm2901_vm11, %v2561_v56, %v2965_v0  ;;  %vm2902_vm13 = vcmp.gt.f32.partialorder %v2563_v1, 0.0  ;;  %v2966_v4 = vmul.f32 0.01, %v2563_v1 }
 0x325   : > { %3093 = vst [vmem:[%s5930_s12 + $0xb0] sm:$0xff] %v3029_v3  ;;  %v3028_v37 = vsel %vm2900_vm12, %v2486_v62, %v2964_v2 }
 0x326   : > { %3092 = vst [vmem:[%s5930_s12 + $0xa8] sm:$0xff] %v3028_v37  ;;  %v3030_v5 = vsel %vm2902_vm13, %v2563_v1, %v2966_v4 }
 0x327   : > { %3094 = vst [vmem:[%s5930_s12 + $0xb8] sm:$0xff] %v3030_v5 }
 0x34b   : > { %v2489_v6 = vpop.f32.mrf.mxu0 }
 0x34c   : > { %v2490_v7 = vadd.f32 %v2489_v6, %v6048_v35  ;;  %v2566_v8 = vpop.f32.mrf.mxu1 }
 0x34d   : > { %v2567_v52 = vadd.f32 %v2566_v8, %v6048_v35  ;;  %v2491_v10 = vpop.f32.mrf.mxu0 }
 0x34e   : > { %vm2931_vm14 = vcmp.gt.f32.partialorder %v2490_v7, 0.0  ;;  %v2995_v32 = vmul.f32 0.01, %v2490_v7  ;;  %v2492_v11 = vadd.f32 %v2491_v10, %v6048_v35  ;;  %v2568_v36 = vpop.f32.mrf.mxu1 }
 0x34f   : > { %vm2933_vm0 = vcmp.gt.f32.partialorder %v2567_v52, 0.0  ;;  %v2997_v12 = vmul.f32 0.01, %v2567_v52  ;;  %v2569_v14 = vadd.f32 %v2568_v36, %v6048_v35 }
 0x350   : > { %v3059_v15 = vsel %vm2931_vm14, %v2490_v7, %v2995_v32  ;;  %vm2932_vm15 = vcmp.gt.f32.partialorder %v2492_v11, 0.0  ;;  %v2996_v16 = vmul.f32 0.01, %v2492_v11 }
 0x351   : > { %3123 = vst [vmem:[%s5930_s12 + $0x1a0] sm:$0xff] %v3059_v15  ;;  %v3061_v17 = vsel %vm2933_vm0, %v2567_v52, %v2997_v12  ;;  %vm2934_vm1 = vcmp.gt.f32.partialorder %v2569_v14, 0.0  ;;  %v2998_v18 = vmul.f32 0.01, %v2569_v14 }
 0x352   : > { %3125 = vst [vmem:[%s5930_s12 + $0x1b0] sm:$0xff] %v3061_v17  ;;  %v3060_v19 = vsel %vm2932_vm15, %v2492_v11, %v2996_v16 }
 0x353   : > { %3124 = vst [vmem:[%s5930_s12 + $0x1a8] sm:$0xff] %v3060_v19  ;;  %v3062_v58 = vsel %vm2934_vm1, %v2569_v14, %v2998_v18 }
 0x354   : > { %3126 = vst [vmem:[%s5930_s12 + $0x1b8] sm:$0xff] %v3062_v58  ;;  %v2637_v20 = vpop.f32.mrf.mxu0 }
 0x355   : > { %v2638_v21 = vadd.f32 %v2637_v20, %v5902_v61  ;;  %v2714_v57 = vpop.f32.mrf.mxu1 }
 0x356   : > { %v2715_v22 = vadd.f32 %v2714_v57, %v5902_v61  ;;  %v2639_v23 = vpop.f32.mrf.mxu0 }
 0x357   : > { %vm2903_vm2 = vcmp.gt.f32.partialorder %v2638_v21, 0.0  ;;  %v2967_v24 = vmul.f32 0.01, %v2638_v21  ;;  %v2640_v25 = vadd.f32 %v2639_v23, %v5902_v61  ;;  %v2716_v26 = vpop.f32.mrf.mxu1 }
 0x358   : > { %vm2905_vm3 = vcmp.gt.f32.partialorder %v2715_v22, 0.0  ;;  %v2969_v27 = vmul.f32 0.01, %v2715_v22  ;;  %v2717_v28 = vadd.f32 %v2716_v26, %v5902_v61 }
 0x359   : > { %v3031_v9 = vsel %vm2903_vm2, %v2638_v21, %v2967_v24  ;;  %vm2904_vm4 = vcmp.gt.f32.partialorder %v2640_v25, 0.0  ;;  %v2968_v29 = vmul.f32 0.01, %v2640_v25 }
 0x35a   : > { %3095 = vst [vmem:[%s5930_s12 + $0xc0] sm:$0xff] %v3031_v9  ;;  %v3033_v31 = vsel %vm2905_vm3, %v2715_v22, %v2969_v27  ;;  %vm2906_vm5 = vcmp.gt.f32.partialorder %v2717_v28, 0.0  ;;  %v2970_v51 = vmul.f32 0.01, %v2717_v28 }
 0x35b   : > { %3097 = vst [vmem:[%s5930_s12 + $0xd0] sm:$0xff] %v3033_v31  ;;  %v3032_v33 = vsel %vm2904_vm4, %v2640_v25, %v2968_v29 }
 0x35c   : > { %3096 = vst [vmem:[%s5930_s12 + $0xc8] sm:$0xff] %v3032_v33  ;;  %v3034_v13 = vsel %vm2906_vm5, %v2717_v28, %v2970_v51 }
 0x35d   : > { %3098 = vst [vmem:[%s5930_s12 + $0xd8] sm:$0xff] %v3034_v13 }
 0x380   : > { %v2643_v38 = vpop.f32.mrf.mxu0 }
 0x381   : > { %v2644_v39 = vadd.f32 %v2643_v38, %v6048_v35  ;;  %v2720_v40 = vpop.f32.mrf.mxu1 }
 0x382   : > { %v2721_v41 = vadd.f32 %v2720_v40, %v6048_v35  ;;  %v2645_v42 = vpop.f32.mrf.mxu0 }
 0x383   : > { %vm2935_vm6 = vcmp.gt.f32.partialorder %v2644_v39, 0.0  ;;  %v2999_v43 = vmul.f32 0.01, %v2644_v39  ;;  %v2646_v44 = vadd.f32 %v2645_v42, %v6048_v35  ;;  %v2722_v45 = vpop.f32.mrf.mxu1 }
 0x384   : > { %vm2937_vm7 = vcmp.gt.f32.partialorder %v2721_v41, 0.0  ;;  %v3001_v46 = vmul.f32 0.01, %v2721_v41  ;;  %v2723_v47 = vadd.f32 %v2722_v45, %v6048_v35 }
 0x385   : > { %v3063_v30 = vsel %vm2935_vm6, %v2644_v39, %v2999_v43  ;;  %vm2936_vm8 = vcmp.gt.f32.partialorder %v2646_v44, 0.0  ;;  %v3000_v48 = vmul.f32 0.01, %v2646_v44 }
 0x386   : > { %3127 = vst [vmem:[%s5930_s12 + $0x1c0] sm:$0xff] %v3063_v30  ;;  %v3065_v49 = vsel %vm2937_vm7, %v2721_v41, %v3001_v46  ;;  %vm2938_vm9 = vcmp.gt.f32.partialorder %v2723_v47, 0.0  ;;  %v3002_v50 = vmul.f32 0.01, %v2723_v47 }
 0x387   : > { %3129 = vst [vmem:[%s5930_s12 + $0x1d0] sm:$0xff] %v3065_v49  ;;  %v3064_v53 = vsel %vm2936_vm8, %v2646_v44, %v3000_v48 }
 0x388   : > { %3128 = vst [vmem:[%s5930_s12 + $0x1c8] sm:$0xff] %v3064_v53  ;;  %v3066_v54 = vsel %vm2938_vm9, %v2723_v47, %v3002_v50 }
 0x389   : > { %3130 = vst [vmem:[%s5930_s12 + $0x1d8] sm:$0xff] %v3066_v54 }
 0x38a   : > { %v2791_v55 = vpop.f32.mrf.mxu0 }
 0x38b   : > { %v2792_v56 = vadd.f32 %v2791_v55, %v5902_v61  ;;  %v2868_v59 = vpop.f32.mrf.mxu1 }
 0x38c   : > { %v2869_v60 = vadd.f32 %v2868_v59, %v5902_v61  ;;  %v2793_v62 = vpop.f32.mrf.mxu0 }
 0x38d   : > { %vm2907_vm10 = vcmp.gt.f32.partialorder %v2792_v56, 0.0  ;;  %v2971_v63 = vmul.f32 0.01, %v2792_v56  ;;  %v2794_v0 = vadd.f32 %v2793_v62, %v5902_v61  ;;  %v2870_v1 = vpop.f32.mrf.mxu1 }
 0x38e   : > { %vm2909_vm11 = vcmp.gt.f32.partialorder %v2869_v60, 0.0  ;;  %v2973_v34 = vmul.f32 0.01, %v2869_v60  ;;  %v2871_v2 = vadd.f32 %v2870_v1, %v5902_v61  ;;  %v2797_v3 = vpop.f32.mrf.mxu0 }
 0x38f   : > { %v3035_v4 = vsel %vm2907_vm10, %v2792_v56, %v2971_v63  ;;  %vm2908_vm12 = vcmp.gt.f32.partialorder %v2794_v0, 0.0  ;;  %v2972_v37 = vmul.f32 0.01, %v2794_v0  ;;  %v2798_v5 = vadd.f32 %v2797_v3, %v6048_v35  ;;  %v2874_v6 = vpop.f32.mrf.mxu1 }
 0x390   : > { %3099 = vst [vmem:[%s5930_s12 + $0xe0] sm:$0xff] %v3035_v4  ;;  %v3037_v7 = vsel %vm2909_vm11, %v2869_v60, %v2973_v34  ;;  %vm2910_vm13 = vcmp.gt.f32.partialorder %v2871_v2, 0.0  ;;  %v2974_v8 = vmul.f32 0.01, %v2871_v2  ;;  %v2875_v52 = vadd.f32 %v2874_v6, %v6048_v35  ;;  %v2799_v10 = vpop.f32.mrf.mxu0 }
 0x391   : > { %3101 = vst [vmem:[%s5930_s12 + $0xf0] sm:$0xff] %v3037_v7  ;;  %v3036_v32 = vsel %vm2908_vm12, %v2794_v0, %v2972_v37  ;;  %vm2939_vm14 = vcmp.gt.f32.partialorder %v2798_v5, 0.0  ;;  %v3003_v61 = vmul.f32 0.01, %v2798_v5  ;;  %v2800_v11 = vadd.f32 %v2799_v10, %v6048_v35  ;;  %v2876_v36 = vpop.f32.mrf.mxu1 }
 0x392   : > { %3100 = vst [vmem:[%s5930_s12 + $0xe8] sm:$0xff] %v3036_v32  ;;  %v3038_v12 = vsel %vm2910_vm13, %v2871_v2, %v2974_v8  ;;  %vm2941_vm0 = vcmp.gt.f32.partialorder %v2875_v52, 0.0  ;;  %v3005_v14 = vmul.f32 0.01, %v2875_v52  ;;  %v2877_v15 = vadd.f32 %v2876_v36, %v6048_v35 }
 0x393   : > { %3102 = vst [vmem:[%s5930_s12 + $0xf8] sm:$0xff] %v3038_v12  ;;  %v3067_v16 = vsel %vm2939_vm14, %v2798_v5, %v3003_v61  ;;  %vm2940_vm15 = vcmp.gt.f32.partialorder %v2800_v11, 0.0  ;;  %v3004_v17 = vmul.f32 0.01, %v2800_v11  ;;  %3141 = sbr.rel (!%p4520_p5) target bundleno = 1068 (0x42c), region = 102 }
 0x394   : > { %3131 = vst [vmem:[%s5930_s12 + $0x1e0] sm:$0xff] %v3067_v16  ;;  %v3069_v18 = vsel %vm2941_vm0, %v2875_v52, %v3005_v14  ;;  %vm2942_vm1 = vcmp.gt.f32.partialorder %v2877_v15, 0.0  ;;  %v3006_v19 = vmul.f32 0.01, %v2877_v15 }
 0x395   : > { %3133 = vst [vmem:[%s5930_s12 + $0x1f0] sm:$0xff] %v3069_v18  ;;  %v3068_v58 = vsel %vm2940_vm15, %v2800_v11, %v3004_v17 }
 0x396   : > { %3132 = vst [vmem:[%s5930_s12 + $0x1e8] sm:$0xff] %v3068_v58  ;;  %v3070_v20 = vsel %vm2942_vm1, %v2877_v15, %v3006_v19 }
 0x397   : > { %3134 = vst [vmem:[%s5930_s12 + $0x1f8] sm:$0xff] %v3070_v20 }
 0x398   : > { %s6952_s7 = smov (!%p3144_p1, %s3143_s7), 32 }
 0x399   : > { %s3842_s22 = sshll.u32 %s6952_s7, 8  ;;  %s6482_s23 = sshll.u32 %s6952_s7, 3 }
 0x39a   : > { %p3846_p2 = scmp.eq.s32.totalorder %s3842_s22, 0 }
 0x39b   : > { %p3154_p3 = scmp.lt.u32.totalorder (!%p3846_p2), %s6482_s23, 8 }
 0x39c   : > { %3153 = sbr.rel (%p3846_p2) target bundleno = 1068 (0x42c), region = 106 }
 0x3a1   : > { %3157 = sbr.rel (%p3154_p3) target bundleno = 1058 (0x422), region = 110  ;;  %s6486_s20 = sand.u32 (!%p3154_p3), 7, %s6482_s23  }
 0x3a2   : > { %p3176_p5 = scmp.eq.s32.totalorder (!%p3154_p3), %s6486_s20, 0  ;;  %p3847_p4 = scmp.ne.s32.totalorder (!%p3154_p3), %s6486_s20, 0 }
 0x3a6   : > { %3179 = sbr.rel (%p3847_p4) target bundleno = 993 (0x3e1), region = 125  ;;  %s3180_s15 = sshrl.u32 (!%p3847_p4), %s6482_s23, 3 }
 0x3a7   : > { %s6493_s30 = sshrl.u32 (!%p3847_p4), %s3180_s15, 5 }
 0x3a8   : > { %p3848_p6 = scmp.le.s32.totalorder (!%p3847_p4), %s6493_s30, 0 }
 0x3ab   : > { %3710 = sbr.rel (%p3848_p6) target bundleno = 977 (0x3d1), region = 273  ;;  %s6928_s17 = smov (!%p3848_p6), %s6480_s5 }
 0x3ac   : > { %s6929_s18 = smov (!%p3848_p6), %s5930_s12  ;;  %s6502_s28 = smov (!%p3848_p6), 0  }
 0x3ad   : > { %s6504_s14 = smov (!%p3848_p6), 0  }
 0x3b0 LB: >> { %v3193_v35 = vld [vmem:[%s4406_s18] sm:$0xff]  ;;  %v3195_v21 = vld [vmem:[%s4406_s18 + $0x8] sm:$0xff]  ;;  %v3197_v57 = vld [vmem:[%s4406_s18 + $0x10] sm:$0xff]  ;;  %s3321_s4 = sadd.s32 1, %s4410_s28  ;;  %s3187_s14 = sadd.s32 1, %s4414_s14   ;;  %s4414_s14 = sphi %s6504_s14, %s3187_s14   ;;  %s4410_s28 = sphi %s6502_s28, %s6932_s28   ;;  %s4406_s18 = sphi %s6929_s18, %s6931_s18   ;;  %s4402_s17 = sphi %s6928_s17, %s6930_s17  }
 0x3b1   : >> { %3194 = vst [vmem:[%s4402_s17] sm:$0xff] %v3193_v35  ;;  %3196 = vst [vmem:[%s4402_s17 + $0x8] sm:$0xff] %v3195_v21  ;;  %v3199_v22 = vld [vmem:[%s4406_s18 + $0x18] sm:$0xff]  ;;  %v3201_v23 = vld [vmem:[%s4406_s18 + $0x20] sm:$0xff]  ;;  %p3322_p7 = scmp.ge.s32.totalorder %s3321_s4, %s6493_s30  ;;  %p3186_p8 = scmp.ge.s32.totalorder %s3187_s14, %s6493_s30 }
 0x3b2   : >> { %3198 = vst [vmem:[%s4402_s17 + $0x10] sm:$0xff] %v3197_v57  ;;  %v3203_v24 = vld [vmem:[%s4406_s18 + $0x28] sm:$0xff]  ;;  %3200 = vst [vmem:[%s4402_s17 + $0x18] sm:$0xff] %v3199_v22  ;;  %v3205_v25 = vld [vmem:[%s4406_s18 + $0x30] sm:$0xff] }
 0x3b3   : >> { %3202 = vst [vmem:[%s4402_s17 + $0x20] sm:$0xff] %v3201_v23  ;;  %3204 = vst [vmem:[%s4402_s17 + $0x28] sm:$0xff] %v3203_v24  ;;  %v3207_v26 = vld [vmem:[%s4406_s18 + $0x38] sm:$0xff]  ;;  %v3209_v27 = vld [vmem:[%s4406_s18 + $0x40] sm:$0xff]  ;;  %s6954_s4 = smov (%p3322_p7, %s3321_s4), 0 }
 0x3b4   : >> { %3206 = vst [vmem:[%s4402_s17 + $0x30] sm:$0xff] %v3205_v25  ;;  %3208 = vst [vmem:[%s4402_s17 + $0x38] sm:$0xff] %v3207_v26  ;;  %v3211_v28 = vld [vmem:[%s4406_s18 + $0x48] sm:$0xff]  ;;  %v3213_v9 = vld [vmem:[%s4406_s18 + $0x50] sm:$0xff]  ;;  %s3849_s25 = sshll.u32 %s6954_s4, 8  ;;  %s6932_s28 = smov %s6954_s4 }
 0x3b5   : >> { %3210 = vst [vmem:[%s4402_s17 + $0x40] sm:$0xff] %v3209_v27  ;;  %v3215_v29 = vld [vmem:[%s4406_s18 + $0x58] sm:$0xff]  ;;  %3212 = vst [vmem:[%s4402_s17 + $0x48] sm:$0xff] %v3211_v28  ;;  %v3217_v31 = vld [vmem:[%s4406_s18 + $0x60] sm:$0xff]  ;;  %s6560_s26 = scalar_lea.vmem %s5930_s12, %s3849_s25 [#allocation3]   ;;  %s6563_s27 = scalar_lea.vmem %s6480_s5, %s3849_s25  }
 0x3b6   : >> { %3214 = vst [vmem:[%s4402_s17 + $0x50] sm:$0xff] %v3213_v9  ;;  %3216 = vst [vmem:[%s4402_s17 + $0x58] sm:$0xff] %v3215_v29  ;;  %v3219_v51 = vld [vmem:[%s4406_s18 + $0x68] sm:$0xff]  ;;  %v3221_v33 = vld [vmem:[%s4406_s18 + $0x70] sm:$0xff] }
 0x3b7   : >> { %3218 = vst [vmem:[%s4402_s17 + $0x60] sm:$0xff] %v3217_v31  ;;  %3220 = vst [vmem:[%s4402_s17 + $0x68] sm:$0xff] %v3219_v51  ;;  %v3223_v13 = vld [vmem:[%s4406_s18 + $0x78] sm:$0xff]  ;;  %v3225_v38 = vld [vmem:[%s4406_s18 + $0x80] sm:$0xff] }
 0x3b8   : >> { %3222 = vst [vmem:[%s4402_s17 + $0x70] sm:$0xff] %v3221_v33  ;;  %v3227_v39 = vld [vmem:[%s4406_s18 + $0x88] sm:$0xff]  ;;  %3224 = vst [vmem:[%s4402_s17 + $0x78] sm:$0xff] %v3223_v13  ;;  %v3229_v40 = vld [vmem:[%s4406_s18 + $0x90] sm:$0xff] }
 0x3b9   : >> { %3226 = vst [vmem:[%s4402_s17 + $0x80] sm:$0xff] %v3225_v38  ;;  %3228 = vst [vmem:[%s4402_s17 + $0x88] sm:$0xff] %v3227_v39  ;;  %v3231_v41 = vld [vmem:[%s4406_s18 + $0x98] sm:$0xff]  ;;  %v3233_v42 = vld [vmem:[%s4406_s18 + $0xa0] sm:$0xff] }
 0x3ba   : >> { %3230 = vst [vmem:[%s4402_s17 + $0x90] sm:$0xff] %v3229_v40  ;;  %3232 = vst [vmem:[%s4402_s17 + $0x98] sm:$0xff] %v3231_v41  ;;  %v3235_v43 = vld [vmem:[%s4406_s18 + $0xa8] sm:$0xff]  ;;  %v3237_v44 = vld [vmem:[%s4406_s18 + $0xb0] sm:$0xff] }
 0x3bb   : >> { %3234 = vst [vmem:[%s4402_s17 + $0xa0] sm:$0xff] %v3233_v42  ;;  %v3239_v45 = vld [vmem:[%s4406_s18 + $0xb8] sm:$0xff]  ;;  %3236 = vst [vmem:[%s4402_s17 + $0xa8] sm:$0xff] %v3235_v43  ;;  %v3241_v46 = vld [vmem:[%s4406_s18 + $0xc0] sm:$0xff] }
 0x3bc   : >> { %3238 = vst [vmem:[%s4402_s17 + $0xb0] sm:$0xff] %v3237_v44  ;;  %3240 = vst [vmem:[%s4402_s17 + $0xb8] sm:$0xff] %v3239_v45  ;;  %v3243_v47 = vld [vmem:[%s4406_s18 + $0xc8] sm:$0xff]  ;;  %v3245_v30 = vld [vmem:[%s4406_s18 + $0xd0] sm:$0xff] }
 0x3bd   : >> { %3242 = vst [vmem:[%s4402_s17 + $0xc0] sm:$0xff] %v3241_v46  ;;  %3244 = vst [vmem:[%s4402_s17 + $0xc8] sm:$0xff] %v3243_v47  ;;  %v3247_v48 = vld [vmem:[%s4406_s18 + $0xd8] sm:$0xff]  ;;  %v3249_v49 = vld [vmem:[%s4406_s18 + $0xe0] sm:$0xff] }
 0x3be   : >> { %3246 = vst [vmem:[%s4402_s17 + $0xd0] sm:$0xff] %v3245_v30  ;;  %v3251_v50 = vld [vmem:[%s4406_s18 + $0xe8] sm:$0xff]  ;;  %3248 = vst [vmem:[%s4402_s17 + $0xd8] sm:$0xff] %v3247_v48  ;;  %v3253_v53 = vld [vmem:[%s4406_s18 + $0xf0] sm:$0xff] }
 0x3bf   : >> { %3250 = vst [vmem:[%s4402_s17 + $0xe0] sm:$0xff] %v3249_v49  ;;  %3252 = vst [vmem:[%s4402_s17 + $0xe8] sm:$0xff] %v3251_v50  ;;  %v3255_v54 = vld [vmem:[%s4406_s18 + $0xf8] sm:$0xff]  ;;  %v3257_v55 = vld [vmem:[%s4406_s18 + $0x100] sm:$0xff] }
 0x3c0   : >> { %3254 = vst [vmem:[%s4402_s17 + $0xf0] sm:$0xff] %v3253_v53  ;;  %3256 = vst [vmem:[%s4402_s17 + $0xf8] sm:$0xff] %v3255_v54  ;;  %v3259_v56 = vld [vmem:[%s4406_s18 + $0x108] sm:$0xff]  ;;  %v3261_v59 = vld [vmem:[%s4406_s18 + $0x110] sm:$0xff] }
 0x3c1   : >> { %3258 = vst [vmem:[%s4402_s17 + $0x148] sm:$0xff] %v3257_v55  ;;  %v3263_v60 = vld [vmem:[%s4406_s18 + $0x118] sm:$0xff]  ;;  %3260 = vst [vmem:[%s4402_s17 + $0x150] sm:$0xff] %v3259_v56  ;;  %v3265_v62 = vld [vmem:[%s4406_s18 + $0x120] sm:$0xff] }
 0x3c2   : >> { %3262 = vst [vmem:[%s4402_s17 + $0x158] sm:$0xff] %v3261_v59  ;;  %3264 = vst [vmem:[%s4402_s17 + $0x160] sm:$0xff] %v3263_v60  ;;  %v3267_v63 = vld [vmem:[%s4406_s18 + $0x128] sm:$0xff]  ;;  %v3269_v0 = vld [vmem:[%s4406_s18 + $0x130] sm:$0xff] }
 0x3c3   : >> { %3266 = vst [vmem:[%s4402_s17 + $0x168] sm:$0xff] %v3265_v62  ;;  %3268 = vst [vmem:[%s4402_s17 + $0x170] sm:$0xff] %v3267_v63  ;;  %v3271_v1 = vld [vmem:[%s4406_s18 + $0x138] sm:$0xff]  ;;  %v3273_v34 = vld [vmem:[%s4406_s18 + $0x140] sm:$0xff] }
 0x3c4   : >> { %3270 = vst [vmem:[%s4402_s17 + $0x178] sm:$0xff] %v3269_v0  ;;  %v3275_v2 = vld [vmem:[%s4406_s18 + $0x148] sm:$0xff]  ;;  %3272 = vst [vmem:[%s4402_s17 + $0x180] sm:$0xff] %v3271_v1  ;;  %v3277_v3 = vld [vmem:[%s4406_s18 + $0x150] sm:$0xff] }
 0x3c5   : >> { %3274 = vst [vmem:[%s4402_s17 + $0x188] sm:$0xff] %v3273_v34  ;;  %3276 = vst [vmem:[%s4402_s17 + $0x190] sm:$0xff] %v3275_v2  ;;  %v3279_v4 = vld [vmem:[%s4406_s18 + $0x158] sm:$0xff]  ;;  %v3281_v37 = vld [vmem:[%s4406_s18 + $0x160] sm:$0xff] }
 0x3c6   : >> { %3278 = vst [vmem:[%s4402_s17 + $0x198] sm:$0xff] %v3277_v3  ;;  %3280 = vst [vmem:[%s4402_s17 + $0x1a0] sm:$0xff] %v3279_v4  ;;  %v3283_v5 = vld [vmem:[%s4406_s18 + $0x168] sm:$0xff]  ;;  %v3285_v6 = vld [vmem:[%s4406_s18 + $0x170] sm:$0xff] }
 0x3c7   : >> { %3282 = vst [vmem:[%s4402_s17 + $0x1a8] sm:$0xff] %v3281_v37  ;;  %v3287_v7 = vld [vmem:[%s4406_s18 + $0x178] sm:$0xff]  ;;  %3284 = vst [vmem:[%s4402_s17 + $0x1b0] sm:$0xff] %v3283_v5  ;;  %v3289_v8 = vld [vmem:[%s4406_s18 + $0x180] sm:$0xff] }
 0x3c8   : >> { %3286 = vst [vmem:[%s4402_s17 + $0x1b8] sm:$0xff] %v3285_v6  ;;  %3288 = vst [vmem:[%s4402_s17 + $0x1c0] sm:$0xff] %v3287_v7  ;;  %v3291_v52 = vld [vmem:[%s4406_s18 + $0x188] sm:$0xff]  ;;  %v3293_v10 = vld [vmem:[%s4406_s18 + $0x190] sm:$0xff] }
 0x3c9   : >> { %3290 = vst [vmem:[%s4402_s17 + $0x1c8] sm:$0xff] %v3289_v8  ;;  %3292 = vst [vmem:[%s4402_s17 + $0x1d0] sm:$0xff] %v3291_v52  ;;  %v3295_v32 = vld [vmem:[%s4406_s18 + $0x198] sm:$0xff]  ;;  %v3297_v61 = vld [vmem:[%s4406_s18 + $0x1a0] sm:$0xff] }
 0x3ca   : >> { %3294 = vst [vmem:[%s4402_s17 + $0x1d8] sm:$0xff] %v3293_v10  ;;  %v3299_v11 = vld [vmem:[%s4406_s18 + $0x1a8] sm:$0xff]  ;;  %3296 = vst [vmem:[%s4402_s17 + $0x1e0] sm:$0xff] %v3295_v32  ;;  %v3301_v36 = vld [vmem:[%s4406_s18 + $0x1b0] sm:$0xff] }
 0x3cb   : >> { %3298 = vst [vmem:[%s4402_s17 + $0x1e8] sm:$0xff] %v3297_v61  ;;  %3300 = vst [vmem:[%s4402_s17 + $0x1f0] sm:$0xff] %v3299_v11  ;;  %v3303_v12 = vld [vmem:[%s4406_s18 + $0x1b8] sm:$0xff]  ;;  %v3305_v14 = vld [vmem:[%s4406_s18 + $0x1c0] sm:$0xff] }
 0x3cc   : >> { %3302 = vst [vmem:[%s4402_s17 + $0x1f8] sm:$0xff] %v3301_v36  ;;  %3304 = vst [vmem:[%s4402_s17 + $0x200] sm:$0xff] %v3303_v12  ;;  %v3307_v15 = vld [vmem:[%s4406_s18 + $0x1c8] sm:$0xff]  ;;  %v3309_v16 = vld [vmem:[%s4406_s18 + $0x1d0] sm:$0xff]  ;;  %3189 = sbr.rel (!%p3186_p8) target bundleno = 944 (0x3b0), region = 279 }
 0x3cd   : >> { %3306 = vst [vmem:[%s4402_s17 + $0x208] sm:$0xff] %v3305_v14  ;;  %v3311_v17 = vld [vmem:[%s4406_s18 + $0x1d8] sm:$0xff]  ;;  %3308 = vst [vmem:[%s4402_s17 + $0x210] sm:$0xff] %v3307_v15  ;;  %v3313_v18 = vld [vmem:[%s4406_s18 + $0x1e0] sm:$0xff] }
 0x3ce   : >> { %3310 = vst [vmem:[%s4402_s17 + $0x218] sm:$0xff] %v3309_v16  ;;  %3312 = vst [vmem:[%s4402_s17 + $0x220] sm:$0xff] %v3311_v17  ;;  %v3315_v19 = vld [vmem:[%s4406_s18 + $0x1e8] sm:$0xff]  ;;  %v3317_v58 = vld [vmem:[%s4406_s18 + $0x1f0] sm:$0xff] }
 0x3cf   : >> { %3314 = vst [vmem:[%s4402_s17 + $0x228] sm:$0xff] %v3313_v18  ;;  %3316 = vst [vmem:[%s4402_s17 + $0x230] sm:$0xff] %v3315_v19  ;;  %v3319_v20 = vld [vmem:[%s4406_s18 + $0x1f8] sm:$0xff]  ;;  %s6931_s18 = smov %s6560_s26 }
 0x3d0   : >> { %3318 = vst [vmem:[%s4402_s17 + $0x238] sm:$0xff] %v3317_v58  ;;  %3320 = vst [vmem:[%s4402_s17 + $0x240] sm:$0xff] %v3319_v20  ;;  %s6930_s17 = smov %s6563_s27 }
 0x3d1 PF: > { %s6669_s21 = sand.u32 31, %s3180_s15   ;;  %s3873_s24 = sshll.u32 %s6493_s30, 12 }
 0x3d2   : > { %s3332_s29 = sshra.s32 %s3873_s24, 4  ;;  %p3854_p9 = scmp.le.s32.totalorder %s6669_s21, 0 }
 0x3d3   : > { %s6673_s8 = scalar_lea.vmem %s5930_s12, %s3332_s29 [#allocation3]   ;;  %s3336_s9 = scalar_lea.vmem %s6480_s5, %s3332_s29  }
 0x3d4   : > { %3724 = sbr.rel (%p3854_p9) target bundleno = 993 (0x3e1), region = 284  ;;  %s4416_s6 = smov (!%p3854_p9), %s3336_s9  }
 0x3d5   : > { %s4420_s7 = smov (!%p3854_p9), %s6673_s8   ;;  %s4424_s10 = smov (!%p3854_p9), 0  }
 0x3d6   : > { %s4428_s11 = smov (!%p3854_p9), 0  }
 0x3d9 LB: >> { %v3348_v35 = vld [vmem:[%s4422_s7] sm:$0xff]  ;;  %s3352_s22 = sadd.s32 1, %s4426_s10  ;;  %s3342_s11 = sadd.s32 1, %s4430_s11   ;;  %s4430_s11 = sphi %s4428_s11, %s3342_s11   ;;  %s4426_s10 = sphi %s4424_s10, %s4425_s10   ;;  %s4422_s7 = sphi %s4420_s7, %s3357_s7   ;;  %s4418_s6 = sphi %s4416_s6, %s3358_s6  }
 0x3da   : >> { %v3350_v21 = vld [vmem:[%s4422_s7 + $0x100] sm:$0xff]  ;;  %3349 = vst [vmem:[%s4418_s6] sm:$0xff] %v3348_v35  ;;  %p3353_p10 = scmp.ge.s32.totalorder %s3352_s22, %s6669_s21  ;;  %p3341_p11 = scmp.ge.s32.totalorder %s3342_s11, %s6669_s21 }
 0x3db   : >> { %3351 = vst [vmem:[%s4418_s6 + $0x148] sm:$0xff] %v3350_v21 }
 0x3dc   : >> { %s6956_s22 = smov (%p3353_p10, %s3352_s22), 0  ;;  %3344 = sbr.rel (!%p3341_p11) target bundleno = 985 (0x3d9), region = 290 }
 0x3dd   : >> { %s3855_s15 = sshll.u32 %s6956_s22, 3  ;;  %s4425_s10 = smov %s6956_s22  }
 0x3de   : >> { %s3357_s7 = scalar_lea.vmem %s6673_s8, %s3855_s15 [#allocation3]   ;;  %s3358_s6 = scalar_lea.vmem %s3336_s9, %s3855_s15  }
 0x3e1 PF: > { %3361 = sbr.rel (%p3176_p5) target bundleno = 1058 (0x422), region = 143  ;;  %s3363_s30 = ssub.s32 (!%p3176_p5), %s6482_s23, %s6486_s20 }
 0x3e2   : > { %s3367_s17 = sshrl.u32 (!%p3176_p5), %s6482_s23, 3  ;;  %s6687_s18 = scalar_lea.vmem (!%p3176_p5), %s5930_s12, %s3363_s30 [#allocation3] }
 0x3e3   : > { %s6690_s28 = scalar_lea.vmem (!%p3176_p5), %s6480_s5, %s3363_s30  ;;  %s6694_s14 = sshrl.u32 (!%p3176_p5), %s3367_s17, 5 }
 0x3e4   : > { %p3857_p12 = scmp.le.s32.totalorder (!%p3176_p5), %s6694_s14, 0 }
 0x3e6   : > { %3738 = sbr.rel (%p3857_p12) target bundleno = 1036 (0x40c), region = 295  ;;  %s6933_s4 = smov (!%p3857_p12), %s6480_s5 }
 0x3e7   : > { %s6934_s25 = smov (!%p3857_p12), %s5930_s12  ;;  %s6703_s26 = smov (!%p3857_p12), 0  }
 0x3e8   : > { %s6705_s27 = smov (!%p3857_p12), 0  }
 0x3eb LB: >> { %v3380_v57 = vld [vmem:[%s4438_s25] sm:$0xff]  ;;  %v3382_v22 = vld [vmem:[%s4438_s25 + $0x8] sm:$0xff]  ;;  %v3384_v23 = vld [vmem:[%s4438_s25 + $0x10] sm:$0xff]  ;;  %s3508_s21 = sadd.s32 1, %s4442_s26  ;;  %s3374_s27 = sadd.s32 1, %s4446_s27   ;;  %s4446_s27 = sphi %s6705_s27, %s3374_s27   ;;  %s4442_s26 = sphi %s6703_s26, %s6937_s26   ;;  %s4438_s25 = sphi %s6934_s25, %s6936_s25   ;;  %s4434_s4 = sphi %s6933_s4, %s6935_s4  }
 0x3ec   : >> { %3381 = vst [vmem:[%s4434_s4] sm:$0xff] %v3380_v57  ;;  %3383 = vst [vmem:[%s4434_s4 + $0x8] sm:$0xff] %v3382_v22  ;;  %v3386_v24 = vld [vmem:[%s4438_s25 + $0x18] sm:$0xff]  ;;  %v3388_v25 = vld [vmem:[%s4438_s25 + $0x20] sm:$0xff]  ;;  %p3509_p13 = scmp.ge.s32.totalorder %s3508_s21, %s6694_s14  ;;  %p3373_p0 = scmp.ge.s32.totalorder %s3374_s27, %s6694_s14 }
 0x3ed   : >> { %3385 = vst [vmem:[%s4434_s4 + $0x10] sm:$0xff] %v3384_v23  ;;  %v3390_v26 = vld [vmem:[%s4438_s25 + $0x28] sm:$0xff]  ;;  %3387 = vst [vmem:[%s4434_s4 + $0x18] sm:$0xff] %v3386_v24  ;;  %v3392_v27 = vld [vmem:[%s4438_s25 + $0x30] sm:$0xff] }
 0x3ee   : >> { %3389 = vst [vmem:[%s4434_s4 + $0x20] sm:$0xff] %v3388_v25  ;;  %3391 = vst [vmem:[%s4434_s4 + $0x28] sm:$0xff] %v3390_v26  ;;  %v3394_v28 = vld [vmem:[%s4438_s25 + $0x38] sm:$0xff]  ;;  %v3396_v9 = vld [vmem:[%s4438_s25 + $0x40] sm:$0xff]  ;;  %s6958_s21 = smov (%p3509_p13, %s3508_s21), 0 }
 0x3ef   : >> { %3393 = vst [vmem:[%s4434_s4 + $0x30] sm:$0xff] %v3392_v27  ;;  %3395 = vst [vmem:[%s4434_s4 + $0x38] sm:$0xff] %v3394_v28  ;;  %v3398_v29 = vld [vmem:[%s4438_s25 + $0x48] sm:$0xff]  ;;  %v3400_v31 = vld [vmem:[%s4438_s25 + $0x50] sm:$0xff]  ;;  %s3858_s24 = sshll.u32 %s6958_s21, 8  ;;  %s6937_s26 = smov %s6958_s21 }
 0x3f0   : >> { %3397 = vst [vmem:[%s4434_s4 + $0x40] sm:$0xff] %v3396_v9  ;;  %v3402_v51 = vld [vmem:[%s4438_s25 + $0x58] sm:$0xff]  ;;  %3399 = vst [vmem:[%s4434_s4 + $0x48] sm:$0xff] %v3398_v29  ;;  %v3404_v33 = vld [vmem:[%s4438_s25 + $0x60] sm:$0xff]  ;;  %s6761_s29 = scalar_lea.vmem %s5930_s12, %s3858_s24 [#allocation3]   ;;  %s6764_s8 = scalar_lea.vmem %s6480_s5, %s3858_s24  }
 0x3f1   : >> { %3401 = vst [vmem:[%s4434_s4 + $0x50] sm:$0xff] %v3400_v31  ;;  %3403 = vst [vmem:[%s4434_s4 + $0x58] sm:$0xff] %v3402_v51  ;;  %v3406_v13 = vld [vmem:[%s4438_s25 + $0x68] sm:$0xff]  ;;  %v3408_v38 = vld [vmem:[%s4438_s25 + $0x70] sm:$0xff] }
 0x3f2   : >> { %3405 = vst [vmem:[%s4434_s4 + $0x60] sm:$0xff] %v3404_v33  ;;  %3407 = vst [vmem:[%s4434_s4 + $0x68] sm:$0xff] %v3406_v13  ;;  %v3410_v39 = vld [vmem:[%s4438_s25 + $0x78] sm:$0xff]  ;;  %v3412_v40 = vld [vmem:[%s4438_s25 + $0x80] sm:$0xff] }
 0x3f3   : >> { %3409 = vst [vmem:[%s4434_s4 + $0x70] sm:$0xff] %v3408_v38  ;;  %v3414_v41 = vld [vmem:[%s4438_s25 + $0x88] sm:$0xff]  ;;  %3411 = vst [vmem:[%s4434_s4 + $0x78] sm:$0xff] %v3410_v39  ;;  %v3416_v42 = vld [vmem:[%s4438_s25 + $0x90] sm:$0xff] }
 0x3f4   : >> { %3413 = vst [vmem:[%s4434_s4 + $0x80] sm:$0xff] %v3412_v40  ;;  %3415 = vst [vmem:[%s4434_s4 + $0x88] sm:$0xff] %v3414_v41  ;;  %v3418_v43 = vld [vmem:[%s4438_s25 + $0x98] sm:$0xff]  ;;  %v3420_v44 = vld [vmem:[%s4438_s25 + $0xa0] sm:$0xff] }
 0x3f5   : >> { %3417 = vst [vmem:[%s4434_s4 + $0x90] sm:$0xff] %v3416_v42  ;;  %3419 = vst [vmem:[%s4434_s4 + $0x98] sm:$0xff] %v3418_v43  ;;  %v3422_v45 = vld [vmem:[%s4438_s25 + $0xa8] sm:$0xff]  ;;  %v3424_v46 = vld [vmem:[%s4438_s25 + $0xb0] sm:$0xff] }
 0x3f6   : >> { %3421 = vst [vmem:[%s4434_s4 + $0xa0] sm:$0xff] %v3420_v44  ;;  %v3426_v47 = vld [vmem:[%s4438_s25 + $0xb8] sm:$0xff]  ;;  %3423 = vst [vmem:[%s4434_s4 + $0xa8] sm:$0xff] %v3422_v45  ;;  %v3428_v30 = vld [vmem:[%s4438_s25 + $0xc0] sm:$0xff] }
 0x3f7   : >> { %3425 = vst [vmem:[%s4434_s4 + $0xb0] sm:$0xff] %v3424_v46  ;;  %3427 = vst [vmem:[%s4434_s4 + $0xb8] sm:$0xff] %v3426_v47  ;;  %v3430_v48 = vld [vmem:[%s4438_s25 + $0xc8] sm:$0xff]  ;;  %v3432_v49 = vld [vmem:[%s4438_s25 + $0xd0] sm:$0xff] }
 0x3f8   : >> { %3429 = vst [vmem:[%s4434_s4 + $0xc0] sm:$0xff] %v3428_v30  ;;  %3431 = vst [vmem:[%s4434_s4 + $0xc8] sm:$0xff] %v3430_v48  ;;  %v3434_v50 = vld [vmem:[%s4438_s25 + $0xd8] sm:$0xff]  ;;  %v3436_v53 = vld [vmem:[%s4438_s25 + $0xe0] sm:$0xff] }
 0x3f9   : >> { %3433 = vst [vmem:[%s4434_s4 + $0xd0] sm:$0xff] %v3432_v49  ;;  %v3438_v54 = vld [vmem:[%s4438_s25 + $0xe8] sm:$0xff]  ;;  %3435 = vst [vmem:[%s4434_s4 + $0xd8] sm:$0xff] %v3434_v50  ;;  %v3440_v55 = vld [vmem:[%s4438_s25 + $0xf0] sm:$0xff] }
 0x3fa   : >> { %3437 = vst [vmem:[%s4434_s4 + $0xe0] sm:$0xff] %v3436_v53  ;;  %3439 = vst [vmem:[%s4434_s4 + $0xe8] sm:$0xff] %v3438_v54  ;;  %v3442_v56 = vld [vmem:[%s4438_s25 + $0xf8] sm:$0xff]  ;;  %v3444_v59 = vld [vmem:[%s4438_s25 + $0x100] sm:$0xff] }
 0x3fb   : >> { %3441 = vst [vmem:[%s4434_s4 + $0xf0] sm:$0xff] %v3440_v55  ;;  %3443 = vst [vmem:[%s4434_s4 + $0xf8] sm:$0xff] %v3442_v56  ;;  %v3446_v60 = vld [vmem:[%s4438_s25 + $0x108] sm:$0xff]  ;;  %v3448_v62 = vld [vmem:[%s4438_s25 + $0x110] sm:$0xff] }
 0x3fc   : >> { %3445 = vst [vmem:[%s4434_s4 + $0x148] sm:$0xff] %v3444_v59  ;;  %v3450_v63 = vld [vmem:[%s4438_s25 + $0x118] sm:$0xff]  ;;  %3447 = vst [vmem:[%s4434_s4 + $0x150] sm:$0xff] %v3446_v60  ;;  %v3452_v0 = vld [vmem:[%s4438_s25 + $0x120] sm:$0xff] }
 0x3fd   : >> { %3449 = vst [vmem:[%s4434_s4 + $0x158] sm:$0xff] %v3448_v62  ;;  %3451 = vst [vmem:[%s4434_s4 + $0x160] sm:$0xff] %v3450_v63  ;;  %v3454_v1 = vld [vmem:[%s4438_s25 + $0x128] sm:$0xff]  ;;  %v3456_v34 = vld [vmem:[%s4438_s25 + $0x130] sm:$0xff] }
 0x3fe   : >> { %3453 = vst [vmem:[%s4434_s4 + $0x168] sm:$0xff] %v3452_v0  ;;  %3455 = vst [vmem:[%s4434_s4 + $0x170] sm:$0xff] %v3454_v1  ;;  %v3458_v2 = vld [vmem:[%s4438_s25 + $0x138] sm:$0xff]  ;;  %v3460_v3 = vld [vmem:[%s4438_s25 + $0x140] sm:$0xff] }
 0x3ff   : >> { %3457 = vst [vmem:[%s4434_s4 + $0x178] sm:$0xff] %v3456_v34  ;;  %v3462_v4 = vld [vmem:[%s4438_s25 + $0x148] sm:$0xff]  ;;  %3459 = vst [vmem:[%s4434_s4 + $0x180] sm:$0xff] %v3458_v2  ;;  %v3464_v37 = vld [vmem:[%s4438_s25 + $0x150] sm:$0xff] }
 0x400   : >> { %3461 = vst [vmem:[%s4434_s4 + $0x188] sm:$0xff] %v3460_v3  ;;  %3463 = vst [vmem:[%s4434_s4 + $0x190] sm:$0xff] %v3462_v4  ;;  %v3466_v5 = vld [vmem:[%s4438_s25 + $0x158] sm:$0xff]  ;;  %v3468_v6 = vld [vmem:[%s4438_s25 + $0x160] sm:$0xff] }
 0x401   : >> { %3465 = vst [vmem:[%s4434_s4 + $0x198] sm:$0xff] %v3464_v37  ;;  %3467 = vst [vmem:[%s4434_s4 + $0x1a0] sm:$0xff] %v3466_v5  ;;  %v3470_v7 = vld [vmem:[%s4438_s25 + $0x168] sm:$0xff]  ;;  %v3472_v8 = vld [vmem:[%s4438_s25 + $0x170] sm:$0xff] }
 0x402   : >> { %3469 = vst [vmem:[%s4434_s4 + $0x1a8] sm:$0xff] %v3468_v6  ;;  %v3474_v52 = vld [vmem:[%s4438_s25 + $0x178] sm:$0xff]  ;;  %3471 = vst [vmem:[%s4434_s4 + $0x1b0] sm:$0xff] %v3470_v7  ;;  %v3476_v10 = vld [vmem:[%s4438_s25 + $0x180] sm:$0xff] }
 0x403   : >> { %3473 = vst [vmem:[%s4434_s4 + $0x1b8] sm:$0xff] %v3472_v8  ;;  %3475 = vst [vmem:[%s4434_s4 + $0x1c0] sm:$0xff] %v3474_v52  ;;  %v3478_v32 = vld [vmem:[%s4438_s25 + $0x188] sm:$0xff]  ;;  %v3480_v61 = vld [vmem:[%s4438_s25 + $0x190] sm:$0xff] }
 0x404   : >> { %3477 = vst [vmem:[%s4434_s4 + $0x1c8] sm:$0xff] %v3476_v10  ;;  %3479 = vst [vmem:[%s4434_s4 + $0x1d0] sm:$0xff] %v3478_v32  ;;  %v3482_v11 = vld [vmem:[%s4438_s25 + $0x198] sm:$0xff]  ;;  %v3484_v36 = vld [vmem:[%s4438_s25 + $0x1a0] sm:$0xff] }
 0x405   : >> { %3481 = vst [vmem:[%s4434_s4 + $0x1d8] sm:$0xff] %v3480_v61  ;;  %v3486_v12 = vld [vmem:[%s4438_s25 + $0x1a8] sm:$0xff]  ;;  %3483 = vst [vmem:[%s4434_s4 + $0x1e0] sm:$0xff] %v3482_v11  ;;  %v3488_v14 = vld [vmem:[%s4438_s25 + $0x1b0] sm:$0xff] }
 0x406   : >> { %3485 = vst [vmem:[%s4434_s4 + $0x1e8] sm:$0xff] %v3484_v36  ;;  %3487 = vst [vmem:[%s4434_s4 + $0x1f0] sm:$0xff] %v3486_v12  ;;  %v3490_v15 = vld [vmem:[%s4438_s25 + $0x1b8] sm:$0xff]  ;;  %v3492_v16 = vld [vmem:[%s4438_s25 + $0x1c0] sm:$0xff] }
 0x407   : >> { %3489 = vst [vmem:[%s4434_s4 + $0x1f8] sm:$0xff] %v3488_v14  ;;  %3491 = vst [vmem:[%s4434_s4 + $0x200] sm:$0xff] %v3490_v15  ;;  %v3494_v17 = vld [vmem:[%s4438_s25 + $0x1c8] sm:$0xff]  ;;  %v3496_v18 = vld [vmem:[%s4438_s25 + $0x1d0] sm:$0xff]  ;;  %3376 = sbr.rel (!%p3373_p0) target bundleno = 1003 (0x3eb), region = 301 }
 0x408   : >> { %3493 = vst [vmem:[%s4434_s4 + $0x208] sm:$0xff] %v3492_v16  ;;  %v3498_v19 = vld [vmem:[%s4438_s25 + $0x1d8] sm:$0xff]  ;;  %3495 = vst [vmem:[%s4434_s4 + $0x210] sm:$0xff] %v3494_v17  ;;  %v3500_v58 = vld [vmem:[%s4438_s25 + $0x1e0] sm:$0xff] }
 0x409   : >> { %3497 = vst [vmem:[%s4434_s4 + $0x218] sm:$0xff] %v3496_v18  ;;  %3499 = vst [vmem:[%s4434_s4 + $0x220] sm:$0xff] %v3498_v19  ;;  %v3502_v20 = vld [vmem:[%s4438_s25 + $0x1e8] sm:$0xff]  ;;  %v3504_v35 = vld [vmem:[%s4438_s25 + $0x1f0] sm:$0xff] }
 0x40a   : >> { %3501 = vst [vmem:[%s4434_s4 + $0x228] sm:$0xff] %v3500_v58  ;;  %3503 = vst [vmem:[%s4434_s4 + $0x230] sm:$0xff] %v3502_v20  ;;  %v3506_v21 = vld [vmem:[%s4438_s25 + $0x1f8] sm:$0xff]  ;;  %s6936_s25 = smov %s6761_s29 }
 0x40b   : >> { %3505 = vst [vmem:[%s4434_s4 + $0x238] sm:$0xff] %v3504_v35  ;;  %3507 = vst [vmem:[%s4434_s4 + $0x240] sm:$0xff] %v3506_v21  ;;  %s6935_s4 = smov %s6764_s8 }
 0x40c PF: > { %s6870_s9 = sand.u32 31, %s3367_s17   ;;  %s3875_s6 = sshll.u32 %s6694_s14, 12 }
 0x40d   : > { %s3519_s7 = sshra.s32 %s3875_s6, 4  ;;  %p3863_p1 = scmp.le.s32.totalorder %s6870_s9, 0 }
 0x40e   : > { %s6874_s10 = scalar_lea.vmem %s5930_s12, %s3519_s7 [#allocation3]   ;;  %s3523_s11 = scalar_lea.vmem %s6480_s5, %s3519_s7  }
 0x40f   : > { %3752 = sbr.rel (%p3863_p1) target bundleno = 1052 (0x41c), region = 306  ;;  %s4448_s22 = smov (!%p3863_p1), %s3523_s11  }
 0x410   : > { %s4452_s15 = smov (!%p3863_p1), %s6874_s10   ;;  %s4456_s30 = smov (!%p3863_p1), 0  }
 0x411   : > { %s4460_s4 = smov (!%p3863_p1), 0  }
 0x414 LB: >> { %v3535_v57 = vld [vmem:[%s4454_s15] sm:$0xff]  ;;  %s3539_s17 = sadd.s32 1, %s4458_s30  ;;  %s3529_s4 = sadd.s32 1, %s4462_s4   ;;  %s4462_s4 = sphi %s4460_s4, %s3529_s4   ;;  %s4458_s30 = sphi %s4456_s30, %s4457_s30   ;;  %s4454_s15 = sphi %s4452_s15, %s3544_s15   ;;  %s4450_s22 = sphi %s4448_s22, %s3545_s22  }
 0x415   : >> { %v3537_v22 = vld [vmem:[%s4454_s15 + $0x100] sm:$0xff]  ;;  %3536 = vst [vmem:[%s4450_s22] sm:$0xff] %v3535_v57  ;;  %p3540_p2 = scmp.ge.s32.totalorder %s3539_s17, %s6870_s9  ;;  %p3528_p3 = scmp.ge.s32.totalorder %s3529_s4, %s6870_s9 }
 0x416   : >> { %3538 = vst [vmem:[%s4450_s22 + $0x148] sm:$0xff] %v3537_v22 }
 0x417   : >> { %s6960_s17 = smov (%p3540_p2, %s3539_s17), 0  ;;  %3531 = sbr.rel (!%p3528_p3) target bundleno = 1044 (0x414), region = 312 }
 0x418   : >> { %s3864_s14 = sshll.u32 %s6960_s17, 3  ;;  %s4457_s30 = smov %s6960_s17  }
 0x419   : >> { %s3544_s15 = scalar_lea.vmem %s6874_s10, %s3864_s14 [#allocation3]   ;;  %s3545_s22 = scalar_lea.vmem %s3523_s11, %s3864_s14  }
 0x41c PF: > { %s4467_s25 = smov 1  }
 0x41d   : > { %s3546_s26 = sshll.u32 %s4467_s25, %s6486_s20 }
 0x41e   : > { %s3866_s27 = sadd.s32 4294967295, %s3546_s26 }
 0x41f   : > { %v3556_v23 = vld [vmem:[%s6687_s18] sm:%s3866_s27] }
 0x420   : > { %v3558_v24 = vld [vmem:[%s6687_s18 + $0x100] sm:%s3866_s27]  ;;  %3557 = vst [vmem:[%s6690_s28] sm:%s3866_s27] %v3556_v23 }
 0x421   : > { %3559 = vst [vmem:[%s6690_s28 + $0x148] sm:%s3866_s27] %v3558_v24 }
 0x422 PF: > { %p3867_p5 = scmp.ge.u32.totalorder %s6482_s23, 8 }
 0x423   : > { %s4468_s21 = smov (!%p3867_p5), 1  }
 0x424   : > { %3160 = sbr.rel (%p3867_p5) target bundleno = 1068 (0x42c), region = 114  ;;  %s3161_s24 = sshll.u32 (!%p3867_p5), %s4468_s21, %s6482_s23 }
 0x425   : > { %s3868_s29 = sadd.s32 (!%p3867_p5), 4294967295, %s3161_s24 }
 0x429   : > { %v3171_v25 = vld [vmem:[%s5930_s12] sm:%s3868_s29] }
 0x42a   : > { %v3173_v26 = vld [vmem:[%s5930_s12 + $0x100] sm:%s3868_s29]  ;;  %3172 = vst [vmem:[%s6480_s5] sm:%s3868_s29] %v3171_v25 }
 0x42b   : > { %3174 = vst [vmem:[%s6480_s5 + $0x148] sm:%s3868_s29] %v3173_v26 }
 0x42c PF: > { %p10_p4 = scmp.ge.s32.totalorder %s4508_s16, 4   ;;  %s6938_s12 = smov %s4330_s13 }
 0x42d   : > { %s6939_s13 = smov %s4518_s19  ;;  %s6940_s14 = smov %s4508_s16 }
 0x42e   :  { %12 = sbr.rel (!%p10_p4) target bundleno = 2 (0x2), region = 323 }

// kernel: convnet_forward.7
= control target key start
LH: loop header
LB: loop body
LE: loop exit
PB: predicated region body
PF: predicated region fallthrough
CT: control target
= control target key end

     0   :  { %v734_v3 = vmov 0   ;;  %vm210_vm0 = vcmask 130048   ;;  %s1435_s1 = inlined_call_operand.vmem [shape: f32[144,1250], index: 1, kind: input, shape index: {}]   ;;  %s1436_s0 = inlined_call_operand.vmem [shape: f32[16,144], index: 0, kind: input, shape index: {}]   ;;  %s1437_s2 = inlined_call_operand.vmem [shape: f32[16,1], index: 2, kind: input, shape index: {}]   ;;  %s1438_s3 = inlined_call_operand.vmem [shape: f32[16,1250], index: 3, kind: output, shape index: {}]  }
   0x1   :  { %v169_v0 = vld [vmem:[%s1435_s1 + $0x4b8] sm:$0xff]  ;;  %v171_v1 = vld [vmem:[%s1435_s1 + $0x4c8] sm:$0xff]  ;;  %v168_v2 = vld [vmem:[%s1435_s1 + $0x4b0] sm:$0xff]  ;;  %733 = vset.pattern.permute.xlu0 %v734_v3 }
   0x2   :  { %217 = vmatprep.subr.mxu0 %v169_v0  ;;  %294 = vmatprep.subr.mxu1 %v171_v1  ;;  %v170_v4 = vld [vmem:[%s1435_s1 + $0x4c0] sm:$0xff]  ;;  %v159_v5 = vld [vmem:[%s1435_s1 + $0x468] sm:$0xff]  ;;  %v161_v6 = vld [vmem:[%s1435_s1 + $0x478] sm:$0xff] }
   0x3   :  { %218 = vmatpush1.msra.mxu0 %v168_v2  ;;  %295 = vmatpush1.msra.mxu1 %v170_v4  ;;  %v158_v7 = vld [vmem:[%s1435_s1 + $0x460] sm:$0xff]  ;;  %v160_v8 = vld [vmem:[%s1435_s1 + $0x470] sm:$0xff]  ;;  %v149_v9 = vld [vmem:[%s1435_s1 + $0x418] sm:$0xff] }
   0x4   :  { %219 = vmatprep.subr.mxu0 %v159_v5  ;;  %296 = vmatprep.subr.mxu1 %v161_v6  ;;  %v151_v10 = vld [vmem:[%s1435_s1 + $0x428] sm:$0xff]  ;;  %v148_v11 = vld [vmem:[%s1435_s1 + $0x410] sm:$0xff]  ;;  %v150_v12 = vld [vmem:[%s1435_s1 + $0x420] sm:$0xff] }
   0x5   :  { %220 = vmatpush1.msra.mxu0 %v158_v7  ;;  %297 = vmatpush1.msra.mxu1 %v160_v8  ;;  %v139_v13 = vld [vmem:[%s1435_s1 + $0x3c8] sm:$0xff]  ;;  %v141_v14 = vld [vmem:[%s1435_s1 + $0x3d8] sm:$0xff]  ;;  %v138_v15 = vld [vmem:[%s1435_s1 + $0x3c0] sm:$0xff] }
   0x6   :  { %221 = vmatprep.subr.mxu0 %v149_v9  ;;  %298 = vmatprep.subr.mxu1 %v151_v10  ;;  %v140_v16 = vld [vmem:[%s1435_s1 + $0x3d0] sm:$0xff]  ;;  %v129_v17 = vld [vmem:[%s1435_s1 + $0x378] sm:$0xff]  ;;  %v131_v18 = vld [vmem:[%s1435_s1 + $0x388] sm:$0xff] }
   0x7   :  { %222 = vmatpush1.msra.mxu0 %v148_v11  ;;  %299 = vmatpush1.msra.mxu1 %v150_v12  ;;  %v128_v19 = vld [vmem:[%s1435_s1 + $0x370] sm:$0xff]  ;;  %v130_v20 = vld [vmem:[%s1435_s1 + $0x380] sm:$0xff]  ;;  %v119_v21 = vld [vmem:[%s1435_s1 + $0x328] sm:$0xff] }
   0x8   :  { %223 = vmatprep.subr.mxu0 %v139_v13  ;;  %300 = vmatprep.subr.mxu1 %v141_v14  ;;  %v121_v22 = vld [vmem:[%s1435_s1 + $0x338] sm:$0xff]  ;;  %v118_v23 = vld [vmem:[%s1435_s1 + $0x320] sm:$0xff]  ;;  %v120_v24 = vld [vmem:[%s1435_s1 + $0x330] sm:$0xff] }
   0x9   :  { %224 = vmatpush1.msra.mxu0 %v138_v15  ;;  %301 = vmatpush1.msra.mxu1 %v140_v16  ;;  %v109_v25 = vld [vmem:[%s1435_s1 + $0x2d8] sm:$0xff]  ;;  %v111_v26 = vld [vmem:[%s1435_s1 + $0x2e8] sm:$0xff]  ;;  %v108_v27 = vld [vmem:[%s1435_s1 + $0x2d0] sm:$0xff] }
   0xa   :  { %225 = vmatprep.subr.mxu0 %v129_v17  ;;  %302 = vmatprep.subr.mxu1 %v131_v18  ;;  %v110_v28 = vld [vmem:[%s1435_s1 + $0x2e0] sm:$0xff]  ;;  %v99_v29 = vld [vmem:[%s1435_s1 + $0x288] sm:$0xff]  ;;  %v101_v30 = vld [vmem:[%s1435_s1 + $0x298] sm:$0xff] }
   0xb   :  { %226 = vmatpush1.msra.mxu0 %v128_v19  ;;  %303 = vmatpush1.msra.mxu1 %v130_v20  ;;  %v98_v31 = vld [vmem:[%s1435_s1 + $0x280] sm:$0xff]  ;;  %v100_v32 = vld [vmem:[%s1435_s1 + $0x290] sm:$0xff]  ;;  %v89_v33 = vld [vmem:[%s1435_s1 + $0x238] sm:$0xff] }
   0xc   :  { %227 = vmatprep.subr.mxu0 %v119_v21  ;;  %304 = vmatprep.subr.mxu1 %v121_v22  ;;  %v91_v34 = vld [vmem:[%s1435_s1 + $0x248] sm:$0xff]  ;;  %v88_v35 = vld [vmem:[%s1435_s1 + $0x230] sm:$0xff]  ;;  %v90_v36 = vld [vmem:[%s1435_s1 + $0x240] sm:$0xff] }
   0xd   :  { %228 = vmatpush1.msra.mxu0 %v118_v23  ;;  %305 = vmatpush1.msra.mxu1 %v120_v24  ;;  %v79_v37 = vld [vmem:[%s1435_s1 + $0x1e8] sm:$0xff]  ;;  %v81_v38 = vld [vmem:[%s1435_s1 + $0x1f8] sm:$0xff]  ;;  %v78_v39 = vld [vmem:[%s1435_s1 + $0x1e0] sm:$0xff] }
   0xe   :  { %229 = vmatprep.subr.mxu0 %v109_v25  ;;  %306 = vmatprep.subr.mxu1 %v111_v26  ;;  %v80_v40 = vld [vmem:[%s1435_s1 + $0x1f0] sm:$0xff]  ;;  %v69_v41 = vld [vmem:[%s1435_s1 + $0x198] sm:$0xff]  ;;  %v71_v42 = vld [vmem:[%s1435_s1 + $0x1a8] sm:$0xff] }
   0xf   :  { %230 = vmatpush1.msra.mxu0 %v108_v27  ;;  %307 = vmatpush1.msra.mxu1 %v110_v28  ;;  %v68_v43 = vld [vmem:[%s1435_s1 + $0x190] sm:$0xff]  ;;  %v70_v44 = vld [vmem:[%s1435_s1 + $0x1a0] sm:$0xff]  ;;  %v59_v45 = vld [vmem:[%s1435_s1 + $0x148] sm:$0xff] }
  0x10   :  { %231 = vmatprep.subr.mxu0 %v99_v29  ;;  %308 = vmatprep.subr.mxu1 %v101_v30  ;;  %v61_v46 = vld [vmem:[%s1435_s1 + $0x158] sm:$0xff]  ;;  %v58_v47 = vld [vmem:[%s1435_s1 + $0x140] sm:$0xff]  ;;  %v60_v48 = vld [vmem:[%s1435_s1 + $0x150] sm:$0xff] }
  0x11   :  { %232 = vmatpush1.msra.mxu0 %v98_v31  ;;  %309 = vmatpush1.msra.mxu1 %v100_v32  ;;  %v49_v49 = vld [vmem:[%s1435_s1 + $0xf8] sm:$0xff]  ;;  %v51_v50 = vld [vmem:[%s1435_s1 + $0x108] sm:$0xff]  ;;  %v48_v51 = vld [vmem:[%s1435_s1 + $0xf0] sm:$0xff] }
  0x12   :  { %233 = vmatprep.subr.mxu0 %v89_v33  ;;  %310 = vmatprep.subr.mxu1 %v91_v34  ;;  %v50_v52 = vld [vmem:[%s1435_s1 + $0x100] sm:$0xff]  ;;  %v39_v53 = vld [vmem:[%s1435_s1 + $0xa8] sm:$0xff]  ;;  %v41_v54 = vld [vmem:[%s1435_s1 + $0xb8] sm:$0xff] }
  0x13   :  { %234 = vmatpush1.msra.mxu0 %v88_v35  ;;  %311 = vmatpush1.msra.mxu1 %v90_v36  ;;  %v38_v55 = vld [vmem:[%s1435_s1 + $0xa0] sm:$0xff]  ;;  %v40_v56 = vld [vmem:[%s1435_s1 + $0xb0] sm:$0xff]  ;;  %v29_v57 = vld [vmem:[%s1435_s1 + $0x58] sm:$0xff] }
  0x14   :  { %235 = vmatprep.subr.mxu0 %v79_v37  ;;  %312 = vmatprep.subr.mxu1 %v81_v38  ;;  %v31_v58 = vld [vmem:[%s1435_s1 + $0x68] sm:$0xff]  ;;  %v28_v59 = vld [vmem:[%s1435_s1 + $0x50] sm:$0xff]  ;;  %v30_v60 = vld [vmem:[%s1435_s1 + $0x60] sm:$0xff] }
  0x15   :  { %236 = vmatpush1.msra.mxu0 %v78_v39  ;;  %313 = vmatpush1.msra.mxu1 %v80_v40  ;;  %v19_v61 = vld [vmem:[%s1435_s1 + $0x8] sm:$0xff]  ;;  %v21_v62 = vld [vmem:[%s1435_s1 + $0x18] sm:$0xff]  ;;  %v18_v63 = vld [vmem:[%s1435_s1] sm:$0xff] }
  0x16   :  { %237 = vmatprep.subr.mxu0 %v69_v41  ;;  %314 = vmatprep.subr.mxu1 %v71_v42  ;;  %v20_v0 = vld [vmem:[%s1435_s1 + $0x10] sm:$0xff]  ;;  %v189_v1 = vld [vmem:[%s1435_s1 + $0x558] sm:$0xff]  ;;  %v191_v2 = vld [vmem:[%s1435_s1 + $0x568] sm:$0xff] }
  0x17   :  { %238 = vmatpush1.msra.mxu0 %v68_v43  ;;  %315 = vmatpush1.msra.mxu1 %v70_v44  ;;  %v188_v3 = vld [vmem:[%s1435_s1 + $0x550] sm:$0xff]  ;;  %v190_v4 = vld [vmem:[%s1435_s1 + $0x560] sm:$0xff]  ;;  %v179_v5 = vld [vmem:[%s1435_s1 + $0x508] sm:$0xff] }
  0x18   :  { %239 = vmatprep.subr.mxu0 %v59_v45  ;;  %316 = vmatprep.subr.mxu1 %v61_v46  ;;  %v181_v6 = vld [vmem:[%s1435_s1 + $0x518] sm:$0xff]  ;;  %v178_v7 = vld [vmem:[%s1435_s1 + $0x500] sm:$0xff]  ;;  %v971_v8 = vld [vmem:[%s1436_s0 + $0x8] sm:$0xff] }
  0x19   :  { %240 = vmatpush1.msra.mxu0 %v58_v47  ;;  %317 = vmatpush1.msra.mxu1 %v60_v48  ;;  %v180_v9 = vld [vmem:[%s1435_s1 + $0x510] sm:$0xff]  ;;  %v979_v10 = vld [vmem:[%s1436_s0] sm:$0xff]  ;;  %v173_v11 = vld [vmem:[%s1435_s1 + $0x4d8] sm:$0xff] }
  0x1a   :  { %241 = vmatprep.subr.mxu0 %v49_v49  ;;  %318 = vmatprep.subr.mxu1 %v51_v50  ;;  %v175_v12 = vld [vmem:[%s1435_s1 + $0x4e8] sm:$0xff]  ;;  %v172_v13 = vld [vmem:[%s1435_s1 + $0x4d0] sm:$0xff]  ;;  %v174_v14 = vld [vmem:[%s1435_s1 + $0x4e0] sm:$0xff] }
  0x1b   :  { %242 = vmatpush1.msra.mxu0 %v48_v51  ;;  %319 = vmatpush1.msra.mxu1 %v50_v52  ;;  %v163_v15 = vld [vmem:[%s1435_s1 + $0x488] sm:$0xff]  ;;  %v165_v16 = vld [vmem:[%s1435_s1 + $0x498] sm:$0xff]  ;;  %v162_v17 = vld [vmem:[%s1435_s1 + $0x480] sm:$0xff] }
  0x1c   :  { %243 = vmatprep.subr.mxu0 %v39_v53  ;;  %320 = vmatprep.subr.mxu1 %v41_v54  ;;  %v164_v18 = vld [vmem:[%s1435_s1 + $0x490] sm:$0xff]  ;;  %v153_v19 = vld [vmem:[%s1435_s1 + $0x438] sm:$0xff]  ;;  %v155_v20 = vld [vmem:[%s1435_s1 + $0x448] sm:$0xff] }
  0x1d   :  { %244 = vmatpush1.msra.mxu0 %v38_v55  ;;  %321 = vmatpush1.msra.mxu1 %v40_v56  ;;  %v152_v21 = vld [vmem:[%s1435_s1 + $0x430] sm:$0xff]  ;;  %v154_v22 = vld [vmem:[%s1435_s1 + $0x440] sm:$0xff]  ;;  %v143_v23 = vld [vmem:[%s1435_s1 + $0x3e8] sm:$0xff] }
  0x1e   :  { %245 = vmatprep.subr.mxu0 %v29_v57  ;;  %322 = vmatprep.subr.mxu1 %v31_v58  ;;  %v145_v24 = vld [vmem:[%s1435_s1 + $0x3f8] sm:$0xff]  ;;  %v142_v25 = vld [vmem:[%s1435_s1 + $0x3e0] sm:$0xff]  ;;  %v144_v26 = vld [vmem:[%s1435_s1 + $0x3f0] sm:$0xff] }
  0x1f   :  { %246 = vmatpush1.msra.mxu0 %v28_v59  ;;  %323 = vmatpush1.msra.mxu1 %v30_v60  ;;  %v133_v27 = vld [vmem:[%s1435_s1 + $0x398] sm:$0xff]  ;;  %v135_v28 = vld [vmem:[%s1435_s1 + $0x3a8] sm:$0xff]  ;;  %v132_v29 = vld [vmem:[%s1435_s1 + $0x390] sm:$0xff] }
  0x20   :  { %247 = vmatprep.subr.mxu0 %v19_v61  ;;  %324 = vmatprep.subr.mxu1 %v21_v62  ;;  %v134_v30 = vld [vmem:[%s1435_s1 + $0x3a0] sm:$0xff]  ;;  %v123_v31 = vld [vmem:[%s1435_s1 + $0x348] sm:$0xff]  ;;  %v125_v32 = vld [vmem:[%s1435_s1 + $0x358] sm:$0xff] }
  0x21   :  { %248 = vmatpush1.msra.mxu0 %v18_v63  ;;  %325 = vmatpush1.msra.mxu1 %v20_v0  ;;  %v122_v33 = vld [vmem:[%s1435_s1 + $0x340] sm:$0xff]  ;;  %v124_v34 = vld [vmem:[%s1435_s1 + $0x350] sm:$0xff]  ;;  %v113_v35 = vld [vmem:[%s1435_s1 + $0x2f8] sm:$0xff] }
  0x22   :  { %277 = vmatprep.subr.mxu0 %v189_v1  ;;  %354 = vmatprep.subr.mxu1 %v191_v2  ;;  %v115_v36 = vld [vmem:[%s1435_s1 + $0x308] sm:$0xff]  ;;  %v112_v37 = vld [vmem:[%s1435_s1 + $0x2f0] sm:$0xff]  ;;  %v114_v38 = vld [vmem:[%s1435_s1 + $0x300] sm:$0xff] }
  0x23   :  { %278 = vmatpush2.msra.mxu0 %v188_v3  ;;  %355 = vmatpush2.msra.mxu1 %v190_v4  ;;  %v103_v39 = vld [vmem:[%s1435_s1 + $0x2a8] sm:$0xff]  ;;  %v105_v40 = vld [vmem:[%s1435_s1 + $0x2b8] sm:$0xff]  ;;  %v102_v41 = vld [vmem:[%s1435_s1 + $0x2a0] sm:$0xff] }
  0x24   :  { %279 = vmatprep.subr.mxu0 %v179_v5  ;;  %356 = vmatprep.subr.mxu1 %v181_v6  ;;  %v104_v42 = vld [vmem:[%s1435_s1 + $0x2b0] sm:$0xff]  ;;  %v93_v43 = vld [vmem:[%s1435_s1 + $0x258] sm:$0xff]  ;;  %v95_v44 = vld [vmem:[%s1435_s1 + $0x268] sm:$0xff] }
  0x25   :  { %280 = vmatpush2.msra.mxu0 %v178_v7  ;;  %686 = vmatprep.mubr.msk.f32.mxu0 %vm210_vm0, %v971_v8  ;;  %v92_v45 = vld [vmem:[%s1435_s1 + $0x250] sm:$0xff]  ;;  %v94_v46 = vld [vmem:[%s1435_s1 + $0x260] sm:$0xff]  ;;  %v83_v47 = vld [vmem:[%s1435_s1 + $0x208] sm:$0xff] }
  0x26   :  { %357 = vmatpush2.msra.mxu1 %v180_v9  ;;  %688 = vmatprep.mubr.msk.f32.mxu1 %vm210_vm0, %v971_v8  ;;  %v85_v48 = vld [vmem:[%s1435_s1 + $0x218] sm:$0xff]  ;;  %v82_v49 = vld [vmem:[%s1435_s1 + $0x200] sm:$0xff]  ;;  %v84_v50 = vld [vmem:[%s1435_s1 + $0x210] sm:$0xff] }
  0x27   :  { %282 = vmatmul.mubr.f32.vlgmr.msra.gmra.mxu0 %v979_v10  ;;  %359 = vmatmul.mubr.f32.vlgmr.msra.gmra.mxu1 %v979_v10  ;;  %v73_v51 = vld [vmem:[%s1435_s1 + $0x1b8] sm:$0xff]  ;;  %v75_v52 = vld [vmem:[%s1435_s1 + $0x1c8] sm:$0xff]  ;;  %v72_v53 = vld [vmem:[%s1435_s1 + $0x1b0] sm:$0xff] }
  0x28   :  { %371 = vmatprep.subr.mxu0 %v173_v11  ;;  %448 = vmatprep.subr.mxu1 %v175_v12  ;;  %v74_v54 = vld [vmem:[%s1435_s1 + $0x1c0] sm:$0xff]  ;;  %v63_v55 = vld [vmem:[%s1435_s1 + $0x168] sm:$0xff]  ;;  %v65_v56 = vld [vmem:[%s1435_s1 + $0x178] sm:$0xff] }
  0x29   :  { %372 = vmatpush1.msra.mxu0 %v172_v13  ;;  %449 = vmatpush1.msra.mxu1 %v174_v14  ;;  %v62_v57 = vld [vmem:[%s1435_s1 + $0x160] sm:$0xff]  ;;  %v64_v58 = vld [vmem:[%s1435_s1 + $0x170] sm:$0xff]  ;;  %v53_v59 = vld [vmem:[%s1435_s1 + $0x118] sm:$0xff] }
  0x2a   :  { %373 = vmatprep.subr.mxu0 %v163_v15  ;;  %450 = vmatprep.subr.mxu1 %v165_v16  ;;  %v55_v60 = vld [vmem:[%s1435_s1 + $0x128] sm:$0xff]  ;;  %v52_v61 = vld [vmem:[%s1435_s1 + $0x110] sm:$0xff]  ;;  %v54_v62 = vld [vmem:[%s1435_s1 + $0x120] sm:$0xff] }
  0x2b   :  { %374 = vmatpush1.msra.mxu0 %v162_v17  ;;  %451 = vmatpush1.msra.mxu1 %v164_v18  ;;  %v43_v63 = vld [vmem:[%s1435_s1 + $0xc8] sm:$0xff]  ;;  %v45_v0 = vld [vmem:[%s1435_s1 + $0xd8] sm:$0xff]  ;;  %v42_v1 = vld [vmem:[%s1435_s1 + $0xc0] sm:$0xff] }
  0x2c   :  { %375 = vmatprep.subr.mxu0 %v153_v19  ;;  %452 = vmatprep.subr.mxu1 %v155_v20  ;;  %v44_v2 = vld [vmem:[%s1435_s1 + $0xd0] sm:$0xff]  ;;  %v1158_v3 = vld [vmem:[%s1436_s0 + $0x18] sm:$0xff]  ;;  %v35_v5 = vld [vmem:[%s1435_s1 + $0x88] sm:$0xff] }
  0x2d   :  { %376 = vmatpush1.msra.mxu0 %v152_v21  ;;  %453 = vmatpush1.msra.mxu1 %v154_v22  ;;  %v33_v4 = vld [vmem:[%s1435_s1 + $0x78] sm:$0xff]  ;;  %v1169_v6 = vld [vmem:[%s1436_s0 + $0x10] sm:$0xff]  ;;  %v34_v9 = vld [vmem:[%s1435_s1 + $0x80] sm:$0xff] }
  0x2e   :  { %377 = vmatprep.subr.mxu0 %v143_v23  ;;  %454 = vmatprep.subr.mxu1 %v145_v24  ;;  %v32_v7 = vld [vmem:[%s1435_s1 + $0x70] sm:$0xff]  ;;  %v23_v11 = vld [vmem:[%s1435_s1 + $0x28] sm:$0xff]  ;;  %v25_v12 = vld [vmem:[%s1435_s1 + $0x38] sm:$0xff] }
  0x2f   :  { %378 = vmatpush1.msra.mxu0 %v142_v25  ;;  %455 = vmatpush1.msra.mxu1 %v144_v26  ;;  %v22_v13 = vld [vmem:[%s1435_s1 + $0x20] sm:$0xff]  ;;  %v24_v14 = vld [vmem:[%s1435_s1 + $0x30] sm:$0xff]  ;;  %v193_v15 = vld [vmem:[%s1435_s1 + $0x578] sm:$0xff] }
  0x30   :  { %379 = vmatprep.subr.mxu0 %v133_v27  ;;  %456 = vmatprep.subr.mxu1 %v135_v28  ;;  %v195_v16 = vld [vmem:[%s1435_s1 + $0x588] sm:$0xff]  ;;  %v192_v17 = vld [vmem:[%s1435_s1 + $0x570] sm:$0xff]  ;;  %v194_v18 = vld [vmem:[%s1435_s1 + $0x580] sm:$0xff] }
  0x31   :  { %380 = vmatpush1.msra.mxu0 %v132_v29  ;;  %457 = vmatpush1.msra.mxu1 %v134_v30  ;;  %v183_v19 = vld [vmem:[%s1435_s1 + $0x528] sm:$0xff]  ;;  %v185_v20 = vld [vmem:[%s1435_s1 + $0x538] sm:$0xff]  ;;  %v182_v21 = vld [vmem:[%s1435_s1 + $0x520] sm:$0xff] }
  0x32   :  { %381 = vmatprep.subr.mxu0 %v123_v31  ;;  %458 = vmatprep.subr.mxu1 %v125_v32  ;;  %v184_v22 = vld [vmem:[%s1435_s1 + $0x530] sm:$0xff]  ;;  %v177_v23 = vld [vmem:[%s1435_s1 + $0x4f8] sm:$0xff]  ;;  %v167_v25 = vld [vmem:[%s1435_s1 + $0x4a8] sm:$0xff] }
  0x33   :  { %382 = vmatpush1.msra.mxu0 %v122_v33  ;;  %459 = vmatpush1.msra.mxu1 %v124_v34  ;;  %v176_v24 = vld [vmem:[%s1435_s1 + $0x4f0] sm:$0xff]  ;;  %v166_v26 = vld [vmem:[%s1435_s1 + $0x4a0] sm:$0xff]  ;;  %v157_v27 = vld [vmem:[%s1435_s1 + $0x458] sm:$0xff] }
  0x34   :  { %383 = vmatprep.subr.mxu0 %v113_v35  ;;  %460 = vmatprep.subr.mxu1 %v115_v36  ;;  %v156_v28 = vld [vmem:[%s1435_s1 + $0x450] sm:$0xff]  ;;  %v147_v29 = vld [vmem:[%s1435_s1 + $0x408] sm:$0xff]  ;;  %v146_v30 = vld [vmem:[%s1435_s1 + $0x400] sm:$0xff] }
  0x35   :  { %384 = vmatpush1.msra.mxu0 %v112_v37  ;;  %461 = vmatpush1.msra.mxu1 %v114_v38  ;;  %v137_v31 = vld [vmem:[%s1435_s1 + $0x3b8] sm:$0xff]  ;;  %v136_v32 = vld [vmem:[%s1435_s1 + $0x3b0] sm:$0xff]  ;;  %v127_v33 = vld [vmem:[%s1435_s1 + $0x368] sm:$0xff] }
  0x36   :  { %385 = vmatprep.subr.mxu0 %v103_v39  ;;  %462 = vmatprep.subr.mxu1 %v105_v40  ;;  %v126_v34 = vld [vmem:[%s1435_s1 + $0x360] sm:$0xff]  ;;  %v117_v35 = vld [vmem:[%s1435_s1 + $0x318] sm:$0xff]  ;;  %v116_v36 = vld [vmem:[%s1435_s1 + $0x310] sm:$0xff] }
  0x37   :  { %386 = vmatpush1.msra.mxu0 %v102_v41  ;;  %463 = vmatpush1.msra.mxu1 %v104_v42  ;;  %v107_v37 = vld [vmem:[%s1435_s1 + $0x2c8] sm:$0xff]  ;;  %v106_v38 = vld [vmem:[%s1435_s1 + $0x2c0] sm:$0xff]  ;;  %v97_v39 = vld [vmem:[%s1435_s1 + $0x278] sm:$0xff] }
  0x38   :  { %387 = vmatprep.subr.mxu0 %v93_v43  ;;  %464 = vmatprep.subr.mxu1 %v95_v44  ;;  %v96_v40 = vld [vmem:[%s1435_s1 + $0x270] sm:$0xff]  ;;  %v87_v41 = vld [vmem:[%s1435_s1 + $0x228] sm:$0xff]  ;;  %v86_v42 = vld [vmem:[%s1435_s1 + $0x220] sm:$0xff] }
  0x39   :  { %388 = vmatpush1.msra.mxu0 %v92_v45  ;;  %465 = vmatpush1.msra.mxu1 %v94_v46  ;;  %v77_v43 = vld [vmem:[%s1435_s1 + $0x1d8] sm:$0xff]  ;;  %v76_v44 = vld [vmem:[%s1435_s1 + $0x1d0] sm:$0xff]  ;;  %v67_v45 = vld [vmem:[%s1435_s1 + $0x188] sm:$0xff] }
  0x3a   :  { %389 = vmatprep.subr.mxu0 %v83_v47  ;;  %466 = vmatprep.subr.mxu1 %v85_v48  ;;  %v66_v46 = vld [vmem:[%s1435_s1 + $0x180] sm:$0xff]  ;;  %v57_v47 = vld [vmem:[%s1435_s1 + $0x138] sm:$0xff]  ;;  %v56_v48 = vld [vmem:[%s1435_s1 + $0x130] sm:$0xff] }
  0x3b   :  { %390 = vmatpush1.msra.mxu0 %v82_v49  ;;  %467 = vmatpush1.msra.mxu1 %v84_v50  ;;  %v47_v49 = vld [vmem:[%s1435_s1 + $0xe8] sm:$0xff]  ;;  %v46_v50 = vld [vmem:[%s1435_s1 + $0xe0] sm:$0xff] }
  0x3c   :  { %391 = vmatprep.subr.mxu0 %v73_v51  ;;  %468 = vmatprep.subr.mxu1 %v75_v52  ;;  %v37_v51 = vld [vmem:[%s1435_s1 + $0x98] sm:$0xff]  ;;  %v36_v52 = vld [vmem:[%s1435_s1 + $0x90] sm:$0xff] }
  0x3d   :  { %392 = vmatpush1.msra.mxu0 %v72_v53  ;;  %469 = vmatpush1.msra.mxu1 %v74_v54  ;;  %v27_v53 = vld [vmem:[%s1435_s1 + $0x48] sm:$0xff]  ;;  %v26_v54 = vld [vmem:[%s1435_s1 + $0x40] sm:$0xff] }
  0x3e   :  { %393 = vmatprep.subr.mxu0 %v63_v55  ;;  %470 = vmatprep.subr.mxu1 %v65_v56  ;;  %v197_v55 = vld [vmem:[%s1435_s1 + $0x598] sm:$0xff]  ;;  %v198_v56 = vld [vmem:[%s1437_s2] sm:$0xff] }
  0x3f   :  { %394 = vmatpush1.msra.mxu0 %v62_v57  ;;  %471 = vmatpush1.msra.mxu1 %v64_v58  ;;  %v196_v57 = vld [vmem:[%s1435_s1 + $0x590] sm:$0xff]  ;;  %v187_v58 = vld [vmem:[%s1435_s1 + $0x548] sm:$0xff] }
  0x40   :  { %395 = vmatprep.subr.mxu0 %v53_v59  ;;  %472 = vmatprep.subr.mxu1 %v55_v60  ;;  %v186_v59 = vld [vmem:[%s1435_s1 + $0x540] sm:$0xff]  ;;  %v199_v60 = vld [vmem:[%s1437_s2 + $0x8] sm:$0xff] }
  0x41   :  { %396 = vmatpush1.msra.mxu0 %v52_v61  ;;  %473 = vmatpush1.msra.mxu1 %v54_v62 }
  0x42   :  { %397 = vmatprep.subr.mxu0 %v43_v63  ;;  %474 = vmatprep.subr.mxu1 %v45_v0 }
  0x43   :  { %398 = vmatpush1.msra.mxu0 %v42_v1  ;;  %475 = vmatpush1.msra.mxu1 %v44_v2 }
  0x44   :  { %687 = vmatprep.mubr.msk.f32.mxu0 %vm210_vm0, %v1158_v3  ;;  %689 = vmatprep.mubr.msk.f32.mxu1 %vm210_vm0, %v1158_v3 }
  0x45   :  { %399 = vmatprep.subr.mxu0 %v33_v4  ;;  %476 = vmatprep.subr.mxu1 %v35_v5 }
  0x46   :  { %288 = vmatmul.mubr.f32.gmra.mxu0 %v1169_v6  ;;  %365 = vmatmul.mubr.f32.gmra.mxu1 %v1169_v6 }
  0x47   :  { %400 = vmatpush1.msra.mxu0 %v32_v7  ;;  %477 = vmatpush1.msra.mxu1 %v34_v9 }
  0x48   :  { %401 = vmatprep.subr.mxu0 %v23_v11  ;;  %478 = vmatprep.subr.mxu1 %v25_v12 }
  0x49   :  { %402 = vmatpush1.msra.mxu0 %v22_v13  ;;  %479 = vmatpush1.msra.mxu1 %v24_v14 }
  0x4a   :  { %431 = vmatprep.subr.mxu0 %v193_v15  ;;  %508 = vmatprep.subr.mxu1 %v195_v16 }
  0x4b   :  { %432 = vmatpush2.msra.mxu0 %v192_v17  ;;  %509 = vmatpush2.msra.mxu1 %v194_v18 }
  0x4c   :  { %433 = vmatprep.subr.mxu0 %v183_v19  ;;  %510 = vmatprep.subr.mxu1 %v185_v20 }
  0x4d   :  { %434 = vmatpush2.msra.mxu0 %v182_v21  ;;  %690 = vmatprep.mubr.msk.f32.mxu0 %vm210_vm0, %v971_v8 }
  0x4e   :  { %511 = vmatpush2.msra.mxu1 %v184_v22  ;;  %692 = vmatprep.mubr.msk.f32.mxu1 %vm210_vm0, %v971_v8 }
  0x4f   :  { %436 = vmatmul.mubr.f32.vlgmr.msra.gmra.mxu0 %v979_v10  ;;  %513 = vmatmul.mubr.f32.vlgmr.msra.gmra.mxu1 %v979_v10 }
  0x50   :  { %525 = vmatprep.subr.mxu0 %v177_v23  ;;  %696 = vmatprep.subr.mxu1 %v177_v23 }
  0x51   :  { %526 = vmatpush1.msra.mxu0 %v176_v24  ;;  %714 = vmatpush1.msra.mxu1 %v176_v24 }
  0x52   :  { %527 = vmatprep.subr.mxu0 %v167_v25  ;;  %697 = vmatprep.subr.mxu1 %v167_v25 }
  0x53   :  { %528 = vmatpush1.msra.mxu0 %v166_v26  ;;  %715 = vmatpush1.msra.mxu1 %v166_v26 }
  0x54   :  { %529 = vmatprep.subr.mxu0 %v157_v27  ;;  %698 = vmatprep.subr.mxu1 %v157_v27 }
  0x55   :  { %530 = vmatpush1.msra.mxu0 %v156_v28  ;;  %716 = vmatpush1.msra.mxu1 %v156_v28 }
  0x56   :  { %531 = vmatprep.subr.mxu0 %v147_v29  ;;  %699 = vmatprep.subr.mxu1 %v147_v29 }
  0x57   :  { %532 = vmatpush1.msra.mxu0 %v146_v30  ;;  %717 = vmatpush1.msra.mxu1 %v146_v30 }
  0x58   :  { %533 = vmatprep.subr.mxu0 %v137_v31  ;;  %700 = vmatprep.subr.mxu1 %v137_v31 }
  0x59   :  { %534 = vmatpush1.msra.mxu0 %v136_v32  ;;  %718 = vmatpush1.msra.mxu1 %v136_v32 }
  0x5a   :  { %535 = vmatprep.subr.mxu0 %v127_v33  ;;  %701 = vmatprep.subr.mxu1 %v127_v33 }
  0x5b   :  { %536 = vmatpush1.msra.mxu0 %v126_v34  ;;  %719 = vmatpush1.msra.mxu1 %v126_v34 }
  0x5c   :  { %537 = vmatprep.subr.mxu0 %v117_v35  ;;  %702 = vmatprep.subr.mxu1 %v117_v35 }
  0x5d   :  { %538 = vmatpush1.msra.mxu0 %v116_v36  ;;  %720 = vmatpush1.msra.mxu1 %v116_v36 }
  0x5e   :  { %539 = vmatprep.subr.mxu0 %v107_v37  ;;  %703 = vmatprep.subr.mxu1 %v107_v37 }
  0x5f   :  { %540 = vmatpush1.msra.mxu0 %v106_v38  ;;  %721 = vmatpush1.msra.mxu1 %v106_v38 }
  0x60   :  { %541 = vmatprep.subr.mxu0 %v97_v39  ;;  %704 = vmatprep.subr.mxu1 %v97_v39 }
  0x61   :  { %542 = vmatpush1.msra.mxu0 %v96_v40  ;;  %722 = vmatpush1.msra.mxu1 %v96_v40 }
  0x62   :  { %543 = vmatprep.subr.mxu0 %v87_v41  ;;  %705 = vmatprep.subr.mxu1 %v87_v41 }
  0x63   :  { %544 = vmatpush1.msra.mxu0 %v86_v42  ;;  %723 = vmatpush1.msra.mxu1 %v86_v42 }
  0x64   :  { %545 = vmatprep.subr.mxu0 %v77_v43  ;;  %706 = vmatprep.subr.mxu1 %v77_v43 }
  0x65   :  { %546 = vmatpush1.msra.mxu0 %v76_v44  ;;  %724 = vmatpush1.msra.mxu1 %v76_v44 }
  0x66   :  { %547 = vmatprep.subr.mxu0 %v67_v45  ;;  %707 = vmatprep.subr.mxu1 %v67_v45 }
  0x67   :  { %548 = vmatpush1.msra.mxu0 %v66_v46  ;;  %725 = vmatpush1.msra.mxu1 %v66_v46 }
  0x68   :  { %549 = vmatprep.subr.mxu0 %v57_v47  ;;  %708 = vmatprep.subr.mxu1 %v57_v47 }
  0x69   :  { %550 = vmatpush1.msra.mxu0 %v56_v48  ;;  %726 = vmatpush1.msra.mxu1 %v56_v48 }
  0x6a   :  { %551 = vmatprep.subr.mxu0 %v47_v49  ;;  %709 = vmatprep.subr.mxu1 %v47_v49 }
  0x6b   :  { %691 = vmatprep.mubr.msk.f32.mxu0 %vm210_vm0, %v1158_v3  ;;  %693 = vmatprep.mubr.msk.f32.mxu1 %vm210_vm0, %v1158_v3 }
  0x6c   :  { %552 = vmatpush1.msra.mxu0 %v46_v50  ;;  %727 = vmatpush1.msra.mxu1 %v46_v50 }
  0x6d   :  { %442 = vmatmul.mubr.f32.gmra.mxu0 %v1169_v6  ;;  %519 = vmatmul.mubr.f32.gmra.mxu1 %v1169_v6 }
  0x6e   :  { %553 = vmatprep.subr.mxu0 %v37_v51  ;;  %710 = vmatprep.subr.mxu1 %v37_v51 }
  0x6f   :  { %554 = vmatpush1.msra.mxu0 %v36_v52  ;;  %728 = vmatpush1.msra.mxu1 %v36_v52 }
  0x70   :  { %555 = vmatprep.subr.mxu0 %v27_v53  ;;  %711 = vmatprep.subr.mxu1 %v27_v53 }
  0x71   :  { %556 = vmatpush1.msra.mxu0 %v26_v54  ;;  %729 = vmatpush1.msra.mxu1 %v26_v54 }
  0x72   :  { %585 = vmatprep.subr.mxu0 %v197_v55  ;;  %712 = vmatprep.subr.mxu1 %v197_v55 }
  0x73   :  { %202 = vperm.xlu0 %733, %v198_v56   ;;  %586 = vmatpush2.msra.mxu0 %v196_v57 }
  0x74   :  { %730 = vmatpush2.msra.mxu1 %v196_v57  ;;  %587 = vmatprep.subr.mxu0 %v187_v58 }
  0x75   :  { %713 = vmatprep.subr.mxu1 %v187_v58  ;;  %588 = vmatpush2.msra.mxu0 %v186_v59 }
  0x76   :  { %731 = vmatpush2.msra.mxu1 %v186_v59  ;;  %694 = vmatprep.mubr.msk.f32.mxu0 %vm210_vm0, %v971_v8 }
  0x77   :  { %695 = vmatprep.mubr.msk.f32.mxu1 %vm210_vm0, %v1158_v3  ;;  %590 = vmatmul.mubr.f32.vlgmr.msra.gmra.mxu0 %v979_v10 }
  0x78   :  { %596 = vmatmul.mubr.f32.vlgmr.msra.gmra.mxu1 %v1169_v6  ;;  %207 = vperm.xlu0 %733, %v199_v60  }
  0xe7   :  { %v283_v61 = vpop.f32.mrf.mxu0  ;;  %v360_v62 = vpop.f32.mrf.mxu1 }
  0xe9   :  { %v285_v63 = vpop.f32.mrf.mxu0  ;;  %v362_v0 = vpop.f32.mrf.mxu1 }
  0xee   :  { %v1351_v1 = vpop.permute.xlu0 %202 }
  0xef   :  { %v284_v2 = vadd.f32 %v283_v61, %v1351_v1  ;;  %v361_v4 = vadd.f32 %v360_v62, %v1351_v1  ;;  %v286_v8 = vadd.f32 %v285_v63, %v1351_v1  ;;  %v363_v5 = vadd.f32 %v362_v0, %v1351_v1 }
  0xf1   :  { %vm602_vm1 = vcmp.gt.f32.partialorder %v284_v2, 0.0  ;;  %v622_v3 = vmul.f32 0.01, %v284_v2  ;;  %vm604_vm2 = vcmp.gt.f32.partialorder %v361_v4, 0.0  ;;  %v624_v10 = vmul.f32 0.01, %v361_v4 }
  0xf2   :  { %vm603_vm3 = vcmp.gt.f32.partialorder %v286_v8, 0.0  ;;  %v623_v6 = vmul.f32 0.01, %v286_v8  ;;  %vm605_vm4 = vcmp.gt.f32.partialorder %v363_v5, 0.0  ;;  %v625_v7 = vmul.f32 0.01, %v363_v5 }
  0xf3   :  { %v642_v9 = vsel %vm602_vm1, %v284_v2, %v622_v3  ;;  %v644_v11 = vsel %vm604_vm2, %v361_v4, %v624_v10  ;;  %v1369_v14 = vpop.permute.xlu0 %207 }
  0xf4   :  { %662 = vst [vmem:[%s1438_s3] sm:$0xff] %v642_v9  ;;  %664 = vst [vmem:[%s1438_s3 + $0x10] sm:$0xff] %v644_v11  ;;  %v643_v12 = vsel %vm603_vm3, %v286_v8, %v623_v6  ;;  %v645_v13 = vsel %vm605_vm4, %v363_v5, %v625_v7 }
  0xf5   :  { %663 = vst [vmem:[%s1438_s3 + $0x8] sm:$0xff] %v643_v12  ;;  %665 = vst [vmem:[%s1438_s3 + $0x18] sm:$0xff] %v645_v13 }
 0x106   :  { %v289_v15 = vpop.f32.mrf.mxu0  ;;  %v366_v16 = vpop.f32.mrf.mxu1 }
 0x107   :  { %v290_v17 = vadd.f32 %v289_v15, %v1369_v14  ;;  %v367_v18 = vadd.f32 %v366_v16, %v1369_v14 }
 0x108   :  { %v291_v19 = vpop.f32.mrf.mxu0  ;;  %v368_v20 = vpop.f32.mrf.mxu1 }
 0x109   :  { %vm612_vm5 = vcmp.gt.f32.partialorder %v290_v17, 0.0  ;;  %vm614_vm6 = vcmp.gt.f32.partialorder %v367_v18, 0.0  ;;  %v632_v21 = vmul.f32 0.01, %v290_v17  ;;  %v634_v22 = vmul.f32 0.01, %v367_v18 }
 0x10a   :  { %v292_v23 = vadd.f32 %v291_v19, %v1369_v14  ;;  %v369_v24 = vadd.f32 %v368_v20, %v1369_v14 }
 0x10b   :  { %v652_v25 = vsel %vm612_vm5, %v290_v17, %v632_v21  ;;  %v654_v26 = vsel %vm614_vm6, %v367_v18, %v634_v22 }
 0x10c   :  { %672 = vst [vmem:[%s1438_s3 + $0x50] sm:$0xff] %v652_v25  ;;  %674 = vst [vmem:[%s1438_s3 + $0x60] sm:$0xff] %v654_v26  ;;  %vm613_vm7 = vcmp.gt.f32.partialorder %v292_v23, 0.0  ;;  %v633_v27 = vmul.f32 0.01, %v292_v23  ;;  %vm615_vm8 = vcmp.gt.f32.partialorder %v369_v24, 0.0 }
 0x10d   :  { %v635_v28 = vmul.f32 0.01, %v369_v24 }
 0x10e   :  { %v653_v29 = vsel %vm613_vm7, %v292_v23, %v633_v27 }
 0x10f   :  { %v655_v30 = vsel %vm615_vm8, %v369_v24, %v635_v28  ;;  %673 = vst [vmem:[%s1438_s3 + $0x58] sm:$0xff] %v653_v29  ;;  %v437_v31 = vpop.f32.mrf.mxu0  ;;  %v514_v32 = vpop.f32.mrf.mxu1 }
 0x110   :  { %675 = vst [vmem:[%s1438_s3 + $0x68] sm:$0xff] %v655_v30  ;;  %v438_v33 = vadd.f32 %v437_v31, %v1351_v1  ;;  %v515_v34 = vadd.f32 %v514_v32, %v1351_v1 }
 0x111   :  { %v439_v35 = vpop.f32.mrf.mxu0  ;;  %v516_v36 = vpop.f32.mrf.mxu1 }
 0x112   :  { %vm606_vm9 = vcmp.gt.f32.partialorder %v438_v33, 0.0  ;;  %v626_v37 = vmul.f32 0.01, %v438_v33  ;;  %vm608_vm10 = vcmp.gt.f32.partialorder %v515_v34, 0.0  ;;  %v628_v38 = vmul.f32 0.01, %v515_v34 }
 0x113   :  { %v440_v39 = vadd.f32 %v439_v35, %v1351_v1  ;;  %v517_v40 = vadd.f32 %v516_v36, %v1351_v1 }
 0x114   :  { %v646_v41 = vsel %vm606_vm9, %v438_v33, %v626_v37  ;;  %v648_v42 = vsel %vm608_vm10, %v515_v34, %v628_v38 }
 0x115   :  { %666 = vst [vmem:[%s1438_s3 + $0x20] sm:$0xff] %v646_v41  ;;  %668 = vst [vmem:[%s1438_s3 + $0x30] sm:$0xff] %v648_v42  ;;  %vm607_vm11 = vcmp.gt.f32.partialorder %v440_v39, 0.0  ;;  %v627_v43 = vmul.f32 0.01, %v440_v39  ;;  %vm609_vm12 = vcmp.gt.f32.partialorder %v517_v40, 0.0 }
 0x116   :  { %v629_v44 = vmul.f32 0.01, %v517_v40 }
 0x117   :  { %v647_v45 = vsel %vm607_vm11, %v440_v39, %v627_v43 }
 0x118   :  { %v649_v46 = vsel %vm609_vm12, %v517_v40, %v629_v44  ;;  %667 = vst [vmem:[%s1438_s3 + $0x28] sm:$0xff] %v647_v45 }
 0x119   :  { %669 = vst [vmem:[%s1438_s3 + $0x38] sm:$0xff] %v649_v46 }
 0x12d   :  { %v443_v47 = vpop.f32.mrf.mxu0  ;;  %v520_v48 = vpop.f32.mrf.mxu1 }
 0x12e   :  { %v444_v49 = vadd.f32 %v443_v47, %v1369_v14  ;;  %v521_v50 = vadd.f32 %v520_v48, %v1369_v14 }
 0x12f   :  { %v445_v51 = vpop.f32.mrf.mxu0  ;;  %v522_v52 = vpop.f32.mrf.mxu1 }
 0x130   :  { %vm616_vm13 = vcmp.gt.f32.partialorder %v444_v49, 0.0  ;;  %v636_v53 = vmul.f32 0.01, %v444_v49  ;;  %vm618_vm14 = vcmp.gt.f32.partialorder %v521_v50, 0.0  ;;  %v638_v54 = vmul.f32 0.01, %v521_v50 }
 0x131   :  { %v446_v55 = vadd.f32 %v445_v51, %v1369_v14  ;;  %v523_v56 = vadd.f32 %v522_v52, %v1369_v14 }
 0x132   :  { %v656_v57 = vsel %vm616_vm13, %v444_v49, %v636_v53  ;;  %v658_v58 = vsel %vm618_vm14, %v521_v50, %v638_v54 }
 0x133   :  { %676 = vst [vmem:[%s1438_s3 + $0x70] sm:$0xff] %v656_v57  ;;  %678 = vst [vmem:[%s1438_s3 + $0x80] sm:$0xff] %v658_v58  ;;  %vm617_vm15 = vcmp.gt.f32.partialorder %v446_v55, 0.0  ;;  %v637_v59 = vmul.f32 0.01, %v446_v55  ;;  %vm619_vm0 = vcmp.gt.f32.partialorder %v523_v56, 0.0 }
 0x134   :  { %v639_v60 = vmul.f32 0.01, %v523_v56 }
 0x135   :  { %v657_v61 = vsel %vm617_vm15, %v446_v55, %v637_v59 }
 0x136   :  { %v659_v62 = vsel %vm619_vm0, %v523_v56, %v639_v60  ;;  %677 = vst [vmem:[%s1438_s3 + $0x78] sm:$0xff] %v657_v61 }
 0x137   :  { %679 = vst [vmem:[%s1438_s3 + $0x88] sm:$0xff] %v659_v62  ;;  %v591_v63 = vpop.f32.mrf.mxu0 }
 0x138   :  { %v592_v0 = vadd.f32 %v591_v63, %v1351_v1  ;;  %v597_v2 = vpop.f32.mrf.mxu1 }
 0x139   :  { %v598_v4 = vadd.f32 %v597_v2, %v1369_v14  ;;  %v593_v8 = vpop.f32.mrf.mxu0 }
 0x13a   :  { %vm610_vm1 = vcmp.gt.f32.partialorder %v592_v0, 0.0  ;;  %v630_v5 = vmul.f32 0.01, %v592_v0  ;;  %v594_v3 = vadd.f32 %v593_v8, %v1351_v1  ;;  %v599_v10 = vpop.f32.mrf.mxu1 }
 0x13b   :  { %vm620_vm2 = vcmp.gt.f32.partialorder %v598_v4, 0.0  ;;  %v640_v6 = vmul.f32 0.01, %v598_v4  ;;  %v600_v7 = vadd.f32 %v599_v10, %v1369_v14 }
 0x13c   :  { %v650_v9 = vsel %vm610_vm1, %v592_v0, %v630_v5  ;;  %vm611_vm3 = vcmp.gt.f32.partialorder %v594_v3, 0.0  ;;  %v631_v11 = vmul.f32 0.01, %v594_v3 }
 0x13d   :  { %670 = vst [vmem:[%s1438_s3 + $0x40] sm:$0xff] %v650_v9  ;;  %v660_v12 = vsel %vm620_vm2, %v598_v4, %v640_v6  ;;  %vm621_vm4 = vcmp.gt.f32.partialorder %v600_v7, 0.0  ;;  %v641_v13 = vmul.f32 0.01, %v600_v7 }
 0x13e   :  { %680 = vst [vmem:[%s1438_s3 + $0x90] sm:$0xff] %v660_v12  ;;  %v651_v1 = vsel %vm611_vm3, %v594_v3, %v631_v11 }
 0x13f   :  { %671 = vst [vmem:[%s1438_s3 + $0x48] sm:$0xff] %v651_v1  ;;  %v661_v14 = vsel %vm621_vm4, %v600_v7, %v641_v13 }
 0x140   :  { %681 = vst [vmem:[%s1438_s3 + $0x98] sm:$0xff] %v661_v14 }

// kernel: convnet_forward.8
= control target key start
LH: loop header
LB: loop body
LE: loop exit
PB: predicated region body
PF: predicated region fallthrough
CT: control target
= control target key end

     0   :  { %v278_v0 = vmov 0.0   ;;  %v279_v4 = vmov 0   ;;  %vm84_vm0 = vcmask 130048   ;;  %s520_s1 = inlined_call_operand.vmem [shape: f32[144,288], index: 1, kind: input, shape index: {}]   ;;  %s521_s0 = inlined_call_operand.vmem [shape: f32[16,144], index: 0, kind: input, shape index: {}]   ;;  %s522_s2 = inlined_call_operand.vmem [shape: f32[16,1], index: 2, kind: input, shape index: {}]   ;;  %s523_s3 = inlined_call_operand.vmem [shape: f32[16,288], index: 3, kind: output, shape index: {}]  }
   0x1   :  { %168 = vmatprep.subr.mxu1 %v278_v0  ;;  %v64_v1 = vld [vmem:[%s520_s1 + $0x170] sm:$0xff]  ;;  %v65_v2 = vld [vmem:[%s520_s1 + $0x178] sm:$0xff]  ;;  %v63_v3 = vld [vmem:[%s520_s1 + $0x168] sm:$0xff]  ;;  %277 = vset.pattern.permute.xlu0 %v279_v4 }
   0x2   :  { %91 = vmatprep.subr.mxu0 %v64_v1  ;;  %169 = vmatpush1.msra.mxu1 %v65_v2  ;;  %v61_v5 = vld [vmem:[%s520_s1 + $0x158] sm:$0xff]  ;;  %v62_v6 = vld [vmem:[%s520_s1 + $0x160] sm:$0xff]  ;;  %v60_v7 = vld [vmem:[%s520_s1 + $0x150] sm:$0xff] }
   0x3   :  { %92 = vmatpush1.msra.mxu0 %v63_v3  ;;  %170 = vmatprep.subr.mxu1 %v278_v0  ;;  %v58_v8 = vld [vmem:[%s520_s1 + $0x140] sm:$0xff]  ;;  %v59_v9 = vld [vmem:[%s520_s1 + $0x148] sm:$0xff]  ;;  %v57_v10 = vld [vmem:[%s520_s1 + $0x138] sm:$0xff] }
   0x4   :  { %93 = vmatprep.subr.mxu0 %v61_v5  ;;  %171 = vmatpush1.msra.mxu1 %v62_v6  ;;  %v55_v11 = vld [vmem:[%s520_s1 + $0x128] sm:$0xff]  ;;  %v56_v12 = vld [vmem:[%s520_s1 + $0x130] sm:$0xff]  ;;  %v54_v13 = vld [vmem:[%s520_s1 + $0x120] sm:$0xff] }
   0x5   :  { %94 = vmatpush1.msra.mxu0 %v60_v7  ;;  %172 = vmatprep.subr.mxu1 %v278_v0  ;;  %v52_v14 = vld [vmem:[%s520_s1 + $0x110] sm:$0xff]  ;;  %v53_v15 = vld [vmem:[%s520_s1 + $0x118] sm:$0xff]  ;;  %v51_v16 = vld [vmem:[%s520_s1 + $0x108] sm:$0xff] }
   0x6   :  { %95 = vmatprep.subr.mxu0 %v58_v8  ;;  %173 = vmatpush1.msra.mxu1 %v59_v9  ;;  %v49_v17 = vld [vmem:[%s520_s1 + $0xf8] sm:$0xff]  ;;  %v50_v18 = vld [vmem:[%s520_s1 + $0x100] sm:$0xff]  ;;  %v48_v19 = vld [vmem:[%s520_s1 + $0xf0] sm:$0xff] }
   0x7   :  { %96 = vmatpush1.msra.mxu0 %v57_v10  ;;  %174 = vmatprep.subr.mxu1 %v278_v0  ;;  %v46_v20 = vld [vmem:[%s520_s1 + $0xe0] sm:$0xff]  ;;  %v47_v21 = vld [vmem:[%s520_s1 + $0xe8] sm:$0xff]  ;;  %v45_v22 = vld [vmem:[%s520_s1 + $0xd8] sm:$0xff] }
   0x8   :  { %97 = vmatprep.subr.mxu0 %v55_v11  ;;  %175 = vmatpush1.msra.mxu1 %v56_v12  ;;  %v43_v23 = vld [vmem:[%s520_s1 + $0xc8] sm:$0xff]  ;;  %v44_v24 = vld [vmem:[%s520_s1 + $0xd0] sm:$0xff]  ;;  %v42_v25 = vld [vmem:[%s520_s1 + $0xc0] sm:$0xff] }
   0x9   :  { %98 = vmatpush1.msra.mxu0 %v54_v13  ;;  %176 = vmatprep.subr.mxu1 %v278_v0  ;;  %v40_v26 = vld [vmem:[%s520_s1 + $0xb0] sm:$0xff]  ;;  %v41_v27 = vld [vmem:[%s520_s1 + $0xb8] sm:$0xff]  ;;  %v39_v28 = vld [vmem:[%s520_s1 + $0xa8] sm:$0xff] }
   0xa   :  { %99 = vmatprep.subr.mxu0 %v52_v14  ;;  %177 = vmatpush1.msra.mxu1 %v53_v15  ;;  %v37_v29 = vld [vmem:[%s520_s1 + $0x98] sm:$0xff]  ;;  %v38_v30 = vld [vmem:[%s520_s1 + $0xa0] sm:$0xff]  ;;  %v36_v31 = vld [vmem:[%s520_s1 + $0x90] sm:$0xff] }
   0xb   :  { %100 = vmatpush1.msra.mxu0 %v51_v16  ;;  %178 = vmatprep.subr.mxu1 %v278_v0  ;;  %v34_v32 = vld [vmem:[%s520_s1 + $0x80] sm:$0xff]  ;;  %v35_v33 = vld [vmem:[%s520_s1 + $0x88] sm:$0xff]  ;;  %v33_v34 = vld [vmem:[%s520_s1 + $0x78] sm:$0xff] }
   0xc   :  { %101 = vmatprep.subr.mxu0 %v49_v17  ;;  %179 = vmatpush1.msra.mxu1 %v50_v18  ;;  %v31_v35 = vld [vmem:[%s520_s1 + $0x68] sm:$0xff]  ;;  %v32_v36 = vld [vmem:[%s520_s1 + $0x70] sm:$0xff]  ;;  %v30_v37 = vld [vmem:[%s520_s1 + $0x60] sm:$0xff] }
   0xd   :  { %102 = vmatpush1.msra.mxu0 %v48_v19  ;;  %180 = vmatprep.subr.mxu1 %v278_v0  ;;  %v28_v38 = vld [vmem:[%s520_s1 + $0x50] sm:$0xff]  ;;  %v29_v39 = vld [vmem:[%s520_s1 + $0x58] sm:$0xff]  ;;  %v27_v40 = vld [vmem:[%s520_s1 + $0x48] sm:$0xff] }
   0xe   :  { %103 = vmatprep.subr.mxu0 %v46_v20  ;;  %181 = vmatpush1.msra.mxu1 %v47_v21  ;;  %v25_v41 = vld [vmem:[%s520_s1 + $0x38] sm:$0xff]  ;;  %v26_v42 = vld [vmem:[%s520_s1 + $0x40] sm:$0xff]  ;;  %v24_v43 = vld [vmem:[%s520_s1 + $0x30] sm:$0xff] }
   0xf   :  { %104 = vmatpush1.msra.mxu0 %v45_v22  ;;  %182 = vmatprep.subr.mxu1 %v278_v0  ;;  %v22_v44 = vld [vmem:[%s520_s1 + $0x20] sm:$0xff]  ;;  %v23_v45 = vld [vmem:[%s520_s1 + $0x28] sm:$0xff]  ;;  %v21_v46 = vld [vmem:[%s520_s1 + $0x18] sm:$0xff] }
  0x10   :  { %105 = vmatprep.subr.mxu0 %v43_v23  ;;  %183 = vmatpush1.msra.mxu1 %v44_v24  ;;  %v19_v47 = vld [vmem:[%s520_s1 + $0x8] sm:$0xff]  ;;  %v20_v48 = vld [vmem:[%s520_s1 + $0x10] sm:$0xff]  ;;  %v18_v49 = vld [vmem:[%s520_s1] sm:$0xff] }
  0x11   :  { %106 = vmatpush1.msra.mxu0 %v42_v25  ;;  %184 = vmatprep.subr.mxu1 %v278_v0  ;;  %v70_v50 = vld [vmem:[%s520_s1 + $0x1a0] sm:$0xff]  ;;  %v71_v51 = vld [vmem:[%s520_s1 + $0x1a8] sm:$0xff]  ;;  %v69_v52 = vld [vmem:[%s520_s1 + $0x198] sm:$0xff] }
  0x12   :  { %107 = vmatprep.subr.mxu0 %v40_v26  ;;  %185 = vmatpush1.msra.mxu1 %v41_v27  ;;  %v67_v53 = vld [vmem:[%s520_s1 + $0x188] sm:$0xff]  ;;  %v68_v54 = vld [vmem:[%s520_s1 + $0x190] sm:$0xff]  ;;  %v66_v56 = vld [vmem:[%s520_s1 + $0x180] sm:$0xff] }
  0x13   :  { %108 = vmatpush1.msra.mxu0 %v39_v28  ;;  %186 = vmatprep.subr.mxu1 %v278_v0  ;;  %v15_v55 = vld [vmem:[%s521_s0 + $0x8] sm:$0xff]  ;;  %v14_v57 = vld [vmem:[%s521_s0] sm:$0xff]  ;;  %v17_v58 = vld [vmem:[%s521_s0 + $0x18] sm:$0xff] }
  0x14   :  { %109 = vmatprep.subr.mxu0 %v37_v29  ;;  %187 = vmatpush1.msra.mxu1 %v38_v30  ;;  %v72_v59 = vld [vmem:[%s522_s2] sm:$0xff]  ;;  %v16_v60 = vld [vmem:[%s521_s0 + $0x10] sm:$0xff]  ;;  %v73_v61 = vld [vmem:[%s522_s2 + $0x8] sm:$0xff] }
  0x15   :  { %110 = vmatpush1.msra.mxu0 %v36_v31  ;;  %188 = vmatprep.subr.mxu1 %v278_v0 }
  0x16   :  { %111 = vmatprep.subr.mxu0 %v34_v32  ;;  %189 = vmatpush1.msra.mxu1 %v35_v33 }
  0x17   :  { %112 = vmatpush1.msra.mxu0 %v33_v34  ;;  %190 = vmatprep.subr.mxu1 %v278_v0 }
  0x18   :  { %113 = vmatprep.subr.mxu0 %v31_v35  ;;  %191 = vmatpush1.msra.mxu1 %v32_v36 }
  0x19   :  { %114 = vmatpush1.msra.mxu0 %v30_v37  ;;  %192 = vmatprep.subr.mxu1 %v278_v0 }
  0x1a   :  { %115 = vmatprep.subr.mxu0 %v28_v38  ;;  %193 = vmatpush1.msra.mxu1 %v29_v39 }
  0x1b   :  { %116 = vmatpush1.msra.mxu0 %v27_v40  ;;  %194 = vmatprep.subr.mxu1 %v278_v0 }
  0x1c   :  { %117 = vmatprep.subr.mxu0 %v25_v41  ;;  %195 = vmatpush1.msra.mxu1 %v26_v42 }
  0x1d   :  { %118 = vmatpush1.msra.mxu0 %v24_v43  ;;  %196 = vmatprep.subr.mxu1 %v278_v0 }
  0x1e   :  { %119 = vmatprep.subr.mxu0 %v22_v44  ;;  %197 = vmatpush1.msra.mxu1 %v23_v45 }
  0x1f   :  { %120 = vmatpush1.msra.mxu0 %v21_v46  ;;  %198 = vmatprep.subr.mxu1 %v278_v0 }
  0x20   :  { %121 = vmatprep.subr.mxu0 %v19_v47  ;;  %199 = vmatpush1.msra.mxu1 %v20_v48 }
  0x21   :  { %122 = vmatpush1.msra.mxu0 %v18_v49  ;;  %228 = vmatprep.subr.mxu1 %v278_v0 }
  0x22   :  { %151 = vmatprep.subr.mxu0 %v70_v50  ;;  %229 = vmatpush2.msra.mxu1 %v71_v51 }
  0x23   :  { %152 = vmatpush2.msra.mxu0 %v69_v52  ;;  %230 = vmatprep.subr.mxu1 %v278_v0 }
  0x24   :  { %153 = vmatprep.subr.mxu0 %v67_v53  ;;  %231 = vmatpush2.msra.mxu1 %v68_v54 }
  0x25   :  { %273 = vmatprep.mubr.msk.f32.mxu1 %vm84_vm0, %v15_v55  ;;  %154 = vmatpush2.msra.mxu0 %v66_v56 }
  0x26   :  { %271 = vmatprep.mubr.msk.f32.mxu0 %vm84_vm0, %v15_v55  ;;  %233 = vmatmul.mubr.f32.vlgmr.msra.gmra.mxu1 %v14_v57 }
  0x27   :  { %156 = vmatmul.mubr.f32.vlgmr.msra.gmra.mxu0 %v14_v57  ;;  %274 = vmatprep.mubr.msk.f32.mxu1 %vm84_vm0, %v17_v58 }
  0x28   :  { %272 = vmatprep.mubr.msk.f32.mxu0 %vm84_vm0, %v17_v58  ;;  %76 = vperm.xlu0 %277, %v72_v59  }
  0x2a   :  { %238 = vmatmul.mubr.f32.gmra.mxu1 %v16_v60 }
  0x2b   :  { %162 = vmatmul.mubr.f32.gmra.mxu0 %v16_v60 }
  0x2c   :  { %81 = vperm.xlu0 %277, %v73_v61  }
  0xa3   :  { %v77_v62 = vpop.permute.xlu0 %76 }
  0xa7   :  { %v82_v4 = vpop.permute.xlu0 %81 }
  0xe6   :  { %v234_v63 = vpop.f32.mrf.mxu1 }
  0xe7   :  { %v235_v0 = vadd.f32 %v234_v63, %v77_v62  ;;  %v157_v1 = vpop.f32.mrf.mxu0 }
  0xe8   :  { %v158_v2 = vadd.f32 %v157_v1, %v77_v62  ;;  %v236_v3 = vpop.f32.mrf.mxu1 }
  0xe9   :  { %vm245_vm1 = vcmp.gt.f32.partialorder %v235_v0, 0.0  ;;  %v251_v5 = vmul.f32 0.01, %v235_v0  ;;  %v159_v6 = vpop.f32.mrf.mxu0 }
  0xea   :  { %vm243_vm2 = vcmp.gt.f32.partialorder %v158_v2, 0.0  ;;  %v249_v7 = vmul.f32 0.01, %v158_v2  ;;  %v160_v8 = vadd.f32 %v159_v6, %v77_v62  ;;  %v239_v9 = vpop.f32.mrf.mxu1 }
  0xeb   :  { %v257_v10 = vsel %vm245_vm1, %v235_v0, %v251_v5  ;;  %v240_v11 = vadd.f32 %v239_v9, %v82_v4  ;;  %v163_v12 = vpop.f32.mrf.mxu0 }
  0xec   :  { %263 = vst [vmem:[%s523_s3 + $0x10] sm:$0xff] %v257_v10  ;;  %v255_v13 = vsel %vm243_vm2, %v158_v2, %v249_v7  ;;  %vm244_vm3 = vcmp.gt.f32.partialorder %v160_v8, 0.0  ;;  %v250_v14 = vmul.f32 0.01, %v160_v8  ;;  %v164_v15 = vadd.f32 %v163_v12, %v82_v4  ;;  %v241_v16 = vpop.f32.mrf.mxu1 }
  0xed   :  { %261 = vst [vmem:[%s523_s3] sm:$0xff] %v255_v13  ;;  %vm248_vm4 = vcmp.gt.f32.partialorder %v240_v11, 0.0  ;;  %v254_v17 = vmul.f32 0.01, %v240_v11  ;;  %v165_v18 = vpop.f32.mrf.mxu0 }
  0xee   :  { %v256_v19 = vsel %vm244_vm3, %v160_v8, %v250_v14  ;;  %vm246_vm5 = vcmp.gt.f32.partialorder %v164_v15, 0.0  ;;  %v252_v20 = vmul.f32 0.01, %v164_v15  ;;  %v166_v21 = vadd.f32 %v165_v18, %v82_v4 }
  0xef   :  { %262 = vst [vmem:[%s523_s3 + $0x8] sm:$0xff] %v256_v19  ;;  %v260_v22 = vsel %vm248_vm4, %v240_v11, %v254_v17 }
  0xf0   :  { %266 = vst [vmem:[%s523_s3 + $0x28] sm:$0xff] %v260_v22  ;;  %v258_v23 = vsel %vm246_vm5, %v164_v15, %v252_v20  ;;  %vm247_vm6 = vcmp.gt.f32.partialorder %v166_v21, 0.0  ;;  %v253_v24 = vmul.f32 0.01, %v166_v21 }
  0xf1   :  { %264 = vst [vmem:[%s523_s3 + $0x18] sm:$0xff] %v258_v23 }
  0xf2   :  { %v259_v25 = vsel %vm247_vm6, %v166_v21, %v253_v24 }
  0xf3   :  { %265 = vst [vmem:[%s523_s3 + $0x20] sm:$0xff] %v259_v25 }

// kernel: convnet_forward.9
= control target key start
LH: loop header
LB: loop body
LE: loop exit
PB: predicated region body
PF: predicated region fallthrough
CT: control target
= control target key end

     0   :  { %vm125_vm0 = vcmask 130048   ;;  %s5278_s0 = inlined_call_operand.vmem [shape: f32[16,2,144], index: 0, kind: input, shape index: {}]   ;;  %s5279_s1 = inlined_call_operand.vmem [shape: f32[16,144,256], index: 1, kind: input, shape index: {}]   ;;  %s5280_s2 = inlined_call_operand.vmem [shape: f32[1,256], index: 2, kind: input, shape index: {}]   ;;  %s5281_s3 = inlined_call_operand.vmem [shape: f32[256,128], index: 3, kind: input, shape index: {}]   ;;  %s5282_s4 = inlined_call_operand.vmem [shape: f32[1,128], index: 4, kind: input, shape index: {}]   ;;  %s5283_s5 = inlined_call_operand.vmem [shape: f32[128,64], index: 5, kind: input, shape index: {}]   ;;  %s5284_s6 = inlined_call_operand.vmem [shape: f32[1,64], index: 6, kind: input, shape index: {}]   ;;  %s5285_s7 = inlined_call_operand.vmem [shape: f32[64,32], index: 7, kind: input, shape index: {}]   ;;  %s5286_s8 = inlined_call_operand.vmem [shape: f32[1,32], index: 8, kind: input, shape index: {}]   ;;  %s5287_s9 = inlined_call_operand.vmem [shape: f32[32,2], index: 9, kind: input, shape index: {}]   ;;  %s5288_s10 = inlined_call_operand.vmem [shape: f32[1,2], index: 10, kind: input, shape index: {}]   ;;  %s5289_s11 = inlined_call_operand.hbm [shape: f32[2,2], index: 11, kind: output, shape index: {}]  }
   0x1   :  { %v2474_v0 = vld [vmem:[%s5279_s1 + $0x218] sm:$0xff]  ;;  %v2473_v2 = vld [vmem:[%s5279_s1 + $0x210] sm:$0xff]  ;;  %v2472_v4 = vld [vmem:[%s5279_s1 + $0x208] sm:$0xff] }
   0x2   :  { %v71_v1 = vld [vmem:[%s5279_s1 + $0xf8] sm:$0xff]  ;;  %128 = vmatprep.subr.mxu0 %v2474_v0  ;;  %v70_v3 = vld [vmem:[%s5279_s1 + $0xf0] sm:$0xff]  ;;  %v69_v5 = vld [vmem:[%s5279_s1 + $0xe8] sm:$0xff] }
   0x3   :  { %211 = vmatprep.subr.mxu1 %v71_v1  ;;  %129 = vmatpush1.msra.mxu0 %v2473_v2  ;;  %v2471_v6 = vld [vmem:[%s5279_s1 + $0x200] sm:$0xff]  ;;  %v2470_v8 = vld [vmem:[%s5279_s1 + $0x1f8] sm:$0xff]  ;;  %v2469_v10 = vld [vmem:[%s5279_s1 + $0x1f0] sm:$0xff] }
   0x4   :  { %212 = vmatpush1.msra.mxu1 %v70_v3  ;;  %v68_v7 = vld [vmem:[%s5279_s1 + $0xe0] sm:$0xff]  ;;  %130 = vmatprep.subr.mxu0 %v2472_v4  ;;  %v67_v9 = vld [vmem:[%s5279_s1 + $0xd8] sm:$0xff]  ;;  %v66_v11 = vld [vmem:[%s5279_s1 + $0xd0] sm:$0xff] }
   0x5   :  { %213 = vmatprep.subr.mxu1 %v69_v5  ;;  %131 = vmatpush1.msra.mxu0 %v2471_v6  ;;  %v2468_v12 = vld [vmem:[%s5279_s1 + $0x1e8] sm:$0xff]  ;;  %v2467_v14 = vld [vmem:[%s5279_s1 + $0x1e0] sm:$0xff]  ;;  %v2466_v16 = vld [vmem:[%s5279_s1 + $0x1d8] sm:$0xff] }
   0x6   :  { %214 = vmatpush1.msra.mxu1 %v68_v7  ;;  %v65_v13 = vld [vmem:[%s5279_s1 + $0xc8] sm:$0xff]  ;;  %132 = vmatprep.subr.mxu0 %v2470_v8  ;;  %v64_v15 = vld [vmem:[%s5279_s1 + $0xc0] sm:$0xff]  ;;  %v63_v17 = vld [vmem:[%s5279_s1 + $0xb8] sm:$0xff] }
   0x7   :  { %215 = vmatprep.subr.mxu1 %v67_v9  ;;  %133 = vmatpush1.msra.mxu0 %v2469_v10  ;;  %v2465_v18 = vld [vmem:[%s5279_s1 + $0x1d0] sm:$0xff]  ;;  %v2464_v20 = vld [vmem:[%s5279_s1 + $0x1c8] sm:$0xff]  ;;  %v2463_v22 = vld [vmem:[%s5279_s1 + $0x1c0] sm:$0xff] }
   0x8   :  { %216 = vmatpush1.msra.mxu1 %v66_v11  ;;  %134 = vmatprep.subr.mxu0 %v2468_v12  ;;  %v62_v19 = vld [vmem:[%s5279_s1 + $0xb0] sm:$0xff]  ;;  %v61_v21 = vld [vmem:[%s5279_s1 + $0xa8] sm:$0xff]  ;;  %v60_v23 = vld [vmem:[%s5279_s1 + $0xa0] sm:$0xff] }
   0x9   :  { %217 = vmatprep.subr.mxu1 %v65_v13  ;;  %135 = vmatpush1.msra.mxu0 %v2467_v14  ;;  %v2462_v24 = vld [vmem:[%s5279_s1 + $0x1b8] sm:$0xff]  ;;  %v2461_v26 = vld [vmem:[%s5279_s1 + $0x1b0] sm:$0xff]  ;;  %v2460_v28 = vld [vmem:[%s5279_s1 + $0x1a8] sm:$0xff] }
   0xa   :  { %218 = vmatpush1.msra.mxu1 %v64_v15  ;;  %136 = vmatprep.subr.mxu0 %v2466_v16  ;;  %v59_v25 = vld [vmem:[%s5279_s1 + $0x98] sm:$0xff]  ;;  %v58_v27 = vld [vmem:[%s5279_s1 + $0x90] sm:$0xff]  ;;  %v57_v29 = vld [vmem:[%s5279_s1 + $0x88] sm:$0xff] }
   0xb   :  { %219 = vmatprep.subr.mxu1 %v63_v17  ;;  %137 = vmatpush1.msra.mxu0 %v2465_v18  ;;  %v2459_v30 = vld [vmem:[%s5279_s1 + $0x1a0] sm:$0xff]  ;;  %v2458_v32 = vld [vmem:[%s5279_s1 + $0x198] sm:$0xff]  ;;  %v2457_v34 = vld [vmem:[%s5279_s1 + $0x190] sm:$0xff] }
   0xc   :  { %220 = vmatpush1.msra.mxu1 %v62_v19  ;;  %138 = vmatprep.subr.mxu0 %v2464_v20  ;;  %v56_v31 = vld [vmem:[%s5279_s1 + $0x80] sm:$0xff]  ;;  %v55_v33 = vld [vmem:[%s5279_s1 + $0x78] sm:$0xff]  ;;  %v54_v35 = vld [vmem:[%s5279_s1 + $0x70] sm:$0xff] }
   0xd   :  { %221 = vmatprep.subr.mxu1 %v61_v21  ;;  %139 = vmatpush1.msra.mxu0 %v2463_v22  ;;  %v2456_v36 = vld [vmem:[%s5279_s1 + $0x188] sm:$0xff]  ;;  %v2455_v38 = vld [vmem:[%s5279_s1 + $0x180] sm:$0xff]  ;;  %v2454_v40 = vld [vmem:[%s5279_s1 + $0x178] sm:$0xff] }
   0xe   :  { %222 = vmatpush1.msra.mxu1 %v60_v23  ;;  %140 = vmatprep.subr.mxu0 %v2462_v24  ;;  %v53_v37 = vld [vmem:[%s5279_s1 + $0x68] sm:$0xff]  ;;  %v52_v39 = vld [vmem:[%s5279_s1 + $0x60] sm:$0xff]  ;;  %v51_v41 = vld [vmem:[%s5279_s1 + $0x58] sm:$0xff] }
   0xf   :  { %223 = vmatprep.subr.mxu1 %v59_v25  ;;  %141 = vmatpush1.msra.mxu0 %v2461_v26  ;;  %v2453_v42 = vld [vmem:[%s5279_s1 + $0x170] sm:$0xff]  ;;  %v2452_v44 = vld [vmem:[%s5279_s1 + $0x168] sm:$0xff]  ;;  %v2451_v46 = vld [vmem:[%s5279_s1 + $0x160] sm:$0xff] }
  0x10   :  { %224 = vmatpush1.msra.mxu1 %v58_v27  ;;  %142 = vmatprep.subr.mxu0 %v2460_v28  ;;  %v50_v43 = vld [vmem:[%s5279_s1 + $0x50] sm:$0xff]  ;;  %v49_v45 = vld [vmem:[%s5279_s1 + $0x48] sm:$0xff]  ;;  %v48_v47 = vld [vmem:[%s5279_s1 + $0x40] sm:$0xff] }
  0x11   :  { %225 = vmatprep.subr.mxu1 %v57_v29  ;;  %143 = vmatpush1.msra.mxu0 %v2459_v30  ;;  %v2450_v48 = vld [vmem:[%s5279_s1 + $0x158] sm:$0xff]  ;;  %v2449_v50 = vld [vmem:[%s5279_s1 + $0x150] sm:$0xff]  ;;  %v2448_v52 = vld [vmem:[%s5279_s1 + $0x148] sm:$0xff] }
  0x12   :  { %226 = vmatpush1.msra.mxu1 %v56_v31  ;;  %144 = vmatprep.subr.mxu0 %v2458_v32  ;;  %v47_v49 = vld [vmem:[%s5279_s1 + $0x38] sm:$0xff]  ;;  %v46_v51 = vld [vmem:[%s5279_s1 + $0x30] sm:$0xff]  ;;  %v45_v53 = vld [vmem:[%s5279_s1 + $0x28] sm:$0xff] }
  0x13   :  { %227 = vmatprep.subr.mxu1 %v55_v33  ;;  %145 = vmatpush1.msra.mxu0 %v2457_v34  ;;  %v2447_v54 = vld [vmem:[%s5279_s1 + $0x140] sm:$0xff]  ;;  %v2446_v56 = vld [vmem:[%s5279_s1 + $0x138] sm:$0xff]  ;;  %v2445_v58 = vld [vmem:[%s5279_s1 + $0x130] sm:$0xff] }
  0x14   :  { %228 = vmatpush1.msra.mxu1 %v54_v35  ;;  %146 = vmatprep.subr.mxu0 %v2456_v36  ;;  %v44_v55 = vld [vmem:[%s5279_s1 + $0x20] sm:$0xff]  ;;  %v43_v57 = vld [vmem:[%s5279_s1 + $0x18] sm:$0xff]  ;;  %v42_v59 = vld [vmem:[%s5279_s1 + $0x10] sm:$0xff] }
  0x15   :  { %229 = vmatprep.subr.mxu1 %v53_v37  ;;  %147 = vmatpush1.msra.mxu0 %v2455_v38  ;;  %v2444_v60 = vld [vmem:[%s5279_s1 + $0x128] sm:$0xff]  ;;  %v2443_v62 = vld [vmem:[%s5279_s1 + $0x120] sm:$0xff]  ;;  %v2478_v1 = vld [vmem:[%s5279_s1 + $0x238] sm:$0xff] }
  0x16   :  { %230 = vmatpush1.msra.mxu1 %v52_v39  ;;  %148 = vmatprep.subr.mxu0 %v2454_v40  ;;  %v41_v61 = vld [vmem:[%s5279_s1 + $0x8] sm:$0xff]  ;;  %v40_v63 = vld [vmem:[%s5279_s1] sm:$0xff]  ;;  %v75_v2 = vld [vmem:[%s5279_s1 + $0x118] sm:$0xff] }
  0x17   :  { %231 = vmatprep.subr.mxu1 %v51_v41  ;;  %149 = vmatpush1.msra.mxu0 %v2453_v42  ;;  %v2479_v0 = vld.sshfl [vmem:[%s5278_s0 + $0x4] sm:$0x33 pattern:$0x76325410]  ;;  %v2477_v4 = vld [vmem:[%s5279_s1 + $0x230] sm:$0xff]  ;;  %v2476_v6 = vld [vmem:[%s5279_s1 + $0x228] sm:$0xff] }
  0x18   :  { %232 = vmatpush1.msra.mxu1 %v50_v43  ;;  %150 = vmatprep.subr.mxu0 %v2452_v44  ;;  %v2481_v3 = vld.sshfl [vmem:[%s5278_s0] sm:$0x33 pattern:$0x76325410]  ;;  %v74_v5 = vld [vmem:[%s5279_s1 + $0x110] sm:$0xff]  ;;  %v73_v7 = vld [vmem:[%s5279_s1 + $0x108] sm:$0xff]  ;;  %v123_v8 = vcombine.high %v2479_v0, %v2479_v0 }
  0x19   :  { %233 = vmatprep.subr.mxu1 %v49_v45  ;;  %151 = vmatpush1.msra.mxu0 %v2451_v46  ;;  %v2475_v9 = vld [vmem:[%s5279_s1 + $0x220] sm:$0xff]  ;;  %v207_v10 = vcombine.high %v2481_v3, %v2481_v3  ;;  %v2515_v12 = vld [vmem:[%s5279_s1 + $0x338] sm:$0xff]  ;;  %v2514_v14 = vld [vmem:[%s5279_s1 + $0x330] sm:$0xff] }
  0x1a   :  { %234 = vmatpush1.msra.mxu1 %v48_v47  ;;  %152 = vmatprep.subr.mxu0 %v2450_v48  ;;  %v72_v11 = vld [vmem:[%s5279_s1 + $0x100] sm:$0xff]  ;;  %v2554_v13 = vld [vmem:[%s5279_s1 + $0x458] sm:$0xff]  ;;  %v2553_v15 = vld [vmem:[%s5279_s1 + $0x450] sm:$0xff] }
  0x1b   :  { %235 = vmatprep.subr.mxu1 %v47_v49  ;;  %153 = vmatpush1.msra.mxu0 %v2449_v50  ;;  %v2513_v16 = vld [vmem:[%s5279_s1 + $0x328] sm:$0xff]  ;;  %v2512_v18 = vld [vmem:[%s5279_s1 + $0x320] sm:$0xff]  ;;  %v2511_v20 = vld [vmem:[%s5279_s1 + $0x318] sm:$0xff] }
  0x1c   :  { %236 = vmatpush1.msra.mxu1 %v46_v51  ;;  %154 = vmatprep.subr.mxu0 %v2448_v52  ;;  %v2552_v17 = vld [vmem:[%s5279_s1 + $0x448] sm:$0xff]  ;;  %v2551_v19 = vld [vmem:[%s5279_s1 + $0x440] sm:$0xff]  ;;  %v2550_v21 = vld [vmem:[%s5279_s1 + $0x438] sm:$0xff] }
  0x1d   :  { %237 = vmatprep.subr.mxu1 %v45_v53  ;;  %155 = vmatpush1.msra.mxu0 %v2447_v54  ;;  %v2510_v22 = vld [vmem:[%s5279_s1 + $0x310] sm:$0xff]  ;;  %v2509_v24 = vld [vmem:[%s5279_s1 + $0x308] sm:$0xff]  ;;  %v2508_v26 = vld [vmem:[%s5279_s1 + $0x300] sm:$0xff] }
  0x1e   :  { %238 = vmatpush1.msra.mxu1 %v44_v55  ;;  %156 = vmatprep.subr.mxu0 %v2446_v56  ;;  %v2549_v23 = vld [vmem:[%s5279_s1 + $0x430] sm:$0xff]  ;;  %v2548_v25 = vld [vmem:[%s5279_s1 + $0x428] sm:$0xff]  ;;  %v2547_v27 = vld [vmem:[%s5279_s1 + $0x420] sm:$0xff] }
  0x1f   :  { %239 = vmatprep.subr.mxu1 %v43_v57  ;;  %157 = vmatpush1.msra.mxu0 %v2445_v58  ;;  %v2507_v28 = vld [vmem:[%s5279_s1 + $0x2f8] sm:$0xff]  ;;  %v2506_v30 = vld [vmem:[%s5279_s1 + $0x2f0] sm:$0xff]  ;;  %v2505_v32 = vld [vmem:[%s5279_s1 + $0x2e8] sm:$0xff] }
  0x20   :  { %240 = vmatpush1.msra.mxu1 %v42_v59  ;;  %158 = vmatprep.subr.mxu0 %v2444_v60  ;;  %v2546_v29 = vld [vmem:[%s5279_s1 + $0x418] sm:$0xff]  ;;  %v2545_v31 = vld [vmem:[%s5279_s1 + $0x410] sm:$0xff]  ;;  %v2544_v33 = vld [vmem:[%s5279_s1 + $0x408] sm:$0xff] }
  0x21   :  { %241 = vmatprep.subr.mxu1 %v41_v61  ;;  %159 = vmatpush1.msra.mxu0 %v2443_v62  ;;  %v2504_v34 = vld [vmem:[%s5279_s1 + $0x2e0] sm:$0xff]  ;;  %v2503_v36 = vld [vmem:[%s5279_s1 + $0x2d8] sm:$0xff]  ;;  %v2502_v38 = vld [vmem:[%s5279_s1 + $0x2d0] sm:$0xff] }
  0x22   :  { %242 = vmatpush1.msra.mxu1 %v40_v63  ;;  %188 = vmatprep.subr.mxu0 %v2478_v1  ;;  %v2543_v35 = vld [vmem:[%s5279_s1 + $0x400] sm:$0xff]  ;;  %v2542_v37 = vld [vmem:[%s5279_s1 + $0x3f8] sm:$0xff]  ;;  %v2541_v39 = vld [vmem:[%s5279_s1 + $0x3f0] sm:$0xff] }
  0x23   :  { %271 = vmatprep.subr.mxu1 %v75_v2  ;;  %189 = vmatpush2.msra.mxu0 %v2477_v4  ;;  %v2501_v40 = vld [vmem:[%s5279_s1 + $0x2c8] sm:$0xff]  ;;  %v2500_v42 = vld [vmem:[%s5279_s1 + $0x2c0] sm:$0xff]  ;;  %v2499_v44 = vld [vmem:[%s5279_s1 + $0x2b8] sm:$0xff] }
  0x24   :  { %272 = vmatpush2.msra.mxu1 %v74_v5  ;;  %190 = vmatprep.subr.mxu0 %v2476_v6  ;;  %v2540_v41 = vld [vmem:[%s5279_s1 + $0x3e8] sm:$0xff]  ;;  %v2539_v43 = vld [vmem:[%s5279_s1 + $0x3e0] sm:$0xff]  ;;  %v2538_v45 = vld [vmem:[%s5279_s1 + $0x3d8] sm:$0xff] }
  0x25   :  { %273 = vmatprep.subr.mxu1 %v73_v7  ;;  %191 = vmatpush2.msra.mxu0 %v2475_v9  ;;  %v2498_v46 = vld [vmem:[%s5279_s1 + $0x2b0] sm:$0xff]  ;;  %v2497_v48 = vld [vmem:[%s5279_s1 + $0x2a8] sm:$0xff]  ;;  %v2496_v50 = vld [vmem:[%s5279_s1 + $0x2a0] sm:$0xff] }
  0x26   :  { %2480 = vmatprep.mubr.msk.f32.mxu0 %vm125_vm0, %v123_v8  ;;  %274 = vmatpush2.msra.mxu1 %v72_v11  ;;  %v2537_v47 = vld [vmem:[%s5279_s1 + $0x3d0] sm:$0xff]  ;;  %v2536_v49 = vld [vmem:[%s5279_s1 + $0x3c8] sm:$0xff]  ;;  %v2535_v51 = vld [vmem:[%s5279_s1 + $0x3c0] sm:$0xff] }
  0x27   :  { %2482 = vmatprep.mubr.msk.f32.mxu1 %vm125_vm0, %v207_v10  ;;  %193 = vmatmul.mubr.f32.vlgmr.msra.gmra.mxu0 %v2479_v0  ;;  %v2495_v52 = vld [vmem:[%s5279_s1 + $0x298] sm:$0xff]  ;;  %v2494_v54 = vld [vmem:[%s5279_s1 + $0x290] sm:$0xff]  ;;  %v2493_v56 = vld [vmem:[%s5279_s1 + $0x288] sm:$0xff] }
  0x28   :  { %276 = vmatmul.mubr.f32.vlgmr.msra.gmra.mxu1 %v2481_v3  ;;  %333 = vmatprep.subr.mxu0 %v2515_v12  ;;  %v2534_v53 = vld [vmem:[%s5279_s1 + $0x3b8] sm:$0xff]  ;;  %v2533_v55 = vld [vmem:[%s5279_s1 + $0x3b0] sm:$0xff]  ;;  %v2532_v57 = vld [vmem:[%s5279_s1 + $0x3a8] sm:$0xff] }
  0x29   :  { %457 = vmatprep.subr.mxu1 %v2554_v13  ;;  %334 = vmatpush1.msra.mxu0 %v2514_v14  ;;  %v2492_v58 = vld [vmem:[%s5279_s1 + $0x280] sm:$0xff]  ;;  %v2491_v60 = vld [vmem:[%s5279_s1 + $0x278] sm:$0xff]  ;;  %v2490_v62 = vld [vmem:[%s5279_s1 + $0x270] sm:$0xff] }
  0x2a   :  { %458 = vmatpush1.msra.mxu1 %v2553_v15  ;;  %335 = vmatprep.subr.mxu0 %v2513_v16  ;;  %v2531_v59 = vld [vmem:[%s5279_s1 + $0x3a0] sm:$0xff]  ;;  %v2530_v61 = vld [vmem:[%s5279_s1 + $0x398] sm:$0xff]  ;;  %v2529_v63 = vld [vmem:[%s5279_s1 + $0x390] sm:$0xff] }
  0x2b   :  { %459 = vmatprep.subr.mxu1 %v2552_v17  ;;  %336 = vmatpush1.msra.mxu0 %v2512_v18  ;;  %v2489_v0 = vld [vmem:[%s5279_s1 + $0x268] sm:$0xff]  ;;  %v2488_v2 = vld [vmem:[%s5279_s1 + $0x260] sm:$0xff]  ;;  %v2487_v4 = vld [vmem:[%s5279_s1 + $0x258] sm:$0xff] }
  0x2c   :  { %460 = vmatpush1.msra.mxu1 %v2551_v19  ;;  %337 = vmatprep.subr.mxu0 %v2511_v20  ;;  %v2528_v1 = vld [vmem:[%s5279_s1 + $0x388] sm:$0xff]  ;;  %v2527_v3 = vld [vmem:[%s5279_s1 + $0x380] sm:$0xff]  ;;  %v2526_v5 = vld [vmem:[%s5279_s1 + $0x378] sm:$0xff] }
  0x2d   :  { %461 = vmatprep.subr.mxu1 %v2550_v21  ;;  %338 = vmatpush1.msra.mxu0 %v2510_v22  ;;  %v2486_v6 = vld [vmem:[%s5279_s1 + $0x250] sm:$0xff]  ;;  %v2485_v8 = vld [vmem:[%s5279_s1 + $0x248] sm:$0xff]  ;;  %v2484_v10 = vld [vmem:[%s5279_s1 + $0x240] sm:$0xff] }
  0x2e   :  { %462 = vmatpush1.msra.mxu1 %v2549_v23  ;;  %339 = vmatprep.subr.mxu0 %v2509_v24  ;;  %v2525_v7 = vld [vmem:[%s5279_s1 + $0x370] sm:$0xff]  ;;  %v2524_v9 = vld [vmem:[%s5279_s1 + $0x368] sm:$0xff]  ;;  %v2523_v11 = vld [vmem:[%s5279_s1 + $0x360] sm:$0xff] }
  0x2f   :  { %463 = vmatprep.subr.mxu1 %v2548_v25  ;;  %340 = vmatpush1.msra.mxu0 %v2508_v26  ;;  %v2520_v12 = vld.sshfl [vmem:[%s5278_s0 + $0x8] sm:$0x33 pattern:$0x76325410]  ;;  %v2519_v13 = vld [vmem:[%s5279_s1 + $0x358] sm:$0xff]  ;;  %v2518_v15 = vld [vmem:[%s5279_s1 + $0x350] sm:$0xff] }
  0x30   :  { %464 = vmatpush1.msra.mxu1 %v2547_v27  ;;  %341 = vmatprep.subr.mxu0 %v2507_v28  ;;  %v2558_v14 = vld [vmem:[%s5279_s1 + $0x478] sm:$0xff]  ;;  %v2557_v16 = vld [vmem:[%s5279_s1 + $0x470] sm:$0xff]  ;;  %v2559_v17 = vld.sshfl [vmem:[%s5278_s0 + $0xc] sm:$0x33 pattern:$0x76325410]  ;;  %v329_v20 = vcombine.high %v2520_v12, %v2520_v12 }
  0x31   :  { %465 = vmatprep.subr.mxu1 %v2546_v29  ;;  %342 = vmatpush1.msra.mxu0 %v2506_v30  ;;  %v2517_v18 = vld [vmem:[%s5279_s1 + $0x348] sm:$0xff]  ;;  %v2516_v21 = vld [vmem:[%s5279_s1 + $0x340] sm:$0xff]  ;;  %v453_v23 = vcombine.high %v2559_v17, %v2559_v17  ;;  %v2593_v24 = vld [vmem:[%s5279_s1 + $0x578] sm:$0xff] }
  0x32   :  { %466 = vmatpush1.msra.mxu1 %v2545_v31  ;;  %343 = vmatprep.subr.mxu0 %v2505_v32  ;;  %v2556_v19 = vld [vmem:[%s5279_s1 + $0x468] sm:$0xff]  ;;  %v2555_v22 = vld [vmem:[%s5279_s1 + $0x460] sm:$0xff]  ;;  %v2632_v25 = vld [vmem:[%s5279_s1 + $0x698] sm:$0xff] }
  0x33   :  { %467 = vmatprep.subr.mxu1 %v2544_v33  ;;  %344 = vmatpush1.msra.mxu0 %v2504_v34  ;;  %v2592_v26 = vld [vmem:[%s5279_s1 + $0x570] sm:$0xff]  ;;  %v2591_v28 = vld [vmem:[%s5279_s1 + $0x568] sm:$0xff]  ;;  %v2590_v30 = vld [vmem:[%s5279_s1 + $0x560] sm:$0xff] }
  0x34   :  { %468 = vmatpush1.msra.mxu1 %v2543_v35  ;;  %345 = vmatprep.subr.mxu0 %v2503_v36  ;;  %v2631_v27 = vld [vmem:[%s5279_s1 + $0x690] sm:$0xff]  ;;  %v2630_v29 = vld [vmem:[%s5279_s1 + $0x688] sm:$0xff]  ;;  %v2629_v31 = vld [vmem:[%s5279_s1 + $0x680] sm:$0xff] }
  0x35   :  { %469 = vmatprep.subr.mxu1 %v2542_v37  ;;  %346 = vmatpush1.msra.mxu0 %v2502_v38  ;;  %v2589_v32 = vld [vmem:[%s5279_s1 + $0x558] sm:$0xff]  ;;  %v2588_v34 = vld [vmem:[%s5279_s1 + $0x550] sm:$0xff]  ;;  %v2587_v36 = vld [vmem:[%s5279_s1 + $0x548] sm:$0xff] }
  0x36   :  { %470 = vmatpush1.msra.mxu1 %v2541_v39  ;;  %347 = vmatprep.subr.mxu0 %v2501_v40  ;;  %v2628_v33 = vld [vmem:[%s5279_s1 + $0x678] sm:$0xff]  ;;  %v2627_v35 = vld [vmem:[%s5279_s1 + $0x670] sm:$0xff]  ;;  %v2626_v37 = vld [vmem:[%s5279_s1 + $0x668] sm:$0xff] }
  0x37   :  { %471 = vmatprep.subr.mxu1 %v2540_v41  ;;  %348 = vmatpush1.msra.mxu0 %v2500_v42  ;;  %v2586_v38 = vld [vmem:[%s5279_s1 + $0x540] sm:$0xff]  ;;  %v2585_v40 = vld [vmem:[%s5279_s1 + $0x538] sm:$0xff]  ;;  %v2584_v42 = vld [vmem:[%s5279_s1 + $0x530] sm:$0xff] }
  0x38   :  { %472 = vmatpush1.msra.mxu1 %v2539_v43  ;;  %349 = vmatprep.subr.mxu0 %v2499_v44  ;;  %v2625_v39 = vld [vmem:[%s5279_s1 + $0x660] sm:$0xff]  ;;  %v2624_v41 = vld [vmem:[%s5279_s1 + $0x658] sm:$0xff]  ;;  %v2623_v43 = vld [vmem:[%s5279_s1 + $0x650] sm:$0xff] }
  0x39   :  { %473 = vmatprep.subr.mxu1 %v2538_v45  ;;  %350 = vmatpush1.msra.mxu0 %v2498_v46  ;;  %v2583_v44 = vld [vmem:[%s5279_s1 + $0x528] sm:$0xff]  ;;  %v2582_v46 = vld [vmem:[%s5279_s1 + $0x520] sm:$0xff] }
  0x3a   :  { %474 = vmatpush1.msra.mxu1 %v2537_v47  ;;  %351 = vmatprep.subr.mxu0 %v2497_v48  ;;  %v2622_v45 = vld [vmem:[%s5279_s1 + $0x648] sm:$0xff]  ;;  %v2621_v47 = vld [vmem:[%s5279_s1 + $0x640] sm:$0xff]  ;;  %v2581_v48 = vld [vmem:[%s5279_s1 + $0x518] sm:$0xff] }
  0x3b   :  { %475 = vmatprep.subr.mxu1 %v2536_v49  ;;  %352 = vmatpush1.msra.mxu0 %v2496_v50  ;;  %v2620_v49 = vld [vmem:[%s5279_s1 + $0x638] sm:$0xff]  ;;  %v2580_v50 = vld [vmem:[%s5279_s1 + $0x510] sm:$0xff] }
  0x3c   :  { %476 = vmatpush1.msra.mxu1 %v2535_v51  ;;  %353 = vmatprep.subr.mxu0 %v2495_v52  ;;  %v2619_v51 = vld [vmem:[%s5279_s1 + $0x630] sm:$0xff]  ;;  %v2579_v52 = vld [vmem:[%s5279_s1 + $0x508] sm:$0xff] }
  0x3d   :  { %477 = vmatprep.subr.mxu1 %v2534_v53  ;;  %354 = vmatpush1.msra.mxu0 %v2494_v54  ;;  %v2618_v53 = vld [vmem:[%s5279_s1 + $0x628] sm:$0xff]  ;;  %v2578_v54 = vld [vmem:[%s5279_s1 + $0x500] sm:$0xff] }
  0x3e   :  { %478 = vmatpush1.msra.mxu1 %v2533_v55  ;;  %355 = vmatprep.subr.mxu0 %v2493_v56  ;;  %v2617_v55 = vld [vmem:[%s5279_s1 + $0x620] sm:$0xff]  ;;  %v2577_v56 = vld [vmem:[%s5279_s1 + $0x4f8] sm:$0xff] }
  0x3f   :  { %479 = vmatprep.subr.mxu1 %v2532_v57  ;;  %356 = vmatpush1.msra.mxu0 %v2492_v58  ;;  %v2616_v57 = vld [vmem:[%s5279_s1 + $0x618] sm:$0xff]  ;;  %v2576_v58 = vld [vmem:[%s5279_s1 + $0x4f0] sm:$0xff] }
  0x40   :  { %480 = vmatpush1.msra.mxu1 %v2531_v59  ;;  %357 = vmatprep.subr.mxu0 %v2491_v60  ;;  %v2615_v59 = vld [vmem:[%s5279_s1 + $0x610] sm:$0xff]  ;;  %v2575_v60 = vld [vmem:[%s5279_s1 + $0x4e8] sm:$0xff] }
  0x41   :  { %481 = vmatprep.subr.mxu1 %v2530_v61  ;;  %358 = vmatpush1.msra.mxu0 %v2490_v62  ;;  %v2614_v61 = vld [vmem:[%s5279_s1 + $0x608] sm:$0xff]  ;;  %v2574_v62 = vld [vmem:[%s5279_s1 + $0x4e0] sm:$0xff] }
  0x42   :  { %482 = vmatpush1.msra.mxu1 %v2529_v63  ;;  %359 = vmatprep.subr.mxu0 %v2489_v0  ;;  %v2613_v63 = vld [vmem:[%s5279_s1 + $0x600] sm:$0xff]  ;;  %v2573_v0 = vld [vmem:[%s5279_s1 + $0x4d8] sm:$0xff] }
  0x43   :  { %483 = vmatprep.subr.mxu1 %v2528_v1  ;;  %360 = vmatpush1.msra.mxu0 %v2488_v2  ;;  %v2612_v1 = vld [vmem:[%s5279_s1 + $0x5f8] sm:$0xff]  ;;  %v2572_v2 = vld [vmem:[%s5279_s1 + $0x4d0] sm:$0xff] }
  0x44   :  { %484 = vmatpush1.msra.mxu1 %v2527_v3  ;;  %361 = vmatprep.subr.mxu0 %v2487_v4  ;;  %v2611_v3 = vld [vmem:[%s5279_s1 + $0x5f0] sm:$0xff]  ;;  %v2571_v4 = vld [vmem:[%s5279_s1 + $0x4c8] sm:$0xff] }
  0x45   :  { %485 = vmatprep.subr.mxu1 %v2526_v5  ;;  %362 = vmatpush1.msra.mxu0 %v2486_v6  ;;  %v2610_v5 = vld [vmem:[%s5279_s1 + $0x5e8] sm:$0xff]  ;;  %v2570_v6 = vld [vmem:[%s5279_s1 + $0x4c0] sm:$0xff] }
  0x46   :  { %486 = vmatpush1.msra.mxu1 %v2525_v7  ;;  %363 = vmatprep.subr.mxu0 %v2485_v8  ;;  %v2609_v7 = vld [vmem:[%s5279_s1 + $0x5e0] sm:$0xff]  ;;  %v2569_v8 = vld [vmem:[%s5279_s1 + $0x4b8] sm:$0xff] }
  0x47   :  { %487 = vmatprep.subr.mxu1 %v2524_v9  ;;  %364 = vmatpush1.msra.mxu0 %v2484_v10  ;;  %v2608_v9 = vld [vmem:[%s5279_s1 + $0x5d8] sm:$0xff]  ;;  %v2568_v10 = vld [vmem:[%s5279_s1 + $0x4b0] sm:$0xff] }
  0x48   :  { %488 = vmatpush1.msra.mxu1 %v2523_v11  ;;  %393 = vmatprep.subr.mxu0 %v2519_v13  ;;  %v2607_v11 = vld [vmem:[%s5279_s1 + $0x5d0] sm:$0xff]  ;;  %v2606_v13 = vld [vmem:[%s5279_s1 + $0x5c8] sm:$0xff] }
  0x49   :  { %517 = vmatprep.subr.mxu1 %v2558_v14  ;;  %394 = vmatpush2.msra.mxu0 %v2518_v15  ;;  %v2566_v14 = vld [vmem:[%s5279_s1 + $0x4a0] sm:$0xff] }
  0x4a   :  { %518 = vmatpush2.msra.mxu1 %v2557_v16  ;;  %395 = vmatprep.subr.mxu0 %v2517_v18  ;;  %v2605_v15 = vld [vmem:[%s5279_s1 + $0x5c0] sm:$0xff]  ;;  %v2565_v16 = vld [vmem:[%s5279_s1 + $0x498] sm:$0xff]  ;;  %v2564_v18 = vld [vmem:[%s5279_s1 + $0x490] sm:$0xff] }
  0x4b   :  { %519 = vmatprep.subr.mxu1 %v2556_v19  ;;  %396 = vmatpush2.msra.mxu0 %v2516_v21  ;;  %v2603_v19 = vld [vmem:[%s5279_s1 + $0x5b0] sm:$0xff]  ;;  %v2602_v21 = vld [vmem:[%s5279_s1 + $0x5a8] sm:$0xff] }
  0x4c   :  { %2521 = vmatprep.mubr.msk.f32.mxu0 %vm125_vm0, %v329_v20  ;;  %520 = vmatpush2.msra.mxu1 %v2555_v22  ;;  %v2563_v20 = vld [vmem:[%s5279_s1 + $0x488] sm:$0xff]  ;;  %v2562_v22 = vld [vmem:[%s5279_s1 + $0x480] sm:$0xff] }
  0x4d   :  { %398 = vmatmul.mubr.f32.vlgmr.msra.gmra.mxu0 %v2520_v12  ;;  %2560 = vmatprep.mubr.msk.f32.mxu1 %vm125_vm0, %v453_v23  ;;  %v2567_v12 = vld [vmem:[%s5279_s1 + $0x4a8] sm:$0xff]  ;;  %v2601_v23 = vld [vmem:[%s5279_s1 + $0x5a0] sm:$0xff] }
  0x4e   :  { %581 = vmatprep.subr.mxu0 %v2593_v24  ;;  %705 = vmatprep.subr.mxu1 %v2632_v25  ;;  %v2598_v24 = vld.sshfl [vmem:[%s5278_s0 + $0x10] sm:$0x33 pattern:$0x76325410]  ;;  %v2597_v25 = vld [vmem:[%s5279_s1 + $0x598] sm:$0xff] }
  0x4f   :  { %522 = vmatmul.mubr.f32.vlgmr.msra.gmra.mxu1 %v2559_v17  ;;  %582 = vmatpush1.msra.mxu0 %v2592_v26  ;;  %v2604_v17 = vld [vmem:[%s5279_s1 + $0x5b8] sm:$0xff] }
  0x50   :  { %706 = vmatpush1.msra.mxu1 %v2631_v27  ;;  %583 = vmatprep.subr.mxu0 %v2591_v28  ;;  %v2636_v26 = vld [vmem:[%s5279_s1 + $0x6b8] sm:$0xff]  ;;  %v2596_v27 = vld [vmem:[%s5279_s1 + $0x590] sm:$0xff] }
  0x51   :  { %707 = vmatprep.subr.mxu1 %v2630_v29  ;;  %584 = vmatpush1.msra.mxu0 %v2590_v30  ;;  %v2635_v28 = vld [vmem:[%s5279_s1 + $0x6b0] sm:$0xff]  ;;  %v2595_v30 = vld [vmem:[%s5279_s1 + $0x588] sm:$0xff] }
  0x52   :  { %708 = vmatpush1.msra.mxu1 %v2629_v31  ;;  %585 = vmatprep.subr.mxu0 %v2589_v32  ;;  %v2637_v29 = vld.sshfl [vmem:[%s5278_s0 + $0x14] sm:$0x33 pattern:$0x76325410]  ;;  %v2634_v31 = vld [vmem:[%s5279_s1 + $0x6a8] sm:$0xff]  ;;  %v577_v32 = vcombine.high %v2598_v24, %v2598_v24 }
  0x53   :  { %709 = vmatprep.subr.mxu1 %v2628_v33  ;;  %586 = vmatpush1.msra.mxu0 %v2588_v34  ;;  %v2594_v33 = vld [vmem:[%s5279_s1 + $0x580] sm:$0xff] }
  0x54   :  { %710 = vmatpush1.msra.mxu1 %v2627_v35  ;;  %587 = vmatprep.subr.mxu0 %v2587_v36  ;;  %v2633_v34 = vld [vmem:[%s5279_s1 + $0x6a0] sm:$0xff]  ;;  %v701_v35 = vcombine.high %v2637_v29, %v2637_v29  ;;  %v2671_v36 = vld [vmem:[%s5279_s1 + $0x7b8] sm:$0xff] }
  0x55   :  { %711 = vmatprep.subr.mxu1 %v2626_v37  ;;  %588 = vmatpush1.msra.mxu0 %v2586_v38  ;;  %v2710_v37 = vld [vmem:[%s5279_s1 + $0x8d8] sm:$0xff]  ;;  %v2670_v38 = vld [vmem:[%s5279_s1 + $0x7b0] sm:$0xff] }
  0x56   :  { %712 = vmatpush1.msra.mxu1 %v2625_v39  ;;  %589 = vmatprep.subr.mxu0 %v2585_v40  ;;  %v2709_v39 = vld [vmem:[%s5279_s1 + $0x8d0] sm:$0xff]  ;;  %v2669_v40 = vld [vmem:[%s5279_s1 + $0x7a8] sm:$0xff] }
  0x57   :  { %713 = vmatprep.subr.mxu1 %v2624_v41  ;;  %590 = vmatpush1.msra.mxu0 %v2584_v42  ;;  %v2708_v41 = vld [vmem:[%s5279_s1 + $0x8c8] sm:$0xff]  ;;  %v2668_v42 = vld [vmem:[%s5279_s1 + $0x7a0] sm:$0xff] }
  0x58   :  { %714 = vmatpush1.msra.mxu1 %v2623_v43  ;;  %591 = vmatprep.subr.mxu0 %v2583_v44  ;;  %v2707_v43 = vld [vmem:[%s5279_s1 + $0x8c0] sm:$0xff]  ;;  %v2667_v44 = vld [vmem:[%s5279_s1 + $0x798] sm:$0xff] }
  0x59   :  { %715 = vmatprep.subr.mxu1 %v2622_v45  ;;  %592 = vmatpush1.msra.mxu0 %v2582_v46  ;;  %v2706_v45 = vld [vmem:[%s5279_s1 + $0x8b8] sm:$0xff]  ;;  %v2666_v46 = vld [vmem:[%s5279_s1 + $0x790] sm:$0xff] }
  0x5a   :  { %716 = vmatpush1.msra.mxu1 %v2621_v47  ;;  %593 = vmatprep.subr.mxu0 %v2581_v48  ;;  %v2705_v47 = vld [vmem:[%s5279_s1 + $0x8b0] sm:$0xff]  ;;  %v2665_v48 = vld [vmem:[%s5279_s1 + $0x788] sm:$0xff] }
  0x5b   :  { %717 = vmatprep.subr.mxu1 %v2620_v49  ;;  %594 = vmatpush1.msra.mxu0 %v2580_v50  ;;  %v2704_v49 = vld [vmem:[%s5279_s1 + $0x8a8] sm:$0xff]  ;;  %v2664_v50 = vld [vmem:[%s5279_s1 + $0x780] sm:$0xff] }
  0x5c   :  { %718 = vmatpush1.msra.mxu1 %v2619_v51  ;;  %595 = vmatprep.subr.mxu0 %v2579_v52  ;;  %v2703_v51 = vld [vmem:[%s5279_s1 + $0x8a0] sm:$0xff]  ;;  %v2663_v52 = vld [vmem:[%s5279_s1 + $0x778] sm:$0xff] }
  0x5d   :  { %719 = vmatprep.subr.mxu1 %v2618_v53  ;;  %596 = vmatpush1.msra.mxu0 %v2578_v54  ;;  %v2702_v53 = vld [vmem:[%s5279_s1 + $0x898] sm:$0xff]  ;;  %v2662_v54 = vld [vmem:[%s5279_s1 + $0x770] sm:$0xff] }
  0x5e   :  { %720 = vmatpush1.msra.mxu1 %v2617_v55  ;;  %597 = vmatprep.subr.mxu0 %v2577_v56  ;;  %v2701_v55 = vld [vmem:[%s5279_s1 + $0x890] sm:$0xff]  ;;  %v2661_v56 = vld [vmem:[%s5279_s1 + $0x768] sm:$0xff] }
  0x5f   :  { %721 = vmatprep.subr.mxu1 %v2616_v57  ;;  %598 = vmatpush1.msra.mxu0 %v2576_v58  ;;  %v2700_v57 = vld [vmem:[%s5279_s1 + $0x888] sm:$0xff]  ;;  %v2660_v58 = vld [vmem:[%s5279_s1 + $0x760] sm:$0xff] }
  0x60   :  { %722 = vmatpush1.msra.mxu1 %v2615_v59  ;;  %599 = vmatprep.subr.mxu0 %v2575_v60  ;;  %v2699_v59 = vld [vmem:[%s5279_s1 + $0x880] sm:$0xff]  ;;  %v2659_v60 = vld [vmem:[%s5279_s1 + $0x758] sm:$0xff] }
  0x61   :  { %723 = vmatprep.subr.mxu1 %v2614_v61  ;;  %600 = vmatpush1.msra.mxu0 %v2574_v62  ;;  %v2698_v61 = vld [vmem:[%s5279_s1 + $0x878] sm:$0xff]  ;;  %v2658_v62 = vld [vmem:[%s5279_s1 + $0x750] sm:$0xff] }
  0x62   :  { %724 = vmatpush1.msra.mxu1 %v2613_v63  ;;  %601 = vmatprep.subr.mxu0 %v2573_v0  ;;  %v2697_v63 = vld [vmem:[%s5279_s1 + $0x870] sm:$0xff]  ;;  %v2657_v0 = vld [vmem:[%s5279_s1 + $0x748] sm:$0xff] }
  0x63   :  { %725 = vmatprep.subr.mxu1 %v2612_v1  ;;  %602 = vmatpush1.msra.mxu0 %v2572_v2  ;;  %v2696_v1 = vld [vmem:[%s5279_s1 + $0x868] sm:$0xff]  ;;  %v2656_v2 = vld [vmem:[%s5279_s1 + $0x740] sm:$0xff] }
  0x64   :  { %726 = vmatpush1.msra.mxu1 %v2611_v3  ;;  %603 = vmatprep.subr.mxu0 %v2571_v4  ;;  %v2695_v3 = vld [vmem:[%s5279_s1 + $0x860] sm:$0xff]  ;;  %v2655_v4 = vld [vmem:[%s5279_s1 + $0x738] sm:$0xff] }
  0x65   :  { %727 = vmatprep.subr.mxu1 %v2610_v5  ;;  %604 = vmatpush1.msra.mxu0 %v2570_v6  ;;  %v2694_v5 = vld [vmem:[%s5279_s1 + $0x858] sm:$0xff]  ;;  %v2654_v6 = vld [vmem:[%s5279_s1 + $0x730] sm:$0xff] }
  0x66   :  { %728 = vmatpush1.msra.mxu1 %v2609_v7  ;;  %605 = vmatprep.subr.mxu0 %v2569_v8  ;;  %v2693_v7 = vld [vmem:[%s5279_s1 + $0x850] sm:$0xff]  ;;  %v2653_v8 = vld [vmem:[%s5279_s1 + $0x728] sm:$0xff] }
  0x67   :  { %729 = vmatprep.subr.mxu1 %v2608_v9  ;;  %606 = vmatpush1.msra.mxu0 %v2568_v10  ;;  %v2692_v9 = vld [vmem:[%s5279_s1 + $0x848] sm:$0xff]  ;;  %v2652_v10 = vld [vmem:[%s5279_s1 + $0x720] sm:$0xff] }
  0x68   :  { %730 = vmatpush1.msra.mxu1 %v2607_v11  ;;  %607 = vmatprep.subr.mxu0 %v2567_v12  ;;  %v2691_v11 = vld [vmem:[%s5279_s1 + $0x840] sm:$0xff]  ;;  %v2651_v12 = vld [vmem:[%s5279_s1 + $0x718] sm:$0xff] }
  0x69   :  { %731 = vmatprep.subr.mxu1 %v2606_v13  ;;  %608 = vmatpush1.msra.mxu0 %v2566_v14  ;;  %v2690_v13 = vld [vmem:[%s5279_s1 + $0x838] sm:$0xff]  ;;  %v2650_v14 = vld [vmem:[%s5279_s1 + $0x710] sm:$0xff] }
  0x6a   :  { %732 = vmatpush1.msra.mxu1 %v2605_v15  ;;  %609 = vmatprep.subr.mxu0 %v2565_v16  ;;  %v2689_v15 = vld [vmem:[%s5279_s1 + $0x830] sm:$0xff]  ;;  %v2649_v16 = vld [vmem:[%s5279_s1 + $0x708] sm:$0xff] }
  0x6b   :  { %733 = vmatprep.subr.mxu1 %v2604_v17  ;;  %610 = vmatpush1.msra.mxu0 %v2564_v18  ;;  %v2688_v17 = vld [vmem:[%s5279_s1 + $0x828] sm:$0xff]  ;;  %v2648_v18 = vld [vmem:[%s5279_s1 + $0x700] sm:$0xff] }
  0x6c   :  { %734 = vmatpush1.msra.mxu1 %v2603_v19  ;;  %611 = vmatprep.subr.mxu0 %v2563_v20  ;;  %v2687_v19 = vld [vmem:[%s5279_s1 + $0x820] sm:$0xff]  ;;  %v2647_v20 = vld [vmem:[%s5279_s1 + $0x6f8] sm:$0xff] }
  0x6d   :  { %735 = vmatprep.subr.mxu1 %v2602_v21  ;;  %612 = vmatpush1.msra.mxu0 %v2562_v22  ;;  %v2686_v21 = vld [vmem:[%s5279_s1 + $0x818] sm:$0xff]  ;;  %v2646_v22 = vld [vmem:[%s5279_s1 + $0x6f0] sm:$0xff] }
  0x6e   :  { %736 = vmatpush1.msra.mxu1 %v2601_v23  ;;  %641 = vmatprep.subr.mxu0 %v2597_v25  ;;  %v2685_v23 = vld [vmem:[%s5279_s1 + $0x810] sm:$0xff]  ;;  %v2684_v25 = vld [vmem:[%s5279_s1 + $0x808] sm:$0xff] }
  0x6f   :  { %765 = vmatprep.subr.mxu1 %v2636_v26  ;;  %642 = vmatpush2.msra.mxu0 %v2596_v27  ;;  %v2644_v26 = vld [vmem:[%s5279_s1 + $0x6e0] sm:$0xff] }
  0x70   :  { %766 = vmatpush2.msra.mxu1 %v2635_v28  ;;  %643 = vmatprep.subr.mxu0 %v2595_v30  ;;  %v2683_v27 = vld [vmem:[%s5279_s1 + $0x800] sm:$0xff]  ;;  %v2643_v28 = vld [vmem:[%s5279_s1 + $0x6d8] sm:$0xff]  ;;  %v2642_v30 = vld [vmem:[%s5279_s1 + $0x6d0] sm:$0xff] }
  0x71   :  { %767 = vmatprep.subr.mxu1 %v2634_v31  ;;  %644 = vmatpush2.msra.mxu0 %v2594_v33  ;;  %v2681_v31 = vld [vmem:[%s5279_s1 + $0x7f0] sm:$0xff]  ;;  %v2680_v33 = vld [vmem:[%s5279_s1 + $0x7e8] sm:$0xff] }
  0x72   :  { %2599 = vmatprep.mubr.msk.f32.mxu0 %vm125_vm0, %v577_v32  ;;  %768 = vmatpush2.msra.mxu1 %v2633_v34  ;;  %v2641_v32 = vld [vmem:[%s5279_s1 + $0x6c8] sm:$0xff]  ;;  %v2640_v34 = vld [vmem:[%s5279_s1 + $0x6c0] sm:$0xff] }
  0x73   :  { %646 = vmatmul.mubr.f32.vlgmr.msra.gmra.mxu0 %v2598_v24  ;;  %2638 = vmatprep.mubr.msk.f32.mxu1 %vm125_vm0, %v701_v35  ;;  %v2645_v24 = vld [vmem:[%s5279_s1 + $0x6e8] sm:$0xff]  ;;  %v2679_v35 = vld [vmem:[%s5279_s1 + $0x7e0] sm:$0xff] }
  0x74   :  { %829 = vmatprep.subr.mxu0 %v2671_v36  ;;  %953 = vmatprep.subr.mxu1 %v2710_v37  ;;  %v2676_v36 = vld.sshfl [vmem:[%s5278_s0 + $0x18] sm:$0x33 pattern:$0x76325410] }
  0x75   :  { %770 = vmatmul.mubr.f32.vlgmr.msra.gmra.mxu1 %v2637_v29  ;;  %830 = vmatpush1.msra.mxu0 %v2670_v38  ;;  %v2682_v29 = vld [vmem:[%s5279_s1 + $0x7f8] sm:$0xff] }
  0x76   :  { %954 = vmatpush1.msra.mxu1 %v2709_v39  ;;  %831 = vmatprep.subr.mxu0 %v2669_v40  ;;  %v2675_v37 = vld [vmem:[%s5279_s1 + $0x7d8] sm:$0xff]  ;;  %v2674_v39 = vld [vmem:[%s5279_s1 + $0x7d0] sm:$0xff] }
  0x77   :  { %955 = vmatprep.subr.mxu1 %v2708_v41  ;;  %832 = vmatpush1.msra.mxu0 %v2668_v42  ;;  %v2714_v38 = vld [vmem:[%s5279_s1 + $0x8f8] sm:$0xff]  ;;  %v2713_v40 = vld [vmem:[%s5279_s1 + $0x8f0] sm:$0xff]  ;;  %v2673_v42 = vld [vmem:[%s5279_s1 + $0x7c8] sm:$0xff] }
  0x78   :  { %956 = vmatpush1.msra.mxu1 %v2707_v43  ;;  %833 = vmatprep.subr.mxu0 %v2667_v44  ;;  %v2715_v41 = vld.sshfl [vmem:[%s5278_s0 + $0x1c] sm:$0x33 pattern:$0x76325410]  ;;  %v2712_v43 = vld [vmem:[%s5279_s1 + $0x8e8] sm:$0xff]  ;;  %v825_v44 = vcombine.high %v2676_v36, %v2676_v36 }
  0x79   :  { %957 = vmatprep.subr.mxu1 %v2706_v45  ;;  %834 = vmatpush1.msra.mxu0 %v2666_v46  ;;  %v2672_v45 = vld [vmem:[%s5279_s1 + $0x7c0] sm:$0xff] }
  0x7a   :  { %958 = vmatpush1.msra.mxu1 %v2705_v47  ;;  %835 = vmatprep.subr.mxu0 %v2665_v48  ;;  %v2711_v46 = vld [vmem:[%s5279_s1 + $0x8e0] sm:$0xff]  ;;  %v949_v47 = vcombine.high %v2715_v41, %v2715_v41  ;;  %v2749_v48 = vld [vmem:[%s5279_s1 + $0x9f8] sm:$0xff] }
  0x7b   :  { %959 = vmatprep.subr.mxu1 %v2704_v49  ;;  %836 = vmatpush1.msra.mxu0 %v2664_v50  ;;  %v2788_v49 = vld [vmem:[%s5279_s1 + $0xb18] sm:$0xff]  ;;  %v2748_v50 = vld [vmem:[%s5279_s1 + $0x9f0] sm:$0xff] }
  0x7c   :  { %960 = vmatpush1.msra.mxu1 %v2703_v51  ;;  %837 = vmatprep.subr.mxu0 %v2663_v52  ;;  %v2787_v51 = vld [vmem:[%s5279_s1 + $0xb10] sm:$0xff]  ;;  %v2747_v52 = vld [vmem:[%s5279_s1 + $0x9e8] sm:$0xff] }
  0x7d   :  { %961 = vmatprep.subr.mxu1 %v2702_v53  ;;  %838 = vmatpush1.msra.mxu0 %v2662_v54  ;;  %v2786_v53 = vld [vmem:[%s5279_s1 + $0xb08] sm:$0xff]  ;;  %v2746_v54 = vld [vmem:[%s5279_s1 + $0x9e0] sm:$0xff] }
  0x7e   :  { %962 = vmatpush1.msra.mxu1 %v2701_v55  ;;  %839 = vmatprep.subr.mxu0 %v2661_v56  ;;  %v2785_v55 = vld [vmem:[%s5279_s1 + $0xb00] sm:$0xff]  ;;  %v2745_v56 = vld [vmem:[%s5279_s1 + $0x9d8] sm:$0xff] }
  0x7f   :  { %963 = vmatprep.subr.mxu1 %v2700_v57  ;;  %840 = vmatpush1.msra.mxu0 %v2660_v58  ;;  %v2784_v57 = vld [vmem:[%s5279_s1 + $0xaf8] sm:$0xff]  ;;  %v2744_v58 = vld [vmem:[%s5279_s1 + $0x9d0] sm:$0xff] }
  0x80   :  { %964 = vmatpush1.msra.mxu1 %v2699_v59  ;;  %841 = vmatprep.subr.mxu0 %v2659_v60  ;;  %v2783_v59 = vld [vmem:[%s5279_s1 + $0xaf0] sm:$0xff]  ;;  %v2743_v60 = vld [vmem:[%s5279_s1 + $0x9c8] sm:$0xff] }
  0x81   :  { %965 = vmatprep.subr.mxu1 %v2698_v61  ;;  %842 = vmatpush1.msra.mxu0 %v2658_v62  ;;  %v2782_v61 = vld [vmem:[%s5279_s1 + $0xae8] sm:$0xff]  ;;  %v2742_v62 = vld [vmem:[%s5279_s1 + $0x9c0] sm:$0xff] }
  0x82   :  { %966 = vmatpush1.msra.mxu1 %v2697_v63  ;;  %843 = vmatprep.subr.mxu0 %v2657_v0  ;;  %v2781_v63 = vld [vmem:[%s5279_s1 + $0xae0] sm:$0xff]  ;;  %v2741_v0 = vld [vmem:[%s5279_s1 + $0x9b8] sm:$0xff] }
  0x83   :  { %967 = vmatprep.subr.mxu1 %v2696_v1  ;;  %844 = vmatpush1.msra.mxu0 %v2656_v2  ;;  %v2780_v1 = vld [vmem:[%s5279_s1 + $0xad8] sm:$0xff]  ;;  %v2740_v2 = vld [vmem:[%s5279_s1 + $0x9b0] sm:$0xff] }
  0x84   :  { %968 = vmatpush1.msra.mxu1 %v2695_v3  ;;  %845 = vmatprep.subr.mxu0 %v2655_v4  ;;  %v2779_v3 = vld [vmem:[%s5279_s1 + $0xad0] sm:$0xff]  ;;  %v2739_v4 = vld [vmem:[%s5279_s1 + $0x9a8] sm:$0xff] }
  0x85   :  { %969 = vmatprep.subr.mxu1 %v2694_v5  ;;  %846 = vmatpush1.msra.mxu0 %v2654_v6  ;;  %v2778_v5 = vld [vmem:[%s5279_s1 + $0xac8] sm:$0xff]  ;;  %v2738_v6 = vld [vmem:[%s5279_s1 + $0x9a0] sm:$0xff] }
  0x86   :  { %970 = vmatpush1.msra.mxu1 %v2693_v7  ;;  %847 = vmatprep.subr.mxu0 %v2653_v8  ;;  %v2777_v7 = vld [vmem:[%s5279_s1 + $0xac0] sm:$0xff]  ;;  %v2737_v8 = vld [vmem:[%s5279_s1 + $0x998] sm:$0xff] }
  0x87   :  { %971 = vmatprep.subr.mxu1 %v2692_v9  ;;  %848 = vmatpush1.msra.mxu0 %v2652_v10  ;;  %v2776_v9 = vld [vmem:[%s5279_s1 + $0xab8] sm:$0xff]  ;;  %v2736_v10 = vld [vmem:[%s5279_s1 + $0x990] sm:$0xff] }
  0x88   :  { %972 = vmatpush1.msra.mxu1 %v2691_v11  ;;  %849 = vmatprep.subr.mxu0 %v2651_v12  ;;  %v2775_v11 = vld [vmem:[%s5279_s1 + $0xab0] sm:$0xff]  ;;  %v2735_v12 = vld [vmem:[%s5279_s1 + $0x988] sm:$0xff] }
  0x89   :  { %973 = vmatprep.subr.mxu1 %v2690_v13  ;;  %850 = vmatpush1.msra.mxu0 %v2650_v14  ;;  %v2774_v13 = vld [vmem:[%s5279_s1 + $0xaa8] sm:$0xff]  ;;  %v2734_v14 = vld [vmem:[%s5279_s1 + $0x980] sm:$0xff] }
  0x8a   :  { %974 = vmatpush1.msra.mxu1 %v2689_v15  ;;  %851 = vmatprep.subr.mxu0 %v2649_v16  ;;  %v2773_v15 = vld [vmem:[%s5279_s1 + $0xaa0] sm:$0xff]  ;;  %v2733_v16 = vld [vmem:[%s5279_s1 + $0x978] sm:$0xff] }
  0x8b   :  { %975 = vmatprep.subr.mxu1 %v2688_v17  ;;  %852 = vmatpush1.msra.mxu0 %v2648_v18  ;;  %v2772_v17 = vld [vmem:[%s5279_s1 + $0xa98] sm:$0xff]  ;;  %v2732_v18 = vld [vmem:[%s5279_s1 + $0x970] sm:$0xff] }
  0x8c   :  { %976 = vmatpush1.msra.mxu1 %v2687_v19  ;;  %853 = vmatprep.subr.mxu0 %v2647_v20  ;;  %v2771_v19 = vld [vmem:[%s5279_s1 + $0xa90] sm:$0xff]  ;;  %v2731_v20 = vld [vmem:[%s5279_s1 + $0x968] sm:$0xff] }
  0x8d   :  { %977 = vmatprep.subr.mxu1 %v2686_v21  ;;  %854 = vmatpush1.msra.mxu0 %v2646_v22  ;;  %v2770_v21 = vld [vmem:[%s5279_s1 + $0xa88] sm:$0xff]  ;;  %v2730_v22 = vld [vmem:[%s5279_s1 + $0x960] sm:$0xff] }
  0x8e   :  { %978 = vmatpush1.msra.mxu1 %v2685_v23  ;;  %855 = vmatprep.subr.mxu0 %v2645_v24  ;;  %v2769_v23 = vld [vmem:[%s5279_s1 + $0xa80] sm:$0xff]  ;;  %v2729_v24 = vld [vmem:[%s5279_s1 + $0x958] sm:$0xff] }
  0x8f   :  { %979 = vmatprep.subr.mxu1 %v2684_v25  ;;  %856 = vmatpush1.msra.mxu0 %v2644_v26  ;;  %v2768_v25 = vld [vmem:[%s5279_s1 + $0xa78] sm:$0xff]  ;;  %v2728_v26 = vld [vmem:[%s5279_s1 + $0x950] sm:$0xff] }
  0x90   :  { %980 = vmatpush1.msra.mxu1 %v2683_v27  ;;  %857 = vmatprep.subr.mxu0 %v2643_v28  ;;  %v2767_v27 = vld [vmem:[%s5279_s1 + $0xa70] sm:$0xff]  ;;  %v2727_v28 = vld [vmem:[%s5279_s1 + $0x948] sm:$0xff] }
  0x91   :  { %981 = vmatprep.subr.mxu1 %v2682_v29  ;;  %858 = vmatpush1.msra.mxu0 %v2642_v30  ;;  %v2766_v29 = vld [vmem:[%s5279_s1 + $0xa68] sm:$0xff]  ;;  %v2726_v30 = vld [vmem:[%s5279_s1 + $0x940] sm:$0xff] }
  0x92   :  { %982 = vmatpush1.msra.mxu1 %v2681_v31  ;;  %859 = vmatprep.subr.mxu0 %v2641_v32  ;;  %v2765_v31 = vld [vmem:[%s5279_s1 + $0xa60] sm:$0xff]  ;;  %v2725_v32 = vld [vmem:[%s5279_s1 + $0x938] sm:$0xff] }
  0x93   :  { %983 = vmatprep.subr.mxu1 %v2680_v33  ;;  %860 = vmatpush1.msra.mxu0 %v2640_v34  ;;  %v2764_v33 = vld [vmem:[%s5279_s1 + $0xa58] sm:$0xff]  ;;  %v2724_v34 = vld [vmem:[%s5279_s1 + $0x930] sm:$0xff] }
  0x94   :  { %984 = vmatpush1.msra.mxu1 %v2679_v35  ;;  %889 = vmatprep.subr.mxu0 %v2675_v37  ;;  %v2763_v35 = vld [vmem:[%s5279_s1 + $0xa50] sm:$0xff]  ;;  %v2762_v37 = vld [vmem:[%s5279_s1 + $0xa48] sm:$0xff] }
  0x95   :  { %1013 = vmatprep.subr.mxu1 %v2714_v38  ;;  %890 = vmatpush2.msra.mxu0 %v2674_v39  ;;  %v2722_v38 = vld [vmem:[%s5279_s1 + $0x920] sm:$0xff] }
  0x96   :  { %1014 = vmatpush2.msra.mxu1 %v2713_v40  ;;  %891 = vmatprep.subr.mxu0 %v2673_v42  ;;  %v2761_v39 = vld [vmem:[%s5279_s1 + $0xa40] sm:$0xff]  ;;  %v2721_v40 = vld [vmem:[%s5279_s1 + $0x918] sm:$0xff]  ;;  %v2720_v42 = vld [vmem:[%s5279_s1 + $0x910] sm:$0xff] }
  0x97   :  { %1015 = vmatprep.subr.mxu1 %v2712_v43  ;;  %892 = vmatpush2.msra.mxu0 %v2672_v45  ;;  %v2759_v43 = vld [vmem:[%s5279_s1 + $0xa30] sm:$0xff]  ;;  %v2758_v45 = vld [vmem:[%s5279_s1 + $0xa28] sm:$0xff] }
  0x98   :  { %2677 = vmatprep.mubr.msk.f32.mxu0 %vm125_vm0, %v825_v44  ;;  %1016 = vmatpush2.msra.mxu1 %v2711_v46  ;;  %v2719_v44 = vld [vmem:[%s5279_s1 + $0x908] sm:$0xff]  ;;  %v2718_v46 = vld [vmem:[%s5279_s1 + $0x900] sm:$0xff] }
  0x99   :  { %894 = vmatmul.mubr.f32.vlgmr.msra.gmra.mxu0 %v2676_v36  ;;  %2716 = vmatprep.mubr.msk.f32.mxu1 %vm125_vm0, %v949_v47  ;;  %v2723_v36 = vld [vmem:[%s5279_s1 + $0x928] sm:$0xff]  ;;  %v2757_v47 = vld [vmem:[%s5279_s1 + $0xa20] sm:$0xff] }
  0x9a   :  { %1077 = vmatprep.subr.mxu0 %v2749_v48  ;;  %1201 = vmatprep.subr.mxu1 %v2788_v49  ;;  %v2754_v48 = vld.sshfl [vmem:[%s5278_s0 + $0x20] sm:$0x33 pattern:$0x76325410]  ;;  %v2753_v49 = vld [vmem:[%s5279_s1 + $0xa18] sm:$0xff] }
  0x9b   :  { %1018 = vmatmul.mubr.f32.vlgmr.msra.gmra.mxu1 %v2715_v41  ;;  %1078 = vmatpush1.msra.mxu0 %v2748_v50  ;;  %v2760_v41 = vld [vmem:[%s5279_s1 + $0xa38] sm:$0xff] }
  0x9c   :  { %1202 = vmatpush1.msra.mxu1 %v2787_v51  ;;  %1079 = vmatprep.subr.mxu0 %v2747_v52  ;;  %v2792_v50 = vld [vmem:[%s5279_s1 + $0xb38] sm:$0xff]  ;;  %v2752_v51 = vld [vmem:[%s5279_s1 + $0xa10] sm:$0xff] }
  0x9d   :  { %1203 = vmatprep.subr.mxu1 %v2786_v53  ;;  %1080 = vmatpush1.msra.mxu0 %v2746_v54  ;;  %v2791_v52 = vld [vmem:[%s5279_s1 + $0xb30] sm:$0xff]  ;;  %v2793_v53 = vld.sshfl [vmem:[%s5278_s0 + $0x24] sm:$0x33 pattern:$0x76325410]  ;;  %v2751_v54 = vld [vmem:[%s5279_s1 + $0xa08] sm:$0xff] }
  0x9e   :  { %1204 = vmatpush1.msra.mxu1 %v2785_v55  ;;  %1081 = vmatprep.subr.mxu0 %v2745_v56  ;;  %v2790_v55 = vld [vmem:[%s5279_s1 + $0xb28] sm:$0xff]  ;;  %v1073_v56 = vcombine.high %v2754_v48, %v2754_v48 }
  0x9f   :  { %1205 = vmatprep.subr.mxu1 %v2784_v57  ;;  %1082 = vmatpush1.msra.mxu0 %v2744_v58  ;;  %v2750_v57 = vld [vmem:[%s5279_s1 + $0xa00] sm:$0xff] }
  0xa0   :  { %1206 = vmatpush1.msra.mxu1 %v2783_v59  ;;  %1083 = vmatprep.subr.mxu0 %v2743_v60  ;;  %v2789_v58 = vld [vmem:[%s5279_s1 + $0xb20] sm:$0xff]  ;;  %v1197_v59 = vcombine.high %v2793_v53, %v2793_v53  ;;  %v2827_v60 = vld [vmem:[%s5279_s1 + $0xc38] sm:$0xff] }
  0xa1   :  { %1207 = vmatprep.subr.mxu1 %v2782_v61  ;;  %1084 = vmatpush1.msra.mxu0 %v2742_v62  ;;  %v2866_v61 = vld [vmem:[%s5279_s1 + $0xd58] sm:$0xff]  ;;  %v2826_v62 = vld [vmem:[%s5279_s1 + $0xc30] sm:$0xff] }
  0xa2   :  { %1208 = vmatpush1.msra.mxu1 %v2781_v63  ;;  %1085 = vmatprep.subr.mxu0 %v2741_v0  ;;  %v2865_v63 = vld [vmem:[%s5279_s1 + $0xd50] sm:$0xff]  ;;  %v2825_v0 = vld [vmem:[%s5279_s1 + $0xc28] sm:$0xff] }
  0xa3   :  { %1209 = vmatprep.subr.mxu1 %v2780_v1  ;;  %1086 = vmatpush1.msra.mxu0 %v2740_v2  ;;  %v2864_v1 = vld [vmem:[%s5279_s1 + $0xd48] sm:$0xff]  ;;  %v2824_v2 = vld [vmem:[%s5279_s1 + $0xc20] sm:$0xff] }
  0xa4   :  { %1210 = vmatpush1.msra.mxu1 %v2779_v3  ;;  %1087 = vmatprep.subr.mxu0 %v2739_v4  ;;  %v2863_v3 = vld [vmem:[%s5279_s1 + $0xd40] sm:$0xff]  ;;  %v2823_v4 = vld [vmem:[%s5279_s1 + $0xc18] sm:$0xff] }
  0xa5   :  { %1211 = vmatprep.subr.mxu1 %v2778_v5  ;;  %1088 = vmatpush1.msra.mxu0 %v2738_v6  ;;  %v2862_v5 = vld [vmem:[%s5279_s1 + $0xd38] sm:$0xff]  ;;  %v2822_v6 = vld [vmem:[%s5279_s1 + $0xc10] sm:$0xff] }
  0xa6   :  { %1212 = vmatpush1.msra.mxu1 %v2777_v7  ;;  %1089 = vmatprep.subr.mxu0 %v2737_v8  ;;  %v2861_v7 = vld [vmem:[%s5279_s1 + $0xd30] sm:$0xff]  ;;  %v2821_v8 = vld [vmem:[%s5279_s1 + $0xc08] sm:$0xff] }
  0xa7   :  { %1213 = vmatprep.subr.mxu1 %v2776_v9  ;;  %1090 = vmatpush1.msra.mxu0 %v2736_v10  ;;  %v2860_v9 = vld [vmem:[%s5279_s1 + $0xd28] sm:$0xff]  ;;  %v2820_v10 = vld [vmem:[%s5279_s1 + $0xc00] sm:$0xff] }
  0xa8   :  { %1214 = vmatpush1.msra.mxu1 %v2775_v11  ;;  %1091 = vmatprep.subr.mxu0 %v2735_v12  ;;  %v2859_v11 = vld [vmem:[%s5279_s1 + $0xd20] sm:$0xff]  ;;  %v2819_v12 = vld [vmem:[%s5279_s1 + $0xbf8] sm:$0xff] }
  0xa9   :  { %1215 = vmatprep.subr.mxu1 %v2774_v13  ;;  %1092 = vmatpush1.msra.mxu0 %v2734_v14  ;;  %v2858_v13 = vld [vmem:[%s5279_s1 + $0xd18] sm:$0xff]  ;;  %v2818_v14 = vld [vmem:[%s5279_s1 + $0xbf0] sm:$0xff] }
  0xaa   :  { %1216 = vmatpush1.msra.mxu1 %v2773_v15  ;;  %1093 = vmatprep.subr.mxu0 %v2733_v16  ;;  %v2857_v15 = vld [vmem:[%s5279_s1 + $0xd10] sm:$0xff] }
  0xab   :  { %1217 = vmatprep.subr.mxu1 %v2772_v17  ;;  %1094 = vmatpush1.msra.mxu0 %v2732_v18 }
  0xac   :  { %1218 = vmatpush1.msra.mxu1 %v2771_v19  ;;  %1095 = vmatprep.subr.mxu0 %v2731_v20 }
  0xad   :  { %1219 = vmatprep.subr.mxu1 %v2770_v21  ;;  %1096 = vmatpush1.msra.mxu0 %v2730_v22 }
  0xae   :  { %1220 = vmatpush1.msra.mxu1 %v2769_v23  ;;  %1097 = vmatprep.subr.mxu0 %v2729_v24 }
  0xaf   :  { %1221 = vmatprep.subr.mxu1 %v2768_v25  ;;  %1098 = vmatpush1.msra.mxu0 %v2728_v26 }
  0xb0   :  { %1222 = vmatpush1.msra.mxu1 %v2767_v27  ;;  %1099 = vmatprep.subr.mxu0 %v2727_v28 }
  0xb1   :  { %1223 = vmatprep.subr.mxu1 %v2766_v29  ;;  %1100 = vmatpush1.msra.mxu0 %v2726_v30 }
  0xb2   :  { %1224 = vmatpush1.msra.mxu1 %v2765_v31  ;;  %1101 = vmatprep.subr.mxu0 %v2725_v32 }
  0xb3   :  { %1225 = vmatprep.subr.mxu1 %v2764_v33  ;;  %1102 = vmatpush1.msra.mxu0 %v2724_v34 }
  0xb4   :  { %1226 = vmatpush1.msra.mxu1 %v2763_v35  ;;  %1103 = vmatprep.subr.mxu0 %v2723_v36 }
  0xb5   :  { %1227 = vmatprep.subr.mxu1 %v2762_v37  ;;  %1104 = vmatpush1.msra.mxu0 %v2722_v38 }
  0xb6   :  { %1228 = vmatpush1.msra.mxu1 %v2761_v39  ;;  %1105 = vmatprep.subr.mxu0 %v2721_v40 }
  0xb7   :  { %1229 = vmatprep.subr.mxu1 %v2760_v41  ;;  %1106 = vmatpush1.msra.mxu0 %v2720_v42 }
  0xb8   :  { %1230 = vmatpush1.msra.mxu1 %v2759_v43  ;;  %1107 = vmatprep.subr.mxu0 %v2719_v44 }
  0xb9   :  { %1231 = vmatprep.subr.mxu1 %v2758_v45  ;;  %1108 = vmatpush1.msra.mxu0 %v2718_v46 }
  0xba   :  { %1232 = vmatpush1.msra.mxu1 %v2757_v47  ;;  %1137 = vmatprep.subr.mxu0 %v2753_v49 }
  0xbb   :  { %1261 = vmatprep.subr.mxu1 %v2792_v50  ;;  %1138 = vmatpush2.msra.mxu0 %v2752_v51 }
  0xbc   :  { %1262 = vmatpush2.msra.mxu1 %v2791_v52  ;;  %1139 = vmatprep.subr.mxu0 %v2751_v54 }
  0xbd   :  { %1263 = vmatprep.subr.mxu1 %v2790_v55  ;;  %1140 = vmatpush2.msra.mxu0 %v2750_v57 }
  0xbe   :  { %2755 = vmatprep.mubr.msk.f32.mxu0 %vm125_vm0, %v1073_v56  ;;  %1264 = vmatpush2.msra.mxu1 %v2789_v58 }
  0xbf   :  { %1142 = vmatmul.mubr.f32.vlgmr.msra.gmra.mxu0 %v2754_v48  ;;  %2794 = vmatprep.mubr.msk.f32.mxu1 %vm125_vm0, %v1197_v59 }
  0xc0   :  { %1325 = vmatprep.subr.mxu0 %v2827_v60  ;;  %1449 = vmatprep.subr.mxu1 %v2866_v61 }
  0xc1   :  { %1266 = vmatmul.mubr.f32.vlgmr.msra.gmra.mxu1 %v2793_v53  ;;  %1326 = vmatpush1.msra.mxu0 %v2826_v62 }
  0xc2   :  { %1450 = vmatpush1.msra.mxu1 %v2865_v63  ;;  %1327 = vmatprep.subr.mxu0 %v2825_v0 }
  0xc3   :  { %1451 = vmatprep.subr.mxu1 %v2864_v1  ;;  %1328 = vmatpush1.msra.mxu0 %v2824_v2 }
  0xc4   :  { %1452 = vmatpush1.msra.mxu1 %v2863_v3  ;;  %1329 = vmatprep.subr.mxu0 %v2823_v4 }
  0xc5   :  { %1453 = vmatprep.subr.mxu1 %v2862_v5  ;;  %1330 = vmatpush1.msra.mxu0 %v2822_v6 }
  0xc6   :  { %1454 = vmatpush1.msra.mxu1 %v2861_v7  ;;  %1331 = vmatprep.subr.mxu0 %v2821_v8 }
  0xc7   :  { %1455 = vmatprep.subr.mxu1 %v2860_v9 }
  0xc8   :  { %16 = vsyncpa [#allocation3], 0  ;;  %1332 = vmatpush1.msra.mxu0 %v2820_v10  ;;  %1456 = vmatpush1.msra.mxu1 %v2859_v11  ;;  %v2817_v16 = vld [vmem:[%s5279_s1 + $0xbe8] sm:$0xff]  ;;  %v2816_v18 = vld [vmem:[%s5279_s1 + $0xbe0] sm:$0xff]  ;;  %vm3192_vm3 = vmmov 0   ;;  %vm2261_vm6 = vcmask 523264  }
  0xc9   :  { %v2856_v17 = vld [vmem:[%s5279_s1 + $0xd08] sm:$0xff]  ;;  %1333 = vmatprep.subr.mxu0 %v2819_v12  ;;  %1457 = vmatprep.subr.mxu1 %v2858_v13  ;;  %v2855_v19 = vld [vmem:[%s5279_s1 + $0xd00] sm:$0xff]  ;;  %v2815_v20 = vld [vmem:[%s5279_s1 + $0xbd8] sm:$0xff]  ;;  %vm2349_vm8 = vcmask 261120   ;;  %vm2426_vm10 = vcmask 9216  }
  0xca   :  { %1334 = vmatpush1.msra.mxu0 %v2818_v14  ;;  %1458 = vmatpush1.msra.mxu1 %v2857_v15  ;;  %v2854_v21 = vld [vmem:[%s5279_s1 + $0xcf8] sm:$0xff]  ;;  %v2814_v22 = vld [vmem:[%s5279_s1 + $0xbd0] sm:$0xff]  ;;  %v2813_v24 = vld [vmem:[%s5279_s1 + $0xbc8] sm:$0xff] }
  0xcb   :  { %1335 = vmatprep.subr.mxu0 %v2817_v16  ;;  %1459 = vmatprep.subr.mxu1 %v2856_v17  ;;  %v2853_v23 = vld [vmem:[%s5279_s1 + $0xcf0] sm:$0xff]  ;;  %v2852_v25 = vld [vmem:[%s5279_s1 + $0xce8] sm:$0xff]  ;;  %v2812_v26 = vld [vmem:[%s5279_s1 + $0xbc0] sm:$0xff] }
  0xcc   :  { %1336 = vmatpush1.msra.mxu0 %v2816_v18  ;;  %1460 = vmatpush1.msra.mxu1 %v2855_v19  ;;  %v2851_v27 = vld [vmem:[%s5279_s1 + $0xce0] sm:$0xff]  ;;  %v2811_v28 = vld [vmem:[%s5279_s1 + $0xbb8] sm:$0xff]  ;;  %v2810_v30 = vld [vmem:[%s5279_s1 + $0xbb0] sm:$0xff] }
  0xcd   :  { %1337 = vmatprep.subr.mxu0 %v2815_v20  ;;  %1461 = vmatprep.subr.mxu1 %v2854_v21  ;;  %v2850_v29 = vld [vmem:[%s5279_s1 + $0xcd8] sm:$0xff]  ;;  %v2849_v31 = vld [vmem:[%s5279_s1 + $0xcd0] sm:$0xff]  ;;  %v2809_v32 = vld [vmem:[%s5279_s1 + $0xba8] sm:$0xff] }
  0xce   :  { %1338 = vmatpush1.msra.mxu0 %v2814_v22  ;;  %1462 = vmatpush1.msra.mxu1 %v2853_v23  ;;  %v2848_v33 = vld [vmem:[%s5279_s1 + $0xcc8] sm:$0xff]  ;;  %v2808_v34 = vld [vmem:[%s5279_s1 + $0xba0] sm:$0xff]  ;;  %v2807_v36 = vld [vmem:[%s5279_s1 + $0xb98] sm:$0xff] }
  0xcf   :  { %1339 = vmatprep.subr.mxu0 %v2813_v24  ;;  %1463 = vmatprep.subr.mxu1 %v2852_v25  ;;  %v2847_v35 = vld [vmem:[%s5279_s1 + $0xcc0] sm:$0xff]  ;;  %v2846_v37 = vld [vmem:[%s5279_s1 + $0xcb8] sm:$0xff]  ;;  %v2806_v38 = vld [vmem:[%s5279_s1 + $0xb90] sm:$0xff] }
  0xd0   :  { %1340 = vmatpush1.msra.mxu0 %v2812_v26  ;;  %1464 = vmatpush1.msra.mxu1 %v2851_v27  ;;  %v2845_v39 = vld [vmem:[%s5279_s1 + $0xcb0] sm:$0xff]  ;;  %v2805_v40 = vld [vmem:[%s5279_s1 + $0xb88] sm:$0xff]  ;;  %v2804_v42 = vld [vmem:[%s5279_s1 + $0xb80] sm:$0xff] }
  0xd1   :  { %1341 = vmatprep.subr.mxu0 %v2811_v28  ;;  %1465 = vmatprep.subr.mxu1 %v2850_v29  ;;  %v2844_v41 = vld [vmem:[%s5279_s1 + $0xca8] sm:$0xff]  ;;  %v2843_v43 = vld [vmem:[%s5279_s1 + $0xca0] sm:$0xff]  ;;  %v2803_v44 = vld [vmem:[%s5279_s1 + $0xb78] sm:$0xff] }
  0xd2   :  { %1342 = vmatpush1.msra.mxu0 %v2810_v30  ;;  %1466 = vmatpush1.msra.mxu1 %v2849_v31  ;;  %v2842_v45 = vld [vmem:[%s5279_s1 + $0xc98] sm:$0xff]  ;;  %v2802_v46 = vld [vmem:[%s5279_s1 + $0xb70] sm:$0xff]  ;;  %v2801_v48 = vld [vmem:[%s5279_s1 + $0xb68] sm:$0xff] }
  0xd3   :  { %1343 = vmatprep.subr.mxu0 %v2809_v32  ;;  %1467 = vmatprep.subr.mxu1 %v2848_v33  ;;  %v2841_v47 = vld [vmem:[%s5279_s1 + $0xc90] sm:$0xff]  ;;  %v2840_v49 = vld [vmem:[%s5279_s1 + $0xc88] sm:$0xff]  ;;  %v2800_v50 = vld [vmem:[%s5279_s1 + $0xb60] sm:$0xff] }
  0xd4   :  { %1344 = vmatpush1.msra.mxu0 %v2808_v34  ;;  %1468 = vmatpush1.msra.mxu1 %v2847_v35  ;;  %v2839_v51 = vld [vmem:[%s5279_s1 + $0xc80] sm:$0xff]  ;;  %v2799_v52 = vld [vmem:[%s5279_s1 + $0xb58] sm:$0xff]  ;;  %v2798_v54 = vld [vmem:[%s5279_s1 + $0xb50] sm:$0xff] }
  0xd5   :  { %1345 = vmatprep.subr.mxu0 %v2807_v36  ;;  %1469 = vmatprep.subr.mxu1 %v2846_v37  ;;  %v2838_v53 = vld [vmem:[%s5279_s1 + $0xc78] sm:$0xff]  ;;  %v2837_v55 = vld [vmem:[%s5279_s1 + $0xc70] sm:$0xff]  ;;  %v2797_v56 = vld [vmem:[%s5279_s1 + $0xb48] sm:$0xff] }
  0xd6   :  { %1346 = vmatpush1.msra.mxu0 %v2806_v38  ;;  %1470 = vmatpush1.msra.mxu1 %v2845_v39  ;;  %v2836_v57 = vld [vmem:[%s5279_s1 + $0xc68] sm:$0xff]  ;;  %v2796_v58 = vld [vmem:[%s5279_s1 + $0xb40] sm:$0xff]  ;;  %v2831_v61 = vld [vmem:[%s5279_s1 + $0xc58] sm:$0xff] }
  0xd7   :  { %1347 = vmatprep.subr.mxu0 %v2805_v40  ;;  %1471 = vmatprep.subr.mxu1 %v2844_v41  ;;  %v2835_v59 = vld [vmem:[%s5279_s1 + $0xc60] sm:$0xff]  ;;  %v2832_v60 = vld.sshfl [vmem:[%s5278_s0 + $0x28] sm:$0x33 pattern:$0x76325410]  ;;  %v2870_v62 = vld [vmem:[%s5279_s1 + $0xd78] sm:$0xff] }
  0xd8   :  { %1348 = vmatpush1.msra.mxu0 %v2804_v42  ;;  %1472 = vmatpush1.msra.mxu1 %v2843_v43  ;;  %v2830_v63 = vld [vmem:[%s5279_s1 + $0xc50] sm:$0xff]  ;;  %v2871_v1 = vld.sshfl [vmem:[%s5278_s0 + $0x2c] sm:$0x33 pattern:$0x76325410]  ;;  %v1321_v4 = vcombine.high %v2832_v60, %v2832_v60  ;;  %v2828_v5 = vld [vmem:[%s5279_s1 + $0xc40] sm:$0xff] }
  0xd9   :  { %1349 = vmatprep.subr.mxu0 %v2803_v44  ;;  %1473 = vmatprep.subr.mxu1 %v2842_v45  ;;  %v2869_v0 = vld [vmem:[%s5279_s1 + $0xd70] sm:$0xff]  ;;  %v2829_v2 = vld [vmem:[%s5279_s1 + $0xc48] sm:$0xff]  ;;  %v2867_v6 = vld [vmem:[%s5279_s1 + $0xd60] sm:$0xff]  ;;  %v1445_v7 = vcombine.high %v2871_v1, %v2871_v1 }
  0xda   :  { %1350 = vmatpush1.msra.mxu0 %v2802_v46  ;;  %1474 = vmatpush1.msra.mxu1 %v2841_v47  ;;  %v2868_v3 = vld [vmem:[%s5279_s1 + $0xd68] sm:$0xff]  ;;  %v2905_v8 = vld [vmem:[%s5279_s1 + $0xe78] sm:$0xff]  ;;  %v2904_v10 = vld [vmem:[%s5279_s1 + $0xe70] sm:$0xff] }
  0xdb   :  { %1351 = vmatprep.subr.mxu0 %v2801_v48  ;;  %1475 = vmatprep.subr.mxu1 %v2840_v49  ;;  %v2944_v9 = vld [vmem:[%s5279_s1 + $0xf98] sm:$0xff]  ;;  %v2943_v11 = vld [vmem:[%s5279_s1 + $0xf90] sm:$0xff]  ;;  %v2903_v12 = vld [vmem:[%s5279_s1 + $0xe68] sm:$0xff] }
  0xdc   :  { %1352 = vmatpush1.msra.mxu0 %v2800_v50  ;;  %1476 = vmatpush1.msra.mxu1 %v2839_v51  ;;  %v2942_v13 = vld [vmem:[%s5279_s1 + $0xf88] sm:$0xff]  ;;  %v2902_v14 = vld [vmem:[%s5279_s1 + $0xe60] sm:$0xff]  ;;  %v2901_v16 = vld [vmem:[%s5279_s1 + $0xe58] sm:$0xff] }
  0xdd   :  { %1353 = vmatprep.subr.mxu0 %v2799_v52  ;;  %1477 = vmatprep.subr.mxu1 %v2838_v53  ;;  %v2941_v15 = vld [vmem:[%s5279_s1 + $0xf80] sm:$0xff]  ;;  %v2940_v17 = vld [vmem:[%s5279_s1 + $0xf78] sm:$0xff]  ;;  %v2900_v18 = vld [vmem:[%s5279_s1 + $0xe50] sm:$0xff] }
  0xde   :  { %1354 = vmatpush1.msra.mxu0 %v2798_v54  ;;  %1478 = vmatpush1.msra.mxu1 %v2837_v55  ;;  %v2939_v19 = vld [vmem:[%s5279_s1 + $0xf70] sm:$0xff]  ;;  %v2899_v20 = vld [vmem:[%s5279_s1 + $0xe48] sm:$0xff]  ;;  %v2898_v22 = vld [vmem:[%s5279_s1 + $0xe40] sm:$0xff] }
  0xdf   :  { %1355 = vmatprep.subr.mxu0 %v2797_v56  ;;  %1479 = vmatprep.subr.mxu1 %v2836_v57  ;;  %v2938_v21 = vld [vmem:[%s5279_s1 + $0xf68] sm:$0xff]  ;;  %v2937_v23 = vld [vmem:[%s5279_s1 + $0xf60] sm:$0xff]  ;;  %v2897_v24 = vld [vmem:[%s5279_s1 + $0xe38] sm:$0xff] }
  0xe0   :  { %1356 = vmatpush1.msra.mxu0 %v2796_v58  ;;  %1480 = vmatpush1.msra.mxu1 %v2835_v59  ;;  %v2936_v25 = vld [vmem:[%s5279_s1 + $0xf58] sm:$0xff]  ;;  %v2896_v26 = vld [vmem:[%s5279_s1 + $0xe30] sm:$0xff]  ;;  %v2895_v28 = vld [vmem:[%s5279_s1 + $0xe28] sm:$0xff] }
  0xe1   :  { %1385 = vmatprep.subr.mxu0 %v2831_v61  ;;  %1509 = vmatprep.subr.mxu1 %v2870_v62  ;;  %v2935_v27 = vld [vmem:[%s5279_s1 + $0xf50] sm:$0xff]  ;;  %v2934_v29 = vld [vmem:[%s5279_s1 + $0xf48] sm:$0xff]  ;;  %v2894_v30 = vld [vmem:[%s5279_s1 + $0xe20] sm:$0xff] }
  0xe2   :  { %1386 = vmatpush2.msra.mxu0 %v2830_v63  ;;  %1510 = vmatpush2.msra.mxu1 %v2869_v0  ;;  %v2933_v31 = vld [vmem:[%s5279_s1 + $0xf40] sm:$0xff]  ;;  %v2893_v32 = vld [vmem:[%s5279_s1 + $0xe18] sm:$0xff]  ;;  %v2892_v34 = vld [vmem:[%s5279_s1 + $0xe10] sm:$0xff] }
  0xe3   :  { %1387 = vmatprep.subr.mxu0 %v2829_v2  ;;  %1511 = vmatprep.subr.mxu1 %v2868_v3  ;;  %v2932_v33 = vld [vmem:[%s5279_s1 + $0xf38] sm:$0xff]  ;;  %v2931_v35 = vld [vmem:[%s5279_s1 + $0xf30] sm:$0xff]  ;;  %v2891_v36 = vld [vmem:[%s5279_s1 + $0xe08] sm:$0xff] }
  0xe4   :  { %1388 = vmatpush2.msra.mxu0 %v2828_v5  ;;  %2833 = vmatprep.mubr.msk.f32.mxu0 %vm125_vm0, %v1321_v4  ;;  %v2930_v37 = vld [vmem:[%s5279_s1 + $0xf28] sm:$0xff]  ;;  %v2890_v38 = vld [vmem:[%s5279_s1 + $0xe00] sm:$0xff]  ;;  %v2889_v40 = vld [vmem:[%s5279_s1 + $0xdf8] sm:$0xff] }
  0xe5   :  { %1512 = vmatpush2.msra.mxu1 %v2867_v6  ;;  %1390 = vmatmul.mubr.f32.vlgmr.msra.gmra.mxu0 %v2832_v60  ;;  %v2929_v39 = vld [vmem:[%s5279_s1 + $0xf20] sm:$0xff]  ;;  %v2928_v41 = vld [vmem:[%s5279_s1 + $0xf18] sm:$0xff]  ;;  %v2888_v42 = vld [vmem:[%s5279_s1 + $0xdf0] sm:$0xff] }
  0xe6   :  { %2872 = vmatprep.mubr.msk.f32.mxu1 %vm125_vm0, %v1445_v7  ;;  %1573 = vmatprep.subr.mxu0 %v2905_v8  ;;  %v2927_v43 = vld [vmem:[%s5279_s1 + $0xf10] sm:$0xff]  ;;  %v2887_v44 = vld [vmem:[%s5279_s1 + $0xde8] sm:$0xff]  ;;  %v2886_v46 = vld [vmem:[%s5279_s1 + $0xde0] sm:$0xff] }
  0xe7   :  { %1697 = vmatprep.subr.mxu1 %v2944_v9  ;;  %1514 = vmatmul.mubr.f32.vlgmr.msra.gmra.mxu1 %v2871_v1  ;;  %v2926_v45 = vld [vmem:[%s5279_s1 + $0xf08] sm:$0xff]  ;;  %v2925_v47 = vld [vmem:[%s5279_s1 + $0xf00] sm:$0xff]  ;;  %v2885_v48 = vld [vmem:[%s5279_s1 + $0xdd8] sm:$0xff] }
  0xe8   :  { %1574 = vmatpush1.msra.mxu0 %v2904_v10  ;;  %1698 = vmatpush1.msra.mxu1 %v2943_v11  ;;  %v2924_v49 = vld [vmem:[%s5279_s1 + $0xef8] sm:$0xff]  ;;  %v2884_v50 = vld [vmem:[%s5279_s1 + $0xdd0] sm:$0xff]  ;;  %v2883_v52 = vld [vmem:[%s5279_s1 + $0xdc8] sm:$0xff] }
  0xe9   :  { %1575 = vmatprep.subr.mxu0 %v2903_v12  ;;  %1699 = vmatprep.subr.mxu1 %v2942_v13  ;;  %v2923_v51 = vld [vmem:[%s5279_s1 + $0xef0] sm:$0xff]  ;;  %v2922_v53 = vld [vmem:[%s5279_s1 + $0xee8] sm:$0xff]  ;;  %v2882_v54 = vld [vmem:[%s5279_s1 + $0xdc0] sm:$0xff] }
  0xea   :  { %1576 = vmatpush1.msra.mxu0 %v2902_v14  ;;  %1700 = vmatpush1.msra.mxu1 %v2941_v15  ;;  %v2921_v55 = vld [vmem:[%s5279_s1 + $0xee0] sm:$0xff]  ;;  %v2881_v56 = vld [vmem:[%s5279_s1 + $0xdb8] sm:$0xff]  ;;  %v2880_v58 = vld [vmem:[%s5279_s1 + $0xdb0] sm:$0xff] }
  0xeb   :  { %1577 = vmatprep.subr.mxu0 %v2901_v16  ;;  %1701 = vmatprep.subr.mxu1 %v2940_v17  ;;  %v2920_v57 = vld [vmem:[%s5279_s1 + $0xed8] sm:$0xff]  ;;  %v2919_v59 = vld [vmem:[%s5279_s1 + $0xed0] sm:$0xff]  ;;  %v2879_v60 = vld [vmem:[%s5279_s1 + $0xda8] sm:$0xff] }
  0xec   :  { %1578 = vmatpush1.msra.mxu0 %v2900_v18  ;;  %1702 = vmatpush1.msra.mxu1 %v2939_v19  ;;  %v2918_v61 = vld [vmem:[%s5279_s1 + $0xec8] sm:$0xff]  ;;  %v2878_v62 = vld [vmem:[%s5279_s1 + $0xda0] sm:$0xff]  ;;  %v2877_v0 = vld [vmem:[%s5279_s1 + $0xd98] sm:$0xff] }
  0xed   :  { %1579 = vmatprep.subr.mxu0 %v2899_v20  ;;  %1703 = vmatprep.subr.mxu1 %v2938_v21  ;;  %v2917_v63 = vld [vmem:[%s5279_s1 + $0xec0] sm:$0xff]  ;;  %v2916_v1 = vld [vmem:[%s5279_s1 + $0xeb8] sm:$0xff]  ;;  %v2876_v2 = vld [vmem:[%s5279_s1 + $0xd90] sm:$0xff] }
  0xee   :  { %1580 = vmatpush1.msra.mxu0 %v2898_v22  ;;  %1704 = vmatpush1.msra.mxu1 %v2937_v23  ;;  %v2915_v3 = vld [vmem:[%s5279_s1 + $0xeb0] sm:$0xff]  ;;  %v2875_v4 = vld [vmem:[%s5279_s1 + $0xd88] sm:$0xff]  ;;  %v2874_v6 = vld [vmem:[%s5279_s1 + $0xd80] sm:$0xff] }
  0xef   :  { %1581 = vmatprep.subr.mxu0 %v2897_v24  ;;  %1705 = vmatprep.subr.mxu1 %v2936_v25  ;;  %v2914_v5 = vld [vmem:[%s5279_s1 + $0xea8] sm:$0xff]  ;;  %v2913_v7 = vld [vmem:[%s5279_s1 + $0xea0] sm:$0xff]  ;;  %v2910_v8 = vld.sshfl [vmem:[%s5278_s0 + $0x30] sm:$0x33 pattern:$0x76325410] }
  0xf0   :  { %1582 = vmatpush1.msra.mxu0 %v2896_v26  ;;  %1706 = vmatpush1.msra.mxu1 %v2935_v27  ;;  %v2909_v9 = vld [vmem:[%s5279_s1 + $0xe98] sm:$0xff]  ;;  %v2908_v11 = vld [vmem:[%s5279_s1 + $0xe90] sm:$0xff]  ;;  %v2907_v14 = vld [vmem:[%s5279_s1 + $0xe88] sm:$0xff]  ;;  %v1569_v16 = vcombine.high %v2910_v8, %v2910_v8 }
  0xf1   :  { %1583 = vmatprep.subr.mxu0 %v2895_v28  ;;  %1707 = vmatprep.subr.mxu1 %v2934_v29  ;;  %v2948_v10 = vld [vmem:[%s5279_s1 + $0xfb8] sm:$0xff]  ;;  %v2947_v12 = vld [vmem:[%s5279_s1 + $0xfb0] sm:$0xff]  ;;  %v2946_v15 = vld [vmem:[%s5279_s1 + $0xfa8] sm:$0xff] }
  0xf2   :  { %1584 = vmatpush1.msra.mxu0 %v2894_v30  ;;  %1708 = vmatpush1.msra.mxu1 %v2933_v31  ;;  %v2949_v13 = vld.sshfl [vmem:[%s5278_s0 + $0x34] sm:$0x33 pattern:$0x76325410]  ;;  %v2906_v17 = vld [vmem:[%s5279_s1 + $0xe80] sm:$0xff]  ;;  %v2983_v20 = vld [vmem:[%s5279_s1 + $0x10b8] sm:$0xff] }
  0xf3   :  { %1585 = vmatprep.subr.mxu0 %v2893_v32  ;;  %1709 = vmatprep.subr.mxu1 %v2932_v33  ;;  %v2945_v18 = vld [vmem:[%s5279_s1 + $0xfa0] sm:$0xff]  ;;  %v1693_v19 = vcombine.high %v2949_v13, %v2949_v13  ;;  %v3022_v21 = vld [vmem:[%s5279_s1 + $0x11d8] sm:$0xff]  ;;  %v2982_v22 = vld [vmem:[%s5279_s1 + $0x10b0] sm:$0xff] }
  0xf4   :  { %1586 = vmatpush1.msra.mxu0 %v2892_v34  ;;  %1710 = vmatpush1.msra.mxu1 %v2931_v35  ;;  %v3021_v23 = vld [vmem:[%s5279_s1 + $0x11d0] sm:$0xff]  ;;  %v2981_v24 = vld [vmem:[%s5279_s1 + $0x10a8] sm:$0xff]  ;;  %v2980_v26 = vld [vmem:[%s5279_s1 + $0x10a0] sm:$0xff] }
  0xf5   :  { %1587 = vmatprep.subr.mxu0 %v2891_v36  ;;  %1711 = vmatprep.subr.mxu1 %v2930_v37  ;;  %v3020_v25 = vld [vmem:[%s5279_s1 + $0x11c8] sm:$0xff]  ;;  %v3019_v27 = vld [vmem:[%s5279_s1 + $0x11c0] sm:$0xff]  ;;  %v2979_v28 = vld [vmem:[%s5279_s1 + $0x1098] sm:$0xff] }
  0xf6   :  { %1588 = vmatpush1.msra.mxu0 %v2890_v38  ;;  %1712 = vmatpush1.msra.mxu1 %v2929_v39  ;;  %v3018_v29 = vld [vmem:[%s5279_s1 + $0x11b8] sm:$0xff]  ;;  %v2978_v30 = vld [vmem:[%s5279_s1 + $0x1090] sm:$0xff]  ;;  %v2977_v32 = vld [vmem:[%s5279_s1 + $0x1088] sm:$0xff] }
  0xf7   :  { %1589 = vmatprep.subr.mxu0 %v2889_v40  ;;  %1713 = vmatprep.subr.mxu1 %v2928_v41  ;;  %v3017_v31 = vld [vmem:[%s5279_s1 + $0x11b0] sm:$0xff]  ;;  %v3016_v33 = vld [vmem:[%s5279_s1 + $0x11a8] sm:$0xff]  ;;  %v2976_v34 = vld [vmem:[%s5279_s1 + $0x1080] sm:$0xff] }
  0xf8   :  { %1590 = vmatpush1.msra.mxu0 %v2888_v42  ;;  %1714 = vmatpush1.msra.mxu1 %v2927_v43  ;;  %v3015_v35 = vld [vmem:[%s5279_s1 + $0x11a0] sm:$0xff]  ;;  %v2975_v36 = vld [vmem:[%s5279_s1 + $0x1078] sm:$0xff]  ;;  %v2974_v38 = vld [vmem:[%s5279_s1 + $0x1070] sm:$0xff] }
  0xf9   :  { %1591 = vmatprep.subr.mxu0 %v2887_v44  ;;  %1715 = vmatprep.subr.mxu1 %v2926_v45  ;;  %v3014_v37 = vld [vmem:[%s5279_s1 + $0x1198] sm:$0xff]  ;;  %v3013_v39 = vld [vmem:[%s5279_s1 + $0x1190] sm:$0xff]  ;;  %v2973_v40 = vld [vmem:[%s5279_s1 + $0x1068] sm:$0xff] }
  0xfa   :  { %1592 = vmatpush1.msra.mxu0 %v2886_v46  ;;  %1716 = vmatpush1.msra.mxu1 %v2925_v47  ;;  %v3012_v41 = vld [vmem:[%s5279_s1 + $0x1188] sm:$0xff]  ;;  %v2972_v42 = vld [vmem:[%s5279_s1 + $0x1060] sm:$0xff]  ;;  %v2971_v44 = vld [vmem:[%s5279_s1 + $0x1058] sm:$0xff] }
  0xfb   :  { %1593 = vmatprep.subr.mxu0 %v2885_v48  ;;  %1717 = vmatprep.subr.mxu1 %v2924_v49  ;;  %v3011_v43 = vld [vmem:[%s5279_s1 + $0x1180] sm:$0xff]  ;;  %v3010_v45 = vld [vmem:[%s5279_s1 + $0x1178] sm:$0xff]  ;;  %v2970_v46 = vld [vmem:[%s5279_s1 + $0x1050] sm:$0xff] }
  0xfc   :  { %1594 = vmatpush1.msra.mxu0 %v2884_v50  ;;  %1718 = vmatpush1.msra.mxu1 %v2923_v51  ;;  %v3009_v47 = vld [vmem:[%s5279_s1 + $0x1170] sm:$0xff]  ;;  %v2969_v48 = vld [vmem:[%s5279_s1 + $0x1048] sm:$0xff]  ;;  %v2968_v50 = vld [vmem:[%s5279_s1 + $0x1040] sm:$0xff] }
  0xfd   :  { %1595 = vmatprep.subr.mxu0 %v2883_v52  ;;  %1719 = vmatprep.subr.mxu1 %v2922_v53  ;;  %v3008_v49 = vld [vmem:[%s5279_s1 + $0x1168] sm:$0xff]  ;;  %v3007_v51 = vld [vmem:[%s5279_s1 + $0x1160] sm:$0xff]  ;;  %v2967_v52 = vld [vmem:[%s5279_s1 + $0x1038] sm:$0xff] }
  0xfe   :  { %1596 = vmatpush1.msra.mxu0 %v2882_v54  ;;  %1720 = vmatpush1.msra.mxu1 %v2921_v55  ;;  %v3006_v53 = vld [vmem:[%s5279_s1 + $0x1158] sm:$0xff]  ;;  %v2966_v54 = vld [vmem:[%s5279_s1 + $0x1030] sm:$0xff] }
  0xff   :  { %1597 = vmatprep.subr.mxu0 %v2881_v56  ;;  %1721 = vmatprep.subr.mxu1 %v2920_v57  ;;  %v3005_v55 = vld [vmem:[%s5279_s1 + $0x1150] sm:$0xff]  ;;  %v2965_v56 = vld [vmem:[%s5279_s1 + $0x1028] sm:$0xff] }
 0x100   :  { %1598 = vmatpush1.msra.mxu0 %v2880_v58  ;;  %1722 = vmatpush1.msra.mxu1 %v2919_v59  ;;  %v3004_v57 = vld [vmem:[%s5279_s1 + $0x1148] sm:$0xff]  ;;  %v2964_v58 = vld [vmem:[%s5279_s1 + $0x1020] sm:$0xff] }
 0x101   :  { %1599 = vmatprep.subr.mxu0 %v2879_v60  ;;  %1723 = vmatprep.subr.mxu1 %v2918_v61  ;;  %v3003_v59 = vld [vmem:[%s5279_s1 + $0x1140] sm:$0xff]  ;;  %v2963_v60 = vld [vmem:[%s5279_s1 + $0x1018] sm:$0xff] }
 0x102   :  { %1600 = vmatpush1.msra.mxu0 %v2878_v62  ;;  %1724 = vmatpush1.msra.mxu1 %v2917_v63  ;;  %v3002_v61 = vld [vmem:[%s5279_s1 + $0x1138] sm:$0xff]  ;;  %v2962_v62 = vld [vmem:[%s5279_s1 + $0x1010] sm:$0xff] }
 0x103   :  { %1601 = vmatprep.subr.mxu0 %v2877_v0  ;;  %1725 = vmatprep.subr.mxu1 %v2916_v1  ;;  %v3001_v63 = vld [vmem:[%s5279_s1 + $0x1130] sm:$0xff]  ;;  %v2961_v0 = vld [vmem:[%s5279_s1 + $0x1008] sm:$0xff] }
 0x104   :  { %1602 = vmatpush1.msra.mxu0 %v2876_v2  ;;  %1726 = vmatpush1.msra.mxu1 %v2915_v3  ;;  %v3000_v1 = vld [vmem:[%s5279_s1 + $0x1128] sm:$0xff]  ;;  %v2960_v2 = vld [vmem:[%s5279_s1 + $0x1000] sm:$0xff] }
 0x105   :  { %1603 = vmatprep.subr.mxu0 %v2875_v4  ;;  %1727 = vmatprep.subr.mxu1 %v2914_v5  ;;  %v2999_v3 = vld [vmem:[%s5279_s1 + $0x1120] sm:$0xff]  ;;  %v2959_v4 = vld [vmem:[%s5279_s1 + $0xff8] sm:$0xff] }
 0x106   :  { %1604 = vmatpush1.msra.mxu0 %v2874_v6  ;;  %1728 = vmatpush1.msra.mxu1 %v2913_v7  ;;  %v2998_v5 = vld [vmem:[%s5279_s1 + $0x1118] sm:$0xff]  ;;  %v2958_v6 = vld [vmem:[%s5279_s1 + $0xff0] sm:$0xff] }
 0x107   :  { %1633 = vmatprep.subr.mxu0 %v2909_v9  ;;  %1757 = vmatprep.subr.mxu1 %v2948_v10  ;;  %v2997_v7 = vld [vmem:[%s5279_s1 + $0x1110] sm:$0xff]  ;;  %v2996_v9 = vld [vmem:[%s5279_s1 + $0x1108] sm:$0xff]  ;;  %v2956_v10 = vld [vmem:[%s5279_s1 + $0xfe0] sm:$0xff] }
 0x108   :  { %1634 = vmatpush2.msra.mxu0 %v2908_v11  ;;  %1758 = vmatpush2.msra.mxu1 %v2947_v12  ;;  %v2995_v11 = vld [vmem:[%s5279_s1 + $0x1100] sm:$0xff]  ;;  %v2955_v12 = vld [vmem:[%s5279_s1 + $0xfd8] sm:$0xff] }
 0x109   :  { %1635 = vmatprep.subr.mxu0 %v2907_v14  ;;  %1759 = vmatprep.subr.mxu1 %v2946_v15  ;;  %v2954_v14 = vld [vmem:[%s5279_s1 + $0xfd0] sm:$0xff] }
 0x10a   :  { %1636 = vmatpush2.msra.mxu0 %v2906_v17  ;;  %2911 = vmatprep.mubr.msk.f32.mxu0 %vm125_vm0, %v1569_v16  ;;  %v2993_v15 = vld [vmem:[%s5279_s1 + $0x10f0] sm:$0xff]  ;;  %v2953_v16 = vld [vmem:[%s5279_s1 + $0xfc8] sm:$0xff] }
 0x10b   :  { %1760 = vmatpush2.msra.mxu1 %v2945_v18  ;;  %1638 = vmatmul.mubr.f32.vlgmr.msra.gmra.mxu0 %v2910_v8  ;;  %v2957_v8 = vld [vmem:[%s5279_s1 + $0xfe8] sm:$0xff]  ;;  %v2952_v18 = vld [vmem:[%s5279_s1 + $0xfc0] sm:$0xff] }
 0x10c   :  { %2950 = vmatprep.mubr.msk.f32.mxu1 %vm125_vm0, %v1693_v19  ;;  %1821 = vmatprep.subr.mxu0 %v2983_v20  ;;  %v2992_v17 = vld [vmem:[%s5279_s1 + $0x10e8] sm:$0xff]  ;;  %v2991_v19 = vld [vmem:[%s5279_s1 + $0x10e0] sm:$0xff]  ;;  %v2988_v20 = vld.sshfl [vmem:[%s5278_s0 + $0x38] sm:$0x33 pattern:$0x76325410] }
 0x10d   :  { %1945 = vmatprep.subr.mxu1 %v3022_v21  ;;  %1762 = vmatmul.mubr.f32.vlgmr.msra.gmra.mxu1 %v2949_v13  ;;  %v2994_v13 = vld [vmem:[%s5279_s1 + $0x10f8] sm:$0xff] }
 0x10e   :  { %1822 = vmatpush1.msra.mxu0 %v2982_v22  ;;  %1946 = vmatpush1.msra.mxu1 %v3021_v23  ;;  %v2987_v21 = vld [vmem:[%s5279_s1 + $0x10d8] sm:$0xff] }
 0x10f   :  { %1823 = vmatprep.subr.mxu0 %v2981_v24  ;;  %1947 = vmatprep.subr.mxu1 %v3020_v25  ;;  %v3026_v22 = vld [vmem:[%s5279_s1 + $0x11f8] sm:$0xff]  ;;  %v2986_v24 = vld [vmem:[%s5279_s1 + $0x10d0] sm:$0xff] }
 0x110   :  { %1824 = vmatpush1.msra.mxu0 %v2980_v26  ;;  %1948 = vmatpush1.msra.mxu1 %v3019_v27  ;;  %v3027_v23 = vld.sshfl [vmem:[%s5278_s0 + $0x3c] sm:$0x33 pattern:$0x76325410]  ;;  %v3025_v25 = vld [vmem:[%s5279_s1 + $0x11f0] sm:$0xff]  ;;  %v2985_v26 = vld [vmem:[%s5279_s1 + $0x10c8] sm:$0xff] }
 0x111   :  { %1825 = vmatprep.subr.mxu0 %v2979_v28  ;;  %1949 = vmatprep.subr.mxu1 %v3018_v29  ;;  %v3024_v27 = vld [vmem:[%s5279_s1 + $0x11e8] sm:$0xff]  ;;  %v1817_v28 = vcombine.high %v2988_v20, %v2988_v20  ;;  %v2984_v29 = vld [vmem:[%s5279_s1 + $0x10c0] sm:$0xff] }
 0x112   :  { %1826 = vmatpush1.msra.mxu0 %v2978_v30  ;;  %1950 = vmatpush1.msra.mxu1 %v3017_v31  ;;  %v1941_v30 = vcombine.high %v3027_v23, %v3027_v23  ;;  %v3023_v31 = vld [vmem:[%s5279_s1 + $0x11e0] sm:$0xff] }
 0x113   :  { %1827 = vmatprep.subr.mxu0 %v2977_v32  ;;  %1951 = vmatprep.subr.mxu1 %v3016_v33  ;;  %v2069_v32 = vld [vmem:[%s5281_s3 + $0xf8] sm:$0xff] }
 0x114   :  { %1828 = vmatpush1.msra.mxu0 %v2976_v34  ;;  %1952 = vmatpush1.msra.mxu1 %v3015_v35  ;;  %v2053_v33 = vld [vmem:[%s5281_s3 + $0x78] sm:$0xff]  ;;  %v2068_v34 = vld [vmem:[%s5281_s3 + $0xf0] sm:$0xff] }
 0x115   :  { %1829 = vmatprep.subr.mxu0 %v2975_v36  ;;  %1953 = vmatprep.subr.mxu1 %v3014_v37  ;;  %v2052_v35 = vld [vmem:[%s5281_s3 + $0x70] sm:$0xff]  ;;  %v2067_v36 = vld [vmem:[%s5281_s3 + $0xe8] sm:$0xff] }
 0x116   :  { %1830 = vmatpush1.msra.mxu0 %v2974_v38  ;;  %1954 = vmatpush1.msra.mxu1 %v3013_v39  ;;  %v2051_v37 = vld [vmem:[%s5281_s3 + $0x68] sm:$0xff]  ;;  %v2066_v38 = vld [vmem:[%s5281_s3 + $0xe0] sm:$0xff] }
 0x117   :  { %1831 = vmatprep.subr.mxu0 %v2973_v40  ;;  %1955 = vmatprep.subr.mxu1 %v3012_v41  ;;  %v2050_v39 = vld [vmem:[%s5281_s3 + $0x60] sm:$0xff]  ;;  %v2065_v40 = vld [vmem:[%s5281_s3 + $0xd8] sm:$0xff] }
 0x118   :  { %1832 = vmatpush1.msra.mxu0 %v2972_v42  ;;  %1956 = vmatpush1.msra.mxu1 %v3011_v43  ;;  %v2049_v41 = vld [vmem:[%s5281_s3 + $0x58] sm:$0xff]  ;;  %v2064_v42 = vld [vmem:[%s5281_s3 + $0xd0] sm:$0xff] }
 0x119   :  { %1833 = vmatprep.subr.mxu0 %v2971_v44  ;;  %1957 = vmatprep.subr.mxu1 %v3010_v45  ;;  %v2048_v43 = vld [vmem:[%s5281_s3 + $0x50] sm:$0xff]  ;;  %v2063_v44 = vld [vmem:[%s5281_s3 + $0xc8] sm:$0xff] }
 0x11a   :  { %1834 = vmatpush1.msra.mxu0 %v2970_v46  ;;  %1958 = vmatpush1.msra.mxu1 %v3009_v47  ;;  %v2047_v45 = vld [vmem:[%s5281_s3 + $0x48] sm:$0xff]  ;;  %v2062_v46 = vld [vmem:[%s5281_s3 + $0xc0] sm:$0xff] }
 0x11b   :  { %1835 = vmatprep.subr.mxu0 %v2969_v48  ;;  %1959 = vmatprep.subr.mxu1 %v3008_v49  ;;  %v2046_v47 = vld [vmem:[%s5281_s3 + $0x40] sm:$0xff]  ;;  %v2061_v48 = vld [vmem:[%s5281_s3 + $0xb8] sm:$0xff] }
 0x11c   :  { %1836 = vmatpush1.msra.mxu0 %v2968_v50  ;;  %1960 = vmatpush1.msra.mxu1 %v3007_v51  ;;  %v2045_v49 = vld [vmem:[%s5281_s3 + $0x38] sm:$0xff]  ;;  %v2060_v50 = vld [vmem:[%s5281_s3 + $0xb0] sm:$0xff] }
 0x11d   :  { %1837 = vmatprep.subr.mxu0 %v2967_v52  ;;  %1961 = vmatprep.subr.mxu1 %v3006_v53  ;;  %v2044_v51 = vld [vmem:[%s5281_s3 + $0x30] sm:$0xff]  ;;  %v2059_v52 = vld [vmem:[%s5281_s3 + $0xa8] sm:$0xff] }
 0x11e   :  { %1838 = vmatpush1.msra.mxu0 %v2966_v54  ;;  %1962 = vmatpush1.msra.mxu1 %v3005_v55  ;;  %v2043_v53 = vld [vmem:[%s5281_s3 + $0x28] sm:$0xff]  ;;  %v2058_v54 = vld [vmem:[%s5281_s3 + $0xa0] sm:$0xff] }
 0x11f   :  { %1839 = vmatprep.subr.mxu0 %v2965_v56  ;;  %1963 = vmatprep.subr.mxu1 %v3004_v57  ;;  %v2042_v55 = vld [vmem:[%s5281_s3 + $0x20] sm:$0xff]  ;;  %v2057_v56 = vld [vmem:[%s5281_s3 + $0x98] sm:$0xff] }
 0x120   :  { %1840 = vmatpush1.msra.mxu0 %v2964_v58  ;;  %1964 = vmatpush1.msra.mxu1 %v3003_v59  ;;  %v2041_v57 = vld [vmem:[%s5281_s3 + $0x18] sm:$0xff]  ;;  %v2056_v58 = vld [vmem:[%s5281_s3 + $0x90] sm:$0xff] }
 0x121   :  { %1841 = vmatprep.subr.mxu0 %v2963_v60  ;;  %1965 = vmatprep.subr.mxu1 %v3002_v61  ;;  %v2040_v59 = vld [vmem:[%s5281_s3 + $0x10] sm:$0xff]  ;;  %v2055_v60 = vld [vmem:[%s5281_s3 + $0x88] sm:$0xff] }
 0x122   :  { %1842 = vmatpush1.msra.mxu0 %v2962_v62  ;;  %1966 = vmatpush1.msra.mxu1 %v3001_v63  ;;  %v2039_v61 = vld [vmem:[%s5281_s3 + $0x8] sm:$0xff]  ;;  %v2054_v62 = vld [vmem:[%s5281_s3 + $0x80] sm:$0xff] }
 0x123   :  { %1843 = vmatprep.subr.mxu0 %v2961_v0  ;;  %1967 = vmatprep.subr.mxu1 %v3000_v1  ;;  %v2038_v63 = vld [vmem:[%s5281_s3] sm:$0xff]  ;;  %v2165_v0 = vld [vmem:[%s5283_s5 + $0x78] sm:$0xff]  ;;  %v3191_v1 = vmov 0.0  }
 0x124   :  { %1844 = vmatpush1.msra.mxu0 %v2960_v2  ;;  %1968 = vmatpush1.msra.mxu1 %v2999_v3  ;;  %v2164_v2 = vld [vmem:[%s5283_s5 + $0x70] sm:$0xff]  ;;  %v2163_v3 = vld [vmem:[%s5283_s5 + $0x68] sm:$0xff] }
 0x125   :  { %1845 = vmatprep.subr.mxu0 %v2959_v4  ;;  %1969 = vmatprep.subr.mxu1 %v2998_v5  ;;  %v2162_v4 = vld [vmem:[%s5283_s5 + $0x60] sm:$0xff]  ;;  %v2161_v5 = vld [vmem:[%s5283_s5 + $0x58] sm:$0xff] }
 0x126   :  { %1846 = vmatpush1.msra.mxu0 %v2958_v6  ;;  %1970 = vmatpush1.msra.mxu1 %v2997_v7  ;;  %v2160_v6 = vld [vmem:[%s5283_s5 + $0x50] sm:$0xff]  ;;  %v2159_v7 = vld [vmem:[%s5283_s5 + $0x48] sm:$0xff] }
 0x127   :  { %1847 = vmatprep.subr.mxu0 %v2957_v8  ;;  %1971 = vmatprep.subr.mxu1 %v2996_v9  ;;  %v2158_v8 = vld [vmem:[%s5283_s5 + $0x40] sm:$0xff]  ;;  %v2157_v9 = vld [vmem:[%s5283_s5 + $0x38] sm:$0xff] }
 0x128   :  { %1848 = vmatpush1.msra.mxu0 %v2956_v10  ;;  %1972 = vmatpush1.msra.mxu1 %v2995_v11  ;;  %v2156_v10 = vld [vmem:[%s5283_s5 + $0x30] sm:$0xff]  ;;  %v2155_v11 = vld [vmem:[%s5283_s5 + $0x28] sm:$0xff] }
 0x129   :  { %1849 = vmatprep.subr.mxu0 %v2955_v12  ;;  %1973 = vmatprep.subr.mxu1 %v2994_v13  ;;  %v194_v12 = vpop.f32.mrf.mxu0  ;;  %v277_v13 = vpop.f32.mrf.mxu1 }
 0x12a   :  { %1850 = vmatpush1.msra.mxu0 %v2954_v14  ;;  %1974 = vmatpush1.msra.mxu1 %v2993_v15 }
 0x12b   :  { %1851 = vmatprep.subr.mxu0 %v2953_v16  ;;  %1975 = vmatprep.subr.mxu1 %v2992_v17  ;;  %v196_v14 = vpop.f32.mrf.mxu0  ;;  %v279_v16 = vpop.f32.mrf.mxu1  ;;  %v278_v17 = vadd.f32 %v277_v13, %v194_v12 }
 0x12c   :  { %1852 = vmatpush1.msra.mxu0 %v2952_v18  ;;  %1976 = vmatpush1.msra.mxu1 %v2991_v19 }
 0x12d   :  { %1881 = vmatprep.subr.mxu0 %v2987_v21  ;;  %2005 = vmatprep.subr.mxu1 %v3026_v22  ;;  %v399_v15 = vpop.f32.mrf.mxu0  ;;  %v523_v18 = vpop.f32.mrf.mxu1 }
 0x12e   :  { %1882 = vmatpush2.msra.mxu0 %v2986_v24  ;;  %2006 = vmatpush2.msra.mxu1 %v3025_v25  ;;  %v404_v21 = vadd.f32 %v399_v15, %v278_v17 }
 0x12f   :  { %1883 = vmatprep.subr.mxu0 %v2985_v26  ;;  %2007 = vmatprep.subr.mxu1 %v3024_v27  ;;  %v401_v19 = vpop.f32.mrf.mxu0  ;;  %v525_v24 = vpop.f32.mrf.mxu1 }
 0x130   :  { %1884 = vmatpush2.msra.mxu0 %v2984_v29  ;;  %2989 = vmatprep.mubr.msk.f32.mxu0 %vm125_vm0, %v1817_v28  ;;  %v528_v25 = vadd.f32 %v523_v18, %v404_v21 }
 0x131   :  { %2008 = vmatpush2.msra.mxu1 %v3023_v31  ;;  %3028 = vmatprep.mubr.msk.f32.mxu1 %vm125_vm0, %v1941_v30 }
 0x132   :  { %1886 = vmatmul.mubr.f32.vlgmr.msra.gmra.mxu0 %v2988_v20  ;;  %2010 = vmatmul.mubr.f32.vlgmr.msra.gmra.mxu1 %v3027_v23  ;;  %v280_v20 = vadd.f32 %v279_v16, %v196_v14 }
 0x133   :  { %3035 = vmatprep.subr.mxu0 %v2069_v32  ;;  %3101 = vmatprep.subr.mxu1 %v3191_v1  ;;  %v647_v22 = vpop.f32.mrf.mxu0 }
 0x134   :  { %3036 = vmatpush3.msra.mxu0 %v2053_v33  ;;  %3102 = vmatpush3.msra.mxu1 %v2165_v0  ;;  %v405_v23 = vadd.f32 %v401_v19, %v280_v20  ;;  %v652_v29 = vadd.f32 %v647_v22, %v528_v25  ;;  %v2153_v25 = vld [vmem:[%s5283_s5 + $0x18] sm:$0xff] }
 0x135   :  { %3037 = vmatprep.subr.mxu0 %v2068_v34  ;;  %3103 = vmatprep.subr.mxu1 %v3191_v1  ;;  %v771_v26 = vpop.f32.mrf.mxu1  ;;  %v649_v27 = vpop.f32.mrf.mxu0 }
 0x136   :  { %3038 = vmatpush3.msra.mxu0 %v2052_v35  ;;  %3104 = vmatpush3.msra.mxu1 %v2164_v2  ;;  %v529_v28 = vadd.f32 %v525_v24, %v405_v23  ;;  %v776_v33 = vadd.f32 %v771_v26, %v652_v29  ;;  %v2154_v24 = vld [vmem:[%s5283_s5 + $0x20] sm:$0xff]  ;;  %v2152_v26 = vld [vmem:[%s5283_s5 + $0x10] sm:$0xff]  ;;  %v2253_v29 = vld [vmem:[%s5285_s7 + $0x38] sm:$0xff] }
 0x137   :  { %3039 = vmatprep.subr.mxu0 %v2067_v36  ;;  %3105 = vmatprep.subr.mxu1 %v3191_v1  ;;  %v773_v32 = vpop.f32.mrf.mxu1 }
 0x138   :  { %3040 = vmatpush3.msra.mxu0 %v2051_v37  ;;  %3106 = vmatpush3.msra.mxu1 %v2163_v3  ;;  %v653_v31 = vadd.f32 %v649_v27, %v529_v28  ;;  %v2151_v27 = vld [vmem:[%s5283_s5 + $0x8] sm:$0xff]  ;;  %v2150_v28 = vld [vmem:[%s5283_s5] sm:$0xff] }
 0x139   :  { %3041 = vmatprep.subr.mxu0 %v2066_v38  ;;  %3107 = vmatprep.subr.mxu1 %v3191_v1 }
 0x13a   :  { %3042 = vmatpush3.msra.mxu0 %v2050_v39  ;;  %3108 = vmatpush3.msra.mxu1 %v2162_v4  ;;  %v777_v36 = vadd.f32 %v773_v32, %v653_v31  ;;  %v2018_v4 = vld [vmem:[%s5280_s2] sm:$0x3]  ;;  %v2251_v31 = vld [vmem:[%s5285_s7 + $0x28] sm:$0xff] }
 0x13b   :  { %3043 = vmatprep.subr.mxu0 %v2065_v40  ;;  %3109 = vmatprep.subr.mxu1 %v3191_v1  ;;  %v2250_v32 = vld [vmem:[%s5285_s7 + $0x20] sm:$0xff] }
 0x13c   :  { %3044 = vmatpush3.msra.mxu0 %v2049_v41  ;;  %3110 = vmatpush3.msra.mxu1 %v2161_v5 }
 0x13d   :  { %3045 = vmatprep.subr.mxu0 %v2064_v42  ;;  %3111 = vmatprep.subr.mxu1 %v3191_v1 }
 0x13e   :  { %3046 = vmatpush3.msra.mxu0 %v2048_v43  ;;  %3112 = vmatpush3.msra.mxu1 %v2160_v6 }
 0x13f   :  { %3047 = vmatprep.subr.mxu0 %v2063_v44  ;;  %3113 = vmatprep.subr.mxu1 %v3191_v1 }
 0x140   :  { %3048 = vmatpush3.msra.mxu0 %v2047_v45  ;;  %3114 = vmatpush3.msra.mxu1 %v2159_v7 }
 0x141   :  { %3049 = vmatprep.subr.mxu0 %v2062_v46  ;;  %3115 = vmatprep.subr.mxu1 %v3191_v1 }
 0x142   :  { %3050 = vmatpush3.msra.mxu0 %v2046_v47  ;;  %3116 = vmatpush3.msra.mxu1 %v2158_v8 }
 0x143   :  { %3051 = vmatprep.subr.mxu0 %v2061_v48  ;;  %3117 = vmatprep.subr.mxu1 %v3191_v1 }
 0x144   :  { %3052 = vmatpush3.msra.mxu0 %v2045_v49  ;;  %3118 = vmatpush3.msra.mxu1 %v2157_v9 }
 0x145   :  { %3053 = vmatprep.subr.mxu0 %v2060_v50  ;;  %3119 = vmatprep.subr.mxu1 %v3191_v1 }
 0x146   :  { %3054 = vmatpush3.msra.mxu0 %v2044_v51  ;;  %3120 = vmatpush3.msra.mxu1 %v2156_v10 }
 0x147   :  { %3055 = vmatprep.subr.mxu0 %v2059_v52  ;;  %3121 = vmatprep.subr.mxu1 %v3191_v1 }
 0x148   :  { %3056 = vmatpush3.msra.mxu0 %v2043_v53  ;;  %3122 = vmatpush3.msra.mxu1 %v2155_v11 }
 0x149   :  { %3057 = vmatprep.subr.mxu0 %v2058_v54  ;;  %3123 = vmatprep.subr.mxu1 %v3191_v1  ;;  %v2020_v54 = vlaneseq }
 0x14a   :  { %3058 = vmatpush3.msra.mxu0 %v2042_v55  ;;  %3124 = vmatpush3.msra.mxu1 %v2154_v24 }
 0x14b   :  { %3059 = vmatprep.subr.mxu0 %v2057_v56  ;;  %3125 = vmatprep.subr.mxu1 %v3191_v1 }
 0x14c   :  { %3060 = vmatpush3.msra.mxu0 %v2041_v57  ;;  %3126 = vmatpush3.msra.mxu1 %v2153_v25 }
 0x14d   :  { %3061 = vmatprep.subr.mxu0 %v2056_v58  ;;  %3127 = vmatprep.subr.mxu1 %v3191_v1 }
 0x14e   :  { %3062 = vmatpush3.msra.mxu0 %v2040_v59  ;;  %v2021_v59 = vshrl.u32 %v2020_v54, 7  ;;  %3128 = vmatpush3.msra.mxu1 %v2152_v26  ;;  %v3031_v54 = vld [vmem:[%s5286_s8] ss:$0 sm:$0xff] }
 0x14f   :  { %3063 = vmatprep.subr.mxu0 %v2055_v60  ;;  %3129 = vmatprep.subr.mxu1 %v3191_v1 }
 0x150   :  { %3064 = vmatpush3.msra.mxu0 %v2039_v61  ;;  %v2022_v2 = vsub.s32 0, %v2021_v59  ;;  %v2026_v6 = vsub.s32 1, %v2021_v59  ;;  %3130 = vmatpush3.msra.mxu1 %v2151_v27 }
 0x151   :  { %3065 = vmatprep.subr.mxu0 %v2054_v62  ;;  %3131 = vmatprep.subr.mxu1 %v3191_v1 }
 0x152   :  { %3066 = vmatpush3.msra.mxu0 %v2038_v63  ;;  %v2023_v11 = vrot.slane %v2018_v4, %v2022_v2  ;;  %v2027_v15 = vrot.slane %v2018_v4, %v2026_v6  ;;  %3133 = vmatprep.mubr.msk.f32.mxu1 %vm3192_vm3, %v3191_v1 }
 0x153   :  { %3136 = vmatprep.subr.mxu0 %v3191_v1  ;;  %3132 = vmatpush3.msra.mxu1 %v2150_v28 }
 0x154   :  { %3155 = vmatprep.subr.mxu1 %v3191_v1 }
 0x159   :  { %v895_v30 = vpop.f32.mrf.mxu0 }
 0x15a   :  { %v900_v37 = vadd.f32 %v895_v30, %v776_v33  ;;  %v2252_v30 = vld [vmem:[%s5285_s7 + $0x30] sm:$0xff]  ;;  %v2249_v33 = vld [vmem:[%s5285_s7 + $0x18] sm:$0xff] }
 0x15b   :  { %v1019_v34 = vpop.f32.mrf.mxu1  ;;  %v897_v35 = vpop.f32.mrf.mxu0 }
 0x15c   :  { %v901_v39 = vadd.f32 %v897_v35, %v777_v36  ;;  %v1024_v41 = vadd.f32 %v1019_v34, %v900_v37  ;;  %v3029_v35 = vld [vmem:[%s5282_s4] ss:$0 sm:$0xff] }
 0x15d   :  { %v1021_v40 = vpop.f32.mrf.mxu1 }
 0x15e   :  { %v1025_v44 = vadd.f32 %v1021_v40, %v901_v39 }
 0x17f   :  { %v1143_v38 = vpop.f32.mrf.mxu0 }
 0x180   :  { %v1148_v45 = vadd.f32 %v1143_v38, %v1024_v41  ;;  %v2248_v41 = vld [vmem:[%s5285_s7 + $0x10] sm:$0xff] }
 0x181   :  { %v1267_v42 = vpop.f32.mrf.mxu1  ;;  %v1145_v43 = vpop.f32.mrf.mxu0 }
 0x182   :  { %v1149_v47 = vadd.f32 %v1145_v43, %v1025_v44  ;;  %v1272_v49 = vadd.f32 %v1267_v42, %v1148_v45  ;;  %v2247_v42 = vld [vmem:[%s5285_s7 + $0x8] sm:$0xff]  ;;  %v2246_v43 = vld [vmem:[%s5285_s7] sm:$0xff]  ;;  %v2341_v44 = vld [vmem:[%s5287_s9 + $0x18] sm:$0xff] }
 0x183   :  { %v1269_v48 = vpop.f32.mrf.mxu1  ;;  %v3030_v45 = vld [vmem:[%s5284_s6] ss:$0 sm:$0xff] }
 0x184   :  { %v1273_v52 = vadd.f32 %v1269_v48, %v1149_v47 }
 0x1a5   :  { %v1391_v46 = vpop.f32.mrf.mxu0 }
 0x1a6   :  { %v1396_v53 = vadd.f32 %v1391_v46, %v1272_v49 }
 0x1a7   :  { %v1515_v50 = vpop.f32.mrf.mxu1  ;;  %v1393_v51 = vpop.f32.mrf.mxu0 }
 0x1a8   :  { %v1397_v56 = vadd.f32 %v1393_v51, %v1273_v52  ;;  %v1520_v58 = vadd.f32 %v1515_v50, %v1396_v53  ;;  %v2340_v51 = vld [vmem:[%s5287_s9 + $0x10] sm:$0xff]  ;;  %v2339_v52 = vld [vmem:[%s5287_s9 + $0x8] sm:$0xff]  ;;  %v2338_v53 = vld [vmem:[%s5287_s9] sm:$0xff]  ;;  %s3193_s9 = smov [#allocation2]  }
 0x1a9   :  { %v1517_v57 = vpop.f32.mrf.mxu1  ;;  %s2434_s17 = sshll.u32 %s3193_s9, 4  ;;  %s2435_s17 = int_to_ptr.vmem [resolvable:$true] %s2434_s17 }
 0x1aa   :  { %v1521_v62 = vadd.f32 %v1517_v57, %v1397_v56  ;;  %s3169_s8 = scalar_lea.vmem %s2435_s17, 32  ;;  %p3174_p1 = scmp.lt.s32.totalorder %s2435_s17, %s2435_s17 }
 0x1ab   :  { %p3170_p0 = scmp.ne.s32.totalorder %s2435_s17, %s3169_s8  ;;  %p3175_p2 = scmp.lt.s32.totalorder %s3169_s8, %s3169_s8 }
 0x1ad   :  { %p3176_p3 = por %p3175_p2, %p3174_p1 }
 0x1af   :  { %p3177_p4 = pnand %p3176_p3, %p3170_p0 }
 0x1cb   :  { %v1639_v55 = vpop.f32.mrf.mxu0 }
 0x1cc   :  { %v1644_v63 = vadd.f32 %v1639_v55, %v1520_v58 }
 0x1cd   :  { %v1763_v60 = vpop.f32.mrf.mxu1  ;;  %v1641_v61 = vpop.f32.mrf.mxu0 }
 0x1ce   :  { %v1645_v0 = vadd.f32 %v1641_v61, %v1521_v62  ;;  %v1768_v5 = vadd.f32 %v1763_v60, %v1644_v63 }
 0x1cf   :  { %v1765_v3 = vpop.f32.mrf.mxu1 }
 0x1d0   :  { %v1769_v9 = vadd.f32 %v1765_v3, %v1645_v0 }
 0x1f2   :  { %v1887_v7 = vpop.f32.mrf.mxu0  ;;  %v2011_v8 = vpop.f32.mrf.mxu1 }
 0x1f3   :  { %v1892_v10 = vadd.f32 %v1887_v7, %v1768_v5 }
 0x1f4   :  { %v1889_v12 = vpop.f32.mrf.mxu0  ;;  %v2013_v16 = vpop.f32.mrf.mxu1 }
 0x1f5   :  { %v2016_v13 = vadd.f32 %v2011_v8, %v1892_v10  ;;  %v1893_v14 = vadd.f32 %v1889_v12, %v1769_v9 }
 0x1f7   :  { %v2030_v17 = vadd.f32 %v2023_v11, %v2016_v13  ;;  %v2017_v18 = vadd.f32 %v2013_v16, %v1893_v14 }
 0x1f9   :  { %v2031_v19 = vadd.f32 %v2027_v15, %v2017_v18  ;;  %v2034_v20 = vmul.f32 0.01, %v2030_v17  ;;  %vm2032_vm2 = vcmp.gt.f32.partialorder %v2030_v17, 0.0 }
 0x1fb   :  { %vm2033_vm1 = vcmp.gt.f32.partialorder %v2031_v19, 0.0  ;;  %v2035_v21 = vmul.f32 0.01, %v2031_v19  ;;  %v2036_v23 = vsel %vm2032_vm2, %v2030_v17, %v2034_v20 }
 0x1fd   :  { %v2037_v22 = vsel %vm2033_vm1, %v2031_v19, %v2035_v21 }
 0x1fe   :  { %2141 = vmatprep.mubr.f32.mxu0 %v2037_v22 }
 0x1ff   :  { %2142 = vmatmul.mubr.f32.vlgmr.msra.gmra.mxu0 %v2036_v23 }
 0x200   :  { %3152 = vmatprep.mubr.msk.f32.mxu0 %vm3192_vm3, %v3191_v1  ;;  %3137 = vmatpush3.msra.mxu0 %v2253_v29 }
 0x201   :  { %3138 = vmatprep.subr.mxu0 %v3191_v1 }
 0x202   :  { %3139 = vmatpush3.msra.mxu0 %v2252_v30 }
 0x203   :  { %3140 = vmatprep.subr.mxu0 %v3191_v1 }
 0x204   :  { %3141 = vmatpush3.msra.mxu0 %v2251_v31 }
 0x205   :  { %3142 = vmatprep.subr.mxu0 %v3191_v1 }
 0x206   :  { %3143 = vmatpush3.msra.mxu0 %v2250_v32 }
 0x207   :  { %3144 = vmatprep.subr.mxu0 %v3191_v1 }
 0x208   :  { %3145 = vmatpush3.msra.mxu0 %v2249_v33 }
 0x209   :  { %3146 = vmatprep.subr.mxu0 %v3191_v1 }
 0x20a   :  { %3147 = vmatpush3.msra.mxu0 %v2248_v41 }
 0x20b   :  { %3148 = vmatprep.subr.mxu0 %v3191_v1 }
 0x20c   :  { %3149 = vmatpush3.msra.mxu0 %v2247_v42 }
 0x20d   :  { %3150 = vmatprep.subr.mxu0 %v3191_v1 }
 0x20e   :  { %3151 = vmatpush3.msra.mxu0 %v2246_v43 }
 0x2bf   :  { %v3067_v34 = vpop.f32.mrf.mxu0 }
 0x2c1   :  { %v3068_v36 = vpop.f32.mrf.mxu0 }
 0x2c2   :  { %v3069_v37 = vadd.f32 %v3068_v36, %v3067_v34 }
 0x2c4   :  { %v2144_v38 = vadd.f32 %v3069_v37, %v3029_v35 }
 0x2c6   :  { %v2148_v39 = vmul.f32 0.01, %v2144_v38  ;;  %vm2147_vm4 = vcmp.gt.f32.partialorder %v2144_v38, 0.0 }
 0x2c8   :  { %v2149_v40 = vsel %vm2147_vm4, %v2144_v38, %v2148_v39 }
 0x2c9   :  { %3134 = vmatmul.mubr.f32.vlgmr.msra.gmra.mxu1 %v2149_v40 }
 0x2ca   :  { %3163 = vmatprep.mubr.msk.f32.mxu1 %vm3192_vm3, %v3191_v1  ;;  %3156 = vmatpush3.msra.mxu1 %v2341_v44 }
 0x2cb   :  { %3157 = vmatprep.subr.mxu1 %v3191_v1 }
 0x2cc   :  { %3158 = vmatpush3.msra.mxu1 %v2340_v51 }
 0x2cd   :  { %3159 = vmatprep.subr.mxu1 %v3191_v1 }
 0x2ce   :  { %3160 = vmatpush3.msra.mxu1 %v2339_v52 }
 0x2cf   :  { %3161 = vmatprep.subr.mxu1 %v3191_v1  ;;  %v3033_v1 = vld [vmem:[%s5288_s10] ss:$0 sm:$0xff] }
 0x2d0   :  { %3162 = vmatpush3.msra.mxu1 %v2338_v53 }
 0x389   :  { %v2239_v46 = vpop.f32.mrf.mxu1 }
 0x38a   :  { %v2240_v47 = vadd.f32 %v3030_v45, %v2239_v46 }
 0x38b   :  { %v3135_v48 = vpop.f32.mrf.mxu1 }
 0x38c   :  { %vm2243_vm5 = vcmp.gt.f32.partialorder %v2240_v47, 0.0  ;;  %v2244_v49 = vmul.f32 0.01, %v2240_v47 }
 0x38e   :  { %v2245_v50 = vsel %vm2243_vm5, %v2240_v47, %v2244_v49 }
 0x38f   :  { %3153 = vmatmul.mubr.msk.f32.vlgmr.msra.gmra.mxu0 %vm2261_vm6, %v2245_v50 }
 0x44f   :  { %v2331_v55 = vpop.f32.mrf.mxu0 }
 0x450   :  { %v2332_v56 = vadd.f32 %v3031_v54, %v2331_v55 }
 0x451   :  { %v3154_v57 = vpop.f32.mrf.mxu0 }
 0x452   :  { %vm2335_vm7 = vcmp.gt.f32.partialorder %v2332_v56, 0.0  ;;  %v2336_v58 = vmul.f32 0.01, %v2332_v56 }
 0x454   :  { %v2337_v59 = vsel %vm2335_vm7, %v2332_v56, %v2336_v58 }
 0x455   :  { %3164 = vmatmul.mubr.msk.f32.vlgmr.msra.gmra.mxu1 %vm2349_vm8, %v2337_v59 }
 0x515   :  { %v2419_v60 = vpop.f32.mrf.mxu1 }
 0x516   :  { %v2420_v61 = vadd.f32 %v3033_v1, %v2419_v60 }
 0x517   :  { %v3165_v62 = vpop.f32.mrf.mxu1 }
 0x518   :  { %v2424_v63 = vmul.f32 0.01, %v2420_v61  ;;  %vm2423_vm9 = vcmp.gt.f32.partialorder %v2420_v61, 0.0 }
 0x51a   :  { %v2425_v0 = vsel %vm2423_vm9, %v2420_v61, %v2424_v63 }
 0x51b   :  { %2427 = vst.msk [vmem:[#allocation2] sm:$0x3] %vm2426_vm10, %v2425_v0 }
 0x51c   :  { %3180 = shalt.err (!%p3177_p4)
}
 0x51d   :  { %2437 = dma.vmem_to_hbm [thread:$0]  %s2435_s17, 32, %s5289_s11, [#allocation3]  }
 0x51e   :  { %3189 = dma.done.wait [#allocation3], 32  }
 0x51f   :  { %3190 = vsyncadd [#allocation3], 4294967264 }
 0x520   :  { %2441 = vsyncpa [#allocation3], 1 }

</bundles_post_ra>
